<compile_context>
chip_gen: v7x
topology: tpu7x:2x2x1
jax: 0.10.0
libtpu: 0.0.40
codegen_flags: <defaults>
</compile_context>

<pallas_src>
import functools

import jax
import jax.numpy as jnp
from jax import lax
from jax.experimental import pallas as pl
from jax.experimental.pallas import tpu as pltpu


# ---------------------------------------------------------------------------
# Pallas kernel: matmul + fused BN / residual / ReLU epilogue (+ optional raw
# conv "hook" output)
# ---------------------------------------------------------------------------

def _conv_kernel(*refs, relu, has_res, has_hook):
    if has_res:
        p_ref, w_ref, s_ref, b_ref, r_ref = refs[:5]
        out_refs = refs[5:]
    else:
        p_ref, w_ref, s_ref, b_ref = refs[:4]
        r_ref = None
        out_refs = refs[4:]

    acc = jnp.dot(p_ref[...], w_ref[...], preferred_element_type=jnp.float32)

    if has_hook:
        hook_ref, o_ref = out_refs
        hook_ref[...] = acc.astype(hook_ref.dtype)      # raw conv output (pre-BN)
    else:
        (o_ref,) = out_refs

    y = acc * s_ref[...] + b_ref[...]                   # folded BatchNorm
    if has_res:
        y = y + r_ref[...].astype(jnp.float32)          # fused residual add
    if relu:
        y = jnp.maximum(y, 0.0)
    o_ref[...] = y.astype(o_ref.dtype)


def _pick_tm(M):
    """Two sublane-aligned grid steps when possible (keeps v7x's 2nd TC busy)."""
    half = M // 2
    if M % 2 == 0 and half % 8 == 0:
        return half
    return M


def conv_mm(patches, w_mat, scale, bias, *, residual=None, relu=True,
            hook=False, out_dtype=jnp.bfloat16):
    M, K = patches.shape
    _, N = w_mat.shape
    tm = _pick_tm(M)
    grid = (M // tm,)

    kernel = functools.partial(_conv_kernel, relu=relu,
                               has_res=residual is not None, has_hook=hook)

    in_specs = [
        pl.BlockSpec((tm, K), lambda i: (i, 0)),
        pl.BlockSpec((K, N), lambda i: (0, 0)),
        pl.BlockSpec((1, N), lambda i: (0, 0)),
        pl.BlockSpec((1, N), lambda i: (0, 0)),
    ]
    inputs = [patches, w_mat, scale, bias]
    if residual is not None:
        in_specs.append(pl.BlockSpec((tm, N), lambda i: (i, 0)))
        inputs.append(residual)

    if hook:
        out_shape = (jax.ShapeDtypeStruct((M, N), jnp.float32),
                     jax.ShapeDtypeStruct((M, N), out_dtype))
        out_specs = (pl.BlockSpec((tm, N), lambda i: (i, 0)),
                     pl.BlockSpec((tm, N), lambda i: (i, 0)))
    else:
        out_shape = jax.ShapeDtypeStruct((M, N), out_dtype)
        out_specs = pl.BlockSpec((tm, N), lambda i: (i, 0))

    return pl.pallas_call(
        kernel,
        out_shape=out_shape,
        grid_spec=pltpu.PrefetchScalarGridSpec(
            num_scalar_prefetch=0,
            grid=grid,
            in_specs=in_specs,
            out_specs=out_specs,
        ),
        compiler_params=pltpu.CompilerParams(
            dimension_semantics=("parallel",)),
    )(*inputs)


# ---------------------------------------------------------------------------
# Glue: im2col (no 5-D transpose), weight flattening, BN folding
# ---------------------------------------------------------------------------

def im2col(x_nhwc, kh, kw, stride, pad):
    """Patches with flattened K ordering (kh, kw, Cin): simple channel-concat of
    the shifted slices.  The matching permutation lives on the weight."""
    B, H, W, C = x_nhwc.shape
    xp = jnp.pad(x_nhwc, ((0, 0), (pad, pad), (pad, pad), (0, 0))) if pad else x_nhwc
    Ho = (H + 2 * pad - kh) // stride + 1
    Wo = (W + 2 * pad - kw) // stride + 1
    cols = []
    for i in range(kh):
        for j in range(kw):
            sl = lax.slice(
                xp,
                (0, i, j, 0),
                (B, i + (Ho - 1) * stride + 1, j + (Wo - 1) * stride + 1, C),
                (1, stride, stride, 1),
            )  # [B, Ho, Wo, C]
            cols.append(sl)
    p = jnp.concatenate(cols, axis=-1)          # [B, Ho, Wo, kh*kw*C]
    return p.reshape(B * Ho * Wo, kh * kw * C), Ho, Wo


def fold_bn(gamma, beta, mean, var, eps=1e-5):
    scale = gamma / jnp.sqrt(var + eps)
    bias = beta - mean * scale
    return scale.reshape(1, -1), bias.reshape(1, -1)


def prep_conv(w_oihw, scale, bias, *, cin_pad=None, cout_pad=None, k_pad=None):
    """PyTorch OIHW weight + folded BN -> padded, (kh,kw,Cin)-ordered bf16 w_mat."""
    cout, cin, kh, kw = w_oihw.shape
    if cin_pad is not None and cin_pad > cin:
        w_oihw = jnp.pad(w_oihw, ((0, 0), (0, cin_pad - cin), (0, 0), (0, 0)))
        cin = cin_pad
    if cout_pad is not None and cout_pad > cout:
        w_oihw = jnp.pad(w_oihw, ((0, cout_pad - cout), (0, 0), (0, 0), (0, 0)))
        scale = jnp.pad(scale, ((0, 0), (0, cout_pad - cout)))
        bias = jnp.pad(bias, ((0, 0), (0, cout_pad - cout)))
        cout = cout_pad
    # (Cout, Cin, kh, kw) -> (kh, kw, Cin, Cout) -> [K, Cout]; K order = (kh, kw, Cin)
    w_mat = jnp.transpose(w_oihw, (2, 3, 1, 0)).reshape(kh * kw * cin, cout)
    if k_pad is not None and k_pad > w_mat.shape[0]:
        w_mat = jnp.pad(w_mat, ((0, k_pad - w_mat.shape[0]), (0, 0)))
    return w_mat.astype(jnp.bfloat16), scale.astype(jnp.float32), bias.astype(jnp.float32)


def conv_layer(x_nhwc, wsb, kh, kw, stride, pad, *, relu=True, residual=None,
               hook=False, k_pad=None):
    """conv + folded BN (+ residual, + ReLU), fused into one Pallas matmul."""
    w_mat, scale, bias = wsb
    B = x_nhwc.shape[0]
    patches, Ho, Wo = im2col(x_nhwc, kh, kw, stride, pad)
    if k_pad is not None and k_pad > patches.shape[1]:
        patches = jnp.pad(patches, ((0, 0), (0, k_pad - patches.shape[1])))
    patches = patches.astype(jnp.bfloat16)
    N = w_mat.shape[1]
    res2 = residual.reshape(-1, N) if residual is not None else None
    out = conv_mm(patches, w_mat, scale, bias, residual=res2, relu=relu, hook=hook)
    if hook:
        hook_out, main = out
        return hook_out.reshape(B, Ho, Wo, N), main.reshape(B, Ho, Wo, N)
    return out.reshape(B, Ho, Wo, N)


# ---------------------------------------------------------------------------
# Deterministic parameter init (synthetic weights, no checkpoint available)
# ---------------------------------------------------------------------------

def conv_init(key, cout, cin, kh, kw):
    fan_in = cin * kh * kw
    return jax.random.normal(key, (cout, cin, kh, kw), jnp.float32) * (2.0 / fan_in) ** 0.5


def bn_init(key, c):
    k1, k2, k3, k4 = jax.random.split(key, 4)
    gamma = 1.0 + 0.1 * jax.random.normal(k1, (c,), jnp.float32)
    beta = 0.1 * jax.random.normal(k2, (c,), jnp.float32)
    mean = 0.1 * jax.random.normal(k3, (c,), jnp.float32)
    var = 1.0 + 0.1 * jax.random.uniform(k4, (c,), jnp.float32)
    return fold_bn(gamma, beta, mean, var)


def make_params(key):
    ks = jax.random.split(key, 32)
    p = {}
    p["conv1.w"] = conv_init(ks[0], 64, 3, 7, 7)
    p["bn1"] = bn_init(ks[1], 64)
    for b in range(2):                                   # layer1: 2 BasicBlocks, 64->64
        p[f"l1.{b}.c1"] = conv_init(ks[2 + 4 * b], 64, 64, 3, 3)
        p[f"l1.{b}.bn1"] = bn_init(ks[3 + 4 * b], 64)
        p[f"l1.{b}.c2"] = conv_init(ks[4 + 4 * b], 64, 64, 3, 3)
        p[f"l1.{b}.bn2"] = bn_init(ks[5 + 4 * b], 64)
    p["l2.0.c1"] = conv_init(ks[10], 128, 64, 3, 3)      # layer2 block0: stride 2 + 1x1 ds
    p["l2.0.bn1"] = bn_init(ks[11], 128)
    p["l2.0.c2"] = conv_init(ks[12], 128, 128, 3, 3)
    p["l2.0.bn2"] = bn_init(ks[13], 128)
    p["l2.0.ds"] = conv_init(ks[14], 128, 64, 1, 1)
    p["l2.0.dsbn"] = bn_init(ks[15], 128)
    p["l2.1.c1"] = conv_init(ks[16], 128, 128, 3, 3)
    p["l2.1.bn1"] = bn_init(ks[17], 128)
    p["l2.1.c2"] = conv_init(ks[18], 128, 128, 3, 3)
    p["l2.1.bn2"] = bn_init(ks[19], 128)
    return p


def prepare_params(p):
    """Pad all 64-channel dims to 128 (lane-dense outputs; padded channels stay 0)
    and flatten weights to bf16 (K, Cout) matmul form once, offline."""
    q = {}
    q["conv1"] = prep_conv(p["conv1.w"], *p["bn1"], cout_pad=128, k_pad=160)
    for b in range(2):
        q[f"l1.{b}.c1"] = prep_conv(p[f"l1.{b}.c1"], *p[f"l1.{b}.bn1"],
                                    cin_pad=128, cout_pad=128)
        q[f"l1.{b}.c2"] = prep_conv(p[f"l1.{b}.c2"], *p[f"l1.{b}.bn2"],
                                    cin_pad=128, cout_pad=128)
    q["l2.0.c1"] = prep_conv(p["l2.0.c1"], *p["l2.0.bn1"], cin_pad=128)
    q["l2.0.c2"] = prep_conv(p["l2.0.c2"], *p["l2.0.bn2"])
    q["l2.0.ds"] = prep_conv(p["l2.0.ds"], *p["l2.0.dsbn"], cin_pad=128)
    q["l2.1.c1"] = prep_conv(p["l2.1.c1"], *p["l2.1.bn1"])
    q["l2.1.c2"] = prep_conv(p["l2.1.c2"], *p["l2.1.bn2"])
    return q


# ---------------------------------------------------------------------------
# TeacherModel('resnet18', input_resolution=32) forward
# ---------------------------------------------------------------------------

def teacher_forward(params, x_nchw):
    """Returns {16: layer1[-1].conv2 out, 8: layer2[-1].conv2 out} in NCHW."""
    x = jnp.transpose(x_nchw, (0, 2, 3, 1)).astype(jnp.float32)  # NHWC

    # stem: conv1 7x7/2 + bn1 + relu   (maxpool is Identity for input_resolution=32)
    y = conv_layer(x, params["conv1"], 7, 7, 2, 3, relu=True, k_pad=160)

    # ----- layer1, block 0 -----
    t = conv_layer(y, params["l1.0.c1"], 3, 3, 1, 1, relu=True)
    y = conv_layer(t, params["l1.0.c2"], 3, 3, 1, 1, relu=True, residual=y)

    # ----- layer1, block 1 (hook on conv2; BN+res+ReLU fused in same call) -----
    t = conv_layer(y, params["l1.1.c1"], 3, 3, 1, 1, relu=True)
    hook16, y = conv_layer(t, params["l1.1.c2"], 3, 3, 1, 1,
                           relu=True, residual=y, hook=True)

    # ----- layer2, block 0 (stride 2, 1x1 downsample) -----
    idn = conv_layer(y, params["l2.0.ds"], 1, 1, 2, 0, relu=False)
    t = conv_layer(y, params["l2.0.c1"], 3, 3, 2, 1, relu=True)
    y = conv_layer(t, params["l2.0.c2"], 3, 3, 1, 1, relu=True, residual=idn)

    # ----- layer2, block 1 (hook on conv2) -----
    t = conv_layer(y, params["l2.1.c1"], 3, 3, 1, 1, relu=True)
    hook8, y = conv_layer(t, params["l2.1.c2"], 3, 3, 1, 1,
                          relu=True, residual=y, hook=True)

    # TODO(synk): layer3, layer4, avgpool and fc are executed by the PyTorch
    # forward but are dead compute w.r.t. the returned hook dict; skipped here.

    # hooks returned in PyTorch NCHW layout, keyed by spatial size
    return {
        16: jnp.transpose(hook16[:, :, :, :64], (0, 3, 1, 2)),  # crop 128->64 pad
        8: jnp.transpose(hook8, (0, 3, 1, 2)),
    }


# ---------------------------------------------------------------------------

if __name__ == "__main__":
    key = jax.random.PRNGKey(0)
    kp, kx = jax.random.split(key)
    params = prepare_params(make_params(kp))

    # TeacherModel('resnet18', input_resolution=32): input is [B, 3, 32, 32] NCHW
    x = jax.random.normal(kx, (2, 3, 32, 32), jnp.float32)

    fwd = jax.jit(teacher_forward)
    out = fwd(params, x)
    out = jax.block_until_ready(out)

    assert out[16].shape == (2, 64, 16, 16), out[16].shape
    assert out[8].shape == (2, 128, 8, 8), out[8].shape
    assert jnp.all(jnp.isfinite(out[16])) and jnp.all(jnp.isfinite(out[8]))

    print("KERNEL_OK")
</pallas_src>

<mosaic_0001>
module attributes {stable_mosaic.version = 11 : i64} {
  func.func @_conv_kernel(%arg0: i32, %arg1: memref<256x160xbf16, #tpu.memory_space<vmem>>, %arg2: memref<160x128xbf16, #tpu.memory_space<vmem>>, %arg3: memref<1x128xf32, #tpu.memory_space<vmem>>, %arg4: memref<1x128xf32, #tpu.memory_space<vmem>>, %arg5: memref<256x128xbf16, #tpu.memory_space<vmem>>) attributes {dimension_semantics = [#tpu.dimension_semantics<parallel>], iteration_bounds = array<i64: 2>, scalar_prefetch = 0 : i64, scratch_operands = 0 : i64, tpu.core_type = #tpu.core_type<tc>, window_params = [{transform_indices = @transform_0, window_bounds = array<i64: 256, 160>}, {pipeline_mode = #tpu.pipeline_mode<synchronous>, transform_indices = @transform_1, window_bounds = array<i64: 160, 128>}, {pipeline_mode = #tpu.pipeline_mode<synchronous>, transform_indices = @transform_2, window_bounds = array<i64: 1, 128>}, {pipeline_mode = #tpu.pipeline_mode<synchronous>, transform_indices = @transform_3, window_bounds = array<i64: 1, 128>}, {transform_indices = @transform_4, window_bounds = array<i64: 256, 128>}]} {
    %c0 = arith.constant 0 : index
    %c0_0 = arith.constant 0 : index
    %0 = vector.load %arg1[%c0, %c0_0] : memref<256x160xbf16, #tpu.memory_space<vmem>>, vector<256x160xbf16>
    %c0_1 = arith.constant 0 : index
    %c0_2 = arith.constant 0 : index
    %1 = vector.load %arg2[%c0_1, %c0_2] : memref<160x128xbf16, #tpu.memory_space<vmem>>, vector<160x128xbf16>
    %cst = arith.constant dense<0.000000e+00> : vector<256x128xf32>
    %2 = tpu.matmul %0, %1, %cst {dimension_numbers = #tpu.dot_dimension_numbers<[1], [0], [0], [1], [0, 0, 1, 1], [], []>} : vector<256x160xbf16>, vector<160x128xbf16>, vector<256x128xf32> -> vector<256x128xf32>
    %c0_3 = arith.constant 0 : index
    %c0_4 = arith.constant 0 : index
    %3 = vector.load %arg3[%c0_3, %c0_4] : memref<1x128xf32, #tpu.memory_space<vmem>>, vector<1x128xf32>
    %4 = vector.broadcast %3 : vector<1x128xf32> to vector<256x128xf32>
    %5 = arith.mulf %2, %4 : vector<256x128xf32>
    %c0_5 = arith.constant 0 : index
    %c0_6 = arith.constant 0 : index
    %6 = vector.load %arg4[%c0_5, %c0_6] : memref<1x128xf32, #tpu.memory_space<vmem>>, vector<1x128xf32>
    %7 = vector.broadcast %6 : vector<1x128xf32> to vector<256x128xf32>
    %8 = arith.addf %5, %7 : vector<256x128xf32>
    %cst_7 = arith.constant 0.000000e+00 : f32
    %9 = vector.broadcast %cst_7 : f32 to vector<256x128xf32>
    %10 = arith.maximumf %8, %9 : vector<256x128xf32>
    %11 = arith.truncf %10 : vector<256x128xf32> to vector<256x128xbf16>
    %c0_8 = arith.constant 0 : index
    %c0_9 = arith.constant 0 : index
    %12 = vector.load %arg5[%c0_8, %c0_9] : memref<256x128xbf16, #tpu.memory_space<vmem>>, vector<256x128xbf16>
    tpu.vector_store %arg5[%c0_8, %c0_9], %11 {strides = array<i32>} : memref<256x128xbf16, #tpu.memory_space<vmem>>, vector<256x128xbf16>,
    return
  }
  func.func @transform_0(%arg0: i32) -> (i32, i32) {
    %c0_i32 = arith.constant 0 : i32
    %c0_i32_0 = arith.constant 0 : i32
    return %arg0, %c0_i32 : i32, i32
  }
  func.func @transform_1(%arg0: i32) -> (i32, i32) {
    %c0_i32 = arith.constant 0 : i32
    %c0_i32_0 = arith.constant 0 : i32
    %c0_i32_1 = arith.constant 0 : i32
    return %c0_i32, %c0_i32_0 : i32, i32
  }
  func.func @transform_2(%arg0: i32) -> (i32, i32) {
    %c0_i32 = arith.constant 0 : i32
    %c0_i32_0 = arith.constant 0 : i32
    %c0_i32_1 = arith.constant 0 : i32
    return %c0_i32, %c0_i32_0 : i32, i32
  }
  func.func @transform_3(%arg0: i32) -> (i32, i32) {
    %c0_i32 = arith.constant 0 : i32
    %c0_i32_0 = arith.constant 0 : i32
    %c0_i32_1 = arith.constant 0 : i32
    return %c0_i32, %c0_i32_0 : i32, i32
  }
  func.func @transform_4(%arg0: i32) -> (i32, i32) {
    %c0_i32 = arith.constant 0 : i32
    %c0_i32_0 = arith.constant 0 : i32
    return %arg0, %c0_i32 : i32, i32
  }
}

module attributes {stable_mosaic.version = 11 : i64} {
  func.func @_conv_kernel(%arg0: i32, %arg1: memref<256x1152xbf16, #tpu.memory_space<vmem>>, %arg2: memref<1152x128xbf16, #tpu.memory_space<vmem>>, %arg3: memref<1x128xf32, #tpu.memory_space<vmem>>, %arg4: memref<1x128xf32, #tpu.memory_space<vmem>>, %arg5: memref<256x128xbf16, #tpu.memory_space<vmem>>) attributes {dimension_semantics = [#tpu.dimension_semantics<parallel>], iteration_bounds = array<i64: 2>, scalar_prefetch = 0 : i64, scratch_operands = 0 : i64, tpu.core_type = #tpu.core_type<tc>, window_params = [{transform_indices = @transform_0, window_bounds = array<i64: 256, 1152>}, {pipeline_mode = #tpu.pipeline_mode<synchronous>, transform_indices = @transform_1, window_bounds = array<i64: 1152, 128>}, {pipeline_mode = #tpu.pipeline_mode<synchronous>, transform_indices = @transform_2, window_bounds = array<i64: 1, 128>}, {pipeline_mode = #tpu.pipeline_mode<synchronous>, transform_indices = @transform_3, window_bounds = array<i64: 1, 128>}, {transform_indices = @transform_4, window_bounds = array<i64: 256, 128>}]} {
    %c0 = arith.constant 0 : index
    %c0_0 = arith.constant 0 : index
    %0 = vector.load %arg1[%c0, %c0_0] : memref<256x1152xbf16, #tpu.memory_space<vmem>>, vector<256x1152xbf16>
    %c0_1 = arith.constant 0 : index
    %c0_2 = arith.constant 0 : index
    %1 = vector.load %arg2[%c0_1, %c0_2] : memref<1152x128xbf16, #tpu.memory_space<vmem>>, vector<1152x128xbf16>
    %cst = arith.constant dense<0.000000e+00> : vector<256x128xf32>
    %2 = tpu.matmul %0, %1, %cst {dimension_numbers = #tpu.dot_dimension_numbers<[1], [0], [0], [1], [0, 0, 1, 1], [], []>} : vector<256x1152xbf16>, vector<1152x128xbf16>, vector<256x128xf32> -> vector<256x128xf32>
    %c0_3 = arith.constant 0 : index
    %c0_4 = arith.constant 0 : index
    %3 = vector.load %arg3[%c0_3, %c0_4] : memref<1x128xf32, #tpu.memory_space<vmem>>, vector<1x128xf32>
    %4 = vector.broadcast %3 : vector<1x128xf32> to vector<256x128xf32>
    %5 = arith.mulf %2, %4 : vector<256x128xf32>
    %c0_5 = arith.constant 0 : index
    %c0_6 = arith.constant 0 : index
    %6 = vector.load %arg4[%c0_5, %c0_6] : memref<1x128xf32, #tpu.memory_space<vmem>>, vector<1x128xf32>
    %7 = vector.broadcast %6 : vector<1x128xf32> to vector<256x128xf32>
    %8 = arith.addf %5, %7 : vector<256x128xf32>
    %cst_7 = arith.constant 0.000000e+00 : f32
    %9 = vector.broadcast %cst_7 : f32 to vector<256x128xf32>
    %10 = arith.maximumf %8, %9 : vector<256x128xf32>
    %11 = arith.truncf %10 : vector<256x128xf32> to vector<256x128xbf16>
    %c0_8 = arith.constant 0 : index
    %c0_9 = arith.constant 0 : index
    %12 = vector.load %arg5[%c0_8, %c0_9] : memref<256x128xbf16, #tpu.memory_space<vmem>>, vector<256x128xbf16>
    tpu.vector_store %arg5[%c0_8, %c0_9], %11 {strides = array<i32>} : memref<256x128xbf16, #tpu.memory_space<vmem>>, vector<256x128xbf16>,
    return
  }
  func.func @transform_0(%arg0: i32) -> (i32, i32) {
    %c0_i32 = arith.constant 0 : i32
    %c0_i32_0 = arith.constant 0 : i32
    return %arg0, %c0_i32 : i32, i32
  }
  func.func @transform_1(%arg0: i32) -> (i32, i32) {
    %c0_i32 = arith.constant 0 : i32
    %c0_i32_0 = arith.constant 0 : i32
    %c0_i32_1 = arith.constant 0 : i32
    return %c0_i32, %c0_i32_0 : i32, i32
  }
  func.func @transform_2(%arg0: i32) -> (i32, i32) {
    %c0_i32 = arith.constant 0 : i32
    %c0_i32_0 = arith.constant 0 : i32
    %c0_i32_1 = arith.constant 0 : i32
    return %c0_i32, %c0_i32_0 : i32, i32
  }
  func.func @transform_3(%arg0: i32) -> (i32, i32) {
    %c0_i32 = arith.constant 0 : i32
    %c0_i32_0 = arith.constant 0 : i32
    %c0_i32_1 = arith.constant 0 : i32
    return %c0_i32, %c0_i32_0 : i32, i32
  }
  func.func @transform_4(%arg0: i32) -> (i32, i32) {
    %c0_i32 = arith.constant 0 : i32
    %c0_i32_0 = arith.constant 0 : i32
    return %arg0, %c0_i32 : i32, i32
  }
}

module attributes {stable_mosaic.version = 11 : i64} {
  func.func @_conv_kernel(%arg0: i32, %arg1: memref<256x1152xbf16, #tpu.memory_space<vmem>>, %arg2: memref<1152x128xbf16, #tpu.memory_space<vmem>>, %arg3: memref<1x128xf32, #tpu.memory_space<vmem>>, %arg4: memref<1x128xf32, #tpu.memory_space<vmem>>, %arg5: memref<256x128xbf16, #tpu.memory_space<vmem>>, %arg6: memref<256x128xf32, #tpu.memory_space<vmem>>, %arg7: memref<256x128xbf16, #tpu.memory_space<vmem>>) attributes {dimension_semantics = [#tpu.dimension_semantics<parallel>], iteration_bounds = array<i64: 2>, scalar_prefetch = 0 : i64, scratch_operands = 0 : i64, tpu.core_type = #tpu.core_type<tc>, window_params = [{transform_indices = @transform_0, window_bounds = array<i64: 256, 1152>}, {pipeline_mode = #tpu.pipeline_mode<synchronous>, transform_indices = @transform_1, window_bounds = array<i64: 1152, 128>}, {pipeline_mode = #tpu.pipeline_mode<synchronous>, transform_indices = @transform_2, window_bounds = array<i64: 1, 128>}, {pipeline_mode = #tpu.pipeline_mode<synchronous>, transform_indices = @transform_3, window_bounds = array<i64: 1, 128>}, {transform_indices = @transform_4, window_bounds = array<i64: 256, 128>}, {transform_indices = @transform_5, window_bounds = array<i64: 256, 128>}, {transform_indices = @transform_6, window_bounds = array<i64: 256, 128>}]} {
    %c0 = arith.constant 0 : index
    %c0_0 = arith.constant 0 : index
    %0 = vector.load %arg1[%c0, %c0_0] : memref<256x1152xbf16, #tpu.memory_space<vmem>>, vector<256x1152xbf16>
    %c0_1 = arith.constant 0 : index
    %c0_2 = arith.constant 0 : index
    %1 = vector.load %arg2[%c0_1, %c0_2] : memref<1152x128xbf16, #tpu.memory_space<vmem>>, vector<1152x128xbf16>
    %cst = arith.constant dense<0.000000e+00> : vector<256x128xf32>
    %2 = tpu.matmul %0, %1, %cst {dimension_numbers = #tpu.dot_dimension_numbers<[1], [0], [0], [1], [0, 0, 1, 1], [], []>} : vector<256x1152xbf16>, vector<1152x128xbf16>, vector<256x128xf32> -> vector<256x128xf32>
    %c0_3 = arith.constant 0 : index
    %c0_4 = arith.constant 0 : index
    %3 = vector.load %arg6[%c0_3, %c0_4] : memref<256x128xf32, #tpu.memory_space<vmem>>, vector<256x128xf32>
    tpu.vector_store %arg6[%c0_3, %c0_4], %2 {strides = array<i32>} : memref<256x128xf32, #tpu.memory_space<vmem>>, vector<256x128xf32>,
    %c0_5 = arith.constant 0 : index
    %c0_6 = arith.constant 0 : index
    %4 = vector.load %arg3[%c0_5, %c0_6] : memref<1x128xf32, #tpu.memory_space<vmem>>, vector<1x128xf32>
    %5 = vector.broadcast %4 : vector<1x128xf32> to vector<256x128xf32>
    %6 = arith.mulf %2, %5 : vector<256x128xf32>
    %c0_7 = arith.constant 0 : index
    %c0_8 = arith.constant 0 : index
    %7 = vector.load %arg4[%c0_7, %c0_8] : memref<1x128xf32, #tpu.memory_space<vmem>>, vector<1x128xf32>
    %8 = vector.broadcast %7 : vector<1x128xf32> to vector<256x128xf32>
    %9 = arith.addf %6, %8 : vector<256x128xf32>
    %c0_9 = arith.constant 0 : index
    %c0_10 = arith.constant 0 : index
    %10 = vector.load %arg5[%c0_9, %c0_10] : memref<256x128xbf16, #tpu.memory_space<vmem>>, vector<256x128xbf16>
    %11 = arith.extf %10 : vector<256x128xbf16> to vector<256x128xf32>
    %12 = arith.addf %9, %11 : vector<256x128xf32>
    %cst_11 = arith.constant 0.000000e+00 : f32
    %13 = vector.broadcast %cst_11 : f32 to vector<256x128xf32>
    %14 = arith.maximumf %12, %13 : vector<256x128xf32>
    %15 = arith.truncf %14 : vector<256x128xf32> to vector<256x128xbf16>
    %c0_12 = arith.constant 0 : index
    %c0_13 = arith.constant 0 : index
    %16 = vector.load %arg7[%c0_12, %c0_13] : memref<256x128xbf16, #tpu.memory_space<vmem>>, vector<256x128xbf16>
    tpu.vector_store %arg7[%c0_12, %c0_13], %15 {strides = array<i32>} : memref<256x128xbf16, #tpu.memory_space<vmem>>, vector<256x128xbf16>,
    return
  }
  func.func @transform_0(%arg0: i32) -> (i32, i32) {
    %c0_i32 = arith.constant 0 : i32
    %c0_i32_0 = arith.constant 0 : i32
    return %arg0, %c0_i32 : i32, i32
  }
  func.func @transform_1(%arg0: i32) -> (i32, i32) {
    %c0_i32 = arith.constant 0 : i32
    %c0_i32_0 = arith.constant 0 : i32
    %c0_i32_1 = arith.constant 0 : i32
    return %c0_i32, %c0_i32_0 : i32, i32
  }
  func.func @transform_2(%arg0: i32) -> (i32, i32) {
    %c0_i32 = arith.constant 0 : i32
    %c0_i32_0 = arith.constant 0 : i32
    %c0_i32_1 = arith.constant 0 : i32
    return %c0_i32, %c0_i32_0 : i32, i32
  }
  func.func @transform_3(%arg0: i32) -> (i32, i32) {
    %c0_i32 = arith.constant 0 : i32
    %c0_i32_0 = arith.constant 0 : i32
    %c0_i32_1 = arith.constant 0 : i32
    return %c0_i32, %c0_i32_0 : i32, i32
  }
  func.func @transform_4(%arg0: i32) -> (i32, i32) {
    %c0_i32 = arith.constant 0 : i32
    %c0_i32_0 = arith.constant 0 : i32
    return %arg0, %c0_i32 : i32, i32
  }
  func.func @transform_5(%arg0: i32) -> (i32, i32) {
    %c0_i32 = arith.constant 0 : i32
    %c0_i32_0 = arith.constant 0 : i32
    return %arg0, %c0_i32 : i32, i32
  }
  func.func @transform_6(%arg0: i32) -> (i32, i32) {
    %c0_i32 = arith.constant 0 : i32
    %c0_i32_0 = arith.constant 0 : i32
    return %arg0, %c0_i32 : i32, i32
  }
}

module attributes {stable_mosaic.version = 11 : i64} {
  func.func @_conv_kernel(%arg0: i32, %arg1: memref<256x1152xbf16, #tpu.memory_space<vmem>>, %arg2: memref<1152x128xbf16, #tpu.memory_space<vmem>>, %arg3: memref<1x128xf32, #tpu.memory_space<vmem>>, %arg4: memref<1x128xf32, #tpu.memory_space<vmem>>, %arg5: memref<256x128xbf16, #tpu.memory_space<vmem>>, %arg6: memref<256x128xbf16, #tpu.memory_space<vmem>>) attributes {dimension_semantics = [#tpu.dimension_semantics<parallel>], iteration_bounds = array<i64: 2>, scalar_prefetch = 0 : i64, scratch_operands = 0 : i64, tpu.core_type = #tpu.core_type<tc>, window_params = [{transform_indices = @transform_0, window_bounds = array<i64: 256, 1152>}, {pipeline_mode = #tpu.pipeline_mode<synchronous>, transform_indices = @transform_1, window_bounds = array<i64: 1152, 128>}, {pipeline_mode = #tpu.pipeline_mode<synchronous>, transform_indices = @transform_2, window_bounds = array<i64: 1, 128>}, {pipeline_mode = #tpu.pipeline_mode<synchronous>, transform_indices = @transform_3, window_bounds = array<i64: 1, 128>}, {transform_indices = @transform_4, window_bounds = array<i64: 256, 128>}, {transform_indices = @transform_5, window_bounds = array<i64: 256, 128>}]} {
    %c0 = arith.constant 0 : index
    %c0_0 = arith.constant 0 : index
    %0 = vector.load %arg1[%c0, %c0_0] : memref<256x1152xbf16, #tpu.memory_space<vmem>>, vector<256x1152xbf16>
    %c0_1 = arith.constant 0 : index
    %c0_2 = arith.constant 0 : index
    %1 = vector.load %arg2[%c0_1, %c0_2] : memref<1152x128xbf16, #tpu.memory_space<vmem>>, vector<1152x128xbf16>
    %cst = arith.constant dense<0.000000e+00> : vector<256x128xf32>
    %2 = tpu.matmul %0, %1, %cst {dimension_numbers = #tpu.dot_dimension_numbers<[1], [0], [0], [1], [0, 0, 1, 1], [], []>} : vector<256x1152xbf16>, vector<1152x128xbf16>, vector<256x128xf32> -> vector<256x128xf32>
    %c0_3 = arith.constant 0 : index
    %c0_4 = arith.constant 0 : index
    %3 = vector.load %arg3[%c0_3, %c0_4] : memref<1x128xf32, #tpu.memory_space<vmem>>, vector<1x128xf32>
    %4 = vector.broadcast %3 : vector<1x128xf32> to vector<256x128xf32>
    %5 = arith.mulf %2, %4 : vector<256x128xf32>
    %c0_5 = arith.constant 0 : index
    %c0_6 = arith.constant 0 : index
    %6 = vector.load %arg4[%c0_5, %c0_6] : memref<1x128xf32, #tpu.memory_space<vmem>>, vector<1x128xf32>
    %7 = vector.broadcast %6 : vector<1x128xf32> to vector<256x128xf32>
    %8 = arith.addf %5, %7 : vector<256x128xf32>
    %c0_7 = arith.constant 0 : index
    %c0_8 = arith.constant 0 : index
    %9 = vector.load %arg5[%c0_7, %c0_8] : memref<256x128xbf16, #tpu.memory_space<vmem>>, vector<256x128xbf16>
    %10 = arith.extf %9 : vector<256x128xbf16> to vector<256x128xf32>
    %11 = arith.addf %8, %10 : vector<256x128xf32>
    %cst_9 = arith.constant 0.000000e+00 : f32
    %12 = vector.broadcast %cst_9 : f32 to vector<256x128xf32>
    %13 = arith.maximumf %11, %12 : vector<256x128xf32>
    %14 = arith.truncf %13 : vector<256x128xf32> to vector<256x128xbf16>
    %c0_10 = arith.constant 0 : index
    %c0_11 = arith.constant 0 : index
    %15 = vector.load %arg6[%c0_10, %c0_11] : memref<256x128xbf16, #tpu.memory_space<vmem>>, vector<256x128xbf16>
    tpu.vector_store %arg6[%c0_10, %c0_11], %14 {strides = array<i32>} : memref<256x128xbf16, #tpu.memory_space<vmem>>, vector<256x128xbf16>,
    return
  }
  func.func @transform_0(%arg0: i32) -> (i32, i32) {
    %c0_i32 = arith.constant 0 : i32
    %c0_i32_0 = arith.constant 0 : i32
    return %arg0, %c0_i32 : i32, i32
  }
  func.func @transform_1(%arg0: i32) -> (i32, i32) {
    %c0_i32 = arith.constant 0 : i32
    %c0_i32_0 = arith.constant 0 : i32
    %c0_i32_1 = arith.constant 0 : i32
    return %c0_i32, %c0_i32_0 : i32, i32
  }
  func.func @transform_2(%arg0: i32) -> (i32, i32) {
    %c0_i32 = arith.constant 0 : i32
    %c0_i32_0 = arith.constant 0 : i32
    %c0_i32_1 = arith.constant 0 : i32
    return %c0_i32, %c0_i32_0 : i32, i32
  }
  func.func @transform_3(%arg0: i32) -> (i32, i32) {
    %c0_i32 = arith.constant 0 : i32
    %c0_i32_0 = arith.constant 0 : i32
    %c0_i32_1 = arith.constant 0 : i32
    return %c0_i32, %c0_i32_0 : i32, i32
  }
  func.func @transform_4(%arg0: i32) -> (i32, i32) {
    %c0_i32 = arith.constant 0 : i32
    %c0_i32_0 = arith.constant 0 : i32
    return %arg0, %c0_i32 : i32, i32
  }
  func.func @transform_5(%arg0: i32) -> (i32, i32) {
    %c0_i32 = arith.constant 0 : i32
    %c0_i32_0 = arith.constant 0 : i32
    return %arg0, %c0_i32 : i32, i32
  }
}

module attributes {stable_mosaic.version = 11 : i64} {
  func.func @_conv_kernel(%arg0: i32, %arg1: memref<64x128xbf16, #tpu.memory_space<vmem>>, %arg2: memref<128x128xbf16, #tpu.memory_space<vmem>>, %arg3: memref<1x128xf32, #tpu.memory_space<vmem>>, %arg4: memref<1x128xf32, #tpu.memory_space<vmem>>, %arg5: memref<64x128xbf16, #tpu.memory_space<vmem>>) attributes {dimension_semantics = [#tpu.dimension_semantics<parallel>], iteration_bounds = array<i64: 2>, scalar_prefetch = 0 : i64, scratch_operands = 0 : i64, tpu.core_type = #tpu.core_type<tc>, window_params = [{transform_indices = @transform_0, window_bounds = array<i64: 64, 128>}, {pipeline_mode = #tpu.pipeline_mode<synchronous>, transform_indices = @transform_1, window_bounds = array<i64: 128, 128>}, {pipeline_mode = #tpu.pipeline_mode<synchronous>, transform_indices = @transform_2, window_bounds = array<i64: 1, 128>}, {pipeline_mode = #tpu.pipeline_mode<synchronous>, transform_indices = @transform_3, window_bounds = array<i64: 1, 128>}, {transform_indices = @transform_4, window_bounds = array<i64: 64, 128>}]} {
    %c0 = arith.constant 0 : index
    %c0_0 = arith.constant 0 : index
    %0 = vector.load %arg1[%c0, %c0_0] : memref<64x128xbf16, #tpu.memory_space<vmem>>, vector<64x128xbf16>
    %c0_1 = arith.constant 0 : index
    %c0_2 = arith.constant 0 : index
    %1 = vector.load %arg2[%c0_1, %c0_2] : memref<128x128xbf16, #tpu.memory_space<vmem>>, vector<128x128xbf16>
    %cst = arith.constant dense<0.000000e+00> : vector<64x128xf32>
    %2 = tpu.matmul %0, %1, %cst {dimension_numbers = #tpu.dot_dimension_numbers<[1], [0], [0], [1], [0, 0, 1, 1], [], []>} : vector<64x128xbf16>, vector<128x128xbf16>, vector<64x128xf32> -> vector<64x128xf32>
    %c0_3 = arith.constant 0 : index
    %c0_4 = arith.constant 0 : index
    %3 = vector.load %arg3[%c0_3, %c0_4] : memref<1x128xf32, #tpu.memory_space<vmem>>, vector<1x128xf32>
    %4 = vector.broadcast %3 : vector<1x128xf32> to vector<64x128xf32>
    %5 = arith.mulf %2, %4 : vector<64x128xf32>
    %c0_5 = arith.constant 0 : index
    %c0_6 = arith.constant 0 : index
    %6 = vector.load %arg4[%c0_5, %c0_6] : memref<1x128xf32, #tpu.memory_space<vmem>>, vector<1x128xf32>
    %7 = vector.broadcast %6 : vector<1x128xf32> to vector<64x128xf32>
    %8 = arith.addf %5, %7 : vector<64x128xf32>
    %9 = arith.truncf %8 : vector<64x128xf32> to vector<64x128xbf16>
    %c0_7 = arith.constant 0 : index
    %c0_8 = arith.constant 0 : index
    %10 = vector.load %arg5[%c0_7, %c0_8] : memref<64x128xbf16, #tpu.memory_space<vmem>>, vector<64x128xbf16>
    tpu.vector_store %arg5[%c0_7, %c0_8], %9 {strides = array<i32>} : memref<64x128xbf16, #tpu.memory_space<vmem>>, vector<64x128xbf16>,
    return
  }
  func.func @transform_0(%arg0: i32) -> (i32, i32) {
    %c0_i32 = arith.constant 0 : i32
    %c0_i32_0 = arith.constant 0 : i32
    return %arg0, %c0_i32 : i32, i32
  }
  func.func @transform_1(%arg0: i32) -> (i32, i32) {
    %c0_i32 = arith.constant 0 : i32
    %c0_i32_0 = arith.constant 0 : i32
    %c0_i32_1 = arith.constant 0 : i32
    return %c0_i32, %c0_i32_0 : i32, i32
  }
  func.func @transform_2(%arg0: i32) -> (i32, i32) {
    %c0_i32 = arith.constant 0 : i32
    %c0_i32_0 = arith.constant 0 : i32
    %c0_i32_1 = arith.constant 0 : i32
    return %c0_i32, %c0_i32_0 : i32, i32
  }
  func.func @transform_3(%arg0: i32) -> (i32, i32) {
    %c0_i32 = arith.constant 0 : i32
    %c0_i32_0 = arith.constant 0 : i32
    %c0_i32_1 = arith.constant 0 : i32
    return %c0_i32, %c0_i32_0 : i32, i32
  }
  func.func @transform_4(%arg0: i32) -> (i32, i32) {
    %c0_i32 = arith.constant 0 : i32
    %c0_i32_0 = arith.constant 0 : i32
    return %arg0, %c0_i32 : i32, i32
  }
}

module attributes {stable_mosaic.version = 11 : i64} {
  func.func @_conv_kernel(%arg0: i32, %arg1: memref<64x1152xbf16, #tpu.memory_space<vmem>>, %arg2: memref<1152x128xbf16, #tpu.memory_space<vmem>>, %arg3: memref<1x128xf32, #tpu.memory_space<vmem>>, %arg4: memref<1x128xf32, #tpu.memory_space<vmem>>, %arg5: memref<64x128xbf16, #tpu.memory_space<vmem>>) attributes {dimension_semantics = [#tpu.dimension_semantics<parallel>], iteration_bounds = array<i64: 2>, scalar_prefetch = 0 : i64, scratch_operands = 0 : i64, tpu.core_type = #tpu.core_type<tc>, window_params = [{transform_indices = @transform_0, window_bounds = array<i64: 64, 1152>}, {pipeline_mode = #tpu.pipeline_mode<synchronous>, transform_indices = @transform_1, window_bounds = array<i64: 1152, 128>}, {pipeline_mode = #tpu.pipeline_mode<synchronous>, transform_indices = @transform_2, window_bounds = array<i64: 1, 128>}, {pipeline_mode = #tpu.pipeline_mode<synchronous>, transform_indices = @transform_3, window_bounds = array<i64: 1, 128>}, {transform_indices = @transform_4, window_bounds = array<i64: 64, 128>}]} {
    %c0 = arith.constant 0 : index
    %c0_0 = arith.constant 0 : index
    %0 = vector.load %arg1[%c0, %c0_0] : memref<64x1152xbf16, #tpu.memory_space<vmem>>, vector<64x1152xbf16>
    %c0_1 = arith.constant 0 : index
    %c0_2 = arith.constant 0 : index
    %1 = vector.load %arg2[%c0_1, %c0_2] : memref<1152x128xbf16, #tpu.memory_space<vmem>>, vector<1152x128xbf16>
    %cst = arith.constant dense<0.000000e+00> : vector<64x128xf32>
    %2 = tpu.matmul %0, %1, %cst {dimension_numbers = #tpu.dot_dimension_numbers<[1], [0], [0], [1], [0, 0, 1, 1], [], []>} : vector<64x1152xbf16>, vector<1152x128xbf16>, vector<64x128xf32> -> vector<64x128xf32>
    %c0_3 = arith.constant 0 : index
    %c0_4 = arith.constant 0 : index
    %3 = vector.load %arg3[%c0_3, %c0_4] : memref<1x128xf32, #tpu.memory_space<vmem>>, vector<1x128xf32>
    %4 = vector.broadcast %3 : vector<1x128xf32> to vector<64x128xf32>
    %5 = arith.mulf %2, %4 : vector<64x128xf32>
    %c0_5 = arith.constant 0 : index
    %c0_6 = arith.constant 0 : index
    %6 = vector.load %arg4[%c0_5, %c0_6] : memref<1x128xf32, #tpu.memory_space<vmem>>, vector<1x128xf32>
    %7 = vector.broadcast %6 : vector<1x128xf32> to vector<64x128xf32>
    %8 = arith.addf %5, %7 : vector<64x128xf32>
    %cst_7 = arith.constant 0.000000e+00 : f32
    %9 = vector.broadcast %cst_7 : f32 to vector<64x128xf32>
    %10 = arith.maximumf %8, %9 : vector<64x128xf32>
    %11 = arith.truncf %10 : vector<64x128xf32> to vector<64x128xbf16>
    %c0_8 = arith.constant 0 : index
    %c0_9 = arith.constant 0 : index
    %12 = vector.load %arg5[%c0_8, %c0_9] : memref<64x128xbf16, #tpu.memory_space<vmem>>, vector<64x128xbf16>
    tpu.vector_store %arg5[%c0_8, %c0_9], %11 {strides = array<i32>} : memref<64x128xbf16, #tpu.memory_space<vmem>>, vector<64x128xbf16>,
    return
  }
  func.func @transform_0(%arg0: i32) -> (i32, i32) {
    %c0_i32 = arith.constant 0 : i32
    %c0_i32_0 = arith.constant 0 : i32
    return %arg0, %c0_i32 : i32, i32
  }
  func.func @transform_1(%arg0: i32) -> (i32, i32) {
    %c0_i32 = arith.constant 0 : i32
    %c0_i32_0 = arith.constant 0 : i32
    %c0_i32_1 = arith.constant 0 : i32
    return %c0_i32, %c0_i32_0 : i32, i32
  }
  func.func @transform_2(%arg0: i32) -> (i32, i32) {
    %c0_i32 = arith.constant 0 : i32
    %c0_i32_0 = arith.constant 0 : i32
    %c0_i32_1 = arith.constant 0 : i32
    return %c0_i32, %c0_i32_0 : i32, i32
  }
  func.func @transform_3(%arg0: i32) -> (i32, i32) {
    %c0_i32 = arith.constant 0 : i32
    %c0_i32_0 = arith.constant 0 : i32
    %c0_i32_1 = arith.constant 0 : i32
    return %c0_i32, %c0_i32_0 : i32, i32
  }
  func.func @transform_4(%arg0: i32) -> (i32, i32) {
    %c0_i32 = arith.constant 0 : i32
    %c0_i32_0 = arith.constant 0 : i32
    return %arg0, %c0_i32 : i32, i32
  }
}

module attributes {stable_mosaic.version = 11 : i64} {
  func.func @_conv_kernel(%arg0: i32, %arg1: memref<64x1152xbf16, #tpu.memory_space<vmem>>, %arg2: memref<1152x128xbf16, #tpu.memory_space<vmem>>, %arg3: memref<1x128xf32, #tpu.memory_space<vmem>>, %arg4: memref<1x128xf32, #tpu.memory_space<vmem>>, %arg5: memref<64x128xbf16, #tpu.memory_space<vmem>>, %arg6: memref<64x128xbf16, #tpu.memory_space<vmem>>) attributes {dimension_semantics = [#tpu.dimension_semantics<parallel>], iteration_bounds = array<i64: 2>, scalar_prefetch = 0 : i64, scratch_operands = 0 : i64, tpu.core_type = #tpu.core_type<tc>, window_params = [{transform_indices = @transform_0, window_bounds = array<i64: 64, 1152>}, {pipeline_mode = #tpu.pipeline_mode<synchronous>, transform_indices = @transform_1, window_bounds = array<i64: 1152, 128>}, {pipeline_mode = #tpu.pipeline_mode<synchronous>, transform_indices = @transform_2, window_bounds = array<i64: 1, 128>}, {pipeline_mode = #tpu.pipeline_mode<synchronous>, transform_indices = @transform_3, window_bounds = array<i64: 1, 128>}, {transform_indices = @transform_4, window_bounds = array<i64: 64, 128>}, {transform_indices = @transform_5, window_bounds = array<i64: 64, 128>}]} {
    %c0 = arith.constant 0 : index
    %c0_0 = arith.constant 0 : index
    %0 = vector.load %arg1[%c0, %c0_0] : memref<64x1152xbf16, #tpu.memory_space<vmem>>, vector<64x1152xbf16>
    %c0_1 = arith.constant 0 : index
    %c0_2 = arith.constant 0 : index
    %1 = vector.load %arg2[%c0_1, %c0_2] : memref<1152x128xbf16, #tpu.memory_space<vmem>>, vector<1152x128xbf16>
    %cst = arith.constant dense<0.000000e+00> : vector<64x128xf32>
    %2 = tpu.matmul %0, %1, %cst {dimension_numbers = #tpu.dot_dimension_numbers<[1], [0], [0], [1], [0, 0, 1, 1], [], []>} : vector<64x1152xbf16>, vector<1152x128xbf16>, vector<64x128xf32> -> vector<64x128xf32>
    %c0_3 = arith.constant 0 : index
    %c0_4 = arith.constant 0 : index
    %3 = vector.load %arg3[%c0_3, %c0_4] : memref<1x128xf32, #tpu.memory_space<vmem>>, vector<1x128xf32>
    %4 = vector.broadcast %3 : vector<1x128xf32> to vector<64x128xf32>
    %5 = arith.mulf %2, %4 : vector<64x128xf32>
    %c0_5 = arith.constant 0 : index
    %c0_6 = arith.constant 0 : index
    %6 = vector.load %arg4[%c0_5, %c0_6] : memref<1x128xf32, #tpu.memory_space<vmem>>, vector<1x128xf32>
    %7 = vector.broadcast %6 : vector<1x128xf32> to vector<64x128xf32>
    %8 = arith.addf %5, %7 : vector<64x128xf32>
    %c0_7 = arith.constant 0 : index
    %c0_8 = arith.constant 0 : index
    %9 = vector.load %arg5[%c0_7, %c0_8] : memref<64x128xbf16, #tpu.memory_space<vmem>>, vector<64x128xbf16>
    %10 = arith.extf %9 : vector<64x128xbf16> to vector<64x128xf32>
    %11 = arith.addf %8, %10 : vector<64x128xf32>
    %cst_9 = arith.constant 0.000000e+00 : f32
    %12 = vector.broadcast %cst_9 : f32 to vector<64x128xf32>
    %13 = arith.maximumf %11, %12 : vector<64x128xf32>
    %14 = arith.truncf %13 : vector<64x128xf32> to vector<64x128xbf16>
    %c0_10 = arith.constant 0 : index
    %c0_11 = arith.constant 0 : index
    %15 = vector.load %arg6[%c0_10, %c0_11] : memref<64x128xbf16, #tpu.memory_space<vmem>>, vector<64x128xbf16>
    tpu.vector_store %arg6[%c0_10, %c0_11], %14 {strides = array<i32>} : memref<64x128xbf16, #tpu.memory_space<vmem>>, vector<64x128xbf16>,
    return
  }
  func.func @transform_0(%arg0: i32) -> (i32, i32) {
    %c0_i32 = arith.constant 0 : i32
    %c0_i32_0 = arith.constant 0 : i32
    return %arg0, %c0_i32 : i32, i32
  }
  func.func @transform_1(%arg0: i32) -> (i32, i32) {
    %c0_i32 = arith.constant 0 : i32
    %c0_i32_0 = arith.constant 0 : i32
    %c0_i32_1 = arith.constant 0 : i32
    return %c0_i32, %c0_i32_0 : i32, i32
  }
  func.func @transform_2(%arg0: i32) -> (i32, i32) {
    %c0_i32 = arith.constant 0 : i32
    %c0_i32_0 = arith.constant 0 : i32
    %c0_i32_1 = arith.constant 0 : i32
    return %c0_i32, %c0_i32_0 : i32, i32
  }
  func.func @transform_3(%arg0: i32) -> (i32, i32) {
    %c0_i32 = arith.constant 0 : i32
    %c0_i32_0 = arith.constant 0 : i32
    %c0_i32_1 = arith.constant 0 : i32
    return %c0_i32, %c0_i32_0 : i32, i32
  }
  func.func @transform_4(%arg0: i32) -> (i32, i32) {
    %c0_i32 = arith.constant 0 : i32
    %c0_i32_0 = arith.constant 0 : i32
    return %arg0, %c0_i32 : i32, i32
  }
  func.func @transform_5(%arg0: i32) -> (i32, i32) {
    %c0_i32 = arith.constant 0 : i32
    %c0_i32_0 = arith.constant 0 : i32
    return %arg0, %c0_i32 : i32, i32
  }
}

module attributes {stable_mosaic.version = 11 : i64} {
  func.func @_conv_kernel(%arg0: i32, %arg1: memref<64x1152xbf16, #tpu.memory_space<vmem>>, %arg2: memref<1152x128xbf16, #tpu.memory_space<vmem>>, %arg3: memref<1x128xf32, #tpu.memory_space<vmem>>, %arg4: memref<1x128xf32, #tpu.memory_space<vmem>>, %arg5: memref<64x128xbf16, #tpu.memory_space<vmem>>, %arg6: memref<64x128xf32, #tpu.memory_space<vmem>>, %arg7: memref<64x128xbf16, #tpu.memory_space<vmem>>) attributes {dimension_semantics = [#tpu.dimension_semantics<parallel>], iteration_bounds = array<i64: 2>, scalar_prefetch = 0 : i64, scratch_operands = 0 : i64, tpu.core_type = #tpu.core_type<tc>, window_params = [{transform_indices = @transform_0, window_bounds = array<i64: 64, 1152>}, {pipeline_mode = #tpu.pipeline_mode<synchronous>, transform_indices = @transform_1, window_bounds = array<i64: 1152, 128>}, {pipeline_mode = #tpu.pipeline_mode<synchronous>, transform_indices = @transform_2, window_bounds = array<i64: 1, 128>}, {pipeline_mode = #tpu.pipeline_mode<synchronous>, transform_indices = @transform_3, window_bounds = array<i64: 1, 128>}, {transform_indices = @transform_4, window_bounds = array<i64: 64, 128>}, {transform_indices = @transform_5, window_bounds = array<i64: 64, 128>}, {transform_indices = @transform_6, window_bounds = array<i64: 64, 128>}]} {
    %c0 = arith.constant 0 : index
    %c0_0 = arith.constant 0 : index
    %0 = vector.load %arg1[%c0, %c0_0] : memref<64x1152xbf16, #tpu.memory_space<vmem>>, vector<64x1152xbf16>
    %c0_1 = arith.constant 0 : index
    %c0_2 = arith.constant 0 : index
    %1 = vector.load %arg2[%c0_1, %c0_2] : memref<1152x128xbf16, #tpu.memory_space<vmem>>, vector<1152x128xbf16>
    %cst = arith.constant dense<0.000000e+00> : vector<64x128xf32>
    %2 = tpu.matmul %0, %1, %cst {dimension_numbers = #tpu.dot_dimension_numbers<[1], [0], [0], [1], [0, 0, 1, 1], [], []>} : vector<64x1152xbf16>, vector<1152x128xbf16>, vector<64x128xf32> -> vector<64x128xf32>
    %c0_3 = arith.constant 0 : index
    %c0_4 = arith.constant 0 : index
    %3 = vector.load %arg6[%c0_3, %c0_4] : memref<64x128xf32, #tpu.memory_space<vmem>>, vector<64x128xf32>
    tpu.vector_store %arg6[%c0_3, %c0_4], %2 {strides = array<i32>} : memref<64x128xf32, #tpu.memory_space<vmem>>, vector<64x128xf32>,
    %c0_5 = arith.constant 0 : index
    %c0_6 = arith.constant 0 : index
    %4 = vector.load %arg3[%c0_5, %c0_6] : memref<1x128xf32, #tpu.memory_space<vmem>>, vector<1x128xf32>
    %5 = vector.broadcast %4 : vector<1x128xf32> to vector<64x128xf32>
    %6 = arith.mulf %2, %5 : vector<64x128xf32>
    %c0_7 = arith.constant 0 : index
    %c0_8 = arith.constant 0 : index
    %7 = vector.load %arg4[%c0_7, %c0_8] : memref<1x128xf32, #tpu.memory_space<vmem>>, vector<1x128xf32>
    %8 = vector.broadcast %7 : vector<1x128xf32> to vector<64x128xf32>
    %9 = arith.addf %6, %8 : vector<64x128xf32>
    %c0_9 = arith.constant 0 : index
    %c0_10 = arith.constant 0 : index
    %10 = vector.load %arg5[%c0_9, %c0_10] : memref<64x128xbf16, #tpu.memory_space<vmem>>, vector<64x128xbf16>
    %11 = arith.extf %10 : vector<64x128xbf16> to vector<64x128xf32>
    %12 = arith.addf %9, %11 : vector<64x128xf32>
    %cst_11 = arith.constant 0.000000e+00 : f32
    %13 = vector.broadcast %cst_11 : f32 to vector<64x128xf32>
    %14 = arith.maximumf %12, %13 : vector<64x128xf32>
    %15 = arith.truncf %14 : vector<64x128xf32> to vector<64x128xbf16>
    %c0_12 = arith.constant 0 : index
    %c0_13 = arith.constant 0 : index
    %16 = vector.load %arg7[%c0_12, %c0_13] : memref<64x128xbf16, #tpu.memory_space<vmem>>, vector<64x128xbf16>
    tpu.vector_store %arg7[%c0_12, %c0_13], %15 {strides = array<i32>} : memref<64x128xbf16, #tpu.memory_space<vmem>>, vector<64x128xbf16>,
    return
  }
  func.func @transform_0(%arg0: i32) -> (i32, i32) {
    %c0_i32 = arith.constant 0 : i32
    %c0_i32_0 = arith.constant 0 : i32
    return %arg0, %c0_i32 : i32, i32
  }
  func.func @transform_1(%arg0: i32) -> (i32, i32) {
    %c0_i32 = arith.constant 0 : i32
    %c0_i32_0 = arith.constant 0 : i32
    %c0_i32_1 = arith.constant 0 : i32
    return %c0_i32, %c0_i32_0 : i32, i32
  }
  func.func @transform_2(%arg0: i32) -> (i32, i32) {
    %c0_i32 = arith.constant 0 : i32
    %c0_i32_0 = arith.constant 0 : i32
    %c0_i32_1 = arith.constant 0 : i32
    return %c0_i32, %c0_i32_0 : i32, i32
  }
  func.func @transform_3(%arg0: i32) -> (i32, i32) {
    %c0_i32 = arith.constant 0 : i32
    %c0_i32_0 = arith.constant 0 : i32
    %c0_i32_1 = arith.constant 0 : i32
    return %c0_i32, %c0_i32_0 : i32, i32
  }
  func.func @transform_4(%arg0: i32) -> (i32, i32) {
    %c0_i32 = arith.constant 0 : i32
    %c0_i32_0 = arith.constant 0 : i32
    return %arg0, %c0_i32 : i32, i32
  }
  func.func @transform_5(%arg0: i32) -> (i32, i32) {
    %c0_i32 = arith.constant 0 : i32
    %c0_i32_0 = arith.constant 0 : i32
    return %arg0, %c0_i32 : i32, i32
  }
  func.func @transform_6(%arg0: i32) -> (i32, i32) {
    %c0_i32 = arith.constant 0 : i32
    %c0_i32_0 = arith.constant 0 : i32
    return %arg0, %c0_i32 : i32, i32
  }
}

</mosaic_0001>

<bundles_post_ra>
// kernel: teacher_forward.10
= control target key start
LH: loop header
LB: loop body
LE: loop exit
PB: predicated region body
PF: predicated region fallthrough
CT: control target
= control target key end

     0   :  { %s1350_s15 = smov 0   ;;  %s1543_s0 = inlined_call_operand.vmem [shape: bf16[512,160], index: 0, kind: input, shape index: {}]   ;;  %s1544_s1 = inlined_call_operand.vmem [shape: bf16[160,128], index: 1, kind: input, shape index: {}]   ;;  %s1545_s2 = inlined_call_operand.vmem [shape: f32[1,128], index: 2, kind: input, shape index: {}]   ;;  %s1546_s3 = inlined_call_operand.vmem [shape: f32[1,128], index: 3, kind: input, shape index: {}]   ;;  %s1547_s4 = inlined_call_operand.vmem [shape: bf16[512,128], index: 4, kind: output, shape index: {}]  }
   0x1 LB: > { %s997_s16 = sadd.s32 4294967295, %s1322_s15   ;;  %p1001_p0 = scmp.ge.s32.totalorder %s1322_s15, 1  ;;  %s1322_s15 = sphi %s1350_s15, %s14_s15  }
   0x2   : > { %p164_p1 = scmp.lt.s32.totalorder %s1322_s15, 3 }
   0x4   : > { %p165_p2 = pnand %p1001_p0, %p164_p1 }
   0x5   : > { %v1258_v0 = vld [vmem:[%s1544_s1] sm:$0xff] (!%p165_p2)   ;;  %v1324_v1 = vmov (!%p165_p2), 0   ;;  %s1002_s19 = sshll.u32 (!%p165_p2), %s997_s16, 5  ;;  %v1259_v2 = vld [vmem:[%s1544_s1 + $0x8] sm:$0xff] (!%p165_p2)   ;;  %v1260_v3 = vld [vmem:[%s1544_s1 + $0x10] sm:$0xff] (!%p165_p2)   ;;  %vm461_vm0 = vcmask (!%p165_p2), 261120  }
   0x6   : > { %168 = sbr.rel (%p165_p2) target bundleno = 326 (0x146), region = 36  ;;  %510 = vmatprep.subr.bf16.mxu0 (!%p165_p2), %v1324_v1  ;;  %1229 = vmatprep.subr.bf16.mxu1 (!%p165_p2), %v1324_v1  ;;  %p192_p3 = scmp.lt.s32.totalorder (!%p165_p2), %s1002_s19, 63  ;;  %v1261_v4 = vld [vmem:[%s1544_s1 + $0x18] sm:$0xff] (!%p165_p2)   ;;  %v1262_v7 = vld [vmem:[%s1544_s1 + $0x20] sm:$0xff] (!%p165_p2)   ;;  %v1263_v8 = vld [vmem:[%s1544_s1 + $0x28] sm:$0xff] (!%p165_p2)  }
   0x7   : > { %511 = vmatpush1.bf16.msra.mxu0 (!%p165_p2), %v1258_v0  ;;  %1239 = vmatpush1.bf16.msra.mxu1 (!%p165_p2), %v1258_v0  ;;  %v1264_v9 = vld [vmem:[%s1544_s1 + $0x30] sm:$0xff] (!%p165_p2)   ;;  %v1265_v10 = vld [vmem:[%s1544_s1 + $0x38] sm:$0xff] (!%p165_p2)   ;;  %v1266_v11 = vld [vmem:[%s1544_s1 + $0x40] sm:$0xff] (!%p165_p2)  }
   0x8   : > { %512 = vmatprep.subr.bf16.mxu0 (!%p165_p2), %v1324_v1  ;;  %1230 = vmatprep.subr.bf16.mxu1 (!%p165_p2), %v1324_v1  ;;  %v1267_v12 = vld [vmem:[%s1544_s1 + $0x48] sm:$0xff] (!%p165_p2)   ;;  %v1447_v43 = vld [vmem:[%s1545_s2] ss:$0 sm:$0xff] (!%p165_p2) }
   0x9   : > { %v1452_v45 = vld [vmem:[%s1546_s3] ss:$0 sm:$0xff] (!%p165_p2) }
   0xb   : > { %513 = vmatpush1.bf16.msra.mxu0 (!%p165_p2), %v1259_v2  ;;  %1240 = vmatpush1.bf16.msra.mxu1 (!%p165_p2), %v1259_v2 }
   0xc   : > { %514 = vmatprep.subr.bf16.mxu0 (!%p165_p2), %v1324_v1  ;;  %1231 = vmatprep.subr.bf16.mxu1 (!%p165_p2), %v1324_v1 }
   0xd   : > { %s1549_s19 = smov (!%p192_p3, %s1002_s19), 63 }
   0xe   : > { %s1101_s24 = sshll.u32 %s1549_s19, 3  ;;  %s1006_s22 = sshll.u32 %s1549_s19, 2 }
   0xf   : > { %s1373_s27 = scalar_lea.vmem %s1543_s0, %s1101_s24  ;;  %515 = vmatpush1.bf16.msra.mxu0 %v1260_v3  ;;  %1241 = vmatpush1.bf16.msra.mxu1 %v1260_v3  ;;  %s1466_s25 = scalar_lea.vmem %s1547_s4, %s1006_s22 }
  0x10   : > { %516 = vmatprep.subr.bf16.mxu0 %v1324_v1  ;;  %1232 = vmatprep.subr.bf16.mxu1 %v1324_v1  ;;  %v1270_v5 = vld [vmem:[%s1373_s27 + $0x4] ss:$8 sps:$4 sm:$0xff]   ;;  %v1268_v13 = vld [vmem:[%s1373_s27] ss:$8 sps:$4 sm:$0xff]   ;;  %v1274_v15 = vld [vmem:[%s1373_s27 + $0x14] ss:$8 sps:$4 sm:$0xff]  }
  0x11   : > { %v1273_v6 = vld [vmem:[%s1373_s27 + $0x84] ss:$8 sps:$4 sm:$0xff]   ;;  %1049 = vmatprep.mubr.msk.bf16.mxu0 %vm461_vm0, %v1270_v5  ;;  %v1271_v14 = vld [vmem:[%s1373_s27 + $0x80] ss:$8 sps:$4 sm:$0xff]   ;;  %v1276_v16 = vld [vmem:[%s1373_s27 + $0x94] ss:$8 sps:$4 sm:$0xff]  }
  0x12   : > { %1057 = vmatprep.mubr.msk.bf16.mxu1 %vm461_vm0, %v1273_v6  ;;  %v1278_v17 = vld [vmem:[%s1373_s27 + $0x10] ss:$8 sps:$4 sm:$0xff]   ;;  %v1280_v19 = vld [vmem:[%s1373_s27 + $0x24] ss:$8 sps:$4 sm:$0xff]   ;;  %v1284_v21 = vld [vmem:[%s1373_s27 + $0x20] ss:$8 sps:$4 sm:$0xff]  }
  0x13   : > { %517 = vmatpush1.bf16.msra.mxu0 %v1261_v4  ;;  %1242 = vmatpush1.bf16.msra.mxu1 %v1261_v4  ;;  %v1279_v18 = vld [vmem:[%s1373_s27 + $0x90] ss:$8 sps:$4 sm:$0xff]   ;;  %v1282_v20 = vld [vmem:[%s1373_s27 + $0xa4] ss:$8 sps:$4 sm:$0xff]   ;;  %v1285_v22 = vld [vmem:[%s1373_s27 + $0xa0] ss:$8 sps:$4 sm:$0xff]  }
  0x14   : > { %518 = vmatprep.subr.bf16.mxu0 %v1324_v1  ;;  %1233 = vmatprep.subr.bf16.mxu1 %v1324_v1  ;;  %v1286_v23 = vld [vmem:[%s1373_s27 + $0x34] ss:$8 sps:$4 sm:$0xff]   ;;  %v1290_v25 = vld [vmem:[%s1373_s27 + $0x30] ss:$8 sps:$4 sm:$0xff]   ;;  %v1292_v27 = vld [vmem:[%s1373_s27 + $0x44] ss:$8 sps:$4 sm:$0xff]  }
  0x15   : > { %v1288_v24 = vld [vmem:[%s1373_s27 + $0xb4] ss:$8 sps:$4 sm:$0xff]   ;;  %v1291_v26 = vld [vmem:[%s1373_s27 + $0xb0] ss:$8 sps:$4 sm:$0xff]   ;;  %v1294_v28 = vld [vmem:[%s1373_s27 + $0xc4] ss:$8 sps:$4 sm:$0xff]  }
  0x16   : > { %v1296_v29 = vld [vmem:[%s1373_s27 + $0x40] ss:$8 sps:$4 sm:$0xff]   ;;  %v1298_v31 = vld [vmem:[%s1373_s27 + $0x54] ss:$8 sps:$4 sm:$0xff]   ;;  %v1302_v33 = vld [vmem:[%s1373_s27 + $0x50] ss:$8 sps:$4 sm:$0xff]  }
  0x17   : > { %519 = vmatpush1.bf16.msra.mxu0 %v1262_v7  ;;  %1243 = vmatpush1.bf16.msra.mxu1 %v1262_v7  ;;  %v1297_v30 = vld [vmem:[%s1373_s27 + $0xc0] ss:$8 sps:$4 sm:$0xff]   ;;  %v1300_v32 = vld [vmem:[%s1373_s27 + $0xd4] ss:$8 sps:$4 sm:$0xff]   ;;  %v1303_v34 = vld [vmem:[%s1373_s27 + $0xd0] ss:$8 sps:$4 sm:$0xff]  }
  0x18   : > { %520 = vmatprep.subr.bf16.mxu0 %v1324_v1  ;;  %1234 = vmatprep.subr.bf16.mxu1 %v1324_v1  ;;  %v1304_v35 = vld [vmem:[%s1373_s27 + $0x64] ss:$8 sps:$4 sm:$0xff]   ;;  %v1308_v37 = vld [vmem:[%s1373_s27 + $0x60] ss:$8 sps:$4 sm:$0xff]   ;;  %v1310_v39 = vld [vmem:[%s1373_s27 + $0x74] ss:$8 sps:$4 sm:$0xff]  }
  0x19   : > { %v1306_v36 = vld [vmem:[%s1373_s27 + $0xe4] ss:$8 sps:$4 sm:$0xff]   ;;  %v1309_v38 = vld [vmem:[%s1373_s27 + $0xe0] ss:$8 sps:$4 sm:$0xff]   ;;  %v1312_v40 = vld [vmem:[%s1373_s27 + $0xf4] ss:$8 sps:$4 sm:$0xff]  }
  0x1a   : > { %v1314_v41 = vld [vmem:[%s1373_s27 + $0x70] ss:$8 sps:$4 sm:$0xff]  }
  0x1b   : > { %521 = vmatpush1.bf16.msra.mxu0 %v1263_v8  ;;  %1244 = vmatpush1.bf16.msra.mxu1 %v1263_v8  ;;  %v1315_v42 = vld [vmem:[%s1373_s27 + $0xf0] ss:$8 sps:$4 sm:$0xff]  }
  0x1c   : > { %522 = vmatprep.subr.bf16.mxu0 %v1324_v1  ;;  %1235 = vmatprep.subr.bf16.mxu1 %v1324_v1 }
  0x1f   : > { %523 = vmatpush1.bf16.msra.mxu0 %v1264_v9  ;;  %1245 = vmatpush1.bf16.msra.mxu1 %v1264_v9 }
  0x20   : > { %524 = vmatprep.subr.bf16.mxu0 %v1324_v1  ;;  %1236 = vmatprep.subr.bf16.mxu1 %v1324_v1 }
  0x23   : > { %525 = vmatpush1.bf16.msra.mxu0 %v1265_v10  ;;  %1246 = vmatpush1.bf16.msra.mxu1 %v1265_v10 }
  0x24   : > { %526 = vmatprep.subr.bf16.mxu0 %v1324_v1  ;;  %1237 = vmatprep.subr.bf16.mxu1 %v1324_v1 }
  0x27   : > { %527 = vmatpush1.bf16.msra.mxu0 %v1266_v11  ;;  %1247 = vmatpush1.bf16.msra.mxu1 %v1266_v11 }
  0x28   : > { %528 = vmatprep.subr.bf16.mxu0 %v1324_v1  ;;  %1238 = vmatprep.subr.bf16.mxu1 %v1324_v1 }
  0x2b   : > { %529 = vmatpush1.bf16.msra.mxu0 %v1267_v12  ;;  %1248 = vmatpush1.bf16.msra.mxu1 %v1267_v12 }
  0x2e   : > { %543 = vmatmul.mubr.bf16.vlgmr.msra.gmra.mrb[0].mxu0 %v1268_v13  ;;  %607 = vmatmul.mubr.bf16.vlgmr.msra.gmra.mrb[0].mxu1 %v1271_v14 }
  0x2f   : > { %1050 = vmatprep.mubr.msk.bf16.mxu0 %vm461_vm0, %v1274_v15  ;;  %1058 = vmatprep.mubr.msk.bf16.mxu1 %vm461_vm0, %v1276_v16 }
  0x36   : > { %551 = vmatmul.mubr.bf16.gmra.mrb[4].mxu0 %v1278_v17  ;;  %615 = vmatmul.mubr.bf16.gmra.mrb[4].mxu1 %v1279_v18 }
  0x37   : > { %1051 = vmatprep.mubr.msk.bf16.mxu0 %vm461_vm0, %v1280_v19  ;;  %1059 = vmatprep.mubr.msk.bf16.mxu1 %vm461_vm0, %v1282_v20 }
  0x3e   : > { %559 = vmatmul.mubr.bf16.gmra.mrb[8].mxu0 %v1284_v21  ;;  %623 = vmatmul.mubr.bf16.gmra.mrb[8].mxu1 %v1285_v22 }
  0x3f   : > { %1052 = vmatprep.mubr.msk.bf16.mxu0 %vm461_vm0, %v1286_v23  ;;  %1060 = vmatprep.mubr.msk.bf16.mxu1 %vm461_vm0, %v1288_v24 }
  0x46   : > { %567 = vmatmul.mubr.bf16.gmra.mrb[12].mxu0 %v1290_v25  ;;  %631 = vmatmul.mubr.bf16.gmra.mrb[12].mxu1 %v1291_v26 }
  0x47   : > { %1053 = vmatprep.mubr.msk.bf16.mxu0 %vm461_vm0, %v1292_v27  ;;  %1061 = vmatprep.mubr.msk.bf16.mxu1 %vm461_vm0, %v1294_v28 }
  0x4e   : > { %575 = vmatmul.mubr.bf16.gmra.mrb[16].mxu0 %v1296_v29  ;;  %639 = vmatmul.mubr.bf16.gmra.mrb[16].mxu1 %v1297_v30 }
  0x4f   : > { %1054 = vmatprep.mubr.msk.bf16.mxu0 %vm461_vm0, %v1298_v31  ;;  %1062 = vmatprep.mubr.msk.bf16.mxu1 %vm461_vm0, %v1300_v32 }
  0x56   : > { %583 = vmatmul.mubr.bf16.gmra.mrb[20].mxu0 %v1302_v33  ;;  %647 = vmatmul.mubr.bf16.gmra.mrb[20].mxu1 %v1303_v34 }
  0x57   : > { %1055 = vmatprep.mubr.msk.bf16.mxu0 %vm461_vm0, %v1304_v35  ;;  %1063 = vmatprep.mubr.msk.bf16.mxu1 %vm461_vm0, %v1306_v36 }
  0x5e   : > { %591 = vmatmul.mubr.bf16.gmra.mrb[24].mxu0 %v1308_v37  ;;  %655 = vmatmul.mubr.bf16.gmra.mrb[24].mxu1 %v1309_v38 }
  0x5f   : > { %1056 = vmatprep.mubr.msk.bf16.mxu0 %vm461_vm0, %v1310_v39  ;;  %1064 = vmatprep.mubr.msk.bf16.mxu1 %vm461_vm0, %v1312_v40 }
  0x66   : > { %599 = vmatmul.mubr.bf16.gmra.mrb[28].mxu0 %v1314_v41  ;;  %663 = vmatmul.mubr.bf16.gmra.mrb[28].mxu1 %v1315_v42 }
 0x101   : > { %v544_v44 = vpop.f32.mrb[0].mxu0  ;;  %v608_v46 = vpop.f32.mrb[0].mxu1 }
 0x102   : > { %v678_v47 = vmul.f32 %v1447_v43, %v544_v44  ;;  %v694_v48 = vmul.f32 %v1447_v43, %v608_v46  ;;  %v546_v49 = vpop.f32.mrb[1].mxu0  ;;  %v610_v50 = vpop.f32.mrb[1].mxu1 }
 0x103   : > { %v547_v51 = vpop.f32.mrb[2].mxu0  ;;  %v611_v52 = vpop.f32.mrb[2].mxu1 }
 0x104   : > { %v717_v53 = vadd.f32 %v1452_v45, %v678_v47  ;;  %v733_v54 = vadd.f32 %v1452_v45, %v694_v48  ;;  %v679_v55 = vmul.f32 %v1447_v43, %v547_v51  ;;  %v695_v56 = vmul.f32 %v1447_v43, %v611_v52  ;;  %v549_v57 = vpop.f32.mrb[3].mxu0  ;;  %v613_v58 = vpop.f32.mrb[3].mxu1 }
 0x106   : > { %v718_v59 = vadd.f32 %v1452_v45, %v679_v55  ;;  %v734_v60 = vadd.f32 %v1452_v45, %v695_v56  ;;  %v749_v61 = vmax.f32 %v717_v53, 0.0  ;;  %v765_v62 = vmax.f32 %v733_v54, 0.0 }
 0x108   : > { %v750_v63 = vmax.f32 %v718_v59, 0.0  ;;  %v766_v0 = vmax.f32 %v734_v60, 0.0 }
 0x109   : > { %v552_v1 = vpop.f32.mrb[4].mxu0  ;;  %v616_v2 = vpop.f32.mrb[4].mxu1 }
 0x10a   : > { %v1137_v3 = vpack.c.bf16 %v750_v63, %v749_v61  ;;  %v1177_v4 = vpack.c.bf16 %v766_v0, %v765_v62  ;;  %v680_v5 = vmul.f32 %v1447_v43, %v552_v1  ;;  %v696_v6 = vmul.f32 %v1447_v43, %v616_v2  ;;  %v554_v7 = vpop.f32.mrb[5].mxu0  ;;  %v618_v8 = vpop.f32.mrb[5].mxu1 }
 0x10b   : > { %v555_v9 = vpop.f32.mrb[6].mxu0  ;;  %v619_v10 = vpop.f32.mrb[6].mxu1 }
 0x10c   : > { %1138 = vst [vmem:[%s1466_s25] sm:$0xff] %v1137_v3   ;;  %1221 = vst [vmem:[%s1466_s25 + $0x40] sm:$0xff] %v1177_v4   ;;  %v719_v11 = vadd.f32 %v1452_v45, %v680_v5  ;;  %v735_v12 = vadd.f32 %v1452_v45, %v696_v6  ;;  %v681_v13 = vmul.f32 %v1447_v43, %v555_v9  ;;  %v557_v15 = vpop.f32.mrb[7].mxu0  ;;  %v621_v16 = vpop.f32.mrb[7].mxu1 }
 0x10d   : > { %v697_v14 = vmul.f32 %v1447_v43, %v619_v10 }
 0x10e   : > { %v720_v17 = vadd.f32 %v1452_v45, %v681_v13  ;;  %v751_v19 = vmax.f32 %v719_v11, 0.0  ;;  %v767_v20 = vmax.f32 %v735_v12, 0.0 }
 0x10f   : > { %v736_v18 = vadd.f32 %v1452_v45, %v697_v14 }
 0x110   : > { %v752_v21 = vmax.f32 %v720_v17, 0.0 }
 0x111   : > { %v768_v22 = vmax.f32 %v736_v18, 0.0  ;;  %v560_v23 = vpop.f32.mrb[8].mxu0  ;;  %v624_v24 = vpop.f32.mrb[8].mxu1 }
 0x112   : > { %v1142_v25 = vpack.c.bf16 %v752_v21, %v751_v19  ;;  %v682_v27 = vmul.f32 %v1447_v43, %v560_v23  ;;  %v698_v28 = vmul.f32 %v1447_v43, %v624_v24  ;;  %v562_v29 = vpop.f32.mrb[9].mxu0  ;;  %v626_v30 = vpop.f32.mrb[9].mxu1 }
 0x113   : > { %v1182_v26 = vpack.c.bf16 %v768_v22, %v767_v20  ;;  %v563_v31 = vpop.f32.mrb[10].mxu0  ;;  %v627_v32 = vpop.f32.mrb[10].mxu1 }
 0x114   : > { %1214 = vst [vmem:[%s1466_s25 + $0x8] sm:$0xff] %v1142_v25   ;;  %v721_v33 = vadd.f32 %v1452_v45, %v682_v27  ;;  %v737_v34 = vadd.f32 %v1452_v45, %v698_v28  ;;  %v683_v35 = vmul.f32 %v1447_v43, %v563_v31  ;;  %v699_v36 = vmul.f32 %v1447_v43, %v627_v32  ;;  %v565_v37 = vpop.f32.mrb[11].mxu0  ;;  %v629_v38 = vpop.f32.mrb[11].mxu1 }
 0x115   : > { %1222 = vst [vmem:[%s1466_s25 + $0x48] sm:$0xff] %v1182_v26  }
 0x116   : > { %v722_v39 = vadd.f32 %v1452_v45, %v683_v35  ;;  %v738_v40 = vadd.f32 %v1452_v45, %v699_v36  ;;  %v753_v41 = vmax.f32 %v721_v33, 0.0  ;;  %v769_v42 = vmax.f32 %v737_v34, 0.0 }
 0x118   : > { %v754_v44 = vmax.f32 %v722_v39, 0.0  ;;  %v770_v46 = vmax.f32 %v738_v40, 0.0 }
 0x119   : > { %v568_v47 = vpop.f32.mrb[12].mxu0  ;;  %v632_v48 = vpop.f32.mrb[12].mxu1 }
 0x11a   : > { %v1147_v49 = vpack.c.bf16 %v754_v44, %v753_v41  ;;  %v1187_v50 = vpack.c.bf16 %v770_v46, %v769_v42  ;;  %v684_v51 = vmul.f32 %v1447_v43, %v568_v47  ;;  %v700_v52 = vmul.f32 %v1447_v43, %v632_v48  ;;  %v570_v53 = vpop.f32.mrb[13].mxu0  ;;  %v634_v54 = vpop.f32.mrb[13].mxu1 }
 0x11b   : > { %v571_v55 = vpop.f32.mrb[14].mxu0  ;;  %v635_v56 = vpop.f32.mrb[14].mxu1 }
 0x11c   : > { %1215 = vst [vmem:[%s1466_s25 + $0x10] sm:$0xff] %v1147_v49   ;;  %1223 = vst [vmem:[%s1466_s25 + $0x50] sm:$0xff] %v1187_v50   ;;  %v723_v57 = vadd.f32 %v1452_v45, %v684_v51  ;;  %v739_v58 = vadd.f32 %v1452_v45, %v700_v52  ;;  %v685_v59 = vmul.f32 %v1447_v43, %v571_v55  ;;  %v573_v61 = vpop.f32.mrb[15].mxu0  ;;  %v637_v62 = vpop.f32.mrb[15].mxu1 }
 0x11d   : > { %v701_v60 = vmul.f32 %v1447_v43, %v635_v56 }
 0x11e   : > { %v724_v63 = vadd.f32 %v1452_v45, %v685_v59  ;;  %v755_v1 = vmax.f32 %v723_v57, 0.0  ;;  %v771_v2 = vmax.f32 %v739_v58, 0.0 }
 0x11f   : > { %v740_v0 = vadd.f32 %v1452_v45, %v701_v60 }
 0x120   : > { %v756_v3 = vmax.f32 %v724_v63, 0.0 }
 0x121   : > { %v772_v4 = vmax.f32 %v740_v0, 0.0  ;;  %v576_v5 = vpop.f32.mrb[16].mxu0  ;;  %v640_v6 = vpop.f32.mrb[16].mxu1 }
 0x122   : > { %v1152_v7 = vpack.c.bf16 %v756_v3, %v755_v1  ;;  %v686_v9 = vmul.f32 %v1447_v43, %v576_v5  ;;  %v702_v10 = vmul.f32 %v1447_v43, %v640_v6  ;;  %v578_v11 = vpop.f32.mrb[17].mxu0  ;;  %v642_v12 = vpop.f32.mrb[17].mxu1 }
 0x123   : > { %v1192_v8 = vpack.c.bf16 %v772_v4, %v771_v2  ;;  %v579_v13 = vpop.f32.mrb[18].mxu0  ;;  %v643_v14 = vpop.f32.mrb[18].mxu1 }
 0x124   : > { %1216 = vst [vmem:[%s1466_s25 + $0x18] sm:$0xff] %v1152_v7   ;;  %v725_v15 = vadd.f32 %v1452_v45, %v686_v9  ;;  %v741_v16 = vadd.f32 %v1452_v45, %v702_v10  ;;  %v687_v17 = vmul.f32 %v1447_v43, %v579_v13  ;;  %v703_v18 = vmul.f32 %v1447_v43, %v643_v14  ;;  %v581_v19 = vpop.f32.mrb[19].mxu0  ;;  %v645_v20 = vpop.f32.mrb[19].mxu1 }
 0x125   : > { %1224 = vst [vmem:[%s1466_s25 + $0x58] sm:$0xff] %v1192_v8  }
 0x126   : > { %v726_v21 = vadd.f32 %v1452_v45, %v687_v17  ;;  %v742_v22 = vadd.f32 %v1452_v45, %v703_v18  ;;  %v757_v23 = vmax.f32 %v725_v15, 0.0  ;;  %v773_v24 = vmax.f32 %v741_v16, 0.0 }
 0x128   : > { %v758_v25 = vmax.f32 %v726_v21, 0.0  ;;  %v774_v26 = vmax.f32 %v742_v22, 0.0 }
 0x129   : > { %v584_v27 = vpop.f32.mrb[20].mxu0  ;;  %v648_v28 = vpop.f32.mrb[20].mxu1 }
 0x12a   : > { %v1157_v29 = vpack.c.bf16 %v758_v25, %v757_v23  ;;  %v1197_v30 = vpack.c.bf16 %v774_v26, %v773_v24  ;;  %v688_v31 = vmul.f32 %v1447_v43, %v584_v27  ;;  %v704_v32 = vmul.f32 %v1447_v43, %v648_v28  ;;  %v586_v33 = vpop.f32.mrb[21].mxu0  ;;  %v650_v34 = vpop.f32.mrb[21].mxu1 }
 0x12b   : > { %v587_v35 = vpop.f32.mrb[22].mxu0  ;;  %v651_v36 = vpop.f32.mrb[22].mxu1 }
 0x12c   : > { %1217 = vst [vmem:[%s1466_s25 + $0x20] sm:$0xff] %v1157_v29   ;;  %1225 = vst [vmem:[%s1466_s25 + $0x60] sm:$0xff] %v1197_v30   ;;  %v727_v37 = vadd.f32 %v1452_v45, %v688_v31  ;;  %v743_v38 = vadd.f32 %v1452_v45, %v704_v32  ;;  %v689_v39 = vmul.f32 %v1447_v43, %v587_v35  ;;  %v589_v41 = vpop.f32.mrb[23].mxu0  ;;  %v653_v42 = vpop.f32.mrb[23].mxu1 }
 0x12d   : > { %v705_v40 = vmul.f32 %v1447_v43, %v651_v36 }
 0x12e   : > { %v728_v44 = vadd.f32 %v1452_v45, %v689_v39  ;;  %v759_v47 = vmax.f32 %v727_v37, 0.0  ;;  %v775_v48 = vmax.f32 %v743_v38, 0.0 }
 0x12f   : > { %v744_v46 = vadd.f32 %v1452_v45, %v705_v40 }
 0x130   : > { %v760_v49 = vmax.f32 %v728_v44, 0.0 }
 0x131   : > { %v776_v50 = vmax.f32 %v744_v46, 0.0  ;;  %v592_v51 = vpop.f32.mrb[24].mxu0  ;;  %v656_v52 = vpop.f32.mrb[24].mxu1 }
 0x132   : > { %v1162_v53 = vpack.c.bf16 %v760_v49, %v759_v47  ;;  %v690_v55 = vmul.f32 %v1447_v43, %v592_v51  ;;  %v706_v56 = vmul.f32 %v1447_v43, %v656_v52  ;;  %v594_v57 = vpop.f32.mrb[25].mxu0  ;;  %v658_v58 = vpop.f32.mrb[25].mxu1 }
 0x133   : > { %v1202_v54 = vpack.c.bf16 %v776_v50, %v775_v48  ;;  %v595_v59 = vpop.f32.mrb[26].mxu0  ;;  %v659_v60 = vpop.f32.mrb[26].mxu1 }
 0x134   : > { %1218 = vst [vmem:[%s1466_s25 + $0x28] sm:$0xff] %v1162_v53   ;;  %v729_v61 = vadd.f32 %v1452_v45, %v690_v55  ;;  %v745_v62 = vadd.f32 %v1452_v45, %v706_v56  ;;  %v691_v63 = vmul.f32 %v1447_v43, %v595_v59  ;;  %v707_v0 = vmul.f32 %v1447_v43, %v659_v60  ;;  %v597_v1 = vpop.f32.mrb[27].mxu0  ;;  %v661_v2 = vpop.f32.mrb[27].mxu1 }
 0x135   : > { %1226 = vst [vmem:[%s1466_s25 + $0x68] sm:$0xff] %v1202_v54  }
 0x136   : > { %v730_v3 = vadd.f32 %v1452_v45, %v691_v63  ;;  %v746_v4 = vadd.f32 %v1452_v45, %v707_v0  ;;  %v761_v5 = vmax.f32 %v729_v61, 0.0  ;;  %v777_v6 = vmax.f32 %v745_v62, 0.0 }
 0x138   : > { %v762_v7 = vmax.f32 %v730_v3, 0.0  ;;  %v778_v8 = vmax.f32 %v746_v4, 0.0 }
 0x139   : > { %v600_v9 = vpop.f32.mrb[28].mxu0  ;;  %v664_v10 = vpop.f32.mrb[28].mxu1 }
 0x13a   : > { %v1167_v11 = vpack.c.bf16 %v762_v7, %v761_v5  ;;  %v1207_v12 = vpack.c.bf16 %v778_v8, %v777_v6  ;;  %v692_v13 = vmul.f32 %v1447_v43, %v600_v9  ;;  %v708_v14 = vmul.f32 %v1447_v43, %v664_v10  ;;  %v602_v15 = vpop.f32.mrb[29].mxu0  ;;  %v666_v16 = vpop.f32.mrb[29].mxu1 }
 0x13b   : > { %v603_v17 = vpop.f32.mrb[30].mxu0  ;;  %v667_v18 = vpop.f32.mrb[30].mxu1 }
 0x13c   : > { %1219 = vst [vmem:[%s1466_s25 + $0x30] sm:$0xff] %v1167_v11   ;;  %1227 = vst [vmem:[%s1466_s25 + $0x70] sm:$0xff] %v1207_v12   ;;  %v731_v19 = vadd.f32 %v1452_v45, %v692_v13  ;;  %v747_v20 = vadd.f32 %v1452_v45, %v708_v14  ;;  %v693_v21 = vmul.f32 %v1447_v43, %v603_v17  ;;  %v605_v23 = vpop.f32.mrb[31].mxu0  ;;  %v669_v24 = vpop.f32.mrb[31].mxu1 }
 0x13d   : > { %v709_v22 = vmul.f32 %v1447_v43, %v667_v18 }
 0x13e   : > { %v732_v25 = vadd.f32 %v1452_v45, %v693_v21  ;;  %v763_v27 = vmax.f32 %v731_v19, 0.0  ;;  %v779_v28 = vmax.f32 %v747_v20, 0.0 }
 0x13f   : > { %v748_v26 = vadd.f32 %v1452_v45, %v709_v22 }
 0x140   : > { %v764_v29 = vmax.f32 %v732_v25, 0.0 }
 0x141   : > { %v780_v30 = vmax.f32 %v748_v26, 0.0 }
 0x142   : > { %v1172_v31 = vpack.c.bf16 %v764_v29, %v763_v27 }
 0x143   : > { %v1212_v32 = vpack.c.bf16 %v780_v30, %v779_v28 }
 0x144   : > { %1220 = vst [vmem:[%s1466_s25 + $0x38] sm:$0xff] %v1172_v31  }
 0x145   : > { %1228 = vst [vmem:[%s1466_s25 + $0x78] sm:$0xff] %v1212_v32  }
 0x146 PF: > { %s14_s15 = sadd.s32 1, %s1322_s15  }
 0x147   : > { %p11_p4 = scmp.ge.s32.totalorder %s14_s15, 4  }
 0x149   :  { %13 = sbr.rel (!%p11_p4) target bundleno = 1 (0x1), region = 66 }

// kernel: teacher_forward.15
= control target key start
LH: loop header
LB: loop body
LE: loop exit
PB: predicated region body
PF: predicated region fallthrough
CT: control target
= control target key end

     0   :  { %s658_s15 = smov 0   ;;  %s718_s0 = inlined_call_operand.vmem [shape: bf16[128,128], index: 0, kind: input, shape index: {}]   ;;  %s719_s1 = inlined_call_operand.vmem [shape: bf16[128,128], index: 1, kind: input, shape index: {}]   ;;  %s720_s2 = inlined_call_operand.vmem [shape: f32[1,128], index: 2, kind: input, shape index: {}]   ;;  %s721_s3 = inlined_call_operand.vmem [shape: f32[1,128], index: 3, kind: input, shape index: {}]   ;;  %s722_s4 = inlined_call_operand.vmem [shape: bf16[128,128], index: 4, kind: output, shape index: {}]  }
   0x1 LB: > { %s489_s16 = sadd.s32 4294967295, %s631_s15   ;;  %p493_p0 = scmp.ge.s32.totalorder %s631_s15, 1  ;;  %s631_s15 = sphi %s658_s15, %s14_s15  }
   0x2   : > { %p163_p1 = scmp.lt.s32.totalorder %s631_s15, 3 }
   0x4   : > { %p164_p2 = pnand %p493_p0, %p163_p1 }
   0x5   : > { %v613_v0 = vld [vmem:[%s719_s1] sm:$0xff] (!%p164_p2)   ;;  %s494_s19 = sshll.u32 (!%p164_p2), %s489_s16, 3  ;;  %v614_v1 = vld [vmem:[%s719_s1 + $0x8] sm:$0xff] (!%p164_p2)   ;;  %v615_v2 = vld [vmem:[%s719_s1 + $0x10] sm:$0xff] (!%p164_p2)  }
   0x6   : > { %167 = sbr.rel (%p164_p2) target bundleno = 260 (0x104), region = 36  ;;  %p190_p3 = scmp.lt.s32.totalorder (!%p164_p2), %s494_s19, 15  ;;  %565 = vmatprep.subr.bf16.mxu0 (!%p164_p2), %v613_v0  ;;  %589 = vmatprep.subr.bf16.mxu1 (!%p164_p2), %v613_v0  ;;  %v616_v3 = vld [vmem:[%s719_s1 + $0x18] sm:$0xff] (!%p164_p2)   ;;  %v617_v6 = vld [vmem:[%s719_s1 + $0x20] sm:$0xff] (!%p164_p2)   ;;  %v618_v7 = vld [vmem:[%s719_s1 + $0x28] sm:$0xff] (!%p164_p2)  }
   0x7   : > { %566 = vmatpush3.bf16.msra.mxu0 (!%p164_p2), %v613_v0  ;;  %597 = vmatpush3.bf16.msra.mxu1 (!%p164_p2), %v613_v0  ;;  %v619_v8 = vld [vmem:[%s719_s1 + $0x30] sm:$0xff] (!%p164_p2)   ;;  %v620_v9 = vld [vmem:[%s719_s1 + $0x38] sm:$0xff] (!%p164_p2)   ;;  %v510_v12 = vld [vmem:[%s720_s2] ss:$0 sm:$0xff] (!%p164_p2) }
   0x8   : > { %567 = vmatprep.subr.bf16.mxu0 (!%p164_p2), %v614_v1  ;;  %590 = vmatprep.subr.bf16.mxu1 (!%p164_p2), %v614_v1  ;;  %v511_v19 = vld [vmem:[%s721_s3] ss:$0 sm:$0xff] (!%p164_p2) }
   0xb   : > { %568 = vmatpush3.bf16.msra.mxu0 (!%p164_p2), %v614_v1  ;;  %598 = vmatpush3.bf16.msra.mxu1 (!%p164_p2), %v614_v1 }
   0xc   : > { %569 = vmatprep.subr.bf16.mxu0 (!%p164_p2), %v615_v2  ;;  %591 = vmatprep.subr.bf16.mxu1 (!%p164_p2), %v615_v2 }
   0xd   : > { %s724_s19 = smov (!%p190_p3, %s494_s19), 15 }
   0xe   : > { %s495_s24 = sshll.u32 %s724_s19, 2 }
   0xf   : > { %s683_s27 = scalar_lea.vmem %s718_s0, %s495_s24  ;;  %570 = vmatpush3.bf16.msra.mxu0 %v615_v2  ;;  %599 = vmatpush3.bf16.msra.mxu1 %v615_v2  ;;  %s199_s20 = scalar_lea.vmem %s722_s4, %s495_s24 }
  0x10   : > { %v621_v4 = vld [vmem:[%s683_s27] sm:$0xff]   ;;  %v622_v5 = vld [vmem:[%s683_s27 + $0x10] sm:$0xff]   ;;  %571 = vmatprep.subr.bf16.mxu0 %v616_v3  ;;  %592 = vmatprep.subr.bf16.mxu1 %v616_v3  ;;  %v623_v10 = vld [vmem:[%s683_s27 + $0x8] sm:$0xff]  }
  0x11   : > { %581 = vmatprep.mubr.bf16.mxu0 %v621_v4  ;;  %585 = vmatprep.mubr.bf16.mxu1 %v622_v5  ;;  %v624_v11 = vld [vmem:[%s683_s27 + $0x18] sm:$0xff]  }
  0x13   : > { %572 = vmatpush3.bf16.msra.mxu0 %v616_v3  ;;  %600 = vmatpush3.bf16.msra.mxu1 %v616_v3 }
  0x14   : > { %573 = vmatprep.subr.bf16.mxu0 %v617_v6  ;;  %593 = vmatprep.subr.bf16.mxu1 %v617_v6 }
  0x17   : > { %574 = vmatpush3.bf16.msra.mxu0 %v617_v6  ;;  %601 = vmatpush3.bf16.msra.mxu1 %v617_v6 }
  0x18   : > { %575 = vmatprep.subr.bf16.mxu0 %v618_v7  ;;  %594 = vmatprep.subr.bf16.mxu1 %v618_v7 }
  0x1b   : > { %576 = vmatpush3.bf16.msra.mxu0 %v618_v7  ;;  %602 = vmatpush3.bf16.msra.mxu1 %v618_v7 }
  0x1c   : > { %577 = vmatprep.subr.bf16.mxu0 %v619_v8  ;;  %595 = vmatprep.subr.bf16.mxu1 %v619_v8 }
  0x1f   : > { %578 = vmatpush3.bf16.msra.mxu0 %v619_v8  ;;  %603 = vmatpush3.bf16.msra.mxu1 %v619_v8 }
  0x20   : > { %579 = vmatprep.subr.bf16.mxu0 %v620_v9  ;;  %596 = vmatprep.subr.bf16.mxu1 %v620_v9 }
  0x23   : > { %580 = vmatpush3.bf16.msra.mxu0 %v620_v9  ;;  %604 = vmatpush3.bf16.msra.mxu1 %v620_v9 }
  0x26   : > { %582 = vmatmul.mubr.bf16.vlgmr.msra.gmra.mrb[0].mxu0 %v623_v10  ;;  %586 = vmatmul.mubr.bf16.vlgmr.msra.gmra.mrb[0].mxu1 %v624_v11 }
  0xf9   : > { %v583_v13 = vpop.f32.mrb[0].mxu0  ;;  %v587_v14 = vpop.f32.mrb[0].mxu1 }
  0xfa   : > { %v372_v15 = vmul.f32 %v583_v13, %v510_v12  ;;  %v376_v16 = vmul.f32 %v587_v14, %v510_v12  ;;  %v332_v17 = vpop.f32.mrb[1].mxu0  ;;  %v348_v18 = vpop.f32.mrb[1].mxu1 }
  0xfb   : > { %v370_v20 = vmul.f32 %v510_v12, %v332_v17  ;;  %v374_v21 = vmul.f32 %v510_v12, %v348_v18  ;;  %v584_v22 = vpop.f32.mrb[2].mxu0  ;;  %v588_v23 = vpop.f32.mrb[2].mxu1 }
  0xfc   : > { %v373_v24 = vmul.f32 %v584_v22, %v510_v12  ;;  %v377_v25 = vmul.f32 %v588_v23, %v510_v12  ;;  %v335_v26 = vpop.f32.mrb[3].mxu0  ;;  %v351_v27 = vpop.f32.mrb[3].mxu1  ;;  %v387_v30 = vadd.f32 %v511_v19, %v372_v15  ;;  %v391_v31 = vadd.f32 %v511_v19, %v376_v16 }
  0xfd   : > { %v371_v28 = vmul.f32 %v510_v12, %v335_v26  ;;  %v375_v29 = vmul.f32 %v510_v12, %v351_v27  ;;  %v385_v34 = vadd.f32 %v511_v19, %v370_v20  ;;  %v389_v35 = vadd.f32 %v511_v19, %v374_v21 }
  0xfe   : > { %v388_v32 = vadd.f32 %v511_v19, %v373_v24  ;;  %v392_v33 = vadd.f32 %v511_v19, %v377_v25 }
  0xff   : > { %v386_v36 = vadd.f32 %v511_v19, %v371_v28  ;;  %v390_v37 = vadd.f32 %v511_v19, %v375_v29 }
 0x100   : > { %v538_v38 = vpack.c.bf16 %v388_v32, %v387_v30  ;;  %v548_v39 = vpack.c.bf16 %v392_v33, %v391_v31 }
 0x101   : > { %v533_v40 = vpack.c.bf16 %v386_v36, %v385_v34  ;;  %v543_v41 = vpack.c.bf16 %v390_v37, %v389_v35 }
 0x102   : > { %550 = vst [vmem:[%s199_s20 + $0x8] sm:$0xff] %v538_v38   ;;  %552 = vst [vmem:[%s199_s20 + $0x18] sm:$0xff] %v548_v39  }
 0x103   : > { %534 = vst [vmem:[%s199_s20] sm:$0xff] %v533_v40   ;;  %551 = vst [vmem:[%s199_s20 + $0x10] sm:$0xff] %v543_v41  }
 0x104 PF: > { %s14_s15 = sadd.s32 1, %s631_s15  }
 0x105   : > { %p11_p4 = scmp.ge.s32.totalorder %s14_s15, 4  }
 0x107   :  { %13 = sbr.rel (!%p11_p4) target bundleno = 1 (0x1), region = 66 }

// kernel: teacher_forward.11
= control target key start
LH: loop header
LB: loop body
LE: loop exit
PB: predicated region body
PF: predicated region fallthrough
CT: control target
= control target key end

     0   :  { %s4054_s15 = smov 0   ;;  %s4868_s0 = inlined_call_operand.vmem [shape: bf16[512,1152], index: 0, kind: input, shape index: {}]   ;;  %s4869_s1 = inlined_call_operand.vmem [shape: bf16[1152,128], index: 1, kind: input, shape index: {}]   ;;  %s4870_s2 = inlined_call_operand.vmem [shape: f32[1,128], index: 2, kind: input, shape index: {}]   ;;  %s4871_s3 = inlined_call_operand.vmem [shape: f32[1,128], index: 3, kind: input, shape index: {}]   ;;  %s4872_s4 = inlined_call_operand.vmem [shape: bf16[512,128], index: 4, kind: output, shape index: {}]  }
   0x1 LB: > { %s2808_s16 = sadd.s32 4294967295, %s4027_s15   ;;  %p2812_p0 = scmp.ge.s32.totalorder %s4027_s15, 1  ;;  %s4027_s15 = sphi %s4054_s15, %s14_s15  }
   0x2   : > { %p164_p1 = scmp.lt.s32.totalorder %s4027_s15, 3 }
   0x4   : > { %p165_p2 = pnand %p2812_p0, %p164_p1 }
   0x5   : > { %v3741_v0 = vld [vmem:[%s4869_s1 + $0x40] sm:$0xff] (!%p165_p2)   ;;  %s2813_s19 = sshll.u32 (!%p165_p2), %s2808_s16, 5  ;;  %v3743_v2 = vld [vmem:[%s4869_s1 + $0x48] sm:$0xff] (!%p165_p2)   ;;  %v3745_v4 = vld [vmem:[%s4869_s1 + $0x50] sm:$0xff] (!%p165_p2)  }
   0x6   : > { %168 = sbr.rel (%p165_p2) target bundleno = 548 (0x224), region = 36  ;;  %v3742_v1 = vld [vmem:[%s4869_s1] sm:$0xff] (!%p165_p2)   ;;  %3196 = vmatprep.subr.bf16.mxu0 (!%p165_p2), %v3741_v0  ;;  %3716 = vmatprep.subr.bf16.mxu1 (!%p165_p2), %v3741_v0  ;;  %p192_p3 = scmp.lt.s32.totalorder (!%p165_p2), %s2813_s19, 63  ;;  %v3744_v3 = vld [vmem:[%s4869_s1 + $0x8] sm:$0xff] (!%p165_p2)   ;;  %v3746_v5 = vld [vmem:[%s4869_s1 + $0x10] sm:$0xff] (!%p165_p2)  }
   0x7   : > { %3197 = vmatpush3.bf16.msra.mxu0 (!%p165_p2), %v3742_v1  ;;  %3724 = vmatpush3.bf16.msra.mxu1 (!%p165_p2), %v3742_v1  ;;  %v3747_v6 = vld [vmem:[%s4869_s1 + $0x58] sm:$0xff] (!%p165_p2)   ;;  %v3749_v8 = vld [vmem:[%s4869_s1 + $0x60] sm:$0xff] (!%p165_p2)   ;;  %v3751_v10 = vld [vmem:[%s4869_s1 + $0x68] sm:$0xff] (!%p165_p2)  }
   0x8   : > { %3198 = vmatprep.subr.bf16.mxu0 (!%p165_p2), %v3743_v2  ;;  %3717 = vmatprep.subr.bf16.mxu1 (!%p165_p2), %v3743_v2  ;;  %v3748_v7 = vld [vmem:[%s4869_s1 + $0x18] sm:$0xff] (!%p165_p2)   ;;  %v3750_v9 = vld [vmem:[%s4869_s1 + $0x20] sm:$0xff] (!%p165_p2)   ;;  %v3752_v13 = vld [vmem:[%s4869_s1 + $0x28] sm:$0xff] (!%p165_p2)  }
   0x9   : > { %v3753_v14 = vld [vmem:[%s4869_s1 + $0x70] sm:$0xff] (!%p165_p2)   ;;  %v3755_v16 = vld [vmem:[%s4869_s1 + $0x78] sm:$0xff] (!%p165_p2)   ;;  %v3763_v18 = vld [vmem:[%s4869_s1 + $0xc0] sm:$0xff] (!%p165_p2)  }
   0xa   : > { %v3754_v15 = vld [vmem:[%s4869_s1 + $0x30] sm:$0xff] (!%p165_p2)   ;;  %v3756_v17 = vld [vmem:[%s4869_s1 + $0x38] sm:$0xff] (!%p165_p2)   ;;  %v3766_v21 = vld [vmem:[%s4869_s1 + $0x140] sm:$0xff] (!%p165_p2)  }
   0xb   : > { %3199 = vmatpush3.bf16.msra.mxu0 (!%p165_p2), %v3744_v3  ;;  %3725 = vmatpush3.bf16.msra.mxu1 (!%p165_p2), %v3744_v3  ;;  %v3764_v22 = vld [vmem:[%s4869_s1 + $0x80] sm:$0xff] (!%p165_p2)   ;;  %v3765_v23 = vld [vmem:[%s4869_s1 + $0xc8] sm:$0xff] (!%p165_p2)   ;;  %v3775_v31 = vld [vmem:[%s4869_s1 + $0xd0] sm:$0xff] (!%p165_p2)  }
   0xc   : > { %3200 = vmatprep.subr.bf16.mxu0 (!%p165_p2), %v3745_v4  ;;  %3718 = vmatprep.subr.bf16.mxu1 (!%p165_p2), %v3745_v4  ;;  %v3768_v24 = vld [vmem:[%s4869_s1 + $0x100] sm:$0xff] (!%p165_p2)   ;;  %v3767_v27 = vld [vmem:[%s4869_s1 + $0x88] sm:$0xff] (!%p165_p2)   ;;  %v3776_v32 = vld [vmem:[%s4869_s1 + $0x90] sm:$0xff] (!%p165_p2)  }
   0xd   : > { %s4874_s19 = smov (!%p192_p3, %s2813_s19), 63  ;;  %v3786_v28 = vld [vmem:[%s4869_s1 + $0x148] sm:$0xff]   ;;  %v3777_v34 = vld [vmem:[%s4869_s1 + $0xd8] sm:$0xff]   ;;  %v3785_v40 = vld [vmem:[%s4869_s1 + $0xe0] sm:$0xff]  }
   0xe   : > { %s3732_s6 = smul.u32 36, %s4874_s19  ;;  %v3788_v33 = vld [vmem:[%s4869_s1 + $0x108] sm:$0xff]   ;;  %v3778_v37 = vld [vmem:[%s4869_s1 + $0x98] sm:$0xff]   ;;  %v3787_v41 = vld [vmem:[%s4869_s1 + $0xa0] sm:$0xff]   ;;  %s2816_s30 = sshll.u32 %s4874_s19, 2 }
   0xf   : > { %3201 = vmatpush3.bf16.msra.mxu0 %v3746_v5  ;;  %3726 = vmatpush3.bf16.msra.mxu1 %v3746_v5  ;;  %v3789_v42 = vld [vmem:[%s4869_s1 + $0xe8] sm:$0xff]   ;;  %v3800_v43 = vld [vmem:[%s4869_s1 + $0x150] sm:$0xff]   ;;  %v3799_v52 = vld [vmem:[%s4869_s1 + $0xf8] sm:$0xff]   ;;  %s4752_s7 = scalar_lea.vmem %s4872_s4, %s2816_s30 }
  0x10   : > { %3202 = vmatprep.subr.bf16.mxu0 %v3747_v6  ;;  %3719 = vmatprep.subr.bf16.mxu1 %v3747_v6  ;;  %s4095_s13 = scalar_lea.vmem %s4868_s0, %s3732_s6  ;;  %v3802_v46 = vld [vmem:[%s4869_s1 + $0x110] sm:$0xff]   ;;  %v3790_v47 = vld [vmem:[%s4869_s1 + $0xa8] sm:$0xff]   ;;  %v3817_v55 = vld [vmem:[%s4869_s1 + $0x158] sm:$0xff]  }
  0x11   : > { %v3759_v11 = vld [vmem:[%s4095_s13 + $0x4] ss:$36 sps:$4 sm:$0xff]   ;;  %v3769_v25 = vld [vmem:[%s4095_s13 + $0x4c] ss:$36 sps:$4 sm:$0xff]   ;;  %v3779_v35 = vld [vmem:[%s4095_s13 + $0x94] ss:$36 sps:$4 sm:$0xff]  }
  0x12   : > { %v3762_v12 = vld [vmem:[%s4095_s13 + $0x364] ss:$36 sps:$4 sm:$0xff]   ;;  %1709 = vmatprep.mubr.bf16.mxu0 %v3759_v11  ;;  %v3771_v26 = vld [vmem:[%s4095_s13 + $0x3ac] ss:$36 sps:$4 sm:$0xff]   ;;  %v3781_v36 = vld [vmem:[%s4095_s13 + $0x3f4] ss:$36 sps:$4 sm:$0xff]  }
  0x13   : > { %3203 = vmatpush3.bf16.msra.mxu0 %v3748_v7  ;;  %3727 = vmatpush3.bf16.msra.mxu1 %v3748_v7  ;;  %v3757_v19 = vld [vmem:[%s4095_s13] ss:$36 sps:$4 sm:$0xff]   ;;  %v3773_v29 = vld [vmem:[%s4095_s13 + $0x48] ss:$36 sps:$4 sm:$0xff]   ;;  %v3783_v38 = vld [vmem:[%s4095_s13 + $0x90] ss:$36 sps:$4 sm:$0xff]  }
  0x14   : > { %3204 = vmatprep.subr.bf16.mxu0 %v3749_v8  ;;  %3720 = vmatprep.subr.bf16.mxu1 %v3749_v8  ;;  %v3760_v20 = vld [vmem:[%s4095_s13 + $0x360] ss:$36 sps:$4 sm:$0xff]   ;;  %v3774_v30 = vld [vmem:[%s4095_s13 + $0x3a8] ss:$36 sps:$4 sm:$0xff]   ;;  %v3784_v39 = vld [vmem:[%s4095_s13 + $0x3f0] ss:$36 sps:$4 sm:$0xff]  }
  0x15   : > { %1805 = vmatprep.mubr.bf16.mxu1 %v3762_v12  ;;  %v3791_v44 = vld [vmem:[%s4095_s13 + $0xdc] ss:$36 sps:$4 sm:$0xff]   ;;  %v3797_v48 = vld [vmem:[%s4869_s1 + $0xf0] sm:$0xff]   ;;  %v3803_v53 = vld [vmem:[%s4095_s13 + $0x124] ss:$36 sps:$4 sm:$0xff]  }
  0x16   : > { %v3793_v45 = vld [vmem:[%s4095_s13 + $0x43c] ss:$36 sps:$4 sm:$0xff]   ;;  %v3798_v51 = vld [vmem:[%s4869_s1 + $0xb0] sm:$0xff]   ;;  %v3805_v58 = vld [vmem:[%s4095_s13 + $0x8] ss:$36 sps:$4 sm:$0xff]  }
  0x17   : > { %3205 = vmatpush3.bf16.msra.mxu0 %v3750_v9  ;;  %3728 = vmatpush3.bf16.msra.mxu1 %v3750_v9  ;;  %v3795_v49 = vld [vmem:[%s4095_s13 + $0xd8] ss:$36 sps:$4 sm:$0xff]   ;;  %v3807_v54 = vld [vmem:[%s4095_s13 + $0xc] ss:$36 sps:$4 sm:$0xff]   ;;  %v3808_v59 = vld [vmem:[%s4095_s13 + $0x120] ss:$36 sps:$4 sm:$0xff]  }
  0x18   : > { %3206 = vmatprep.subr.bf16.mxu0 %v3751_v10  ;;  %3721 = vmatprep.subr.bf16.mxu1 %v3751_v10  ;;  %v3796_v50 = vld [vmem:[%s4095_s13 + $0x438] ss:$36 sps:$4 sm:$0xff]   ;;  %v3809_v60 = vld [vmem:[%s4869_s1 + $0x1c0] sm:$0xff]   ;;  %v3811_v62 = vld [vmem:[%s4095_s13 + $0x16c] ss:$36 sps:$4 sm:$0xff]  }
  0x19   : > { %v3818_v56 = vld [vmem:[%s4869_s1 + $0x118] sm:$0xff]   ;;  %v3810_v61 = vld [vmem:[%s4869_s1 + $0x180] sm:$0xff]   ;;  %v3825_v1 = vld [vmem:[%s4869_s1 + $0x1c8] sm:$0xff]  }
  0x1a   : > { %v3801_v57 = vld [vmem:[%s4869_s1 + $0xb8] sm:$0xff]   ;;  %v3827_v0 = vld [vmem:[%s4869_s1 + $0x160] sm:$0xff]   ;;  %v3826_v3 = vld [vmem:[%s4869_s1 + $0x188] sm:$0xff]  }
  0x1b   : > { %3207 = vmatpush3.bf16.msra.mxu0 %v3752_v13  ;;  %3729 = vmatpush3.bf16.msra.mxu1 %v3752_v13  ;;  %v3813_v63 = vld [vmem:[%s4095_s13 + $0x54] ss:$36 sps:$4 sm:$0xff]   ;;  %v3828_v2 = vld [vmem:[%s4869_s1 + $0x120] sm:$0xff]   ;;  %v3815_v4 = vld [vmem:[%s4095_s13 + $0x168] ss:$36 sps:$4 sm:$0xff]  }
  0x1c   : > { %3208 = vmatprep.subr.bf16.mxu0 %v3753_v14  ;;  %3722 = vmatprep.subr.bf16.mxu1 %v3753_v14  ;;  %v3816_v5 = vld [vmem:[%s4095_s13 + $0x50] ss:$36 sps:$4 sm:$0xff]   ;;  %v3821_v7 = vld [vmem:[%s4095_s13 + $0x9c] ss:$36 sps:$4 sm:$0xff]   ;;  %v3841_v8 = vld [vmem:[%s4869_s1 + $0x168] sm:$0xff]  }
  0x1d   : > { %v3819_v6 = vld [vmem:[%s4095_s13 + $0x1b4] ss:$36 sps:$4 sm:$0xff]   ;;  %v3843_v10 = vld [vmem:[%s4869_s1 + $0x128] sm:$0xff]   ;;  %v3829_v14 = vld [vmem:[%s4095_s13 + $0x1fc] ss:$36 sps:$4 sm:$0xff]  }
  0x1e   : > { %v3842_v9 = vld [vmem:[%s4869_s1 + $0x1d0] sm:$0xff]   ;;  %v3824_v13 = vld [vmem:[%s4095_s13 + $0x98] ss:$36 sps:$4 sm:$0xff]  }
  0x1f   : > { %3209 = vmatpush3.bf16.msra.mxu0 %v3754_v15  ;;  %3730 = vmatpush3.bf16.msra.mxu1 %v3754_v15  ;;  %v3844_v11 = vld [vmem:[%s4869_s1 + $0x190] sm:$0xff]  }
  0x20   : > { %3210 = vmatprep.subr.bf16.mxu0 %v3755_v16  ;;  %3723 = vmatprep.subr.bf16.mxu1 %v3755_v16  ;;  %v3823_v12 = vld [vmem:[%s4095_s13 + $0x1b0] ss:$36 sps:$4 sm:$0xff]  }
  0x21   : > { %v3851_v15 = vld [vmem:[%s4869_s1 + $0x170] sm:$0xff]  }
  0x22   : > { %v3852_v16 = vld [vmem:[%s4869_s1 + $0x130] sm:$0xff]  }
  0x23   : > { %3211 = vmatpush3.bf16.msra.mxu0 %v3756_v17  ;;  %3731 = vmatpush3.bf16.msra.mxu1 %v3756_v17  ;;  %v3831_v17 = vld [vmem:[%s4095_s13 + $0xe4] ss:$36 sps:$4 sm:$0xff]  }
  0x24   : > { %3308 = vmatprep.subr.bf16.mxu1 %v3763_v18  ;;  %3420 = vmatprep.subr.bf16.mxu0 %v3766_v21  ;;  %v3859_v18 = vld [vmem:[%s4869_s1 + $0x1d8] sm:$0xff]   ;;  %v3834_v21 = vld [vmem:[%s4095_s13 + $0xe0] ss:$36 sps:$4 sm:$0xff]  }
  0x26   : > { %1710 = vmatmul.mubr.bf16.vlgmr.msra.gmra.mrb[0].mxu0 %v3757_v19  ;;  %1806 = vmatmul.mubr.bf16.vlgmr.msra.gmra.mrb[0].mxu1 %v3760_v20  ;;  %v3860_v19 = vld [vmem:[%s4869_s1 + $0x198] sm:$0xff]  }
  0x27   : > { %3309 = vmatpush3.bf16.msra.mxu1 %v3764_v22  ;;  %3421 = vmatpush3.bf16.msra.mxu0 %v3768_v24  ;;  %v3833_v20 = vld [vmem:[%s4095_s13 + $0x1f8] ss:$36 sps:$4 sm:$0xff]   ;;  %v3835_v22 = vld [vmem:[%s4095_s13 + $0x244] ss:$36 sps:$4 sm:$0xff]  }
  0x28   : > { %3310 = vmatprep.subr.bf16.mxu1 %v3765_v23  ;;  %1717 = vmatprep.mubr.bf16.mxu0 %v3769_v25  ;;  %v3837_v23 = vld [vmem:[%s4095_s13 + $0x12c] ss:$36 sps:$4 sm:$0xff]   ;;  %v3867_v24 = vld [vmem:[%s4869_s1 + $0x178] sm:$0xff]  }
  0x29   : > { %1813 = vmatprep.mubr.bf16.mxu1 %v3771_v26  ;;  %3422 = vmatprep.subr.bf16.mxu0 %v3786_v28  ;;  %v3868_v25 = vld [vmem:[%s4869_s1 + $0x138] sm:$0xff]   ;;  %v3875_v26 = vld [vmem:[%s4869_s1 + $0x1e0] sm:$0xff]  }
  0x2a   : > { %v3876_v28 = vld [vmem:[%s4869_s1 + $0x1a0] sm:$0xff]  }
  0x2b   : > { %3311 = vmatpush3.bf16.msra.mxu1 %v3767_v27  ;;  %3423 = vmatpush3.bf16.msra.mxu0 %v3788_v33  ;;  %v3839_v27 = vld [vmem:[%s4095_s13 + $0x240] ss:$36 sps:$4 sm:$0xff]   ;;  %v3890_v33 = vld [vmem:[%s4869_s1 + $0x1e8] sm:$0xff]  }
  0x2c   : > { %3312 = vmatprep.subr.bf16.mxu1 %v3775_v31  ;;  %3424 = vmatprep.subr.bf16.mxu0 %v3800_v43  ;;  %v3845_v31 = vld [vmem:[%s4095_s13 + $0x28c] ss:$36 sps:$4 sm:$0xff]   ;;  %v3861_v43 = vld [vmem:[%s4095_s13 + $0x31c] ss:$36 sps:$4 sm:$0xff]  }
  0x2e   : > { %1718 = vmatmul.mubr.bf16.gmra.mrb[4].mxu0 %v3773_v29  ;;  %1814 = vmatmul.mubr.bf16.gmra.mrb[4].mxu1 %v3774_v30  ;;  %v3877_v29 = vld [vmem:[%s4869_s1 + $0x200] sm:$0xff]   ;;  %v3840_v30 = vld [vmem:[%s4095_s13 + $0x128] ss:$36 sps:$4 sm:$0xff]  }
  0x2f   : > { %3313 = vmatpush3.bf16.msra.mxu1 %v3776_v32  ;;  %1725 = vmatprep.mubr.bf16.mxu0 %v3779_v35  ;;  %v3847_v32 = vld [vmem:[%s4095_s13 + $0x174] ss:$36 sps:$4 sm:$0xff]   ;;  %v3891_v35 = vld [vmem:[%s4869_s1 + $0x1a8] sm:$0xff]  }
  0x30   : > { %3314 = vmatprep.subr.bf16.mxu1 %v3777_v34  ;;  %1821 = vmatprep.mubr.bf16.mxu1 %v3781_v36  ;;  %v3849_v34 = vld [vmem:[%s4095_s13 + $0x288] ss:$36 sps:$4 sm:$0xff]   ;;  %v3850_v36 = vld [vmem:[%s4095_s13 + $0x170] ss:$36 sps:$4 sm:$0xff]  }
  0x31   : > { %3425 = vmatpush3.bf16.msra.mxu0 %v3802_v46  ;;  %v3866_v46 = vld [vmem:[%s4095_s13 + $0x200] ss:$36 sps:$4 sm:$0xff]  }
  0x32   : > { %3426 = vmatprep.subr.bf16.mxu0 %v3817_v55  ;;  %v3892_v55 = vld [vmem:[%s4869_s1 + $0x208] sm:$0xff]  }
  0x33   : > { %3315 = vmatpush3.bf16.msra.mxu1 %v3778_v37  ;;  %v3853_v37 = vld [vmem:[%s4095_s13 + $0x2d4] ss:$36 sps:$4 sm:$0xff]  }
  0x34   : > { %3316 = vmatprep.subr.bf16.mxu1 %v3785_v40  ;;  %v3858_v40 = vld [vmem:[%s4095_s13 + $0x1b8] ss:$36 sps:$4 sm:$0xff]  }
  0x35   : > { %3427 = vmatpush3.bf16.msra.mxu0 %v3818_v56  ;;  %v3907_v56 = vld [vmem:[%s4869_s1 + $0x210] sm:$0xff]  }
  0x36   : > { %1726 = vmatmul.mubr.bf16.gmra.mrb[8].mxu0 %v3783_v38  ;;  %1822 = vmatmul.mubr.bf16.gmra.mrb[8].mxu1 %v3784_v39  ;;  %v3855_v38 = vld [vmem:[%s4095_s13 + $0x1bc] ss:$36 sps:$4 sm:$0xff]   ;;  %v3857_v39 = vld [vmem:[%s4095_s13 + $0x2d0] ss:$36 sps:$4 sm:$0xff]  }
  0x37   : > { %3317 = vmatpush3.bf16.msra.mxu1 %v3787_v41  ;;  %1733 = vmatprep.mubr.bf16.mxu0 %v3791_v44  ;;  %v3905_v41 = vld [vmem:[%s4869_s1 + $0x1f0] sm:$0xff]   ;;  %v3863_v44 = vld [vmem:[%s4095_s13 + $0x204] ss:$36 sps:$4 sm:$0xff]  }
  0x38   : > { %3318 = vmatprep.subr.bf16.mxu1 %v3789_v42  ;;  %1829 = vmatprep.mubr.bf16.mxu1 %v3793_v45  ;;  %v3906_v42 = vld [vmem:[%s4869_s1 + $0x1b0] sm:$0xff]   ;;  %v3865_v45 = vld [vmem:[%s4095_s13 + $0x318] ss:$36 sps:$4 sm:$0xff]  }
  0x39   : > { %3428 = vmatprep.subr.bf16.mxu0 %v3827_v0  ;;  %v3889_v0 = vld [vmem:[%s4095_s13 + $0xa0] ss:$36 sps:$4 sm:$0xff]  }
  0x3a   : > { %3429 = vmatpush3.bf16.msra.mxu0 %v3828_v2  ;;  %v3895_v2 = vld [vmem:[%s4095_s13 + $0xec] ss:$36 sps:$4 sm:$0xff]  }
  0x3b   : > { %3319 = vmatpush3.bf16.msra.mxu1 %v3790_v47  ;;  %3430 = vmatprep.subr.bf16.mxu0 %v3841_v8  ;;  %v3920_v47 = vld [vmem:[%s4869_s1 + $0x1f8] sm:$0xff]  }
  0x3c   : > { %3320 = vmatprep.subr.bf16.mxu1 %v3797_v48  ;;  %v3921_v48 = vld [vmem:[%s4869_s1 + $0x1b8] sm:$0xff]  }
  0x3d   : > { %v3901_v8 = vld [vmem:[%s4095_s13 + $0x134] ss:$36 sps:$4 sm:$0xff]  }
  0x3e   : > { %1734 = vmatmul.mubr.bf16.gmra.mrb[12].mxu0 %v3795_v49  ;;  %1830 = vmatmul.mubr.bf16.gmra.mrb[12].mxu1 %v3796_v50  ;;  %v3869_v49 = vld [vmem:[%s4095_s13 + $0x24c] ss:$36 sps:$4 sm:$0xff]   ;;  %v3873_v50 = vld [vmem:[%s4095_s13 + $0x14] ss:$36 sps:$4 sm:$0xff]  }
  0x3f   : > { %3321 = vmatpush3.bf16.msra.mxu1 %v3798_v51  ;;  %1741 = vmatprep.mubr.bf16.mxu0 %v3803_v53  ;;  %v3871_v51 = vld [vmem:[%s4095_s13 + $0x10] ss:$36 sps:$4 sm:$0xff]  }
  0x40   : > { %3322 = vmatprep.subr.bf16.mxu1 %v3799_v52  ;;  %1870 = vmatprep.mubr.bf16.mxu1 %v3807_v54  ;;  %v3874_v52 = vld [vmem:[%s4095_s13 + $0x248] ss:$36 sps:$4 sm:$0xff]   ;;  %v3878_v53 = vld [vmem:[%s4095_s13 + $0x294] ss:$36 sps:$4 sm:$0xff]   ;;  %v3880_v54 = vld [vmem:[%s4095_s13 + $0x5c] ss:$36 sps:$4 sm:$0xff]  }
  0x41   : > { %3431 = vmatpush3.bf16.msra.mxu0 %v3843_v10  ;;  %v3903_v10 = vld [vmem:[%s4095_s13 + $0x368] ss:$36 sps:$4 sm:$0xff]  }
  0x42   : > { %3432 = vmatprep.subr.bf16.mxu0 %v3851_v15  ;;  %v3913_v15 = vld [vmem:[%s4095_s13 + $0x178] ss:$36 sps:$4 sm:$0xff]  }
  0x43   : > { %3323 = vmatpush3.bf16.msra.mxu1 %v3801_v57  ;;  %v3882_v57 = vld [vmem:[%s4095_s13 + $0x290] ss:$36 sps:$4 sm:$0xff]  }
  0x44   : > { %3532 = vmatprep.subr.bf16.mxu1 %v3809_v60  ;;  %v3886_v60 = vld [vmem:[%s4095_s13 + $0xa4] ss:$36 sps:$4 sm:$0xff]  }
  0x45   : > { %3433 = vmatpush3.bf16.msra.mxu0 %v3852_v16  ;;  %v3914_v16 = vld [vmem:[%s4095_s13 + $0x3fc] ss:$36 sps:$4 sm:$0xff]  }
  0x46   : > { %1742 = vmatmul.mubr.bf16.gmra.mrb[16].mxu0 %v3808_v59  ;;  %1871 = vmatmul.mubr.bf16.vlgmr.msra.gmra.mrb[16].mxu1 %v3805_v58  ;;  %v3883_v58 = vld [vmem:[%s4095_s13 + $0x58] ss:$36 sps:$4 sm:$0xff]  }
  0x47   : > { %3533 = vmatpush3.bf16.msra.mxu1 %v3810_v61  ;;  %1749 = vmatprep.mubr.bf16.mxu0 %v3811_v62  ;;  %v3884_v59 = vld [vmem:[%s4095_s13 + $0x2dc] ss:$36 sps:$4 sm:$0xff]  }
  0x48   : > { %1878 = vmatprep.mubr.bf16.mxu1 %v3813_v63  ;;  %3534 = vmatprep.subr.bf16.mxu1 %v3825_v1  ;;  %v3922_v61 = vld [vmem:[%s4869_s1 + $0x218] sm:$0xff]   ;;  %v3935_v62 = vld [vmem:[%s4869_s1 + $0x220] sm:$0xff]  }
  0x49   : > { %3434 = vmatprep.subr.bf16.mxu0 %v3867_v24  ;;  %v3888_v63 = vld [vmem:[%s4095_s13 + $0x2d8] ss:$36 sps:$4 sm:$0xff]   ;;  %v3893_v1 = vld [vmem:[%s4095_s13 + $0x324] ss:$36 sps:$4 sm:$0xff]  }
  0x4a   : > { %3435 = vmatpush3.bf16.msra.mxu0 %v3868_v25  ;;  %v3929_v24 = vld [vmem:[%s4095_s13 + $0x254] ss:$36 sps:$4 sm:$0xff]   ;;  %v3933_v25 = vld [vmem:[%s4095_s13 + $0x1c] ss:$36 sps:$4 sm:$0xff]  }
  0x4b   : > { %3535 = vmatpush3.bf16.msra.mxu1 %v3826_v3  ;;  %3668 = vmatprep.subr.bf16.mxu0 %v3877_v29  ;;  %v3948_v3 = vld [vmem:[%s4869_s1 + $0x228] sm:$0xff]  }
  0x4c   : > { %3536 = vmatprep.subr.bf16.mxu1 %v3842_v9  ;;  %v3974_v9 = vld [vmem:[%s4869_s1 + $0x238] sm:$0xff]  }
  0x4e   : > { %1750 = vmatmul.mubr.bf16.gmra.mrb[20].mxu0 %v3815_v4  ;;  %1879 = vmatmul.mubr.bf16.gmra.mrb[20].mxu1 %v3816_v5  ;;  %v3897_v4 = vld [vmem:[%s4095_s13 + $0x320] ss:$36 sps:$4 sm:$0xff]   ;;  %v3898_v5 = vld [vmem:[%s4095_s13 + $0xe8] ss:$36 sps:$4 sm:$0xff]  }
  0x4f   : > { %1757 = vmatprep.mubr.bf16.mxu0 %v3819_v6  ;;  %1886 = vmatprep.mubr.bf16.mxu1 %v3821_v7  ;;  %v3961_v6 = vld [vmem:[%s4869_s1 + $0x230] sm:$0xff]  }
  0x50   : > { %3537 = vmatpush3.bf16.msra.mxu1 %v3844_v11  ;;  %v3899_v7 = vld [vmem:[%s4095_s13 + $0x36c] ss:$36 sps:$4 sm:$0xff]  }
  0x51   : > { %3538 = vmatprep.subr.bf16.mxu1 %v3859_v18  ;;  %v3904_v11 = vld [vmem:[%s4095_s13 + $0x130] ss:$36 sps:$4 sm:$0xff]   ;;  %v3918_v18 = vld [vmem:[%s4095_s13 + $0x3f8] ss:$36 sps:$4 sm:$0xff]  }
  0x54   : > { %3539 = vmatpush3.bf16.msra.mxu1 %v3860_v19  ;;  %v3919_v19 = vld [vmem:[%s4095_s13 + $0x1c0] ss:$36 sps:$4 sm:$0xff]  }
  0x55   : > { %3540 = vmatprep.subr.bf16.mxu1 %v3875_v26  ;;  %v3931_v26 = vld [vmem:[%s4095_s13 + $0x18] ss:$36 sps:$4 sm:$0xff]  }
  0x56   : > { %1758 = vmatmul.mubr.bf16.gmra.mrb[24].mxu0 %v3823_v12  ;;  %1887 = vmatmul.mubr.bf16.gmra.mrb[24].mxu1 %v3824_v13  ;;  %v3908_v12 = vld [vmem:[%s4095_s13 + $0x3b4] ss:$36 sps:$4 sm:$0xff]   ;;  %v3910_v13 = vld [vmem:[%s4095_s13 + $0x17c] ss:$36 sps:$4 sm:$0xff]  }
  0x57   : > { %1765 = vmatprep.mubr.bf16.mxu0 %v3829_v14  ;;  %1894 = vmatprep.mubr.bf16.mxu1 %v3831_v17  ;;  %v3912_v14 = vld [vmem:[%s4095_s13 + $0x3b0] ss:$36 sps:$4 sm:$0xff]   ;;  %v3916_v17 = vld [vmem:[%s4095_s13 + $0x1c4] ss:$36 sps:$4 sm:$0xff]  }
  0x58   : > { %3541 = vmatpush3.bf16.msra.mxu1 %v3876_v28  ;;  %v3936_v28 = vld [vmem:[%s4095_s13 + $0x29c] ss:$36 sps:$4 sm:$0xff]  }
  0x59   : > { %3542 = vmatprep.subr.bf16.mxu1 %v3890_v33  ;;  %v3944_v33 = vld [vmem:[%s4095_s13 + $0xac] ss:$36 sps:$4 sm:$0xff]  }
  0x5c   : > { %3543 = vmatpush3.bf16.msra.mxu1 %v3891_v35  ;;  %v3947_v35 = vld [vmem:[%s4095_s13 + $0xa8] ss:$36 sps:$4 sm:$0xff]  }
  0x5d   : > { %3544 = vmatprep.subr.bf16.mxu1 %v3905_v41  ;;  %v3957_v41 = vld [vmem:[%s4095_s13 + $0x13c] ss:$36 sps:$4 sm:$0xff]  }
  0x5e   : > { %1766 = vmatmul.mubr.bf16.gmra.mrb[28].mxu0 %v3833_v20  ;;  %1895 = vmatmul.mubr.bf16.gmra.mrb[28].mxu1 %v3834_v21  ;;  %v3923_v20 = vld [vmem:[%s4095_s13 + $0x444] ss:$36 sps:$4 sm:$0xff]   ;;  %v3925_v21 = vld [vmem:[%s4095_s13 + $0x20c] ss:$36 sps:$4 sm:$0xff]  }
  0x5f   : > { %1773 = vmatprep.mubr.bf16.mxu0 %v3835_v22  ;;  %1902 = vmatprep.mubr.bf16.mxu1 %v3837_v23  ;;  %v3927_v22 = vld [vmem:[%s4095_s13 + $0x440] ss:$36 sps:$4 sm:$0xff]   ;;  %v3928_v23 = vld [vmem:[%s4095_s13 + $0x208] ss:$36 sps:$4 sm:$0xff]  }
  0x60   : > { %3545 = vmatpush3.bf16.msra.mxu1 %v3906_v42  ;;  %v3959_v42 = vld [vmem:[%s4095_s13 + $0x370] ss:$36 sps:$4 sm:$0xff]  }
  0x61   : > { %3546 = vmatprep.subr.bf16.mxu1 %v3920_v47  ;;  %v3967_v47 = vld [vmem:[%s4095_s13 + $0x180] ss:$36 sps:$4 sm:$0xff]  }
  0x64   : > { %3547 = vmatpush3.bf16.msra.mxu1 %v3921_v48  ;;  %v3968_v48 = vld [vmem:[%s4095_s13 + $0x404] ss:$36 sps:$4 sm:$0xff]  }
  0x66   : > { %1774 = vmatmul.mubr.bf16.gmra.mrb[32].mxu0 %v3839_v27  ;;  %1903 = vmatmul.mubr.bf16.gmra.mrb[32].mxu1 %v3840_v30  ;;  %v3934_v27 = vld [vmem:[%s4095_s13 + $0x250] ss:$36 sps:$4 sm:$0xff]   ;;  %v3940_v30 = vld [vmem:[%s4095_s13 + $0x298] ss:$36 sps:$4 sm:$0xff]  }
  0x67   : > { %1781 = vmatprep.mubr.bf16.mxu0 %v3845_v31  ;;  %1910 = vmatprep.mubr.bf16.mxu1 %v3847_v32  ;;  %v3941_v31 = vld [vmem:[%s4095_s13 + $0x60] ss:$36 sps:$4 sm:$0xff]  }
  0x68   : > { %v3942_v32 = vld [vmem:[%s4095_s13 + $0x2e4] ss:$36 sps:$4 sm:$0xff]  }
  0x6e   : > { %1782 = vmatmul.mubr.bf16.gmra.mrb[36].mxu0 %v3849_v34  ;;  %1911 = vmatmul.mubr.bf16.gmra.mrb[36].mxu1 %v3850_v36  ;;  %v3946_v34 = vld [vmem:[%s4095_s13 + $0x2e0] ss:$36 sps:$4 sm:$0xff]   ;;  %v3949_v36 = vld [vmem:[%s4095_s13 + $0x32c] ss:$36 sps:$4 sm:$0xff]  }
  0x6f   : > { %1789 = vmatprep.mubr.bf16.mxu0 %v3853_v37  ;;  %1918 = vmatprep.mubr.bf16.mxu1 %v3855_v38  ;;  %v3951_v37 = vld [vmem:[%s4095_s13 + $0xf4] ss:$36 sps:$4 sm:$0xff]   ;;  %v3953_v38 = vld [vmem:[%s4095_s13 + $0x328] ss:$36 sps:$4 sm:$0xff]  }
  0x76   : > { %1790 = vmatmul.mubr.bf16.gmra.mrb[40].mxu0 %v3857_v39  ;;  %1919 = vmatmul.mubr.bf16.gmra.mrb[40].mxu1 %v3858_v40  ;;  %v3954_v39 = vld [vmem:[%s4095_s13 + $0xf0] ss:$36 sps:$4 sm:$0xff]  }
  0x77   : > { %1797 = vmatprep.mubr.bf16.mxu0 %v3861_v43  ;;  %1926 = vmatprep.mubr.bf16.mxu1 %v3863_v44  ;;  %v3955_v40 = vld [vmem:[%s4095_s13 + $0x374] ss:$36 sps:$4 sm:$0xff]   ;;  %v3962_v44 = vld [vmem:[%s4095_s13 + $0x3bc] ss:$36 sps:$4 sm:$0xff]  }
  0x78   : > { %v3960_v43 = vld [vmem:[%s4095_s13 + $0x138] ss:$36 sps:$4 sm:$0xff]  }
  0x7e   : > { %1798 = vmatmul.mubr.bf16.gmra.mrb[44].mxu0 %v3865_v45  ;;  %1927 = vmatmul.mubr.bf16.gmra.mrb[44].mxu1 %v3866_v46  ;;  %v3964_v45 = vld [vmem:[%s4095_s13 + $0x184] ss:$36 sps:$4 sm:$0xff]   ;;  %v3966_v46 = vld [vmem:[%s4095_s13 + $0x3b8] ss:$36 sps:$4 sm:$0xff]  }
  0x7f   : > { %1934 = vmatprep.mubr.bf16.mxu1 %v3869_v49  ;;  %2031 = vmatprep.mubr.bf16.mxu0 %v3873_v50  ;;  %v3970_v49 = vld [vmem:[%s4095_s13 + $0x1cc] ss:$36 sps:$4 sm:$0xff]   ;;  %v3972_v50 = vld [vmem:[%s4095_s13 + $0x400] ss:$36 sps:$4 sm:$0xff]  }
  0x86   : > { %1935 = vmatmul.mubr.bf16.gmra.mrb[48].mxu1 %v3874_v52  ;;  %2032 = vmatmul.mubr.bf16.vlgmr.msra.gmra.mrb[48].mxu0 %v3871_v51  ;;  %v3973_v51 = vld [vmem:[%s4095_s13 + $0x1c8] ss:$36 sps:$4 sm:$0xff]  }
  0x87   : > { %3669 = vmatpush3.bf16.msra.mxu0 %v3877_v29  ;;  %1942 = vmatprep.mubr.bf16.mxu1 %v3878_v53  ;;  %v3938_v29 = vld [vmem:[%s4095_s13 + $0x64] ss:$36 sps:$4 sm:$0xff]   ;;  %v3975_v52 = vld [vmem:[%s4095_s13 + $0x44c] ss:$36 sps:$4 sm:$0xff]   ;;  %v3977_v53 = vld [vmem:[%s4095_s13 + $0x214] ss:$36 sps:$4 sm:$0xff]  }
  0x88   : > { %2039 = vmatprep.mubr.bf16.mxu0 %v3880_v54  ;;  %3670 = vmatprep.subr.bf16.mxu0 %v3892_v55 }
  0x8b   : > { %3671 = vmatpush3.bf16.msra.mxu0 %v3892_v55 }
  0x8c   : > { %3672 = vmatprep.subr.bf16.mxu0 %v3907_v56 }
  0x8e   : > { %1943 = vmatmul.mubr.bf16.gmra.mrb[52].mxu1 %v3882_v57  ;;  %2040 = vmatmul.mubr.bf16.gmra.mrb[52].mxu0 %v3883_v58  ;;  %v3979_v58 = vld [vmem:[%s4095_s13 + $0x448] ss:$36 sps:$4 sm:$0xff]  }
  0x8f   : > { %1950 = vmatprep.mubr.bf16.mxu1 %v3884_v59  ;;  %2047 = vmatprep.mubr.bf16.mxu0 %v3886_v60  ;;  %v3980_v59 = vld [vmem:[%s4095_s13 + $0x210] ss:$36 sps:$4 sm:$0xff]  }
  0x90   : > { %3673 = vmatpush3.bf16.msra.mxu0 %v3907_v56 }
  0x91   : > { %3674 = vmatprep.subr.bf16.mxu0 %v3922_v61 }
  0x94   : > { %3675 = vmatpush3.bf16.msra.mxu0 %v3922_v61 }
  0x95   : > { %3676 = vmatprep.subr.bf16.mxu0 %v3935_v62 }
  0x96   : > { %1951 = vmatmul.mubr.bf16.gmra.mrb[56].mxu1 %v3888_v63  ;;  %2048 = vmatmul.mubr.bf16.gmra.mrb[56].mxu0 %v3889_v0  ;;  %v3981_v0 = vld [vmem:[%s4095_s13 + $0x25c] ss:$36 sps:$4 sm:$0xff]  }
  0x97   : > { %1958 = vmatprep.mubr.bf16.mxu1 %v3893_v1  ;;  %2055 = vmatprep.mubr.bf16.mxu0 %v3895_v2  ;;  %v3983_v1 = vld [vmem:[%s4095_s13 + $0x20] ss:$36 sps:$4 sm:$0xff]  }
  0x98   : > { %3677 = vmatpush3.bf16.msra.mxu0 %v3935_v62 }
  0x99   : > { %3678 = vmatprep.subr.bf16.mxu0 %v3948_v3 }
  0x9c   : > { %3679 = vmatpush3.bf16.msra.mxu0 %v3948_v3 }
  0x9d   : > { %3680 = vmatprep.subr.bf16.mxu0 %v3961_v6 }
  0x9e   : > { %1959 = vmatmul.mubr.bf16.gmra.mrb[60].mxu1 %v3897_v4  ;;  %2056 = vmatmul.mubr.bf16.gmra.mrb[60].mxu0 %v3898_v5 }
  0x9f   : > { %1966 = vmatprep.mubr.bf16.mxu1 %v3899_v7  ;;  %2063 = vmatprep.mubr.bf16.mxu0 %v3901_v8 }
  0xa0   : > { %3681 = vmatpush3.bf16.msra.mxu0 %v3961_v6 }
  0xa1   : > { %3682 = vmatprep.subr.bf16.mxu0 %v3974_v9 }
  0xa4   : > { %3683 = vmatpush3.bf16.msra.mxu0 %v3974_v9 }
  0xa6   : > { %1967 = vmatmul.mubr.bf16.gmra.mrb[64].mxu1 %v3903_v10  ;;  %2064 = vmatmul.mubr.bf16.gmra.mrb[64].mxu0 %v3904_v11  ;;  %v3984_v10 = vld [vmem:[%s4095_s13 + $0x258] ss:$36 sps:$4 sm:$0xff]   ;;  %v3985_v11 = vld [vmem:[%s4095_s13 + $0x68] ss:$36 sps:$4 sm:$0xff]  }
  0xa7   : > { %1974 = vmatprep.mubr.bf16.mxu1 %v3908_v12  ;;  %2071 = vmatprep.mubr.bf16.mxu0 %v3910_v13 }
  0xae   : > { %1975 = vmatmul.mubr.bf16.gmra.mrb[68].mxu1 %v3912_v14  ;;  %2072 = vmatmul.mubr.bf16.gmra.mrb[68].mxu0 %v3913_v15 }
  0xaf   : > { %1982 = vmatprep.mubr.bf16.mxu1 %v3914_v16  ;;  %2079 = vmatprep.mubr.bf16.mxu0 %v3916_v17  ;;  %v3986_v16 = vld [vmem:[%s4095_s13 + $0x2a4] ss:$36 sps:$4 sm:$0xff]   ;;  %v3988_v17 = vld [vmem:[%s4095_s13 + $0xb0] ss:$36 sps:$4 sm:$0xff]  }
  0xb6   : > { %1983 = vmatmul.mubr.bf16.gmra.mrb[72].mxu1 %v3918_v18  ;;  %2080 = vmatmul.mubr.bf16.gmra.mrb[72].mxu0 %v3919_v19 }
  0xb7   : > { %1990 = vmatprep.mubr.bf16.mxu1 %v3923_v20  ;;  %2087 = vmatprep.mubr.bf16.mxu0 %v3925_v21 }
  0xbe   : > { %1991 = vmatmul.mubr.bf16.gmra.mrb[76].mxu1 %v3927_v22  ;;  %2088 = vmatmul.mubr.bf16.gmra.mrb[76].mxu0 %v3928_v23 }
  0xbf   : > { %2095 = vmatprep.mubr.bf16.mxu0 %v3929_v24  ;;  %2192 = vmatprep.mubr.bf16.mxu1 %v3933_v25 }
  0xc6   : > { %2096 = vmatmul.mubr.bf16.gmra.mrb[80].mxu0 %v3934_v27  ;;  %2193 = vmatmul.mubr.bf16.vlgmr.msra.gmra.mrb[80].mxu1 %v3931_v26  ;;  %v3989_v26 = vld [vmem:[%s4095_s13 + $0x2a0] ss:$36 sps:$4 sm:$0xff]   ;;  %v3990_v27 = vld [vmem:[%s4095_s13 + $0xf8] ss:$36 sps:$4 sm:$0xff]  }
  0xc7   : > { %2103 = vmatprep.mubr.bf16.mxu0 %v3936_v28  ;;  %2200 = vmatprep.mubr.bf16.mxu1 %v3938_v29 }
  0xce   : > { %2104 = vmatmul.mubr.bf16.gmra.mrb[84].mxu0 %v3940_v30  ;;  %2201 = vmatmul.mubr.bf16.gmra.mrb[84].mxu1 %v3941_v31 }
  0xcf   : > { %2111 = vmatprep.mubr.bf16.mxu0 %v3942_v32  ;;  %2208 = vmatprep.mubr.bf16.mxu1 %v3944_v33  ;;  %v3991_v32 = vld [vmem:[%s4095_s13 + $0x2ec] ss:$36 sps:$4 sm:$0xff]   ;;  %v3993_v33 = vld [vmem:[%s4095_s13 + $0x140] ss:$36 sps:$4 sm:$0xff]  }
  0xd6   : > { %2112 = vmatmul.mubr.bf16.gmra.mrb[88].mxu0 %v3946_v34  ;;  %2209 = vmatmul.mubr.bf16.gmra.mrb[88].mxu1 %v3947_v35 }
  0xd7   : > { %2119 = vmatprep.mubr.bf16.mxu0 %v3949_v36  ;;  %2216 = vmatprep.mubr.bf16.mxu1 %v3951_v37 }
  0xde   : > { %2120 = vmatmul.mubr.bf16.gmra.mrb[92].mxu0 %v3953_v38  ;;  %2217 = vmatmul.mubr.bf16.gmra.mrb[92].mxu1 %v3954_v39 }
  0xdf   : > { %2127 = vmatprep.mubr.bf16.mxu0 %v3955_v40  ;;  %2224 = vmatprep.mubr.bf16.mxu1 %v3957_v41 }
  0xe6   : > { %2128 = vmatmul.mubr.bf16.gmra.mrb[96].mxu0 %v3959_v42  ;;  %2225 = vmatmul.mubr.bf16.gmra.mrb[96].mxu1 %v3960_v43  ;;  %v3994_v42 = vld [vmem:[%s4095_s13 + $0x2e8] ss:$36 sps:$4 sm:$0xff]  }
  0xe7   : > { %2135 = vmatprep.mubr.bf16.mxu0 %v3962_v44  ;;  %2232 = vmatprep.mubr.bf16.mxu1 %v3964_v45  ;;  %v3995_v43 = vld [vmem:[%s4095_s13 + $0x188] ss:$36 sps:$4 sm:$0xff]  }
  0xee   : > { %2136 = vmatmul.mubr.bf16.gmra.mrb[100].mxu0 %v3966_v46  ;;  %2233 = vmatmul.mubr.bf16.gmra.mrb[100].mxu1 %v3967_v47 }
  0xef   : > { %2143 = vmatprep.mubr.bf16.mxu0 %v3968_v48  ;;  %2240 = vmatprep.mubr.bf16.mxu1 %v3970_v49  ;;  %v3996_v48 = vld [vmem:[%s4095_s13 + $0x334] ss:$36 sps:$4 sm:$0xff]  }
  0xf0   : > { %v3998_v49 = vld [vmem:[%s4095_s13 + $0x1d0] ss:$36 sps:$4 sm:$0xff]  }
  0xf6   : > { %2144 = vmatmul.mubr.bf16.gmra.mrb[104].mxu0 %v3972_v50  ;;  %2241 = vmatmul.mubr.bf16.gmra.mrb[104].mxu1 %v3973_v51 }
  0xf7   : > { %2151 = vmatprep.mubr.bf16.mxu0 %v3975_v52  ;;  %2248 = vmatprep.mubr.bf16.mxu1 %v3977_v53 }
  0xf9   : > { %v3284_v54 = vpop.f32.mrb[0].mxu1  ;;  %v3212_v55 = vpop.f32.mrb[0].mxu0 }
  0xfa   : > { %v3285_v56 = vpop.f32.mrb[1].mxu1  ;;  %v3213_v57 = vpop.f32.mrb[1].mxu0 }
  0xfb   : > { %v4398_v60 = vadd.f32 %v3285_v56, %v3284_v54  ;;  %v3287_v61 = vpop.f32.mrb[2].mxu1  ;;  %v4400_v62 = vadd.f32 %v3213_v57, %v3212_v55  ;;  %v3215_v63 = vpop.f32.mrb[2].mxu0 }
  0xfc   : > { %v3288_v2 = vpop.f32.mrb[3].mxu1  ;;  %v3216_v3 = vpop.f32.mrb[3].mxu0 }
  0xfd   : > { %v4404_v4 = vadd.f32 %v3288_v2, %v3287_v61  ;;  %v4406_v5 = vadd.f32 %v3216_v3, %v3215_v63  ;;  %v4001_v2 = vld [vmem:[%s4095_s13 + $0x37c] ss:$36 sps:$4 sm:$0xff]  }
  0xfe   : > { %2152 = vmatmul.mubr.bf16.gmra.mrb[108].mxu0 %v3979_v58  ;;  %2249 = vmatmul.mubr.bf16.gmra.mrb[108].mxu1 %v3980_v59  ;;  %v3999_v58 = vld [vmem:[%s4095_s13 + $0x330] ss:$36 sps:$4 sm:$0xff]   ;;  %v4000_v59 = vld [vmem:[%s4095_s13 + $0x218] ss:$36 sps:$4 sm:$0xff]   ;;  %v4003_v3 = vld [vmem:[%s4095_s13 + $0x260] ss:$36 sps:$4 sm:$0xff]  }
  0xff   : > { %2256 = vmatprep.mubr.bf16.mxu1 %v3981_v0  ;;  %3684 = vmatprep.mubr.bf16.mxu0 %v3983_v1 }
 0x101   : > { %v3290_v6 = vpop.f32.mrb[4].mxu1  ;;  %v3218_v7 = vpop.f32.mrb[4].mxu0 }
 0x102   : > { %v3291_v8 = vpop.f32.mrb[5].mxu1  ;;  %v3219_v9 = vpop.f32.mrb[5].mxu0 }
 0x103   : > { %v4410_v12 = vadd.f32 %v3291_v8, %v3290_v6  ;;  %v3293_v13 = vpop.f32.mrb[6].mxu1  ;;  %v4412_v14 = vadd.f32 %v3219_v9, %v3218_v7  ;;  %v3221_v15 = vpop.f32.mrb[6].mxu0 }
 0x104   : > { %v3294_v18 = vpop.f32.mrb[7].mxu1  ;;  %v3222_v19 = vpop.f32.mrb[7].mxu0 }
 0x105   : > { %v4416_v20 = vadd.f32 %v3294_v18, %v3293_v13  ;;  %v4418_v21 = vadd.f32 %v3222_v19, %v3221_v15  ;;  %v4004_v18 = vld [vmem:[%s4095_s13 + $0x378] ss:$36 sps:$4 sm:$0xff]   ;;  %v4005_v19 = vld [vmem:[%s4095_s13 + $0x2a8] ss:$36 sps:$4 sm:$0xff]  }
 0x106   : > { %2257 = vmatmul.mubr.bf16.gmra.mrb[112].mxu1 %v3984_v10  ;;  %3685 = vmatmul.mubr.bf16.vlgmr.msra.gmra.mrb[112].mxu0 %v3985_v11 }
 0x107   : > { %2264 = vmatprep.mubr.bf16.mxu1 %v3986_v16  ;;  %3688 = vmatprep.mubr.bf16.mxu0 %v3988_v17 }
 0x109   : > { %v3296_v22 = vpop.f32.mrb[8].mxu1  ;;  %v3224_v23 = vpop.f32.mrb[8].mxu0 }
 0x10a   : > { %v3297_v24 = vpop.f32.mrb[9].mxu1  ;;  %v3225_v25 = vpop.f32.mrb[9].mxu0 }
 0x10b   : > { %v4422_v28 = vadd.f32 %v3297_v24, %v3296_v22  ;;  %v3299_v29 = vpop.f32.mrb[10].mxu1  ;;  %v4424_v30 = vadd.f32 %v3225_v25, %v3224_v23  ;;  %v3227_v31 = vpop.f32.mrb[10].mxu0  ;;  %v4006_v25 = vld [vmem:[%s4095_s13 + $0x3c4] ss:$36 sps:$4 sm:$0xff]  }
 0x10c   : > { %v3300_v34 = vpop.f32.mrb[11].mxu1  ;;  %v3228_v35 = vpop.f32.mrb[11].mxu0 }
 0x10d   : > { %v4428_v36 = vadd.f32 %v3300_v34, %v3299_v29  ;;  %v4430_v37 = vadd.f32 %v3228_v35, %v3227_v31 }
 0x10e   : > { %2265 = vmatmul.mubr.bf16.gmra.mrb[116].mxu1 %v3989_v26  ;;  %3689 = vmatmul.mubr.bf16.gmra.mrb[116].mxu0 %v3990_v27  ;;  %v4008_v26 = vld [vmem:[%s4095_s13 + $0x2f0] ss:$36 sps:$4 sm:$0xff]  }
 0x10f   : > { %2272 = vmatprep.mubr.bf16.mxu1 %v3991_v32  ;;  %3692 = vmatprep.mubr.bf16.mxu0 %v3993_v33 }
 0x111   : > { %v3302_v38 = vpop.f32.mrb[12].mxu1  ;;  %v3230_v39 = vpop.f32.mrb[12].mxu0 }
 0x112   : > { %v3303_v40 = vpop.f32.mrb[13].mxu1  ;;  %v3231_v41 = vpop.f32.mrb[13].mxu0 }
 0x113   : > { %v4434_v44 = vadd.f32 %v3303_v40, %v3302_v38  ;;  %v3305_v45 = vpop.f32.mrb[14].mxu1  ;;  %v4436_v46 = vadd.f32 %v3231_v41, %v3230_v39  ;;  %v3233_v47 = vpop.f32.mrb[14].mxu0  ;;  %v4009_v40 = vld [vmem:[%s4095_s13 + $0x3c0] ss:$36 sps:$4 sm:$0xff]   ;;  %v4010_v41 = vld [vmem:[%s4095_s13 + $0x338] ss:$36 sps:$4 sm:$0xff]  }
 0x114   : > { %v3306_v50 = vpop.f32.mrb[15].mxu1  ;;  %v3234_v51 = vpop.f32.mrb[15].mxu0 }
 0x115   : > { %v4440_v52 = vadd.f32 %v3306_v50, %v3305_v45  ;;  %v4442_v53 = vadd.f32 %v3234_v51, %v3233_v47  ;;  %v4011_v47 = vld [vmem:[%s4095_s13 + $0x40c] ss:$36 sps:$4 sm:$0xff]  }
 0x116   : > { %2273 = vmatmul.mubr.bf16.gmra.mrb[120].mxu1 %v3994_v42  ;;  %3693 = vmatmul.mubr.bf16.gmra.mrb[120].mxu0 %v3995_v43 }
 0x117   : > { %2280 = vmatprep.mubr.bf16.mxu1 %v3996_v48  ;;  %3696 = vmatprep.mubr.bf16.mxu0 %v3998_v49  ;;  %v4013_v48 = vld [vmem:[%s4095_s13 + $0x380] ss:$36 sps:$4 sm:$0xff]  }
 0x119   : > { %v3324_v54 = vpop.f32.mrb[16].mxu1  ;;  %v3236_v55 = vpop.f32.mrb[16].mxu0 }
 0x11a   : > { %v3325_v56 = vpop.f32.mrb[17].mxu1  ;;  %v3237_v57 = vpop.f32.mrb[17].mxu0 }
 0x11b   : > { %v3326_v61 = vadd.f32 %v3325_v56, %v3324_v54  ;;  %v3327_v63 = vpop.f32.mrb[18].mxu1  ;;  %v4446_v0 = vadd.f32 %v3237_v57, %v3236_v55  ;;  %v3239_v1 = vpop.f32.mrb[18].mxu0 }
 0x11c   : > { %v3328_v6 = vpop.f32.mrb[19].mxu1  ;;  %v3240_v7 = vpop.f32.mrb[19].mxu0 }
 0x11d   : > { %v4451_v8 = vadd.f32 %v3326_v61, %v4400_v62  ;;  %v3329_v9 = vadd.f32 %v3328_v6, %v3327_v63  ;;  %v4453_v10 = vadd.f32 %v3240_v7, %v3239_v1  ;;  %v4014_v61 = vld [vmem:[%s4095_s13 + $0x408] ss:$36 sps:$4 sm:$0xff]   ;;  %v4016_v6 = vld [vmem:[%s4095_s13 + $0x454] ss:$36 sps:$4 sm:$0xff]  }
 0x11e   : > { %2281 = vmatmul.mubr.bf16.gmra.mrb[124].mxu1 %v3999_v58  ;;  %3697 = vmatmul.mubr.bf16.gmra.mrb[124].mxu0 %v4000_v59  ;;  %v4015_v63 = vld [vmem:[%s4095_s13 + $0x3c8] ss:$36 sps:$4 sm:$0xff]   ;;  %v4018_v7 = vld [vmem:[%s4095_s13 + $0x410] ss:$36 sps:$4 sm:$0xff]  }
 0x11f   : > { %v4456_v11 = vadd.f32 %v3329_v9, %v4406_v5  ;;  %2288 = vmatprep.mubr.bf16.mxu1 %v4001_v2  ;;  %3700 = vmatprep.mubr.bf16.mxu0 %v4003_v3 }
 0x121   : > { %v3330_v13 = vpop.f32.mrb[20].mxu1  ;;  %v3242_v15 = vpop.f32.mrb[20].mxu0 }
 0x122   : > { %v3331_v16 = vpop.f32.mrb[21].mxu1  ;;  %v3243_v17 = vpop.f32.mrb[21].mxu0 }
 0x123   : > { %v3332_v62 = vadd.f32 %v3331_v16, %v3330_v13  ;;  %v3333_v22 = vpop.f32.mrb[22].mxu1  ;;  %v4460_v23 = vadd.f32 %v3243_v17, %v3242_v15  ;;  %v3245_v24 = vpop.f32.mrb[22].mxu0 }
 0x124   : > { %v3334_v27 = vpop.f32.mrb[23].mxu1  ;;  %v3246_v5 = vpop.f32.mrb[23].mxu0 }
 0x125   : > { %v4465_v29 = vadd.f32 %v3332_v62, %v4412_v14  ;;  %v3335_v31 = vadd.f32 %v3334_v27, %v3333_v22  ;;  %v4467_v32 = vadd.f32 %v3246_v5, %v3245_v24  ;;  %v4019_v24 = vld [vmem:[%s4095_s13 + $0x450] ss:$36 sps:$4 sm:$0xff]  }
 0x126   : > { %2289 = vmatmul.mubr.bf16.gmra.mrb[128].mxu1 %v4004_v18  ;;  %3701 = vmatmul.mubr.bf16.gmra.mrb[128].mxu0 %v4005_v19 }
 0x127   : > { %v4470_v33 = vadd.f32 %v3335_v31, %v4418_v21  ;;  %2296 = vmatprep.mubr.bf16.mxu1 %v4006_v25  ;;  %3704 = vmatprep.mubr.bf16.mxu0 %v4008_v26  ;;  %v4020_v25 = vld [vmem:[%s4095_s13 + $0x458] ss:$36 sps:$4 sm:$0xff]  }
 0x129   : > { %v3336_v34 = vpop.f32.mrb[24].mxu1  ;;  %v3248_v35 = vpop.f32.mrb[24].mxu0 }
 0x12a   : > { %v3337_v38 = vpop.f32.mrb[25].mxu1  ;;  %v3249_v39 = vpop.f32.mrb[25].mxu0 }
 0x12b   : > { %v3338_v14 = vadd.f32 %v3337_v38, %v3336_v34  ;;  %v3339_v42 = vpop.f32.mrb[26].mxu1  ;;  %v4474_v43 = vadd.f32 %v3249_v39, %v3248_v35  ;;  %v3251_v45 = vpop.f32.mrb[26].mxu0 }
 0x12c   : > { %v3340_v49 = vpop.f32.mrb[27].mxu1  ;;  %v3252_v21 = vpop.f32.mrb[27].mxu0 }
 0x12d   : > { %v4479_v50 = vadd.f32 %v3338_v14, %v4424_v30  ;;  %v3341_v51 = vadd.f32 %v3340_v49, %v3339_v42  ;;  %v4481_v54 = vadd.f32 %v3252_v21, %v3251_v45 }
 0x12e   : > { %2297 = vmatmul.mubr.bf16.gmra.mrb[132].mxu1 %v4009_v40  ;;  %3705 = vmatmul.mubr.bf16.gmra.mrb[132].mxu0 %v4010_v41 }
 0x12f   : > { %v4484_v55 = vadd.f32 %v3341_v51, %v4430_v37  ;;  %2304 = vmatprep.mubr.bf16.mxu1 %v4011_v47  ;;  %3708 = vmatprep.mubr.bf16.mxu0 %v4013_v48 }
 0x131   : > { %v3342_v56 = vpop.f32.mrb[28].mxu1  ;;  %v3254_v57 = vpop.f32.mrb[28].mxu0 }
 0x132   : > { %v3343_v58 = vpop.f32.mrb[29].mxu1  ;;  %v3255_v59 = vpop.f32.mrb[29].mxu0 }
 0x133   : > { %v3344_v30 = vadd.f32 %v3343_v58, %v3342_v56  ;;  %v3345_v1 = vpop.f32.mrb[30].mxu1  ;;  %v4488_v2 = vadd.f32 %v3255_v59, %v3254_v57  ;;  %v3257_v3 = vpop.f32.mrb[30].mxu0 }
 0x134   : > { %v3346_v9 = vpop.f32.mrb[31].mxu1  ;;  %v3258_v37 = vpop.f32.mrb[31].mxu0 }
 0x135   : > { %v4493_v13 = vadd.f32 %v3344_v30, %v4436_v46  ;;  %v3347_v15 = vadd.f32 %v3346_v9, %v3345_v1  ;;  %v4495_v16 = vadd.f32 %v3258_v37, %v3257_v3 }
 0x136   : > { %2305 = vmatmul.mubr.bf16.gmra.mrb[136].mxu1 %v4014_v61  ;;  %3709 = vmatmul.mubr.bf16.gmra.mrb[136].mxu0 %v4015_v63 }
 0x137   : > { %v4498_v17 = vadd.f32 %v3347_v15, %v4442_v53  ;;  %2312 = vmatprep.mubr.bf16.mxu1 %v4016_v6  ;;  %3712 = vmatprep.mubr.bf16.mxu0 %v4018_v7 }
 0x139   : > { %v3348_v18 = vpop.f32.mrb[32].mxu1  ;;  %v3260_v19 = vpop.f32.mrb[32].mxu0 }
 0x13a   : > { %v3349_v62 = vpop.f32.mrb[33].mxu1  ;;  %v3261_v22 = vpop.f32.mrb[33].mxu0 }
 0x13b   : > { %v3350_v26 = vadd.f32 %v3349_v62, %v3348_v18  ;;  %v3351_v27 = vpop.f32.mrb[34].mxu1  ;;  %v3262_v46 = vadd.f32 %v3261_v22, %v3260_v19  ;;  %v3263_v5 = vpop.f32.mrb[34].mxu0 }
 0x13c   : > { %v3352_v31 = vpop.f32.mrb[35].mxu1  ;;  %v3264_v34 = vpop.f32.mrb[35].mxu0 }
 0x13d   : > { %v4503_v35 = vadd.f32 %v3350_v26, %v4446_v0  ;;  %v3353_v38 = vadd.f32 %v3352_v31, %v3351_v27  ;;  %v3265_v53 = vadd.f32 %v3264_v34, %v3263_v5 }
 0x13e   : > { %2313 = vmatmul.mubr.bf16.gmra.mrb[140].mxu1 %v4019_v24  ;;  %3713 = vmatmul.mubr.bf16.gmra.mrb[140].mxu0 %v4020_v25 }
 0x13f   : > { %v4506_v39 = vadd.f32 %v3353_v38, %v4453_v10 }
 0x141   : > { %v3354_v40 = vpop.f32.mrb[36].mxu1  ;;  %v3266_v41 = vpop.f32.mrb[36].mxu0 }
 0x142   : > { %v3355_v14 = vpop.f32.mrb[37].mxu1  ;;  %v3267_v42 = vpop.f32.mrb[37].mxu0 }
 0x143   : > { %v3356_v45 = vadd.f32 %v3355_v14, %v3354_v40  ;;  %v3357_v47 = vpop.f32.mrb[38].mxu1  ;;  %v3268_v48 = vadd.f32 %v3267_v42, %v3266_v41  ;;  %v3269_v49 = vpop.f32.mrb[38].mxu0 }
 0x144   : > { %v3358_v21 = vpop.f32.mrb[39].mxu1  ;;  %v3270_v51 = vpop.f32.mrb[39].mxu0 }
 0x145   : > { %v4509_v0 = vadd.f32 %v3356_v45, %v4460_v23  ;;  %v3359_v56 = vadd.f32 %v3358_v21, %v3357_v47  ;;  %v3271_v57 = vadd.f32 %v3270_v51, %v3269_v49 }
 0x147   : > { %v4512_v58 = vadd.f32 %v3359_v56, %v4467_v32 }
 0x149   : > { %v3360_v10 = vpop.f32.mrb[40].mxu1  ;;  %v3272_v59 = vpop.f32.mrb[40].mxu0 }
 0x14a   : > { %v3361_v61 = vpop.f32.mrb[41].mxu1  ;;  %v3273_v63 = vpop.f32.mrb[41].mxu0 }
 0x14b   : > { %v3362_v30 = vadd.f32 %v3361_v61, %v3360_v10  ;;  %v3363_v1 = vpop.f32.mrb[42].mxu1  ;;  %v4514_v3 = vadd.f32 %v3273_v63, %v3272_v59  ;;  %v3275_v6 = vpop.f32.mrb[42].mxu0 }
 0x14c   : > { %v3364_v7 = vpop.f32.mrb[43].mxu1  ;;  %v3276_v9 = vpop.f32.mrb[43].mxu0 }
 0x14d   : > { %v4517_v37 = vadd.f32 %v3362_v30, %v4474_v43  ;;  %v3365_v23 = vadd.f32 %v3364_v7, %v3363_v1  ;;  %v3277_v15 = vadd.f32 %v3276_v9, %v3275_v6 }
 0x14f   : > { %v4520_v18 = vadd.f32 %v3365_v23, %v4481_v54 }
 0x151   : > { %v3366_v32 = vpop.f32.mrb[44].mxu1  ;;  %v3278_v19 = vpop.f32.mrb[44].mxu0 }
 0x152   : > { %v3367_v62 = vpop.f32.mrb[45].mxu1  ;;  %v3279_v22 = vpop.f32.mrb[45].mxu0 }
 0x153   : > { %v3368_v24 = vadd.f32 %v3367_v62, %v3366_v32  ;;  %v3369_v25 = vpop.f32.mrb[46].mxu1  ;;  %v4522_v26 = vadd.f32 %v3279_v22, %v3278_v19  ;;  %v3281_v27 = vpop.f32.mrb[46].mxu0 }
 0x154   : > { %v3370_v5 = vpop.f32.mrb[47].mxu1  ;;  %v3282_v31 = vpop.f32.mrb[47].mxu0 }
 0x155   : > { %v4525_v34 = vadd.f32 %v3368_v24, %v4488_v2  ;;  %v3371_v43 = vadd.f32 %v3370_v5, %v3369_v25  ;;  %v4527_v38 = vadd.f32 %v3282_v31, %v3281_v27 }
 0x157   : > { %v4530_v54 = vadd.f32 %v3371_v43, %v4495_v16 }
 0x159   : > { %v3372_v40 = vpop.f32.mrb[48].mxu1  ;;  %v3436_v41 = vpop.f32.mrb[48].mxu0 }
 0x15a   : > { %v3373_v14 = vpop.f32.mrb[49].mxu1  ;;  %v3437_v42 = vpop.f32.mrb[49].mxu0 }
 0x15b   : > { %v3374_v45 = vadd.f32 %v3373_v14, %v3372_v40  ;;  %v3438_v47 = vadd.f32 %v3437_v42, %v3436_v41  ;;  %v3375_v49 = vpop.f32.mrb[50].mxu1  ;;  %v3439_v21 = vpop.f32.mrb[50].mxu0 }
 0x15c   : > { %v3376_v51 = vpop.f32.mrb[51].mxu1  ;;  %v3440_v56 = vpop.f32.mrb[51].mxu0 }
 0x15d   : > { %v4532_v10 = vadd.f32 %v3374_v45, %v3262_v46  ;;  %v4535_v2 = vadd.f32 %v3438_v47, %v4451_v8  ;;  %v3377_v59 = vadd.f32 %v3376_v51, %v3375_v49  ;;  %v3441_v61 = vadd.f32 %v3440_v56, %v3439_v21 }
 0x15f   : > { %v4537_v63 = vadd.f32 %v3377_v59, %v3265_v53  ;;  %v4540_v16 = vadd.f32 %v3441_v61, %v4456_v11 }
 0x161   : > { %v3378_v30 = vpop.f32.mrb[52].mxu1  ;;  %v3442_v1 = vpop.f32.mrb[52].mxu0 }
 0x162   : > { %v3379_v6 = vpop.f32.mrb[53].mxu1  ;;  %v3443_v7 = vpop.f32.mrb[53].mxu0 }
 0x163   : > { %v3380_v9 = vadd.f32 %v3379_v6, %v3378_v30  ;;  %v3444_v23 = vadd.f32 %v3443_v7, %v3442_v1  ;;  %v3381_v32 = vpop.f32.mrb[54].mxu1  ;;  %v3445_v19 = vpop.f32.mrb[54].mxu0 }
 0x164   : > { %v3382_v46 = vpop.f32.mrb[55].mxu1  ;;  %v3446_v62 = vpop.f32.mrb[55].mxu0 }
 0x165   : > { %v4542_v22 = vadd.f32 %v3380_v9, %v3268_v48  ;;  %v4545_v8 = vadd.f32 %v3444_v23, %v4465_v29  ;;  %v3383_v53 = vadd.f32 %v3382_v46, %v3381_v32  ;;  %v3447_v24 = vadd.f32 %v3446_v62, %v3445_v19 }
 0x167   : > { %v4547_v25 = vadd.f32 %v3383_v53, %v3271_v57  ;;  %v4550_v11 = vadd.f32 %v3447_v24, %v4470_v33 }
 0x169   : > { %v3384_v27 = vpop.f32.mrb[56].mxu1  ;;  %v3448_v5 = vpop.f32.mrb[56].mxu0 }
 0x16a   : > { %v3385_v31 = vpop.f32.mrb[57].mxu1  ;;  %v3449_v43 = vpop.f32.mrb[57].mxu0 }
 0x16b   : > { %v3386_v40 = vadd.f32 %v3385_v31, %v3384_v27  ;;  %v3450_v41 = vadd.f32 %v3449_v43, %v3448_v5  ;;  %v3387_v14 = vpop.f32.mrb[58].mxu1  ;;  %v3451_v42 = vpop.f32.mrb[58].mxu0 }
 0x16c   : > { %v3388_v48 = vpop.f32.mrb[59].mxu1  ;;  %v3452_v45 = vpop.f32.mrb[59].mxu0 }
 0x16d   : > { %v4553_v29 = vadd.f32 %v3386_v40, %v4514_v3  ;;  %v4556_v47 = vadd.f32 %v3450_v41, %v4479_v50  ;;  %v3389_v57 = vadd.f32 %v3388_v48, %v3387_v14  ;;  %v3453_v49 = vadd.f32 %v3452_v45, %v3451_v42 }
 0x16f   : > { %v4558_v33 = vadd.f32 %v3389_v57, %v3277_v15  ;;  %v4561_v21 = vadd.f32 %v3453_v49, %v4484_v55 }
 0x171   : > { %v3390_v51 = vpop.f32.mrb[60].mxu1  ;;  %v3454_v56 = vpop.f32.mrb[60].mxu0 }
 0x172   : > { %v3391_v59 = vpop.f32.mrb[61].mxu1  ;;  %v3455_v61 = vpop.f32.mrb[61].mxu0 }
 0x173   : > { %v3392_v30 = vadd.f32 %v3391_v59, %v3390_v51  ;;  %v3456_v1 = vadd.f32 %v3455_v61, %v3454_v56  ;;  %v3393_v6 = vpop.f32.mrb[62].mxu1  ;;  %v3457_v7 = vpop.f32.mrb[62].mxu0 }
 0x174   : > { %v3394_v3 = vpop.f32.mrb[63].mxu1  ;;  %v3458_v9 = vpop.f32.mrb[63].mxu0 }
 0x175   : > { %v4564_v50 = vadd.f32 %v3392_v30, %v4522_v26  ;;  %v4567_v23 = vadd.f32 %v3456_v1, %v4493_v13  ;;  %v3395_v15 = vadd.f32 %v3394_v3, %v3393_v6  ;;  %v3459_v32 = vadd.f32 %v3458_v9, %v3457_v7 }
 0x177   : > { %v4570_v55 = vadd.f32 %v3395_v15, %v4527_v38  ;;  %v4573_v19 = vadd.f32 %v3459_v32, %v4498_v17 }
 0x179   : > { %v3396_v46 = vpop.f32.mrb[64].mxu1  ;;  %v3460_v62 = vpop.f32.mrb[64].mxu0 }
 0x17a   : > { %v3397_v53 = vpop.f32.mrb[65].mxu1  ;;  %v3461_v24 = vpop.f32.mrb[65].mxu0 }
 0x17b   : > { %v3398_v27 = vadd.f32 %v3397_v53, %v3396_v46  ;;  %v3462_v5 = vadd.f32 %v3461_v24, %v3460_v62  ;;  %v3399_v31 = vpop.f32.mrb[66].mxu1  ;;  %v3463_v26 = vpop.f32.mrb[66].mxu0 }
 0x17c   : > { %v3400_v43 = vpop.f32.mrb[67].mxu1  ;;  %v3464_v40 = vpop.f32.mrb[67].mxu0 }
 0x17d   : > { %v4576_v13 = vadd.f32 %v3398_v27, %v4398_v60  ;;  %v4579_v41 = vadd.f32 %v3462_v5, %v4503_v35  ;;  %v3401_v38 = vadd.f32 %v3400_v43, %v3399_v31  ;;  %v3465_v14 = vadd.f32 %v3464_v40, %v3463_v26 }
 0x17f   : > { %v4582_v17 = vadd.f32 %v3401_v38, %v4404_v4  ;;  %v4585_v42 = vadd.f32 %v3465_v14, %v4506_v39 }
 0x181   : > { %v3402_v48 = vpop.f32.mrb[68].mxu1  ;;  %v3466_v45 = vpop.f32.mrb[68].mxu0 }
 0x182   : > { %v3403_v57 = vpop.f32.mrb[69].mxu1  ;;  %v3467_v49 = vpop.f32.mrb[69].mxu0 }
 0x183   : > { %v3404_v51 = vadd.f32 %v3403_v57, %v3402_v48  ;;  %v3468_v56 = vadd.f32 %v3467_v49, %v3466_v45  ;;  %v3405_v59 = vpop.f32.mrb[70].mxu1  ;;  %v3469_v60 = vpop.f32.mrb[70].mxu0 }
 0x184   : > { %v3406_v61 = vpop.f32.mrb[71].mxu1  ;;  %v3470_v30 = vpop.f32.mrb[71].mxu0 }
 0x185   : > { %v4588_v35 = vadd.f32 %v3404_v51, %v4410_v12  ;;  %v4591_v1 = vadd.f32 %v3468_v56, %v4509_v0  ;;  %v3407_v4 = vadd.f32 %v3406_v61, %v3405_v59  ;;  %v3471_v6 = vadd.f32 %v3470_v30, %v3469_v60 }
 0x187   : > { %v4594_v39 = vadd.f32 %v3407_v4, %v4416_v20  ;;  %v4597_v7 = vadd.f32 %v3471_v6, %v4512_v58 }
 0x189   : > { %v3408_v3 = vpop.f32.mrb[72].mxu1  ;;  %v3472_v9 = vpop.f32.mrb[72].mxu0 }
 0x18a   : > { %v3409_v15 = vpop.f32.mrb[73].mxu1  ;;  %v3473_v32 = vpop.f32.mrb[73].mxu0 }
 0x18b   : > { %v3410_v46 = vadd.f32 %v3409_v15, %v3408_v3  ;;  %v3474_v62 = vadd.f32 %v3473_v32, %v3472_v9  ;;  %v3411_v53 = vpop.f32.mrb[74].mxu1  ;;  %v3475_v12 = vpop.f32.mrb[74].mxu0 }
 0x18c   : > { %v3412_v24 = vpop.f32.mrb[75].mxu1  ;;  %v3476_v27 = vpop.f32.mrb[75].mxu0 }
 0x18d   : > { %v4600_v0 = vadd.f32 %v3410_v46, %v4422_v28  ;;  %v4603_v5 = vadd.f32 %v3474_v62, %v4517_v37  ;;  %v3413_v20 = vadd.f32 %v3412_v24, %v3411_v53  ;;  %v3477_v31 = vadd.f32 %v3476_v27, %v3475_v12 }
 0x18f   : > { %v4606_v58 = vadd.f32 %v3413_v20, %v4428_v36  ;;  %v4609_v26 = vadd.f32 %v3477_v31, %v4520_v18 }
 0x191   : > { %v3414_v43 = vpop.f32.mrb[76].mxu1  ;;  %v3478_v40 = vpop.f32.mrb[76].mxu0 }
 0x192   : > { %v3415_v38 = vpop.f32.mrb[77].mxu1  ;;  %v3479_v14 = vpop.f32.mrb[77].mxu0 }
 0x193   : > { %v3416_v48 = vadd.f32 %v3415_v38, %v3414_v43  ;;  %v3480_v45 = vadd.f32 %v3479_v14, %v3478_v40  ;;  %v3417_v57 = vpop.f32.mrb[78].mxu1  ;;  %v3481_v28 = vpop.f32.mrb[78].mxu0 }
 0x194   : > { %v3418_v49 = vpop.f32.mrb[79].mxu1  ;;  %v3482_v51 = vpop.f32.mrb[79].mxu0 }
 0x195   : > { %v4612_v37 = vadd.f32 %v3416_v48, %v4434_v44  ;;  %v4615_v56 = vadd.f32 %v3480_v45, %v4525_v34  ;;  %v3419_v36 = vadd.f32 %v3418_v49, %v3417_v57  ;;  %v3483_v59 = vadd.f32 %v3482_v51, %v3481_v28 }
 0x197   : > { %v4618_v18 = vadd.f32 %v3419_v36, %v4440_v52  ;;  %v4621_v60 = vadd.f32 %v3483_v59, %v4530_v54 }
 0x199   : > { %v3484_v61 = vpop.f32.mrb[80].mxu0  ;;  %v3548_v30 = vpop.f32.mrb[80].mxu1 }
 0x19a   : > { %v3485_v4 = vpop.f32.mrb[81].mxu0  ;;  %v3549_v6 = vpop.f32.mrb[81].mxu1 }
 0x19b   : > { %v3486_v3 = vadd.f32 %v3485_v4, %v3484_v61  ;;  %v3550_v9 = vadd.f32 %v3549_v6, %v3548_v30  ;;  %v3487_v15 = vpop.f32.mrb[82].mxu0  ;;  %v3551_v44 = vpop.f32.mrb[82].mxu1 }
 0x19c   : > { %v3488_v32 = vpop.f32.mrb[83].mxu0  ;;  %v3552_v46 = vpop.f32.mrb[83].mxu1 }
 0x19d   : > { %v4624_v34 = vadd.f32 %v3486_v3, %v4532_v10  ;;  %v3489_v62 = vadd.f32 %v3488_v32, %v3487_v15  ;;  %v3553_v53 = vadd.f32 %v3552_v46, %v3551_v44  ;;  %v4627_v52 = vadd.f32 %v3550_v9, %v4535_v2 }
 0x19f   : > { %v4630_v54 = vadd.f32 %v3489_v62, %v4537_v63  ;;  %v4633_v12 = vadd.f32 %v3553_v53, %v4540_v16 }
 0x1a1   : > { %v3490_v24 = vpop.f32.mrb[84].mxu0  ;;  %v3554_v27 = vpop.f32.mrb[84].mxu1 }
 0x1a2   : > { %v3491_v20 = vpop.f32.mrb[85].mxu0  ;;  %v3555_v31 = vpop.f32.mrb[85].mxu1 }
 0x1a3   : > { %v3492_v43 = vadd.f32 %v3491_v20, %v3490_v24  ;;  %v3556_v40 = vadd.f32 %v3555_v31, %v3554_v27  ;;  %v3493_v38 = vpop.f32.mrb[86].mxu0  ;;  %v3557_v10 = vpop.f32.mrb[86].mxu1 }
 0x1a4   : > { %v3494_v14 = vpop.f32.mrb[87].mxu0  ;;  %v3558_v48 = vpop.f32.mrb[87].mxu1 }
 0x1a5   : > { %v4636_v45 = vadd.f32 %v3492_v43, %v4542_v22  ;;  %v3495_v2 = vadd.f32 %v3494_v14, %v3493_v38  ;;  %v3559_v57 = vadd.f32 %v3558_v48, %v3557_v10  ;;  %v4639_v63 = vadd.f32 %v3556_v40, %v4545_v8 }
 0x1a7   : > { %v4642_v16 = vadd.f32 %v3495_v2, %v4547_v25  ;;  %v4645_v28 = vadd.f32 %v3559_v57, %v4550_v11 }
 0x1a9   : > { %v3496_v49 = vpop.f32.mrb[88].mxu0  ;;  %v3560_v51 = vpop.f32.mrb[88].mxu1 }
 0x1aa   : > { %v3497_v36 = vpop.f32.mrb[89].mxu0  ;;  %v3561_v59 = vpop.f32.mrb[89].mxu1 }
 0x1ab   : > { %v3498_v61 = vadd.f32 %v3497_v36, %v3496_v49  ;;  %v3562_v30 = vadd.f32 %v3561_v59, %v3560_v51  ;;  %v3499_v4 = vpop.f32.mrb[90].mxu0  ;;  %v3563_v22 = vpop.f32.mrb[90].mxu1 }
 0x1ac   : > { %v3500_v6 = vpop.f32.mrb[91].mxu0  ;;  %v3564_v3 = vpop.f32.mrb[91].mxu1 }
 0x1ad   : > { %v4648_v9 = vadd.f32 %v3498_v61, %v4553_v29  ;;  %v3501_v8 = vadd.f32 %v3500_v6, %v3499_v4  ;;  %v3565_v15 = vadd.f32 %v3564_v3, %v3563_v22  ;;  %v4651_v25 = vadd.f32 %v3562_v30, %v4556_v47 }
 0x1af   : > { %v4654_v11 = vadd.f32 %v3501_v8, %v4558_v33  ;;  %v4657_v44 = vadd.f32 %v3565_v15, %v4561_v21 }
 0x1b1   : > { %v3502_v32 = vpop.f32.mrb[92].mxu0  ;;  %v3566_v46 = vpop.f32.mrb[92].mxu1 }
 0x1b2   : > { %v3503_v62 = vpop.f32.mrb[93].mxu0  ;;  %v3567_v53 = vpop.f32.mrb[93].mxu1 }
 0x1b3   : > { %v3504_v24 = vadd.f32 %v3503_v62, %v3502_v32  ;;  %v3568_v27 = vadd.f32 %v3567_v53, %v3566_v46  ;;  %v3505_v20 = vpop.f32.mrb[94].mxu0  ;;  %v3569_v29 = vpop.f32.mrb[94].mxu1 }
 0x1b4   : > { %v3506_v31 = vpop.f32.mrb[95].mxu0  ;;  %v3570_v43 = vpop.f32.mrb[95].mxu1 }
 0x1b5   : > { %v4660_v40 = vadd.f32 %v3504_v24, %v4564_v50  ;;  %v3507_v47 = vadd.f32 %v3506_v31, %v3505_v20  ;;  %v3571_v38 = vadd.f32 %v3570_v43, %v3569_v29  ;;  %v4663_v33 = vadd.f32 %v3568_v27, %v4567_v23 }
 0x1b7   : > { %v4666_v21 = vadd.f32 %v3507_v47, %v4570_v55  ;;  %v4669_v10 = vadd.f32 %v3571_v38, %v4573_v19 }
 0x1b9   : > { %v3508_v14 = vpop.f32.mrb[96].mxu0  ;;  %v3572_v48 = vpop.f32.mrb[96].mxu1 }
 0x1ba   : > { %v3509_v2 = vpop.f32.mrb[97].mxu0  ;;  %v3573_v57 = vpop.f32.mrb[97].mxu1 }
 0x1bb   : > { %v3510_v49 = vadd.f32 %v3509_v2, %v3508_v14  ;;  %v3574_v51 = vadd.f32 %v3573_v57, %v3572_v48  ;;  %v3511_v36 = vpop.f32.mrb[98].mxu0  ;;  %v3575_v50 = vpop.f32.mrb[98].mxu1 }
 0x1bc   : > { %v3512_v59 = vpop.f32.mrb[99].mxu0  ;;  %v3576_v61 = vpop.f32.mrb[99].mxu1 }
 0x1bd   : > { %v4672_v30 = vadd.f32 %v3510_v49, %v4576_v13  ;;  %v3513_v23 = vadd.f32 %v3512_v59, %v3511_v36  ;;  %v3577_v4 = vadd.f32 %v3576_v61, %v3575_v50  ;;  %v4675_v55 = vadd.f32 %v3574_v51, %v4579_v41 }
 0x1bf   : > { %v4678_v19 = vadd.f32 %v3513_v23, %v4582_v17  ;;  %v4681_v22 = vadd.f32 %v3577_v4, %v4585_v42 }
 0x1c1   : > { %v3514_v6 = vpop.f32.mrb[100].mxu0  ;;  %v3578_v3 = vpop.f32.mrb[100].mxu1 }
 0x1c2   : > { %v3515_v8 = vpop.f32.mrb[101].mxu0  ;;  %v3579_v15 = vpop.f32.mrb[101].mxu1 }
 0x1c3   : > { %v3516_v32 = vadd.f32 %v3515_v8, %v3514_v6  ;;  %v3580_v46 = vadd.f32 %v3579_v15, %v3578_v3  ;;  %v3517_v62 = vpop.f32.mrb[102].mxu0  ;;  %v3581_v13 = vpop.f32.mrb[102].mxu1 }
 0x1c4   : > { %v3518_v53 = vpop.f32.mrb[103].mxu0  ;;  %v3582_v24 = vpop.f32.mrb[103].mxu1 }
 0x1c5   : > { %v4684_v27 = vadd.f32 %v3516_v32, %v4588_v35  ;;  %v3519_v41 = vadd.f32 %v3518_v53, %v3517_v62  ;;  %v3583_v20 = vadd.f32 %v3582_v24, %v3581_v13  ;;  %v4687_v17 = vadd.f32 %v3580_v46, %v4591_v1 }
 0x1c7   : > { %v4690_v42 = vadd.f32 %v3519_v41, %v4594_v39  ;;  %v4693_v29 = vadd.f32 %v3583_v20, %v4597_v7  ;;  %v4722_v41 = vld [vmem:[%s4870_s2] ss:$0 sm:$0xff] }
 0x1c9   : > { %v3520_v31 = vpop.f32.mrb[104].mxu0  ;;  %v3584_v43 = vpop.f32.mrb[104].mxu1 }
 0x1ca   : > { %v3521_v47 = vpop.f32.mrb[105].mxu0  ;;  %v3585_v38 = vpop.f32.mrb[105].mxu1 }
 0x1cb   : > { %v3522_v14 = vadd.f32 %v3521_v47, %v3520_v31  ;;  %v3586_v48 = vadd.f32 %v3585_v38, %v3584_v43  ;;  %v3523_v2 = vpop.f32.mrb[106].mxu0  ;;  %v3587_v35 = vpop.f32.mrb[106].mxu1 }
 0x1cc   : > { %v3524_v57 = vpop.f32.mrb[107].mxu0  ;;  %v3588_v49 = vpop.f32.mrb[107].mxu1 }
 0x1cd   : > { %v4696_v51 = vadd.f32 %v3522_v14, %v4600_v0  ;;  %v3525_v1 = vadd.f32 %v3524_v57, %v3523_v2  ;;  %v3589_v36 = vadd.f32 %v3588_v49, %v3587_v35  ;;  %v4699_v39 = vadd.f32 %v3586_v48, %v4603_v5 }
 0x1cf   : > { %v4702_v7 = vadd.f32 %v3525_v1, %v4606_v58  ;;  %v4705_v50 = vadd.f32 %v3589_v36, %v4609_v26 }
 0x1d1   : > { %v3526_v59 = vpop.f32.mrb[108].mxu0  ;;  %v3590_v61 = vpop.f32.mrb[108].mxu1 }
 0x1d2   : > { %v3527_v23 = vpop.f32.mrb[109].mxu0  ;;  %v3591_v4 = vpop.f32.mrb[109].mxu1 }
 0x1d3   : > { %v3528_v6 = vadd.f32 %v3527_v23, %v3526_v59  ;;  %v3592_v3 = vadd.f32 %v3591_v4, %v3590_v61  ;;  %v3529_v8 = vpop.f32.mrb[110].mxu0  ;;  %v3593_v0 = vpop.f32.mrb[110].mxu1 }
 0x1d4   : > { %v3530_v15 = vpop.f32.mrb[111].mxu0  ;;  %v3594_v32 = vpop.f32.mrb[111].mxu1 }
 0x1d5   : > { %v4708_v46 = vadd.f32 %v3528_v6, %v4612_v37  ;;  %v3531_v5 = vadd.f32 %v3530_v15, %v3529_v8  ;;  %v3595_v62 = vadd.f32 %v3594_v32, %v3593_v0  ;;  %v4711_v58 = vadd.f32 %v3592_v3, %v4615_v56  ;;  %v4728_v56 = vld [vmem:[%s4871_s3] ss:$0 sm:$0xff] }
 0x1d7   : > { %v4714_v26 = vadd.f32 %v3531_v5, %v4618_v18  ;;  %v4717_v13 = vadd.f32 %v3595_v62, %v4621_v60 }
 0x1d9   : > { %v3596_v53 = vpop.f32.mrb[112].mxu1  ;;  %v3686_v24 = vpop.f32.mrb[112].mxu0 }
 0x1da   : > { %v2364_v37 = vadd.f32 %v3686_v24, %v4639_v63  ;;  %v3597_v20 = vpop.f32.mrb[113].mxu1  ;;  %v2355_v31 = vpop.f32.mrb[113].mxu0 }
 0x1db   : > { %v3598_v18 = vadd.f32 %v3597_v20, %v3596_v53  ;;  %v2356_v60 = vadd.f32 %v2355_v31, %v4627_v52  ;;  %v3599_v43 = vpop.f32.mrb[114].mxu1  ;;  %v3687_v47 = vpop.f32.mrb[114].mxu0 }
 0x1dc   : > { %v2491_v38 = vmul.f32 %v4722_v41, %v2364_v37  ;;  %v2367_v14 = vadd.f32 %v3687_v47, %v4645_v28  ;;  %v3600_v48 = vpop.f32.mrb[115].mxu1  ;;  %v2358_v2 = vpop.f32.mrb[115].mxu0 }
 0x1dd   : > { %v2489_v63 = vmul.f32 %v4722_v41, %v2356_v60  ;;  %v3601_v35 = vadd.f32 %v3600_v48, %v3599_v43  ;;  %v2359_v57 = vadd.f32 %v2358_v2, %v4633_v12  ;;  %v4736_v49 = vadd.f32 %v3598_v18, %v4624_v34 }
 0x1de   : > { %v2530_v1 = vadd.f32 %v4728_v56, %v2491_v38  ;;  %v2492_v52 = vmul.f32 %v4722_v41, %v2367_v14 }
 0x1df   : > { %v2528_v36 = vadd.f32 %v4728_v56, %v2489_v63  ;;  %v2490_v59 = vmul.f32 %v4722_v41, %v2359_v57  ;;  %v4743_v28 = vadd.f32 %v3601_v35, %v4630_v54 }
 0x1e0   : > { %v2531_v61 = vadd.f32 %v4728_v56, %v2492_v52  ;;  %v2562_v34 = vmax.f32 %v2530_v1, 0.0 }
 0x1e1   : > { %v2529_v23 = vadd.f32 %v4728_v56, %v2490_v59  ;;  %v3602_v12 = vpop.f32.mrb[116].mxu1  ;;  %v3690_v4 = vpop.f32.mrb[116].mxu0  ;;  %v2560_v15 = vmax.f32 %v2528_v36, 0.0 }
 0x1e2   : > { %v2563_v6 = vmax.f32 %v2531_v61, 0.0  ;;  %v2380_v3 = vadd.f32 %v3690_v4, %v4663_v33  ;;  %v3603_v8 = vpop.f32.mrb[117].mxu1  ;;  %v2371_v0 = vpop.f32.mrb[117].mxu0 }
 0x1e3   : > { %v2561_v54 = vmax.f32 %v2529_v23, 0.0  ;;  %v3604_v32 = vadd.f32 %v3603_v8, %v3602_v12  ;;  %v2372_v5 = vadd.f32 %v2371_v0, %v4651_v25  ;;  %v3605_v62 = vpop.f32.mrb[118].mxu1  ;;  %v3691_v53 = vpop.f32.mrb[118].mxu0 }
 0x1e4   : > { %v3109_v24 = vpack.c.bf16 %v2563_v6, %v2562_v34  ;;  %v2495_v37 = vmul.f32 %v4722_v41, %v2380_v3  ;;  %v2383_v33 = vadd.f32 %v3691_v53, %v4669_v10  ;;  %v3606_v20 = vpop.f32.mrb[119].mxu1  ;;  %v2374_v31 = vpop.f32.mrb[119].mxu0 }
 0x1e5   : > { %v3104_v18 = vpack.c.bf16 %v2561_v54, %v2560_v15  ;;  %v2493_v60 = vmul.f32 %v4722_v41, %v2372_v5  ;;  %v3607_v43 = vadd.f32 %v3606_v20, %v3605_v62  ;;  %v2375_v47 = vadd.f32 %v2374_v31, %v4657_v44 }
 0x1e6   : > { %3181 = vst [vmem:[%s4752_s7 + $0x8] sm:$0xff] %v3109_v24   ;;  %v2534_v38 = vadd.f32 %v4728_v56, %v2495_v37  ;;  %v2496_v25 = vmul.f32 %v4722_v41, %v2383_v33  ;;  %v4763_v14 = vadd.f32 %v3604_v32, %v4636_v45 }
 0x1e7   : > { %3105 = vst [vmem:[%s4752_s7] sm:$0xff] %v3104_v18   ;;  %v2532_v48 = vadd.f32 %v4728_v56, %v2493_v60  ;;  %v2494_v10 = vmul.f32 %v4722_v41, %v2375_v47  ;;  %v4769_v2 = vadd.f32 %v3607_v43, %v4642_v16 }
 0x1e8   : > { %v2535_v63 = vadd.f32 %v4728_v56, %v2496_v25  ;;  %v2566_v1 = vmax.f32 %v2534_v38, 0.0 }
 0x1e9   : > { %v2533_v44 = vadd.f32 %v4728_v56, %v2494_v10  ;;  %v3608_v35 = vpop.f32.mrb[120].mxu1  ;;  %v3694_v57 = vpop.f32.mrb[120].mxu0  ;;  %v2564_v61 = vmax.f32 %v2532_v48, 0.0 }
 0x1ea   : > { %v2567_v52 = vmax.f32 %v2535_v63, 0.0  ;;  %v2396_v36 = vadd.f32 %v3694_v57, %v4687_v17  ;;  %v3609_v45 = vpop.f32.mrb[121].mxu1  ;;  %v2387_v59 = vpop.f32.mrb[121].mxu0 }
 0x1eb   : > { %v2565_v23 = vmax.f32 %v2533_v44, 0.0  ;;  %v3610_v12 = vadd.f32 %v3609_v45, %v3608_v35  ;;  %v2388_v4 = vadd.f32 %v2387_v59, %v4675_v55  ;;  %v3611_v16 = vpop.f32.mrb[122].mxu1  ;;  %v3695_v34 = vpop.f32.mrb[122].mxu0 }
 0x1ec   : > { %v3119_v6 = vpack.c.bf16 %v2567_v52, %v2566_v1  ;;  %v2499_v3 = vmul.f32 %v4722_v41, %v2396_v36  ;;  %v2399_v8 = vadd.f32 %v3695_v34, %v4693_v29  ;;  %v3612_v0 = vpop.f32.mrb[123].mxu1  ;;  %v2390_v15 = vpop.f32.mrb[123].mxu0 }
 0x1ed   : > { %v3114_v54 = vpack.c.bf16 %v2565_v23, %v2564_v61  ;;  %v2497_v17 = vmul.f32 %v4722_v41, %v2388_v4  ;;  %v3613_v32 = vadd.f32 %v3612_v0, %v3611_v16  ;;  %v2391_v5 = vadd.f32 %v2390_v15, %v4681_v22 }
 0x1ee   : > { %3183 = vst [vmem:[%s4752_s7 + $0x18] sm:$0xff] %v3119_v6   ;;  %v2538_v62 = vadd.f32 %v4728_v56, %v2499_v3  ;;  %v2500_v55 = vmul.f32 %v4722_v41, %v2399_v8  ;;  %v4783_v53 = vadd.f32 %v3610_v12, %v4648_v9 }
 0x1ef   : > { %3182 = vst [vmem:[%s4752_s7 + $0x10] sm:$0xff] %v3114_v54   ;;  %v2536_v24 = vadd.f32 %v4728_v56, %v2497_v17  ;;  %v2498_v29 = vmul.f32 %v4722_v41, %v2391_v5  ;;  %v4789_v37 = vadd.f32 %v3613_v32, %v4654_v11 }
 0x1f0   : > { %v2539_v33 = vadd.f32 %v4728_v56, %v2500_v55  ;;  %v2570_v18 = vmax.f32 %v2538_v62, 0.0 }
 0x1f1   : > { %v2537_v22 = vadd.f32 %v4728_v56, %v2498_v29  ;;  %v3614_v20 = vpop.f32.mrb[124].mxu1  ;;  %v3698_v31 = vpop.f32.mrb[124].mxu0  ;;  %v2568_v38 = vmax.f32 %v2536_v24, 0.0 }
 0x1f2   : > { %v2571_v60 = vmax.f32 %v2539_v33, 0.0  ;;  %v2412_v43 = vadd.f32 %v3698_v31, %v4711_v58  ;;  %v3615_v9 = vpop.f32.mrb[125].mxu1  ;;  %v2403_v47 = vpop.f32.mrb[125].mxu0 }
 0x1f3   : > { %v2569_v25 = vmax.f32 %v2537_v22, 0.0  ;;  %v3616_v48 = vadd.f32 %v3615_v9, %v3614_v20  ;;  %v2404_v10 = vadd.f32 %v2403_v47, %v4699_v39  ;;  %v3617_v11 = vpop.f32.mrb[126].mxu1  ;;  %v3699_v63 = vpop.f32.mrb[126].mxu0 }
 0x1f4   : > { %v3129_v44 = vpack.c.bf16 %v2571_v60, %v2570_v18  ;;  %v2503_v35 = vmul.f32 %v4722_v41, %v2412_v43  ;;  %v2415_v57 = vadd.f32 %v3699_v63, %v4717_v13  ;;  %v3618_v1 = vpop.f32.mrb[127].mxu1  ;;  %v2406_v52 = vpop.f32.mrb[127].mxu0 }
 0x1f5   : > { %v3124_v36 = vpack.c.bf16 %v2569_v25, %v2568_v38  ;;  %v2501_v58 = vmul.f32 %v4722_v41, %v2404_v10  ;;  %v3619_v45 = vadd.f32 %v3618_v1, %v3617_v11  ;;  %v2407_v59 = vadd.f32 %v2406_v52, %v4705_v50 }
 0x1f6   : > { %3185 = vst [vmem:[%s4752_s7 + $0x28] sm:$0xff] %v3129_v44   ;;  %v2542_v61 = vadd.f32 %v4728_v56, %v2503_v35  ;;  %v2504_v39 = vmul.f32 %v4722_v41, %v2415_v57  ;;  %v2283_v23 = vadd.f32 %v3616_v48, %v4660_v40 }
 0x1f7   : > { %3184 = vst [vmem:[%s4752_s7 + $0x20] sm:$0xff] %v3124_v36   ;;  %v2540_v12 = vadd.f32 %v4728_v56, %v2501_v58  ;;  %v2502_v13 = vmul.f32 %v4722_v41, %v2407_v59  ;;  %v2286_v4 = vadd.f32 %v3619_v45, %v4666_v21 }
 0x1f8   : > { %v2543_v16 = vadd.f32 %v4728_v56, %v2504_v39  ;;  %v2574_v3 = vmax.f32 %v2542_v61, 0.0 }
 0x1f9   : > { %v2541_v34 = vadd.f32 %v4728_v56, %v2502_v13  ;;  %v3620_v6 = vpop.f32.mrb[128].mxu1  ;;  %v3702_v50 = vpop.f32.mrb[128].mxu0  ;;  %v2572_v40 = vmax.f32 %v2540_v12, 0.0 }
 0x1fa   : > { %v2575_v8 = vmax.f32 %v2543_v16, 0.0  ;;  %v2428_v0 = vadd.f32 %v3702_v50, %v4763_v14  ;;  %v3621_v15 = vpop.f32.mrb[129].mxu1  ;;  %v2419_v54 = vpop.f32.mrb[129].mxu0 }
 0x1fb   : > { %v2573_v17 = vmax.f32 %v2541_v34, 0.0  ;;  %v3622_v32 = vadd.f32 %v3621_v15, %v3620_v6  ;;  %v2420_v5 = vadd.f32 %v2419_v54, %v4736_v49  ;;  %v3623_v21 = vpop.f32.mrb[130].mxu1  ;;  %v3703_v62 = vpop.f32.mrb[130].mxu0 }
 0x1fc   : > { %v3139_v55 = vpack.c.bf16 %v2575_v8, %v2574_v3  ;;  %v2507_v24 = vmul.f32 %v4722_v41, %v2428_v0  ;;  %v2431_v29 = vadd.f32 %v3703_v62, %v4769_v2  ;;  %v3624_v33 = vpop.f32.mrb[131].mxu1  ;;  %v2422_v22 = vpop.f32.mrb[131].mxu0 }
 0x1fd   : > { %v3134_v20 = vpack.c.bf16 %v2573_v17, %v2572_v40  ;;  %v2505_v14 = vmul.f32 %v4722_v41, %v2420_v5  ;;  %v3625_v31 = vadd.f32 %v3624_v33, %v3623_v21  ;;  %v2423_v18 = vadd.f32 %v2422_v22, %v4743_v28 }
 0x1fe   : > { %3187 = vst [vmem:[%s4752_s7 + $0x38] sm:$0xff] %v3139_v55   ;;  %v2546_v60 = vadd.f32 %v4728_v56, %v2507_v24  ;;  %v2508_v49 = vmul.f32 %v4722_v41, %v2431_v29  ;;  %v2291_v43 = vadd.f32 %v3622_v32, %v4672_v30 }
 0x1ff   : > { %3186 = vst [vmem:[%s4752_s7 + $0x30] sm:$0xff] %v3134_v20   ;;  %v2544_v9 = vadd.f32 %v4728_v56, %v2505_v14  ;;  %v2506_v2 = vmul.f32 %v4722_v41, %v2423_v18  ;;  %v2294_v47 = vadd.f32 %v3625_v31, %v4678_v19 }
 0x200   : > { %v2547_v38 = vadd.f32 %v4728_v56, %v2508_v49  ;;  %v2578_v10 = vmax.f32 %v2546_v60, 0.0 }
 0x201   : > { %v2545_v25 = vadd.f32 %v4728_v56, %v2506_v2  ;;  %v3626_v48 = vpop.f32.mrb[132].mxu1  ;;  %v3706_v28 = vpop.f32.mrb[132].mxu0  ;;  %v2576_v30 = vmax.f32 %v2544_v9, 0.0 }
 0x202   : > { %v2579_v11 = vmax.f32 %v2547_v38, 0.0  ;;  %v2444_v63 = vadd.f32 %v3706_v28, %v2283_v23  ;;  %v3627_v44 = vpop.f32.mrb[133].mxu1  ;;  %v2435_v35 = vpop.f32.mrb[133].mxu0 }
 0x203   : > { %v2577_v57 = vmax.f32 %v2545_v25, 0.0  ;;  %v3628_v1 = vadd.f32 %v3627_v44, %v3626_v48  ;;  %v2436_v52 = vadd.f32 %v2435_v35, %v4783_v53  ;;  %v3629_v36 = vpop.f32.mrb[134].mxu1  ;;  %v3707_v19 = vpop.f32.mrb[134].mxu0 }
 0x204   : > { %v3149_v58 = vpack.c.bf16 %v2579_v11, %v2578_v10  ;;  %v2511_v45 = vmul.f32 %v4722_v41, %v2444_v63  ;;  %v2447_v59 = vadd.f32 %v3707_v19, %v2286_v4  ;;  %v3630_v61 = vpop.f32.mrb[135].mxu1  ;;  %v2438_v39 = vpop.f32.mrb[135].mxu0 }
 0x205   : > { %v3144_v12 = vpack.c.bf16 %v2577_v57, %v2576_v30  ;;  %v2509_v23 = vmul.f32 %v4722_v41, %v2436_v52  ;;  %v3631_v13 = vadd.f32 %v3630_v61, %v3629_v36  ;;  %v2439_v16 = vadd.f32 %v2438_v39, %v4789_v37 }
 0x206   : > { %3189 = vst [vmem:[%s4752_s7 + $0x48] sm:$0xff] %v3149_v58   ;;  %v2550_v34 = vadd.f32 %v4728_v56, %v2511_v45  ;;  %v2512_v53 = vmul.f32 %v4722_v41, %v2447_v59  ;;  %v2299_v6 = vadd.f32 %v3628_v1, %v4684_v27 }
 0x207   : > { %3188 = vst [vmem:[%s4752_s7 + $0x40] sm:$0xff] %v3144_v12   ;;  %v2548_v50 = vadd.f32 %v4728_v56, %v2509_v23  ;;  %v2510_v4 = vmul.f32 %v4722_v41, %v2439_v16  ;;  %v2302_v3 = vadd.f32 %v3631_v13, %v4690_v42 }
 0x208   : > { %v2551_v8 = vadd.f32 %v4728_v56, %v2512_v53  ;;  %v2582_v54 = vmax.f32 %v2550_v34, 0.0 }
 0x209   : > { %v2549_v0 = vadd.f32 %v4728_v56, %v2510_v4  ;;  %v3632_v15 = vpop.f32.mrb[136].mxu1  ;;  %v3710_v37 = vpop.f32.mrb[136].mxu0  ;;  %v2580_v27 = vmax.f32 %v2548_v50, 0.0 }
 0x20a   : > { %v2583_v40 = vmax.f32 %v2551_v8, 0.0  ;;  %v2460_v17 = vadd.f32 %v3710_v37, %v2299_v6  ;;  %v3633_v32 = vpop.f32.mrb[137].mxu1  ;;  %v2451_v5 = vpop.f32.mrb[137].mxu0 }
 0x20b   : > { %v2581_v21 = vmax.f32 %v2549_v0, 0.0  ;;  %v3634_v62 = vadd.f32 %v3633_v32, %v3632_v15  ;;  %v2452_v55 = vadd.f32 %v2451_v5, %v2291_v43  ;;  %v3635_v24 = vpop.f32.mrb[138].mxu1  ;;  %v3711_v29 = vpop.f32.mrb[138].mxu0 }
 0x20c   : > { %v3159_v42 = vpack.c.bf16 %v2583_v40, %v2582_v54  ;;  %v2515_v33 = vmul.f32 %v4722_v41, %v2460_v17  ;;  %v2463_v22 = vadd.f32 %v3711_v29, %v2302_v3  ;;  %v3636_v20 = vpop.f32.mrb[139].mxu1  ;;  %v2454_v14 = vpop.f32.mrb[139].mxu0 }
 0x20d   : > { %v3154_v31 = vpack.c.bf16 %v2581_v21, %v2580_v27  ;;  %v2513_v18 = vmul.f32 %v4722_v41, %v2452_v55  ;;  %v3637_v60 = vadd.f32 %v3636_v20, %v3635_v24  ;;  %v2455_v49 = vadd.f32 %v2454_v14, %v2294_v47 }
 0x20e   : > { %3191 = vst [vmem:[%s4752_s7 + $0x58] sm:$0xff] %v3159_v42   ;;  %v2554_v9 = vadd.f32 %v4728_v56, %v2515_v33  ;;  %v2516_v2 = vmul.f32 %v4722_v41, %v2463_v22  ;;  %v2307_v43 = vadd.f32 %v3634_v62, %v4696_v51 }
 0x20f   : > { %3190 = vst [vmem:[%s4752_s7 + $0x50] sm:$0xff] %v3154_v31   ;;  %v2552_v38 = vadd.f32 %v4728_v56, %v2513_v18  ;;  %v2514_v25 = vmul.f32 %v4722_v41, %v2455_v49  ;;  %v2310_v48 = vadd.f32 %v3637_v60, %v4702_v7 }
 0x210   : > { %v2555_v28 = vadd.f32 %v4728_v56, %v2516_v2  ;;  %v2586_v63 = vmax.f32 %v2554_v9, 0.0 }
 0x211   : > { %v2553_v10 = vadd.f32 %v4728_v56, %v2514_v25  ;;  %v3638_v11 = vpop.f32.mrb[140].mxu1  ;;  %v3714_v47 = vpop.f32.mrb[140].mxu0  ;;  %v2584_v51 = vmax.f32 %v2552_v38, 0.0 }
 0x212   : > { %v2587_v44 = vmax.f32 %v2555_v28, 0.0  ;;  %v3639_v35 = vpop.f32.mrb[141].mxu1  ;;  %v2467_v30 = vpop.f32.mrb[141].mxu0 }
 0x213   : > { %v2585_v57 = vmax.f32 %v2553_v10, 0.0  ;;  %v3640_v1 = vadd.f32 %v3639_v35, %v3638_v11  ;;  %v2468_v52 = vadd.f32 %v2467_v30, %v2307_v43  ;;  %v3641_v36 = vpop.f32.mrb[142].mxu1  ;;  %v3715_v19 = vpop.f32.mrb[142].mxu0 }
 0x214   : > { %v3169_v58 = vpack.c.bf16 %v2587_v44, %v2586_v63  ;;  %v3642_v7 = vpop.f32.mrb[143].mxu1  ;;  %v2470_v45 = vpop.f32.mrb[143].mxu0 }
 0x215   : > { %v3164_v59 = vpack.c.bf16 %v2585_v57, %v2584_v51  ;;  %v2315_v61 = vadd.f32 %v3640_v1, %v4708_v46  ;;  %v2517_v39 = vmul.f32 %v4722_v41, %v2468_v52  ;;  %v3643_v12 = vadd.f32 %v3642_v7, %v3641_v36 }
 0x216   : > { %3193 = vst [vmem:[%s4752_s7 + $0x68] sm:$0xff] %v3169_v58   ;;  %v2471_v23 = vadd.f32 %v2470_v45, %v2310_v48 }
 0x217   : > { %3192 = vst [vmem:[%s4752_s7 + $0x60] sm:$0xff] %v3164_v59   ;;  %v2476_v13 = vadd.f32 %v3714_v47, %v2315_v61  ;;  %v2318_v16 = vadd.f32 %v3643_v12, %v4714_v26  ;;  %v2556_v34 = vadd.f32 %v4728_v56, %v2517_v39 }
 0x218   : > { %v2518_v53 = vmul.f32 %v4722_v41, %v2471_v23 }
 0x219   : > { %v2519_v6 = vmul.f32 %v4722_v41, %v2476_v13  ;;  %v2479_v50 = vadd.f32 %v3715_v19, %v2318_v16  ;;  %v2588_v8 = vmax.f32 %v2556_v34, 0.0 }
 0x21a   : > { %v2557_v46 = vadd.f32 %v4728_v56, %v2518_v53 }
 0x21b   : > { %v2558_v4 = vadd.f32 %v4728_v56, %v2519_v6  ;;  %v2520_v3 = vmul.f32 %v4722_v41, %v2479_v50 }
 0x21c   : > { %v2589_v0 = vmax.f32 %v2557_v46, 0.0 }
 0x21d   : > { %v2559_v15 = vadd.f32 %v4728_v56, %v2520_v3  ;;  %v2590_v26 = vmax.f32 %v2558_v4, 0.0 }
 0x21e   : > { %v3174_v37 = vpack.c.bf16 %v2589_v0, %v2588_v8 }
 0x21f   : > { %v2591_v54 = vmax.f32 %v2559_v15, 0.0 }
 0x220   : > { %3194 = vst [vmem:[%s4752_s7 + $0x70] sm:$0xff] %v3174_v37  }
 0x221   : > { %v3179_v40 = vpack.c.bf16 %v2591_v54, %v2590_v26 }
 0x223   : > { %3195 = vst [vmem:[%s4752_s7 + $0x78] sm:$0xff] %v3179_v40  }
 0x224 PF: > { %s14_s15 = sadd.s32 1, %s4027_s15  }
 0x225   : > { %p11_p4 = scmp.ge.s32.totalorder %s14_s15, 4  }
 0x227   :  { %13 = sbr.rel (!%p11_p4) target bundleno = 1 (0x1), region = 66 }

// kernel: teacher_forward.14
= control target key start
LH: loop header
LB: loop body
LE: loop exit
PB: predicated region body
PF: predicated region fallthrough
CT: control target
= control target key end

     0   :  { %s4411_s21 = smov 0   ;;  %s5340_s0 = inlined_call_operand.vmem [shape: bf16[512,1152], index: 0, kind: input, shape index: {}]   ;;  %s5341_s1 = inlined_call_operand.vmem [shape: bf16[1152,128], index: 1, kind: input, shape index: {}]   ;;  %s5342_s2 = inlined_call_operand.vmem [shape: f32[1,128], index: 2, kind: input, shape index: {}]   ;;  %s5343_s3 = inlined_call_operand.vmem [shape: f32[1,128], index: 3, kind: input, shape index: {}]   ;;  %s5344_s4 = inlined_call_operand.vmem [shape: bf16[512,128], index: 4, kind: input, shape index: {}]   ;;  %s5345_s5 = inlined_call_operand.vmem [shape: f32[512,128], index: 5, kind: output, shape index: {0}]   ;;  %s5346_s6 = inlined_call_operand.vmem [shape: bf16[512,128], index: 6, kind: output, shape index: {1}]  }
   0x1 LB: > { %s3072_s22 = sadd.s32 4294967295, %s4374_s21   ;;  %p3076_p0 = scmp.ge.s32.totalorder %s4374_s21, 1  ;;  %s4374_s21 = sphi %s4411_s21, %s17_s21  }
   0x2   : > { %p228_p1 = scmp.lt.s32.totalorder %s4374_s21, 3 }
   0x4   : > { %p229_p2 = pnand %p3076_p0, %p228_p1 }
   0x5   : > { %v4088_v0 = vld [vmem:[%s5341_s1 + $0x40] sm:$0xff] (!%p229_p2)   ;;  %s3077_s25 = sshll.u32 (!%p229_p2), %s3072_s22, 5  ;;  %v4090_v2 = vld [vmem:[%s5341_s1 + $0x48] sm:$0xff] (!%p229_p2)   ;;  %v4092_v4 = vld [vmem:[%s5341_s1 + $0x50] sm:$0xff] (!%p229_p2)  }
   0x6   : > { %232 = sbr.rel (%p229_p2) target bundleno = 550 (0x226), region = 40  ;;  %v4089_v1 = vld [vmem:[%s5341_s1] sm:$0xff] (!%p229_p2)   ;;  %3543 = vmatprep.subr.bf16.mxu0 (!%p229_p2), %v4088_v0  ;;  %4063 = vmatprep.subr.bf16.mxu1 (!%p229_p2), %v4088_v0  ;;  %p270_p3 = scmp.lt.s32.totalorder (!%p229_p2), %s3077_s25, 63  ;;  %v4091_v3 = vld [vmem:[%s5341_s1 + $0x8] sm:$0xff] (!%p229_p2)   ;;  %v4093_v5 = vld [vmem:[%s5341_s1 + $0x10] sm:$0xff] (!%p229_p2)  }
   0x7   : > { %3544 = vmatpush3.bf16.msra.mxu0 (!%p229_p2), %v4089_v1  ;;  %4071 = vmatpush3.bf16.msra.mxu1 (!%p229_p2), %v4089_v1  ;;  %v4094_v6 = vld [vmem:[%s5341_s1 + $0x58] sm:$0xff] (!%p229_p2)   ;;  %v4096_v8 = vld [vmem:[%s5341_s1 + $0x60] sm:$0xff] (!%p229_p2)   ;;  %v4098_v10 = vld [vmem:[%s5341_s1 + $0x68] sm:$0xff] (!%p229_p2)  }
   0x8   : > { %3545 = vmatprep.subr.bf16.mxu0 (!%p229_p2), %v4090_v2  ;;  %4064 = vmatprep.subr.bf16.mxu1 (!%p229_p2), %v4090_v2  ;;  %v4095_v7 = vld [vmem:[%s5341_s1 + $0x18] sm:$0xff] (!%p229_p2)   ;;  %v4097_v9 = vld [vmem:[%s5341_s1 + $0x20] sm:$0xff] (!%p229_p2)   ;;  %v4099_v13 = vld [vmem:[%s5341_s1 + $0x28] sm:$0xff] (!%p229_p2)  }
   0x9   : > { %v4100_v14 = vld [vmem:[%s5341_s1 + $0x70] sm:$0xff] (!%p229_p2)   ;;  %v4102_v16 = vld [vmem:[%s5341_s1 + $0x78] sm:$0xff] (!%p229_p2)   ;;  %v4110_v18 = vld [vmem:[%s5341_s1 + $0xc0] sm:$0xff] (!%p229_p2)  }
   0xa   : > { %v4101_v15 = vld [vmem:[%s5341_s1 + $0x30] sm:$0xff] (!%p229_p2)   ;;  %v4103_v17 = vld [vmem:[%s5341_s1 + $0x38] sm:$0xff] (!%p229_p2)   ;;  %v4113_v21 = vld [vmem:[%s5341_s1 + $0x140] sm:$0xff] (!%p229_p2)  }
   0xb   : > { %3546 = vmatpush3.bf16.msra.mxu0 (!%p229_p2), %v4091_v3  ;;  %4072 = vmatpush3.bf16.msra.mxu1 (!%p229_p2), %v4091_v3  ;;  %v4111_v22 = vld [vmem:[%s5341_s1 + $0x80] sm:$0xff] (!%p229_p2)   ;;  %v4112_v23 = vld [vmem:[%s5341_s1 + $0xc8] sm:$0xff] (!%p229_p2)   ;;  %v4122_v31 = vld [vmem:[%s5341_s1 + $0xd0] sm:$0xff] (!%p229_p2)  }
   0xc   : > { %3547 = vmatprep.subr.bf16.mxu0 (!%p229_p2), %v4092_v4  ;;  %4065 = vmatprep.subr.bf16.mxu1 (!%p229_p2), %v4092_v4  ;;  %v4115_v24 = vld [vmem:[%s5341_s1 + $0x100] sm:$0xff] (!%p229_p2)   ;;  %v4114_v27 = vld [vmem:[%s5341_s1 + $0x88] sm:$0xff] (!%p229_p2)   ;;  %v4123_v32 = vld [vmem:[%s5341_s1 + $0x90] sm:$0xff] (!%p229_p2)  }
   0xd   : > { %s5348_s25 = smov (!%p270_p3, %s3077_s25), 63  ;;  %v4133_v28 = vld [vmem:[%s5341_s1 + $0x148] sm:$0xff]   ;;  %v4124_v34 = vld [vmem:[%s5341_s1 + $0xd8] sm:$0xff]   ;;  %v4132_v40 = vld [vmem:[%s5341_s1 + $0xe0] sm:$0xff]  }
   0xe   : > { %s4079_s14 = smul.u32 36, %s5348_s25  ;;  %v4135_v33 = vld [vmem:[%s5341_s1 + $0x108] sm:$0xff]   ;;  %v4125_v37 = vld [vmem:[%s5341_s1 + $0x98] sm:$0xff]   ;;  %v4134_v41 = vld [vmem:[%s5341_s1 + $0xa0] sm:$0xff]   ;;  %s3082_s27 = sshll.u32 %s5348_s25, 3 }
   0xf   : > { %3548 = vmatpush3.bf16.msra.mxu0 %v4093_v5  ;;  %4073 = vmatpush3.bf16.msra.mxu1 %v4093_v5  ;;  %v4136_v42 = vld [vmem:[%s5341_s1 + $0xe8] sm:$0xff]   ;;  %v4147_v43 = vld [vmem:[%s5341_s1 + $0x150] sm:$0xff]   ;;  %v4146_v52 = vld [vmem:[%s5341_s1 + $0xf8] sm:$0xff]   ;;  %s5088_s30 = scalar_lea.vmem %s5345_s5, %s3082_s27 }
  0x10   : > { %3549 = vmatprep.subr.bf16.mxu0 %v4094_v6  ;;  %4066 = vmatprep.subr.bf16.mxu1 %v4094_v6  ;;  %s4452_s22 = scalar_lea.vmem %s5340_s0, %s4079_s14  ;;  %v4149_v46 = vld [vmem:[%s5341_s1 + $0x110] sm:$0xff]   ;;  %v4137_v47 = vld [vmem:[%s5341_s1 + $0xa8] sm:$0xff]   ;;  %v4164_v55 = vld [vmem:[%s5341_s1 + $0x158] sm:$0xff]  }
  0x11   : > { %v4106_v11 = vld [vmem:[%s4452_s22 + $0x4] ss:$36 sps:$4 sm:$0xff]   ;;  %v4116_v25 = vld [vmem:[%s4452_s22 + $0x4c] ss:$36 sps:$4 sm:$0xff]   ;;  %v4126_v35 = vld [vmem:[%s4452_s22 + $0x94] ss:$36 sps:$4 sm:$0xff]  }
  0x12   : > { %v4109_v12 = vld [vmem:[%s4452_s22 + $0x364] ss:$36 sps:$4 sm:$0xff]   ;;  %1799 = vmatprep.mubr.bf16.mxu0 %v4106_v11  ;;  %v4118_v26 = vld [vmem:[%s4452_s22 + $0x3ac] ss:$36 sps:$4 sm:$0xff]   ;;  %v4128_v36 = vld [vmem:[%s4452_s22 + $0x3f4] ss:$36 sps:$4 sm:$0xff]  }
  0x13   : > { %3550 = vmatpush3.bf16.msra.mxu0 %v4095_v7  ;;  %4074 = vmatpush3.bf16.msra.mxu1 %v4095_v7  ;;  %v4104_v19 = vld [vmem:[%s4452_s22] ss:$36 sps:$4 sm:$0xff]   ;;  %v4120_v29 = vld [vmem:[%s4452_s22 + $0x48] ss:$36 sps:$4 sm:$0xff]   ;;  %v4130_v38 = vld [vmem:[%s4452_s22 + $0x90] ss:$36 sps:$4 sm:$0xff]  }
  0x14   : > { %3551 = vmatprep.subr.bf16.mxu0 %v4096_v8  ;;  %4067 = vmatprep.subr.bf16.mxu1 %v4096_v8  ;;  %v4107_v20 = vld [vmem:[%s4452_s22 + $0x360] ss:$36 sps:$4 sm:$0xff]   ;;  %v4121_v30 = vld [vmem:[%s4452_s22 + $0x3a8] ss:$36 sps:$4 sm:$0xff]   ;;  %v4131_v39 = vld [vmem:[%s4452_s22 + $0x3f0] ss:$36 sps:$4 sm:$0xff]  }
  0x15   : > { %1895 = vmatprep.mubr.bf16.mxu1 %v4109_v12  ;;  %v4138_v44 = vld [vmem:[%s4452_s22 + $0xdc] ss:$36 sps:$4 sm:$0xff]   ;;  %v4144_v48 = vld [vmem:[%s5341_s1 + $0xf0] sm:$0xff]   ;;  %v4150_v53 = vld [vmem:[%s4452_s22 + $0x124] ss:$36 sps:$4 sm:$0xff]  }
  0x16   : > { %v4140_v45 = vld [vmem:[%s4452_s22 + $0x43c] ss:$36 sps:$4 sm:$0xff]   ;;  %v4145_v51 = vld [vmem:[%s5341_s1 + $0xb0] sm:$0xff]   ;;  %v4152_v58 = vld [vmem:[%s4452_s22 + $0x8] ss:$36 sps:$4 sm:$0xff]  }
  0x17   : > { %3552 = vmatpush3.bf16.msra.mxu0 %v4097_v9  ;;  %4075 = vmatpush3.bf16.msra.mxu1 %v4097_v9  ;;  %v4142_v49 = vld [vmem:[%s4452_s22 + $0xd8] ss:$36 sps:$4 sm:$0xff]   ;;  %v4154_v54 = vld [vmem:[%s4452_s22 + $0xc] ss:$36 sps:$4 sm:$0xff]   ;;  %v4155_v59 = vld [vmem:[%s4452_s22 + $0x120] ss:$36 sps:$4 sm:$0xff]  }
  0x18   : > { %3553 = vmatprep.subr.bf16.mxu0 %v4098_v10  ;;  %4068 = vmatprep.subr.bf16.mxu1 %v4098_v10  ;;  %v4143_v50 = vld [vmem:[%s4452_s22 + $0x438] ss:$36 sps:$4 sm:$0xff]   ;;  %v4156_v60 = vld [vmem:[%s5341_s1 + $0x1c0] sm:$0xff]   ;;  %v4158_v62 = vld [vmem:[%s4452_s22 + $0x16c] ss:$36 sps:$4 sm:$0xff]  }
  0x19   : > { %v4165_v56 = vld [vmem:[%s5341_s1 + $0x118] sm:$0xff]   ;;  %v4157_v61 = vld [vmem:[%s5341_s1 + $0x180] sm:$0xff]   ;;  %v4172_v1 = vld [vmem:[%s5341_s1 + $0x1c8] sm:$0xff]  }
  0x1a   : > { %v4148_v57 = vld [vmem:[%s5341_s1 + $0xb8] sm:$0xff]   ;;  %v4174_v0 = vld [vmem:[%s5341_s1 + $0x160] sm:$0xff]   ;;  %v4173_v3 = vld [vmem:[%s5341_s1 + $0x188] sm:$0xff]  }
  0x1b   : > { %3554 = vmatpush3.bf16.msra.mxu0 %v4099_v13  ;;  %4076 = vmatpush3.bf16.msra.mxu1 %v4099_v13  ;;  %v4160_v63 = vld [vmem:[%s4452_s22 + $0x54] ss:$36 sps:$4 sm:$0xff]   ;;  %v4175_v2 = vld [vmem:[%s5341_s1 + $0x120] sm:$0xff]   ;;  %v4162_v4 = vld [vmem:[%s4452_s22 + $0x168] ss:$36 sps:$4 sm:$0xff]  }
  0x1c   : > { %3555 = vmatprep.subr.bf16.mxu0 %v4100_v14  ;;  %4069 = vmatprep.subr.bf16.mxu1 %v4100_v14  ;;  %v4163_v5 = vld [vmem:[%s4452_s22 + $0x50] ss:$36 sps:$4 sm:$0xff]   ;;  %v4168_v7 = vld [vmem:[%s4452_s22 + $0x9c] ss:$36 sps:$4 sm:$0xff]   ;;  %v4188_v8 = vld [vmem:[%s5341_s1 + $0x168] sm:$0xff]  }
  0x1d   : > { %v4166_v6 = vld [vmem:[%s4452_s22 + $0x1b4] ss:$36 sps:$4 sm:$0xff]   ;;  %v4190_v10 = vld [vmem:[%s5341_s1 + $0x128] sm:$0xff]   ;;  %v4176_v14 = vld [vmem:[%s4452_s22 + $0x1fc] ss:$36 sps:$4 sm:$0xff]  }
  0x1e   : > { %v4189_v9 = vld [vmem:[%s5341_s1 + $0x1d0] sm:$0xff]   ;;  %v4171_v13 = vld [vmem:[%s4452_s22 + $0x98] ss:$36 sps:$4 sm:$0xff]  }
  0x1f   : > { %3556 = vmatpush3.bf16.msra.mxu0 %v4101_v15  ;;  %4077 = vmatpush3.bf16.msra.mxu1 %v4101_v15  ;;  %v4191_v11 = vld [vmem:[%s5341_s1 + $0x190] sm:$0xff]  }
  0x20   : > { %3557 = vmatprep.subr.bf16.mxu0 %v4102_v16  ;;  %4070 = vmatprep.subr.bf16.mxu1 %v4102_v16  ;;  %v4170_v12 = vld [vmem:[%s4452_s22 + $0x1b0] ss:$36 sps:$4 sm:$0xff]  }
  0x21   : > { %v4198_v15 = vld [vmem:[%s5341_s1 + $0x170] sm:$0xff]  }
  0x22   : > { %v4199_v16 = vld [vmem:[%s5341_s1 + $0x130] sm:$0xff]  }
  0x23   : > { %3558 = vmatpush3.bf16.msra.mxu0 %v4103_v17  ;;  %4078 = vmatpush3.bf16.msra.mxu1 %v4103_v17  ;;  %v4178_v17 = vld [vmem:[%s4452_s22 + $0xe4] ss:$36 sps:$4 sm:$0xff]  }
  0x24   : > { %3655 = vmatprep.subr.bf16.mxu1 %v4110_v18  ;;  %3767 = vmatprep.subr.bf16.mxu0 %v4113_v21  ;;  %v4206_v18 = vld [vmem:[%s5341_s1 + $0x1d8] sm:$0xff]   ;;  %v4181_v21 = vld [vmem:[%s4452_s22 + $0xe0] ss:$36 sps:$4 sm:$0xff]  }
  0x26   : > { %1800 = vmatmul.mubr.bf16.vlgmr.msra.gmra.mrb[0].mxu0 %v4104_v19  ;;  %1896 = vmatmul.mubr.bf16.vlgmr.msra.gmra.mrb[0].mxu1 %v4107_v20  ;;  %v4207_v19 = vld [vmem:[%s5341_s1 + $0x198] sm:$0xff]  }
  0x27   : > { %3656 = vmatpush3.bf16.msra.mxu1 %v4111_v22  ;;  %3768 = vmatpush3.bf16.msra.mxu0 %v4115_v24  ;;  %v4180_v20 = vld [vmem:[%s4452_s22 + $0x1f8] ss:$36 sps:$4 sm:$0xff]   ;;  %v4182_v22 = vld [vmem:[%s4452_s22 + $0x244] ss:$36 sps:$4 sm:$0xff]  }
  0x28   : > { %3657 = vmatprep.subr.bf16.mxu1 %v4112_v23  ;;  %1807 = vmatprep.mubr.bf16.mxu0 %v4116_v25  ;;  %v4184_v23 = vld [vmem:[%s4452_s22 + $0x12c] ss:$36 sps:$4 sm:$0xff]   ;;  %v4214_v24 = vld [vmem:[%s5341_s1 + $0x178] sm:$0xff]  }
  0x29   : > { %1903 = vmatprep.mubr.bf16.mxu1 %v4118_v26  ;;  %3769 = vmatprep.subr.bf16.mxu0 %v4133_v28  ;;  %v4215_v25 = vld [vmem:[%s5341_s1 + $0x138] sm:$0xff]   ;;  %v4222_v26 = vld [vmem:[%s5341_s1 + $0x1e0] sm:$0xff]  }
  0x2a   : > { %v4223_v28 = vld [vmem:[%s5341_s1 + $0x1a0] sm:$0xff]  }
  0x2b   : > { %3658 = vmatpush3.bf16.msra.mxu1 %v4114_v27  ;;  %3770 = vmatpush3.bf16.msra.mxu0 %v4135_v33  ;;  %v4186_v27 = vld [vmem:[%s4452_s22 + $0x240] ss:$36 sps:$4 sm:$0xff]   ;;  %v4237_v33 = vld [vmem:[%s5341_s1 + $0x1e8] sm:$0xff]  }
  0x2c   : > { %3659 = vmatprep.subr.bf16.mxu1 %v4122_v31  ;;  %3771 = vmatprep.subr.bf16.mxu0 %v4147_v43  ;;  %v4192_v31 = vld [vmem:[%s4452_s22 + $0x28c] ss:$36 sps:$4 sm:$0xff]   ;;  %v4208_v43 = vld [vmem:[%s4452_s22 + $0x31c] ss:$36 sps:$4 sm:$0xff]  }
  0x2e   : > { %1808 = vmatmul.mubr.bf16.gmra.mrb[4].mxu0 %v4120_v29  ;;  %1904 = vmatmul.mubr.bf16.gmra.mrb[4].mxu1 %v4121_v30  ;;  %v4224_v29 = vld [vmem:[%s5341_s1 + $0x200] sm:$0xff]   ;;  %v4187_v30 = vld [vmem:[%s4452_s22 + $0x128] ss:$36 sps:$4 sm:$0xff]  }
  0x2f   : > { %3660 = vmatpush3.bf16.msra.mxu1 %v4123_v32  ;;  %1815 = vmatprep.mubr.bf16.mxu0 %v4126_v35  ;;  %v4194_v32 = vld [vmem:[%s4452_s22 + $0x174] ss:$36 sps:$4 sm:$0xff]   ;;  %v4238_v35 = vld [vmem:[%s5341_s1 + $0x1a8] sm:$0xff]  }
  0x30   : > { %3661 = vmatprep.subr.bf16.mxu1 %v4124_v34  ;;  %1911 = vmatprep.mubr.bf16.mxu1 %v4128_v36  ;;  %v4196_v34 = vld [vmem:[%s4452_s22 + $0x288] ss:$36 sps:$4 sm:$0xff]   ;;  %v4197_v36 = vld [vmem:[%s4452_s22 + $0x170] ss:$36 sps:$4 sm:$0xff]  }
  0x31   : > { %3772 = vmatpush3.bf16.msra.mxu0 %v4149_v46  ;;  %v4213_v46 = vld [vmem:[%s4452_s22 + $0x200] ss:$36 sps:$4 sm:$0xff]  }
  0x32   : > { %3773 = vmatprep.subr.bf16.mxu0 %v4164_v55  ;;  %v4239_v55 = vld [vmem:[%s5341_s1 + $0x208] sm:$0xff]  }
  0x33   : > { %3662 = vmatpush3.bf16.msra.mxu1 %v4125_v37  ;;  %v4200_v37 = vld [vmem:[%s4452_s22 + $0x2d4] ss:$36 sps:$4 sm:$0xff]  }
  0x34   : > { %3663 = vmatprep.subr.bf16.mxu1 %v4132_v40  ;;  %v4205_v40 = vld [vmem:[%s4452_s22 + $0x1b8] ss:$36 sps:$4 sm:$0xff]  }
  0x35   : > { %3774 = vmatpush3.bf16.msra.mxu0 %v4165_v56  ;;  %v4254_v56 = vld [vmem:[%s5341_s1 + $0x210] sm:$0xff]  }
  0x36   : > { %1816 = vmatmul.mubr.bf16.gmra.mrb[8].mxu0 %v4130_v38  ;;  %1912 = vmatmul.mubr.bf16.gmra.mrb[8].mxu1 %v4131_v39  ;;  %v4202_v38 = vld [vmem:[%s4452_s22 + $0x1bc] ss:$36 sps:$4 sm:$0xff]   ;;  %v4204_v39 = vld [vmem:[%s4452_s22 + $0x2d0] ss:$36 sps:$4 sm:$0xff]  }
  0x37   : > { %3664 = vmatpush3.bf16.msra.mxu1 %v4134_v41  ;;  %1823 = vmatprep.mubr.bf16.mxu0 %v4138_v44  ;;  %v4252_v41 = vld [vmem:[%s5341_s1 + $0x1f0] sm:$0xff]   ;;  %v4210_v44 = vld [vmem:[%s4452_s22 + $0x204] ss:$36 sps:$4 sm:$0xff]  }
  0x38   : > { %3665 = vmatprep.subr.bf16.mxu1 %v4136_v42  ;;  %1919 = vmatprep.mubr.bf16.mxu1 %v4140_v45  ;;  %v4253_v42 = vld [vmem:[%s5341_s1 + $0x1b0] sm:$0xff]   ;;  %v4212_v45 = vld [vmem:[%s4452_s22 + $0x318] ss:$36 sps:$4 sm:$0xff]  }
  0x39   : > { %3775 = vmatprep.subr.bf16.mxu0 %v4174_v0  ;;  %v4236_v0 = vld [vmem:[%s4452_s22 + $0xa0] ss:$36 sps:$4 sm:$0xff]  }
  0x3a   : > { %3776 = vmatpush3.bf16.msra.mxu0 %v4175_v2  ;;  %v4242_v2 = vld [vmem:[%s4452_s22 + $0xec] ss:$36 sps:$4 sm:$0xff]  }
  0x3b   : > { %3666 = vmatpush3.bf16.msra.mxu1 %v4137_v47  ;;  %3777 = vmatprep.subr.bf16.mxu0 %v4188_v8  ;;  %v4267_v47 = vld [vmem:[%s5341_s1 + $0x1f8] sm:$0xff]  }
  0x3c   : > { %3667 = vmatprep.subr.bf16.mxu1 %v4144_v48  ;;  %v4268_v48 = vld [vmem:[%s5341_s1 + $0x1b8] sm:$0xff]  }
  0x3d   : > { %v4248_v8 = vld [vmem:[%s4452_s22 + $0x134] ss:$36 sps:$4 sm:$0xff]  }
  0x3e   : > { %1824 = vmatmul.mubr.bf16.gmra.mrb[12].mxu0 %v4142_v49  ;;  %1920 = vmatmul.mubr.bf16.gmra.mrb[12].mxu1 %v4143_v50  ;;  %v4216_v49 = vld [vmem:[%s4452_s22 + $0x24c] ss:$36 sps:$4 sm:$0xff]   ;;  %v4220_v50 = vld [vmem:[%s4452_s22 + $0x14] ss:$36 sps:$4 sm:$0xff]  }
  0x3f   : > { %3668 = vmatpush3.bf16.msra.mxu1 %v4145_v51  ;;  %1831 = vmatprep.mubr.bf16.mxu0 %v4150_v53  ;;  %v4218_v51 = vld [vmem:[%s4452_s22 + $0x10] ss:$36 sps:$4 sm:$0xff]  }
  0x40   : > { %3669 = vmatprep.subr.bf16.mxu1 %v4146_v52  ;;  %1960 = vmatprep.mubr.bf16.mxu1 %v4154_v54  ;;  %v4221_v52 = vld [vmem:[%s4452_s22 + $0x248] ss:$36 sps:$4 sm:$0xff]   ;;  %v4225_v53 = vld [vmem:[%s4452_s22 + $0x294] ss:$36 sps:$4 sm:$0xff]   ;;  %v4227_v54 = vld [vmem:[%s4452_s22 + $0x5c] ss:$36 sps:$4 sm:$0xff]  }
  0x41   : > { %3778 = vmatpush3.bf16.msra.mxu0 %v4190_v10  ;;  %v4250_v10 = vld [vmem:[%s4452_s22 + $0x368] ss:$36 sps:$4 sm:$0xff]  }
  0x42   : > { %3779 = vmatprep.subr.bf16.mxu0 %v4198_v15  ;;  %v4260_v15 = vld [vmem:[%s4452_s22 + $0x178] ss:$36 sps:$4 sm:$0xff]  }
  0x43   : > { %3670 = vmatpush3.bf16.msra.mxu1 %v4148_v57  ;;  %v4229_v57 = vld [vmem:[%s4452_s22 + $0x290] ss:$36 sps:$4 sm:$0xff]  }
  0x44   : > { %3879 = vmatprep.subr.bf16.mxu1 %v4156_v60  ;;  %v4233_v60 = vld [vmem:[%s4452_s22 + $0xa4] ss:$36 sps:$4 sm:$0xff]  }
  0x45   : > { %3780 = vmatpush3.bf16.msra.mxu0 %v4199_v16  ;;  %v4261_v16 = vld [vmem:[%s4452_s22 + $0x3fc] ss:$36 sps:$4 sm:$0xff]  }
  0x46   : > { %1832 = vmatmul.mubr.bf16.gmra.mrb[16].mxu0 %v4155_v59  ;;  %1961 = vmatmul.mubr.bf16.vlgmr.msra.gmra.mrb[16].mxu1 %v4152_v58  ;;  %v4230_v58 = vld [vmem:[%s4452_s22 + $0x58] ss:$36 sps:$4 sm:$0xff]  }
  0x47   : > { %3880 = vmatpush3.bf16.msra.mxu1 %v4157_v61  ;;  %1839 = vmatprep.mubr.bf16.mxu0 %v4158_v62  ;;  %v4231_v59 = vld [vmem:[%s4452_s22 + $0x2dc] ss:$36 sps:$4 sm:$0xff]  }
  0x48   : > { %1968 = vmatprep.mubr.bf16.mxu1 %v4160_v63  ;;  %3881 = vmatprep.subr.bf16.mxu1 %v4172_v1  ;;  %v4269_v61 = vld [vmem:[%s5341_s1 + $0x218] sm:$0xff]   ;;  %v4282_v62 = vld [vmem:[%s5341_s1 + $0x220] sm:$0xff]  }
  0x49   : > { %3781 = vmatprep.subr.bf16.mxu0 %v4214_v24  ;;  %v4235_v63 = vld [vmem:[%s4452_s22 + $0x2d8] ss:$36 sps:$4 sm:$0xff]   ;;  %v4240_v1 = vld [vmem:[%s4452_s22 + $0x324] ss:$36 sps:$4 sm:$0xff]  }
  0x4a   : > { %3782 = vmatpush3.bf16.msra.mxu0 %v4215_v25  ;;  %v4276_v24 = vld [vmem:[%s4452_s22 + $0x254] ss:$36 sps:$4 sm:$0xff]   ;;  %v4280_v25 = vld [vmem:[%s4452_s22 + $0x1c] ss:$36 sps:$4 sm:$0xff]  }
  0x4b   : > { %3882 = vmatpush3.bf16.msra.mxu1 %v4173_v3  ;;  %4015 = vmatprep.subr.bf16.mxu0 %v4224_v29  ;;  %v4295_v3 = vld [vmem:[%s5341_s1 + $0x228] sm:$0xff]  }
  0x4c   : > { %3883 = vmatprep.subr.bf16.mxu1 %v4189_v9  ;;  %v4321_v9 = vld [vmem:[%s5341_s1 + $0x238] sm:$0xff]  }
  0x4e   : > { %1840 = vmatmul.mubr.bf16.gmra.mrb[20].mxu0 %v4162_v4  ;;  %1969 = vmatmul.mubr.bf16.gmra.mrb[20].mxu1 %v4163_v5  ;;  %v4244_v4 = vld [vmem:[%s4452_s22 + $0x320] ss:$36 sps:$4 sm:$0xff]   ;;  %v4245_v5 = vld [vmem:[%s4452_s22 + $0xe8] ss:$36 sps:$4 sm:$0xff]  }
  0x4f   : > { %1847 = vmatprep.mubr.bf16.mxu0 %v4166_v6  ;;  %1976 = vmatprep.mubr.bf16.mxu1 %v4168_v7  ;;  %v4308_v6 = vld [vmem:[%s5341_s1 + $0x230] sm:$0xff]  }
  0x50   : > { %3884 = vmatpush3.bf16.msra.mxu1 %v4191_v11  ;;  %v4246_v7 = vld [vmem:[%s4452_s22 + $0x36c] ss:$36 sps:$4 sm:$0xff]  }
  0x51   : > { %3885 = vmatprep.subr.bf16.mxu1 %v4206_v18  ;;  %v4251_v11 = vld [vmem:[%s4452_s22 + $0x130] ss:$36 sps:$4 sm:$0xff]   ;;  %v4265_v18 = vld [vmem:[%s4452_s22 + $0x3f8] ss:$36 sps:$4 sm:$0xff]  }
  0x54   : > { %3886 = vmatpush3.bf16.msra.mxu1 %v4207_v19  ;;  %v4266_v19 = vld [vmem:[%s4452_s22 + $0x1c0] ss:$36 sps:$4 sm:$0xff]  }
  0x55   : > { %3887 = vmatprep.subr.bf16.mxu1 %v4222_v26  ;;  %v4278_v26 = vld [vmem:[%s4452_s22 + $0x18] ss:$36 sps:$4 sm:$0xff]  }
  0x56   : > { %1848 = vmatmul.mubr.bf16.gmra.mrb[24].mxu0 %v4170_v12  ;;  %1977 = vmatmul.mubr.bf16.gmra.mrb[24].mxu1 %v4171_v13  ;;  %v4255_v12 = vld [vmem:[%s4452_s22 + $0x3b4] ss:$36 sps:$4 sm:$0xff]   ;;  %v4257_v13 = vld [vmem:[%s4452_s22 + $0x17c] ss:$36 sps:$4 sm:$0xff]  }
  0x57   : > { %1855 = vmatprep.mubr.bf16.mxu0 %v4176_v14  ;;  %1984 = vmatprep.mubr.bf16.mxu1 %v4178_v17  ;;  %v4259_v14 = vld [vmem:[%s4452_s22 + $0x3b0] ss:$36 sps:$4 sm:$0xff]   ;;  %v4263_v17 = vld [vmem:[%s4452_s22 + $0x1c4] ss:$36 sps:$4 sm:$0xff]  }
  0x58   : > { %3888 = vmatpush3.bf16.msra.mxu1 %v4223_v28  ;;  %v4283_v28 = vld [vmem:[%s4452_s22 + $0x29c] ss:$36 sps:$4 sm:$0xff]  }
  0x59   : > { %3889 = vmatprep.subr.bf16.mxu1 %v4237_v33  ;;  %v4291_v33 = vld [vmem:[%s4452_s22 + $0xac] ss:$36 sps:$4 sm:$0xff]  }
  0x5c   : > { %3890 = vmatpush3.bf16.msra.mxu1 %v4238_v35  ;;  %v4294_v35 = vld [vmem:[%s4452_s22 + $0xa8] ss:$36 sps:$4 sm:$0xff]  }
  0x5d   : > { %3891 = vmatprep.subr.bf16.mxu1 %v4252_v41  ;;  %v4304_v41 = vld [vmem:[%s4452_s22 + $0x13c] ss:$36 sps:$4 sm:$0xff]  }
  0x5e   : > { %1856 = vmatmul.mubr.bf16.gmra.mrb[28].mxu0 %v4180_v20  ;;  %1985 = vmatmul.mubr.bf16.gmra.mrb[28].mxu1 %v4181_v21  ;;  %v4270_v20 = vld [vmem:[%s4452_s22 + $0x444] ss:$36 sps:$4 sm:$0xff]   ;;  %v4272_v21 = vld [vmem:[%s4452_s22 + $0x20c] ss:$36 sps:$4 sm:$0xff]  }
  0x5f   : > { %1863 = vmatprep.mubr.bf16.mxu0 %v4182_v22  ;;  %1992 = vmatprep.mubr.bf16.mxu1 %v4184_v23  ;;  %v4274_v22 = vld [vmem:[%s4452_s22 + $0x440] ss:$36 sps:$4 sm:$0xff]   ;;  %v4275_v23 = vld [vmem:[%s4452_s22 + $0x208] ss:$36 sps:$4 sm:$0xff]  }
  0x60   : > { %3892 = vmatpush3.bf16.msra.mxu1 %v4253_v42  ;;  %v4306_v42 = vld [vmem:[%s4452_s22 + $0x370] ss:$36 sps:$4 sm:$0xff]  }
  0x61   : > { %3893 = vmatprep.subr.bf16.mxu1 %v4267_v47  ;;  %v4314_v47 = vld [vmem:[%s4452_s22 + $0x180] ss:$36 sps:$4 sm:$0xff]  }
  0x64   : > { %3894 = vmatpush3.bf16.msra.mxu1 %v4268_v48  ;;  %v4315_v48 = vld [vmem:[%s4452_s22 + $0x404] ss:$36 sps:$4 sm:$0xff]  }
  0x66   : > { %1864 = vmatmul.mubr.bf16.gmra.mrb[32].mxu0 %v4186_v27  ;;  %1993 = vmatmul.mubr.bf16.gmra.mrb[32].mxu1 %v4187_v30  ;;  %v4281_v27 = vld [vmem:[%s4452_s22 + $0x250] ss:$36 sps:$4 sm:$0xff]   ;;  %v4287_v30 = vld [vmem:[%s4452_s22 + $0x298] ss:$36 sps:$4 sm:$0xff]  }
  0x67   : > { %1871 = vmatprep.mubr.bf16.mxu0 %v4192_v31  ;;  %2000 = vmatprep.mubr.bf16.mxu1 %v4194_v32  ;;  %v4288_v31 = vld [vmem:[%s4452_s22 + $0x60] ss:$36 sps:$4 sm:$0xff]  }
  0x68   : > { %v4289_v32 = vld [vmem:[%s4452_s22 + $0x2e4] ss:$36 sps:$4 sm:$0xff]  }
  0x6e   : > { %1872 = vmatmul.mubr.bf16.gmra.mrb[36].mxu0 %v4196_v34  ;;  %2001 = vmatmul.mubr.bf16.gmra.mrb[36].mxu1 %v4197_v36  ;;  %v4293_v34 = vld [vmem:[%s4452_s22 + $0x2e0] ss:$36 sps:$4 sm:$0xff]   ;;  %v4296_v36 = vld [vmem:[%s4452_s22 + $0x32c] ss:$36 sps:$4 sm:$0xff]  }
  0x6f   : > { %1879 = vmatprep.mubr.bf16.mxu0 %v4200_v37  ;;  %2008 = vmatprep.mubr.bf16.mxu1 %v4202_v38  ;;  %v4298_v37 = vld [vmem:[%s4452_s22 + $0xf4] ss:$36 sps:$4 sm:$0xff]   ;;  %v4300_v38 = vld [vmem:[%s4452_s22 + $0x328] ss:$36 sps:$4 sm:$0xff]  }
  0x76   : > { %1880 = vmatmul.mubr.bf16.gmra.mrb[40].mxu0 %v4204_v39  ;;  %2009 = vmatmul.mubr.bf16.gmra.mrb[40].mxu1 %v4205_v40  ;;  %v4301_v39 = vld [vmem:[%s4452_s22 + $0xf0] ss:$36 sps:$4 sm:$0xff]  }
  0x77   : > { %1887 = vmatprep.mubr.bf16.mxu0 %v4208_v43  ;;  %2016 = vmatprep.mubr.bf16.mxu1 %v4210_v44  ;;  %v4302_v40 = vld [vmem:[%s4452_s22 + $0x374] ss:$36 sps:$4 sm:$0xff]   ;;  %v4309_v44 = vld [vmem:[%s4452_s22 + $0x3bc] ss:$36 sps:$4 sm:$0xff]  }
  0x78   : > { %v4307_v43 = vld [vmem:[%s4452_s22 + $0x138] ss:$36 sps:$4 sm:$0xff]  }
  0x7e   : > { %1888 = vmatmul.mubr.bf16.gmra.mrb[44].mxu0 %v4212_v45  ;;  %2017 = vmatmul.mubr.bf16.gmra.mrb[44].mxu1 %v4213_v46  ;;  %v4311_v45 = vld [vmem:[%s4452_s22 + $0x184] ss:$36 sps:$4 sm:$0xff]   ;;  %v4313_v46 = vld [vmem:[%s4452_s22 + $0x3b8] ss:$36 sps:$4 sm:$0xff]  }
  0x7f   : > { %2024 = vmatprep.mubr.bf16.mxu1 %v4216_v49  ;;  %2121 = vmatprep.mubr.bf16.mxu0 %v4220_v50  ;;  %v4317_v49 = vld [vmem:[%s4452_s22 + $0x1cc] ss:$36 sps:$4 sm:$0xff]   ;;  %v4319_v50 = vld [vmem:[%s4452_s22 + $0x400] ss:$36 sps:$4 sm:$0xff]  }
  0x86   : > { %2025 = vmatmul.mubr.bf16.gmra.mrb[48].mxu1 %v4221_v52  ;;  %2122 = vmatmul.mubr.bf16.vlgmr.msra.gmra.mrb[48].mxu0 %v4218_v51  ;;  %v4320_v51 = vld [vmem:[%s4452_s22 + $0x1c8] ss:$36 sps:$4 sm:$0xff]  }
  0x87   : > { %4016 = vmatpush3.bf16.msra.mxu0 %v4224_v29  ;;  %2032 = vmatprep.mubr.bf16.mxu1 %v4225_v53  ;;  %v4285_v29 = vld [vmem:[%s4452_s22 + $0x64] ss:$36 sps:$4 sm:$0xff]   ;;  %v4322_v52 = vld [vmem:[%s4452_s22 + $0x44c] ss:$36 sps:$4 sm:$0xff]   ;;  %v4324_v53 = vld [vmem:[%s4452_s22 + $0x214] ss:$36 sps:$4 sm:$0xff]  }
  0x88   : > { %2129 = vmatprep.mubr.bf16.mxu0 %v4227_v54  ;;  %4017 = vmatprep.subr.bf16.mxu0 %v4239_v55 }
  0x8b   : > { %4018 = vmatpush3.bf16.msra.mxu0 %v4239_v55 }
  0x8c   : > { %4019 = vmatprep.subr.bf16.mxu0 %v4254_v56 }
  0x8e   : > { %2033 = vmatmul.mubr.bf16.gmra.mrb[52].mxu1 %v4229_v57  ;;  %2130 = vmatmul.mubr.bf16.gmra.mrb[52].mxu0 %v4230_v58  ;;  %v4326_v58 = vld [vmem:[%s4452_s22 + $0x448] ss:$36 sps:$4 sm:$0xff]  }
  0x8f   : > { %2040 = vmatprep.mubr.bf16.mxu1 %v4231_v59  ;;  %2137 = vmatprep.mubr.bf16.mxu0 %v4233_v60  ;;  %v4327_v59 = vld [vmem:[%s4452_s22 + $0x210] ss:$36 sps:$4 sm:$0xff]  }
  0x90   : > { %4020 = vmatpush3.bf16.msra.mxu0 %v4254_v56 }
  0x91   : > { %4021 = vmatprep.subr.bf16.mxu0 %v4269_v61 }
  0x94   : > { %4022 = vmatpush3.bf16.msra.mxu0 %v4269_v61 }
  0x95   : > { %4023 = vmatprep.subr.bf16.mxu0 %v4282_v62 }
  0x96   : > { %2041 = vmatmul.mubr.bf16.gmra.mrb[56].mxu1 %v4235_v63  ;;  %2138 = vmatmul.mubr.bf16.gmra.mrb[56].mxu0 %v4236_v0  ;;  %v4328_v0 = vld [vmem:[%s4452_s22 + $0x25c] ss:$36 sps:$4 sm:$0xff]  }
  0x97   : > { %2048 = vmatprep.mubr.bf16.mxu1 %v4240_v1  ;;  %2145 = vmatprep.mubr.bf16.mxu0 %v4242_v2  ;;  %v4330_v1 = vld [vmem:[%s4452_s22 + $0x20] ss:$36 sps:$4 sm:$0xff]  }
  0x98   : > { %4024 = vmatpush3.bf16.msra.mxu0 %v4282_v62 }
  0x99   : > { %4025 = vmatprep.subr.bf16.mxu0 %v4295_v3 }
  0x9c   : > { %4026 = vmatpush3.bf16.msra.mxu0 %v4295_v3 }
  0x9d   : > { %4027 = vmatprep.subr.bf16.mxu0 %v4308_v6 }
  0x9e   : > { %2049 = vmatmul.mubr.bf16.gmra.mrb[60].mxu1 %v4244_v4  ;;  %2146 = vmatmul.mubr.bf16.gmra.mrb[60].mxu0 %v4245_v5 }
  0x9f   : > { %2056 = vmatprep.mubr.bf16.mxu1 %v4246_v7  ;;  %2153 = vmatprep.mubr.bf16.mxu0 %v4248_v8 }
  0xa0   : > { %4028 = vmatpush3.bf16.msra.mxu0 %v4308_v6 }
  0xa1   : > { %4029 = vmatprep.subr.bf16.mxu0 %v4321_v9 }
  0xa4   : > { %4030 = vmatpush3.bf16.msra.mxu0 %v4321_v9 }
  0xa6   : > { %2057 = vmatmul.mubr.bf16.gmra.mrb[64].mxu1 %v4250_v10  ;;  %2154 = vmatmul.mubr.bf16.gmra.mrb[64].mxu0 %v4251_v11  ;;  %v4331_v10 = vld [vmem:[%s4452_s22 + $0x258] ss:$36 sps:$4 sm:$0xff]   ;;  %v4332_v11 = vld [vmem:[%s4452_s22 + $0x68] ss:$36 sps:$4 sm:$0xff]  }
  0xa7   : > { %2064 = vmatprep.mubr.bf16.mxu1 %v4255_v12  ;;  %2161 = vmatprep.mubr.bf16.mxu0 %v4257_v13 }
  0xae   : > { %2065 = vmatmul.mubr.bf16.gmra.mrb[68].mxu1 %v4259_v14  ;;  %2162 = vmatmul.mubr.bf16.gmra.mrb[68].mxu0 %v4260_v15 }
  0xaf   : > { %2072 = vmatprep.mubr.bf16.mxu1 %v4261_v16  ;;  %2169 = vmatprep.mubr.bf16.mxu0 %v4263_v17  ;;  %v4333_v16 = vld [vmem:[%s4452_s22 + $0x2a4] ss:$36 sps:$4 sm:$0xff]   ;;  %v4335_v17 = vld [vmem:[%s4452_s22 + $0xb0] ss:$36 sps:$4 sm:$0xff]  }
  0xb6   : > { %2073 = vmatmul.mubr.bf16.gmra.mrb[72].mxu1 %v4265_v18  ;;  %2170 = vmatmul.mubr.bf16.gmra.mrb[72].mxu0 %v4266_v19 }
  0xb7   : > { %2080 = vmatprep.mubr.bf16.mxu1 %v4270_v20  ;;  %2177 = vmatprep.mubr.bf16.mxu0 %v4272_v21 }
  0xbe   : > { %2081 = vmatmul.mubr.bf16.gmra.mrb[76].mxu1 %v4274_v22  ;;  %2178 = vmatmul.mubr.bf16.gmra.mrb[76].mxu0 %v4275_v23 }
  0xbf   : > { %2185 = vmatprep.mubr.bf16.mxu0 %v4276_v24  ;;  %2282 = vmatprep.mubr.bf16.mxu1 %v4280_v25 }
  0xc6   : > { %2186 = vmatmul.mubr.bf16.gmra.mrb[80].mxu0 %v4281_v27  ;;  %2283 = vmatmul.mubr.bf16.vlgmr.msra.gmra.mrb[80].mxu1 %v4278_v26  ;;  %v4336_v26 = vld [vmem:[%s4452_s22 + $0x2a0] ss:$36 sps:$4 sm:$0xff]   ;;  %v4337_v27 = vld [vmem:[%s4452_s22 + $0xf8] ss:$36 sps:$4 sm:$0xff]  }
  0xc7   : > { %2193 = vmatprep.mubr.bf16.mxu0 %v4283_v28  ;;  %2290 = vmatprep.mubr.bf16.mxu1 %v4285_v29 }
  0xce   : > { %2194 = vmatmul.mubr.bf16.gmra.mrb[84].mxu0 %v4287_v30  ;;  %2291 = vmatmul.mubr.bf16.gmra.mrb[84].mxu1 %v4288_v31 }
  0xcf   : > { %2201 = vmatprep.mubr.bf16.mxu0 %v4289_v32  ;;  %2298 = vmatprep.mubr.bf16.mxu1 %v4291_v33  ;;  %v4338_v32 = vld [vmem:[%s4452_s22 + $0x2ec] ss:$36 sps:$4 sm:$0xff]   ;;  %v4340_v33 = vld [vmem:[%s4452_s22 + $0x140] ss:$36 sps:$4 sm:$0xff]  }
  0xd6   : > { %2202 = vmatmul.mubr.bf16.gmra.mrb[88].mxu0 %v4293_v34  ;;  %2299 = vmatmul.mubr.bf16.gmra.mrb[88].mxu1 %v4294_v35 }
  0xd7   : > { %2209 = vmatprep.mubr.bf16.mxu0 %v4296_v36  ;;  %2306 = vmatprep.mubr.bf16.mxu1 %v4298_v37 }
  0xde   : > { %2210 = vmatmul.mubr.bf16.gmra.mrb[92].mxu0 %v4300_v38  ;;  %2307 = vmatmul.mubr.bf16.gmra.mrb[92].mxu1 %v4301_v39 }
  0xdf   : > { %2217 = vmatprep.mubr.bf16.mxu0 %v4302_v40  ;;  %2314 = vmatprep.mubr.bf16.mxu1 %v4304_v41 }
  0xe6   : > { %2218 = vmatmul.mubr.bf16.gmra.mrb[96].mxu0 %v4306_v42  ;;  %2315 = vmatmul.mubr.bf16.gmra.mrb[96].mxu1 %v4307_v43  ;;  %v4341_v42 = vld [vmem:[%s4452_s22 + $0x2e8] ss:$36 sps:$4 sm:$0xff]  }
  0xe7   : > { %2225 = vmatprep.mubr.bf16.mxu0 %v4309_v44  ;;  %2322 = vmatprep.mubr.bf16.mxu1 %v4311_v45  ;;  %v4342_v43 = vld [vmem:[%s4452_s22 + $0x188] ss:$36 sps:$4 sm:$0xff]  }
  0xee   : > { %2226 = vmatmul.mubr.bf16.gmra.mrb[100].mxu0 %v4313_v46  ;;  %2323 = vmatmul.mubr.bf16.gmra.mrb[100].mxu1 %v4314_v47 }
  0xef   : > { %2233 = vmatprep.mubr.bf16.mxu0 %v4315_v48  ;;  %2330 = vmatprep.mubr.bf16.mxu1 %v4317_v49  ;;  %v4343_v48 = vld [vmem:[%s4452_s22 + $0x334] ss:$36 sps:$4 sm:$0xff]  }
  0xf0   : > { %v4345_v49 = vld [vmem:[%s4452_s22 + $0x1d0] ss:$36 sps:$4 sm:$0xff]  }
  0xf6   : > { %2234 = vmatmul.mubr.bf16.gmra.mrb[104].mxu0 %v4319_v50  ;;  %2331 = vmatmul.mubr.bf16.gmra.mrb[104].mxu1 %v4320_v51 }
  0xf7   : > { %2241 = vmatprep.mubr.bf16.mxu0 %v4322_v52  ;;  %2338 = vmatprep.mubr.bf16.mxu1 %v4324_v53 }
  0xf9   : > { %v3631_v54 = vpop.f32.mrb[0].mxu1  ;;  %v3559_v55 = vpop.f32.mrb[0].mxu0 }
  0xfa   : > { %v3632_v56 = vpop.f32.mrb[1].mxu1  ;;  %v3560_v57 = vpop.f32.mrb[1].mxu0 }
  0xfb   : > { %v4755_v60 = vadd.f32 %v3632_v56, %v3631_v54  ;;  %v3634_v61 = vpop.f32.mrb[2].mxu1  ;;  %v4757_v62 = vadd.f32 %v3560_v57, %v3559_v55  ;;  %v3562_v63 = vpop.f32.mrb[2].mxu0 }
  0xfc   : > { %v3635_v2 = vpop.f32.mrb[3].mxu1  ;;  %v3563_v3 = vpop.f32.mrb[3].mxu0 }
  0xfd   : > { %v4761_v4 = vadd.f32 %v3635_v2, %v3634_v61  ;;  %v4763_v5 = vadd.f32 %v3563_v3, %v3562_v63  ;;  %v4348_v2 = vld [vmem:[%s4452_s22 + $0x37c] ss:$36 sps:$4 sm:$0xff]  }
  0xfe   : > { %2242 = vmatmul.mubr.bf16.gmra.mrb[108].mxu0 %v4326_v58  ;;  %2339 = vmatmul.mubr.bf16.gmra.mrb[108].mxu1 %v4327_v59  ;;  %v4346_v58 = vld [vmem:[%s4452_s22 + $0x330] ss:$36 sps:$4 sm:$0xff]   ;;  %v4347_v59 = vld [vmem:[%s4452_s22 + $0x218] ss:$36 sps:$4 sm:$0xff]   ;;  %v4350_v3 = vld [vmem:[%s4452_s22 + $0x260] ss:$36 sps:$4 sm:$0xff]  }
  0xff   : > { %2346 = vmatprep.mubr.bf16.mxu1 %v4328_v0  ;;  %4031 = vmatprep.mubr.bf16.mxu0 %v4330_v1 }
 0x101   : > { %v3637_v6 = vpop.f32.mrb[4].mxu1  ;;  %v3565_v7 = vpop.f32.mrb[4].mxu0 }
 0x102   : > { %v3638_v8 = vpop.f32.mrb[5].mxu1  ;;  %v3566_v9 = vpop.f32.mrb[5].mxu0 }
 0x103   : > { %v4767_v12 = vadd.f32 %v3638_v8, %v3637_v6  ;;  %v3640_v13 = vpop.f32.mrb[6].mxu1  ;;  %v4769_v14 = vadd.f32 %v3566_v9, %v3565_v7  ;;  %v3568_v15 = vpop.f32.mrb[6].mxu0 }
 0x104   : > { %v3641_v18 = vpop.f32.mrb[7].mxu1  ;;  %v3569_v19 = vpop.f32.mrb[7].mxu0 }
 0x105   : > { %v4773_v20 = vadd.f32 %v3641_v18, %v3640_v13  ;;  %v4775_v21 = vadd.f32 %v3569_v19, %v3568_v15  ;;  %v4351_v18 = vld [vmem:[%s4452_s22 + $0x378] ss:$36 sps:$4 sm:$0xff]   ;;  %v4352_v19 = vld [vmem:[%s4452_s22 + $0x2a8] ss:$36 sps:$4 sm:$0xff]  }
 0x106   : > { %2347 = vmatmul.mubr.bf16.gmra.mrb[112].mxu1 %v4331_v10  ;;  %4032 = vmatmul.mubr.bf16.vlgmr.msra.gmra.mrb[112].mxu0 %v4332_v11 }
 0x107   : > { %2354 = vmatprep.mubr.bf16.mxu1 %v4333_v16  ;;  %4035 = vmatprep.mubr.bf16.mxu0 %v4335_v17 }
 0x109   : > { %v3643_v22 = vpop.f32.mrb[8].mxu1  ;;  %v3571_v23 = vpop.f32.mrb[8].mxu0 }
 0x10a   : > { %v3644_v24 = vpop.f32.mrb[9].mxu1  ;;  %v3572_v25 = vpop.f32.mrb[9].mxu0 }
 0x10b   : > { %v4779_v28 = vadd.f32 %v3644_v24, %v3643_v22  ;;  %v3646_v29 = vpop.f32.mrb[10].mxu1  ;;  %v4781_v30 = vadd.f32 %v3572_v25, %v3571_v23  ;;  %v3574_v31 = vpop.f32.mrb[10].mxu0  ;;  %v4353_v25 = vld [vmem:[%s4452_s22 + $0x3c4] ss:$36 sps:$4 sm:$0xff]  }
 0x10c   : > { %v3647_v34 = vpop.f32.mrb[11].mxu1  ;;  %v3575_v35 = vpop.f32.mrb[11].mxu0 }
 0x10d   : > { %v4785_v36 = vadd.f32 %v3647_v34, %v3646_v29  ;;  %v4787_v37 = vadd.f32 %v3575_v35, %v3574_v31 }
 0x10e   : > { %2355 = vmatmul.mubr.bf16.gmra.mrb[116].mxu1 %v4336_v26  ;;  %4036 = vmatmul.mubr.bf16.gmra.mrb[116].mxu0 %v4337_v27  ;;  %v4355_v26 = vld [vmem:[%s4452_s22 + $0x2f0] ss:$36 sps:$4 sm:$0xff]  }
 0x10f   : > { %2362 = vmatprep.mubr.bf16.mxu1 %v4338_v32  ;;  %4039 = vmatprep.mubr.bf16.mxu0 %v4340_v33 }
 0x111   : > { %v3649_v38 = vpop.f32.mrb[12].mxu1  ;;  %v3577_v39 = vpop.f32.mrb[12].mxu0 }
 0x112   : > { %v3650_v40 = vpop.f32.mrb[13].mxu1  ;;  %v3578_v41 = vpop.f32.mrb[13].mxu0 }
 0x113   : > { %v4791_v44 = vadd.f32 %v3650_v40, %v3649_v38  ;;  %v3652_v45 = vpop.f32.mrb[14].mxu1  ;;  %v4793_v46 = vadd.f32 %v3578_v41, %v3577_v39  ;;  %v3580_v47 = vpop.f32.mrb[14].mxu0  ;;  %v4356_v40 = vld [vmem:[%s4452_s22 + $0x3c0] ss:$36 sps:$4 sm:$0xff]   ;;  %v4357_v41 = vld [vmem:[%s4452_s22 + $0x338] ss:$36 sps:$4 sm:$0xff]  }
 0x114   : > { %v3653_v50 = vpop.f32.mrb[15].mxu1  ;;  %v3581_v51 = vpop.f32.mrb[15].mxu0 }
 0x115   : > { %v4797_v52 = vadd.f32 %v3653_v50, %v3652_v45  ;;  %v4799_v53 = vadd.f32 %v3581_v51, %v3580_v47  ;;  %v4358_v47 = vld [vmem:[%s4452_s22 + $0x40c] ss:$36 sps:$4 sm:$0xff]  }
 0x116   : > { %2363 = vmatmul.mubr.bf16.gmra.mrb[120].mxu1 %v4341_v42  ;;  %4040 = vmatmul.mubr.bf16.gmra.mrb[120].mxu0 %v4342_v43 }
 0x117   : > { %2370 = vmatprep.mubr.bf16.mxu1 %v4343_v48  ;;  %4043 = vmatprep.mubr.bf16.mxu0 %v4345_v49  ;;  %v4360_v48 = vld [vmem:[%s4452_s22 + $0x380] ss:$36 sps:$4 sm:$0xff]  }
 0x119   : > { %v3671_v54 = vpop.f32.mrb[16].mxu1  ;;  %v3583_v55 = vpop.f32.mrb[16].mxu0 }
 0x11a   : > { %v3672_v56 = vpop.f32.mrb[17].mxu1  ;;  %v3584_v57 = vpop.f32.mrb[17].mxu0 }
 0x11b   : > { %v3673_v61 = vadd.f32 %v3672_v56, %v3671_v54  ;;  %v3674_v63 = vpop.f32.mrb[18].mxu1  ;;  %v4803_v0 = vadd.f32 %v3584_v57, %v3583_v55  ;;  %v3586_v1 = vpop.f32.mrb[18].mxu0 }
 0x11c   : > { %v3675_v6 = vpop.f32.mrb[19].mxu1  ;;  %v3587_v7 = vpop.f32.mrb[19].mxu0 }
 0x11d   : > { %v4808_v8 = vadd.f32 %v3673_v61, %v4757_v62  ;;  %v3676_v9 = vadd.f32 %v3675_v6, %v3674_v63  ;;  %v4810_v10 = vadd.f32 %v3587_v7, %v3586_v1  ;;  %v4361_v61 = vld [vmem:[%s4452_s22 + $0x408] ss:$36 sps:$4 sm:$0xff]   ;;  %v4363_v6 = vld [vmem:[%s4452_s22 + $0x454] ss:$36 sps:$4 sm:$0xff]  }
 0x11e   : > { %2371 = vmatmul.mubr.bf16.gmra.mrb[124].mxu1 %v4346_v58  ;;  %4044 = vmatmul.mubr.bf16.gmra.mrb[124].mxu0 %v4347_v59  ;;  %v4362_v63 = vld [vmem:[%s4452_s22 + $0x3c8] ss:$36 sps:$4 sm:$0xff]   ;;  %v4365_v7 = vld [vmem:[%s4452_s22 + $0x410] ss:$36 sps:$4 sm:$0xff]  }
 0x11f   : > { %v4813_v11 = vadd.f32 %v3676_v9, %v4763_v5  ;;  %2378 = vmatprep.mubr.bf16.mxu1 %v4348_v2  ;;  %4047 = vmatprep.mubr.bf16.mxu0 %v4350_v3 }
 0x121   : > { %v3677_v13 = vpop.f32.mrb[20].mxu1  ;;  %v3589_v15 = vpop.f32.mrb[20].mxu0 }
 0x122   : > { %v3678_v16 = vpop.f32.mrb[21].mxu1  ;;  %v3590_v17 = vpop.f32.mrb[21].mxu0 }
 0x123   : > { %v3679_v62 = vadd.f32 %v3678_v16, %v3677_v13  ;;  %v3680_v22 = vpop.f32.mrb[22].mxu1  ;;  %v4817_v23 = vadd.f32 %v3590_v17, %v3589_v15  ;;  %v3592_v24 = vpop.f32.mrb[22].mxu0 }
 0x124   : > { %v3681_v27 = vpop.f32.mrb[23].mxu1  ;;  %v3593_v5 = vpop.f32.mrb[23].mxu0 }
 0x125   : > { %v4822_v29 = vadd.f32 %v3679_v62, %v4769_v14  ;;  %v3682_v31 = vadd.f32 %v3681_v27, %v3680_v22  ;;  %v4824_v32 = vadd.f32 %v3593_v5, %v3592_v24  ;;  %v4366_v24 = vld [vmem:[%s4452_s22 + $0x450] ss:$36 sps:$4 sm:$0xff]  }
 0x126   : > { %2379 = vmatmul.mubr.bf16.gmra.mrb[128].mxu1 %v4351_v18  ;;  %4048 = vmatmul.mubr.bf16.gmra.mrb[128].mxu0 %v4352_v19 }
 0x127   : > { %v4827_v33 = vadd.f32 %v3682_v31, %v4775_v21  ;;  %2386 = vmatprep.mubr.bf16.mxu1 %v4353_v25  ;;  %4051 = vmatprep.mubr.bf16.mxu0 %v4355_v26  ;;  %v4367_v25 = vld [vmem:[%s4452_s22 + $0x458] ss:$36 sps:$4 sm:$0xff]   ;;  %s3080_s22 = sshll.u32 %s5348_s25, 2 }
 0x128   : > { %s5076_s26 = scalar_lea.vmem %s5344_s4, %s3080_s22  ;;  %s5144_s13 = scalar_lea.vmem %s5346_s6, %s3080_s22 }
 0x129   : > { %v3683_v34 = vpop.f32.mrb[24].mxu1  ;;  %v3595_v35 = vpop.f32.mrb[24].mxu0 }
 0x12a   : > { %v3684_v38 = vpop.f32.mrb[25].mxu1  ;;  %v3596_v39 = vpop.f32.mrb[25].mxu0 }
 0x12b   : > { %v3685_v14 = vadd.f32 %v3684_v38, %v3683_v34  ;;  %v3686_v42 = vpop.f32.mrb[26].mxu1  ;;  %v4831_v43 = vadd.f32 %v3596_v39, %v3595_v35  ;;  %v3598_v45 = vpop.f32.mrb[26].mxu0 }
 0x12c   : > { %v3687_v49 = vpop.f32.mrb[27].mxu1  ;;  %v3599_v21 = vpop.f32.mrb[27].mxu0 }
 0x12d   : > { %v4836_v50 = vadd.f32 %v3685_v14, %v4781_v30  ;;  %v3688_v51 = vadd.f32 %v3687_v49, %v3686_v42  ;;  %v4838_v54 = vadd.f32 %v3599_v21, %v3598_v45 }
 0x12e   : > { %2387 = vmatmul.mubr.bf16.gmra.mrb[132].mxu1 %v4356_v40  ;;  %4052 = vmatmul.mubr.bf16.gmra.mrb[132].mxu0 %v4357_v41 }
 0x12f   : > { %v4841_v55 = vadd.f32 %v3688_v51, %v4787_v37  ;;  %2394 = vmatprep.mubr.bf16.mxu1 %v4358_v47  ;;  %4055 = vmatprep.mubr.bf16.mxu0 %v4360_v48 }
 0x131   : > { %v3689_v56 = vpop.f32.mrb[28].mxu1  ;;  %v3601_v57 = vpop.f32.mrb[28].mxu0 }
 0x132   : > { %v3690_v58 = vpop.f32.mrb[29].mxu1  ;;  %v3602_v59 = vpop.f32.mrb[29].mxu0 }
 0x133   : > { %v3691_v30 = vadd.f32 %v3690_v58, %v3689_v56  ;;  %v3692_v1 = vpop.f32.mrb[30].mxu1  ;;  %v4845_v2 = vadd.f32 %v3602_v59, %v3601_v57  ;;  %v3604_v3 = vpop.f32.mrb[30].mxu0 }
 0x134   : > { %v3693_v9 = vpop.f32.mrb[31].mxu1  ;;  %v3605_v37 = vpop.f32.mrb[31].mxu0 }
 0x135   : > { %v4850_v13 = vadd.f32 %v3691_v30, %v4793_v46  ;;  %v3694_v15 = vadd.f32 %v3693_v9, %v3692_v1  ;;  %v4852_v16 = vadd.f32 %v3605_v37, %v3604_v3 }
 0x136   : > { %2395 = vmatmul.mubr.bf16.gmra.mrb[136].mxu1 %v4361_v61  ;;  %4056 = vmatmul.mubr.bf16.gmra.mrb[136].mxu0 %v4362_v63 }
 0x137   : > { %v4855_v17 = vadd.f32 %v3694_v15, %v4799_v53  ;;  %2402 = vmatprep.mubr.bf16.mxu1 %v4363_v6  ;;  %4059 = vmatprep.mubr.bf16.mxu0 %v4365_v7 }
 0x139   : > { %v3695_v18 = vpop.f32.mrb[32].mxu1  ;;  %v3607_v19 = vpop.f32.mrb[32].mxu0 }
 0x13a   : > { %v3696_v62 = vpop.f32.mrb[33].mxu1  ;;  %v3608_v22 = vpop.f32.mrb[33].mxu0 }
 0x13b   : > { %v3697_v26 = vadd.f32 %v3696_v62, %v3695_v18  ;;  %v3698_v27 = vpop.f32.mrb[34].mxu1  ;;  %v3609_v46 = vadd.f32 %v3608_v22, %v3607_v19  ;;  %v3610_v5 = vpop.f32.mrb[34].mxu0 }
 0x13c   : > { %v3699_v31 = vpop.f32.mrb[35].mxu1  ;;  %v3611_v34 = vpop.f32.mrb[35].mxu0 }
 0x13d   : > { %v4860_v35 = vadd.f32 %v3697_v26, %v4803_v0  ;;  %v3700_v38 = vadd.f32 %v3699_v31, %v3698_v27  ;;  %v3612_v53 = vadd.f32 %v3611_v34, %v3610_v5 }
 0x13e   : > { %2403 = vmatmul.mubr.bf16.gmra.mrb[140].mxu1 %v4366_v24  ;;  %4060 = vmatmul.mubr.bf16.gmra.mrb[140].mxu0 %v4367_v25 }
 0x13f   : > { %v4863_v39 = vadd.f32 %v3700_v38, %v4810_v10 }
 0x141   : > { %v3701_v40 = vpop.f32.mrb[36].mxu1  ;;  %v3613_v41 = vpop.f32.mrb[36].mxu0 }
 0x142   : > { %v3702_v14 = vpop.f32.mrb[37].mxu1  ;;  %v3614_v42 = vpop.f32.mrb[37].mxu0 }
 0x143   : > { %v3703_v45 = vadd.f32 %v3702_v14, %v3701_v40  ;;  %v3704_v47 = vpop.f32.mrb[38].mxu1  ;;  %v3615_v48 = vadd.f32 %v3614_v42, %v3613_v41  ;;  %v3616_v49 = vpop.f32.mrb[38].mxu0 }
 0x144   : > { %v3705_v21 = vpop.f32.mrb[39].mxu1  ;;  %v3617_v51 = vpop.f32.mrb[39].mxu0 }
 0x145   : > { %v4866_v0 = vadd.f32 %v3703_v45, %v4817_v23  ;;  %v3706_v56 = vadd.f32 %v3705_v21, %v3704_v47  ;;  %v3618_v57 = vadd.f32 %v3617_v51, %v3616_v49 }
 0x147   : > { %v4869_v58 = vadd.f32 %v3706_v56, %v4824_v32 }
 0x149   : > { %v3707_v10 = vpop.f32.mrb[40].mxu1  ;;  %v3619_v59 = vpop.f32.mrb[40].mxu0 }
 0x14a   : > { %v3708_v61 = vpop.f32.mrb[41].mxu1  ;;  %v3620_v63 = vpop.f32.mrb[41].mxu0 }
 0x14b   : > { %v3709_v30 = vadd.f32 %v3708_v61, %v3707_v10  ;;  %v3710_v1 = vpop.f32.mrb[42].mxu1  ;;  %v4871_v3 = vadd.f32 %v3620_v63, %v3619_v59  ;;  %v3622_v6 = vpop.f32.mrb[42].mxu0 }
 0x14c   : > { %v3711_v7 = vpop.f32.mrb[43].mxu1  ;;  %v3623_v9 = vpop.f32.mrb[43].mxu0 }
 0x14d   : > { %v4874_v37 = vadd.f32 %v3709_v30, %v4831_v43  ;;  %v3712_v23 = vadd.f32 %v3711_v7, %v3710_v1  ;;  %v3624_v15 = vadd.f32 %v3623_v9, %v3622_v6 }
 0x14f   : > { %v4877_v18 = vadd.f32 %v3712_v23, %v4838_v54 }
 0x151   : > { %v3713_v32 = vpop.f32.mrb[44].mxu1  ;;  %v3625_v19 = vpop.f32.mrb[44].mxu0 }
 0x152   : > { %v3714_v62 = vpop.f32.mrb[45].mxu1  ;;  %v3626_v22 = vpop.f32.mrb[45].mxu0 }
 0x153   : > { %v3715_v24 = vadd.f32 %v3714_v62, %v3713_v32  ;;  %v3716_v25 = vpop.f32.mrb[46].mxu1  ;;  %v4879_v26 = vadd.f32 %v3626_v22, %v3625_v19  ;;  %v3628_v27 = vpop.f32.mrb[46].mxu0 }
 0x154   : > { %v3717_v5 = vpop.f32.mrb[47].mxu1  ;;  %v3629_v31 = vpop.f32.mrb[47].mxu0 }
 0x155   : > { %v4882_v34 = vadd.f32 %v3715_v24, %v4845_v2  ;;  %v3718_v43 = vadd.f32 %v3717_v5, %v3716_v25  ;;  %v4884_v38 = vadd.f32 %v3629_v31, %v3628_v27 }
 0x157   : > { %v4887_v54 = vadd.f32 %v3718_v43, %v4852_v16 }
 0x159   : > { %v3719_v40 = vpop.f32.mrb[48].mxu1  ;;  %v3783_v41 = vpop.f32.mrb[48].mxu0 }
 0x15a   : > { %v3720_v14 = vpop.f32.mrb[49].mxu1  ;;  %v3784_v42 = vpop.f32.mrb[49].mxu0 }
 0x15b   : > { %v3721_v45 = vadd.f32 %v3720_v14, %v3719_v40  ;;  %v3785_v47 = vadd.f32 %v3784_v42, %v3783_v41  ;;  %v3722_v49 = vpop.f32.mrb[50].mxu1  ;;  %v3786_v21 = vpop.f32.mrb[50].mxu0 }
 0x15c   : > { %v3723_v51 = vpop.f32.mrb[51].mxu1  ;;  %v3787_v56 = vpop.f32.mrb[51].mxu0 }
 0x15d   : > { %v4889_v10 = vadd.f32 %v3721_v45, %v3609_v46  ;;  %v4892_v2 = vadd.f32 %v3785_v47, %v4808_v8  ;;  %v3724_v59 = vadd.f32 %v3723_v51, %v3722_v49  ;;  %v3788_v61 = vadd.f32 %v3787_v56, %v3786_v21 }
 0x15f   : > { %v4894_v63 = vadd.f32 %v3724_v59, %v3612_v53  ;;  %v4897_v16 = vadd.f32 %v3788_v61, %v4813_v11 }
 0x161   : > { %v3725_v30 = vpop.f32.mrb[52].mxu1  ;;  %v3789_v1 = vpop.f32.mrb[52].mxu0 }
 0x162   : > { %v3726_v6 = vpop.f32.mrb[53].mxu1  ;;  %v3790_v7 = vpop.f32.mrb[53].mxu0 }
 0x163   : > { %v3727_v9 = vadd.f32 %v3726_v6, %v3725_v30  ;;  %v3791_v23 = vadd.f32 %v3790_v7, %v3789_v1  ;;  %v3728_v32 = vpop.f32.mrb[54].mxu1  ;;  %v3792_v19 = vpop.f32.mrb[54].mxu0 }
 0x164   : > { %v3729_v46 = vpop.f32.mrb[55].mxu1  ;;  %v3793_v62 = vpop.f32.mrb[55].mxu0 }
 0x165   : > { %v4899_v22 = vadd.f32 %v3727_v9, %v3615_v48  ;;  %v4902_v8 = vadd.f32 %v3791_v23, %v4822_v29  ;;  %v3730_v53 = vadd.f32 %v3729_v46, %v3728_v32  ;;  %v3794_v24 = vadd.f32 %v3793_v62, %v3792_v19 }
 0x167   : > { %v4904_v25 = vadd.f32 %v3730_v53, %v3618_v57  ;;  %v4907_v11 = vadd.f32 %v3794_v24, %v4827_v33 }
 0x169   : > { %v3731_v27 = vpop.f32.mrb[56].mxu1  ;;  %v3795_v5 = vpop.f32.mrb[56].mxu0 }
 0x16a   : > { %v3732_v31 = vpop.f32.mrb[57].mxu1  ;;  %v3796_v43 = vpop.f32.mrb[57].mxu0 }
 0x16b   : > { %v3733_v40 = vadd.f32 %v3732_v31, %v3731_v27  ;;  %v3797_v41 = vadd.f32 %v3796_v43, %v3795_v5  ;;  %v3734_v14 = vpop.f32.mrb[58].mxu1  ;;  %v3798_v42 = vpop.f32.mrb[58].mxu0 }
 0x16c   : > { %v3735_v48 = vpop.f32.mrb[59].mxu1  ;;  %v3799_v45 = vpop.f32.mrb[59].mxu0 }
 0x16d   : > { %v4910_v29 = vadd.f32 %v3733_v40, %v4871_v3  ;;  %v4913_v47 = vadd.f32 %v3797_v41, %v4836_v50  ;;  %v3736_v57 = vadd.f32 %v3735_v48, %v3734_v14  ;;  %v3800_v49 = vadd.f32 %v3799_v45, %v3798_v42 }
 0x16f   : > { %v4915_v33 = vadd.f32 %v3736_v57, %v3624_v15  ;;  %v4918_v21 = vadd.f32 %v3800_v49, %v4841_v55 }
 0x171   : > { %v3737_v51 = vpop.f32.mrb[60].mxu1  ;;  %v3801_v56 = vpop.f32.mrb[60].mxu0 }
 0x172   : > { %v3738_v59 = vpop.f32.mrb[61].mxu1  ;;  %v3802_v61 = vpop.f32.mrb[61].mxu0 }
 0x173   : > { %v3739_v30 = vadd.f32 %v3738_v59, %v3737_v51  ;;  %v3803_v1 = vadd.f32 %v3802_v61, %v3801_v56  ;;  %v3740_v6 = vpop.f32.mrb[62].mxu1  ;;  %v3804_v7 = vpop.f32.mrb[62].mxu0 }
 0x174   : > { %v3741_v3 = vpop.f32.mrb[63].mxu1  ;;  %v3805_v9 = vpop.f32.mrb[63].mxu0 }
 0x175   : > { %v4921_v50 = vadd.f32 %v3739_v30, %v4879_v26  ;;  %v4924_v23 = vadd.f32 %v3803_v1, %v4850_v13  ;;  %v3742_v15 = vadd.f32 %v3741_v3, %v3740_v6  ;;  %v3806_v32 = vadd.f32 %v3805_v9, %v3804_v7 }
 0x177   : > { %v4927_v55 = vadd.f32 %v3742_v15, %v4884_v38  ;;  %v4930_v19 = vadd.f32 %v3806_v32, %v4855_v17 }
 0x179   : > { %v3743_v46 = vpop.f32.mrb[64].mxu1  ;;  %v3807_v62 = vpop.f32.mrb[64].mxu0 }
 0x17a   : > { %v3744_v53 = vpop.f32.mrb[65].mxu1  ;;  %v3808_v24 = vpop.f32.mrb[65].mxu0 }
 0x17b   : > { %v3745_v27 = vadd.f32 %v3744_v53, %v3743_v46  ;;  %v3809_v5 = vadd.f32 %v3808_v24, %v3807_v62  ;;  %v3746_v31 = vpop.f32.mrb[66].mxu1  ;;  %v3810_v26 = vpop.f32.mrb[66].mxu0 }
 0x17c   : > { %v3747_v43 = vpop.f32.mrb[67].mxu1  ;;  %v3811_v40 = vpop.f32.mrb[67].mxu0 }
 0x17d   : > { %v4933_v13 = vadd.f32 %v3745_v27, %v4755_v60  ;;  %v4936_v41 = vadd.f32 %v3809_v5, %v4860_v35  ;;  %v3748_v38 = vadd.f32 %v3747_v43, %v3746_v31  ;;  %v3812_v14 = vadd.f32 %v3811_v40, %v3810_v26 }
 0x17f   : > { %v4939_v17 = vadd.f32 %v3748_v38, %v4761_v4  ;;  %v4942_v42 = vadd.f32 %v3812_v14, %v4863_v39 }
 0x181   : > { %v3749_v48 = vpop.f32.mrb[68].mxu1  ;;  %v3813_v45 = vpop.f32.mrb[68].mxu0 }
 0x182   : > { %v3750_v57 = vpop.f32.mrb[69].mxu1  ;;  %v3814_v49 = vpop.f32.mrb[69].mxu0 }
 0x183   : > { %v3751_v51 = vadd.f32 %v3750_v57, %v3749_v48  ;;  %v3815_v56 = vadd.f32 %v3814_v49, %v3813_v45  ;;  %v3752_v59 = vpop.f32.mrb[70].mxu1  ;;  %v3816_v60 = vpop.f32.mrb[70].mxu0 }
 0x184   : > { %v3753_v61 = vpop.f32.mrb[71].mxu1  ;;  %v3817_v30 = vpop.f32.mrb[71].mxu0 }
 0x185   : > { %v4945_v35 = vadd.f32 %v3751_v51, %v4767_v12  ;;  %v4948_v1 = vadd.f32 %v3815_v56, %v4866_v0  ;;  %v3754_v4 = vadd.f32 %v3753_v61, %v3752_v59  ;;  %v3818_v6 = vadd.f32 %v3817_v30, %v3816_v60 }
 0x187   : > { %v4951_v39 = vadd.f32 %v3754_v4, %v4773_v20  ;;  %v4954_v7 = vadd.f32 %v3818_v6, %v4869_v58 }
 0x189   : > { %v3755_v3 = vpop.f32.mrb[72].mxu1  ;;  %v3819_v9 = vpop.f32.mrb[72].mxu0 }
 0x18a   : > { %v3756_v15 = vpop.f32.mrb[73].mxu1  ;;  %v3820_v32 = vpop.f32.mrb[73].mxu0 }
 0x18b   : > { %v3757_v46 = vadd.f32 %v3756_v15, %v3755_v3  ;;  %v3821_v62 = vadd.f32 %v3820_v32, %v3819_v9  ;;  %v3758_v53 = vpop.f32.mrb[74].mxu1  ;;  %v3822_v12 = vpop.f32.mrb[74].mxu0 }
 0x18c   : > { %v3759_v24 = vpop.f32.mrb[75].mxu1  ;;  %v3823_v27 = vpop.f32.mrb[75].mxu0 }
 0x18d   : > { %v4957_v0 = vadd.f32 %v3757_v46, %v4779_v28  ;;  %v4960_v5 = vadd.f32 %v3821_v62, %v4874_v37  ;;  %v3760_v20 = vadd.f32 %v3759_v24, %v3758_v53  ;;  %v3824_v31 = vadd.f32 %v3823_v27, %v3822_v12 }
 0x18f   : > { %v4963_v58 = vadd.f32 %v3760_v20, %v4785_v36  ;;  %v4966_v26 = vadd.f32 %v3824_v31, %v4877_v18 }
 0x191   : > { %v3761_v43 = vpop.f32.mrb[76].mxu1  ;;  %v3825_v40 = vpop.f32.mrb[76].mxu0 }
 0x192   : > { %v3762_v38 = vpop.f32.mrb[77].mxu1  ;;  %v3826_v14 = vpop.f32.mrb[77].mxu0 }
 0x193   : > { %v3763_v48 = vadd.f32 %v3762_v38, %v3761_v43  ;;  %v3827_v45 = vadd.f32 %v3826_v14, %v3825_v40  ;;  %v3764_v57 = vpop.f32.mrb[78].mxu1  ;;  %v3828_v28 = vpop.f32.mrb[78].mxu0 }
 0x194   : > { %v3765_v49 = vpop.f32.mrb[79].mxu1  ;;  %v3829_v51 = vpop.f32.mrb[79].mxu0 }
 0x195   : > { %v4969_v37 = vadd.f32 %v3763_v48, %v4791_v44  ;;  %v4972_v56 = vadd.f32 %v3827_v45, %v4882_v34  ;;  %v3766_v36 = vadd.f32 %v3765_v49, %v3764_v57  ;;  %v3830_v59 = vadd.f32 %v3829_v51, %v3828_v28 }
 0x197   : > { %v4975_v18 = vadd.f32 %v3766_v36, %v4797_v52  ;;  %v4978_v60 = vadd.f32 %v3830_v59, %v4887_v54 }
 0x199   : > { %v3831_v61 = vpop.f32.mrb[80].mxu0  ;;  %v3895_v30 = vpop.f32.mrb[80].mxu1 }
 0x19a   : > { %v3832_v4 = vpop.f32.mrb[81].mxu0  ;;  %v3896_v6 = vpop.f32.mrb[81].mxu1 }
 0x19b   : > { %v3833_v3 = vadd.f32 %v3832_v4, %v3831_v61  ;;  %v3897_v9 = vadd.f32 %v3896_v6, %v3895_v30  ;;  %v3834_v15 = vpop.f32.mrb[82].mxu0  ;;  %v3898_v44 = vpop.f32.mrb[82].mxu1 }
 0x19c   : > { %v3835_v32 = vpop.f32.mrb[83].mxu0  ;;  %v3899_v46 = vpop.f32.mrb[83].mxu1 }
 0x19d   : > { %v4981_v34 = vadd.f32 %v3833_v3, %v4889_v10  ;;  %v3836_v62 = vadd.f32 %v3835_v32, %v3834_v15  ;;  %v3900_v53 = vadd.f32 %v3899_v46, %v3898_v44  ;;  %v4984_v52 = vadd.f32 %v3897_v9, %v4892_v2 }
 0x19f   : > { %v4987_v54 = vadd.f32 %v3836_v62, %v4894_v63  ;;  %v4990_v12 = vadd.f32 %v3900_v53, %v4897_v16 }
 0x1a1   : > { %v3837_v24 = vpop.f32.mrb[84].mxu0  ;;  %v3901_v27 = vpop.f32.mrb[84].mxu1 }
 0x1a2   : > { %v3838_v20 = vpop.f32.mrb[85].mxu0  ;;  %v3902_v31 = vpop.f32.mrb[85].mxu1 }
 0x1a3   : > { %v3839_v43 = vadd.f32 %v3838_v20, %v3837_v24  ;;  %v3903_v40 = vadd.f32 %v3902_v31, %v3901_v27  ;;  %v3840_v38 = vpop.f32.mrb[86].mxu0  ;;  %v3904_v10 = vpop.f32.mrb[86].mxu1 }
 0x1a4   : > { %v3841_v14 = vpop.f32.mrb[87].mxu0  ;;  %v3905_v48 = vpop.f32.mrb[87].mxu1 }
 0x1a5   : > { %v4993_v45 = vadd.f32 %v3839_v43, %v4899_v22  ;;  %v3842_v2 = vadd.f32 %v3841_v14, %v3840_v38  ;;  %v3906_v57 = vadd.f32 %v3905_v48, %v3904_v10  ;;  %v4996_v63 = vadd.f32 %v3903_v40, %v4902_v8 }
 0x1a7   : > { %v4999_v16 = vadd.f32 %v3842_v2, %v4904_v25  ;;  %v5002_v28 = vadd.f32 %v3906_v57, %v4907_v11 }
 0x1a9   : > { %v3843_v49 = vpop.f32.mrb[88].mxu0  ;;  %v3907_v51 = vpop.f32.mrb[88].mxu1 }
 0x1aa   : > { %v3844_v36 = vpop.f32.mrb[89].mxu0  ;;  %v3908_v59 = vpop.f32.mrb[89].mxu1 }
 0x1ab   : > { %v3845_v61 = vadd.f32 %v3844_v36, %v3843_v49  ;;  %v3909_v30 = vadd.f32 %v3908_v59, %v3907_v51  ;;  %v3846_v4 = vpop.f32.mrb[90].mxu0  ;;  %v3910_v22 = vpop.f32.mrb[90].mxu1 }
 0x1ac   : > { %v3847_v6 = vpop.f32.mrb[91].mxu0  ;;  %v3911_v3 = vpop.f32.mrb[91].mxu1 }
 0x1ad   : > { %v5005_v9 = vadd.f32 %v3845_v61, %v4910_v29  ;;  %v3848_v8 = vadd.f32 %v3847_v6, %v3846_v4  ;;  %v3912_v15 = vadd.f32 %v3911_v3, %v3910_v22  ;;  %v5008_v25 = vadd.f32 %v3909_v30, %v4913_v47 }
 0x1af   : > { %v5011_v11 = vadd.f32 %v3848_v8, %v4915_v33  ;;  %v5014_v44 = vadd.f32 %v3912_v15, %v4918_v21 }
 0x1b1   : > { %v3849_v32 = vpop.f32.mrb[92].mxu0  ;;  %v3913_v46 = vpop.f32.mrb[92].mxu1 }
 0x1b2   : > { %v3850_v62 = vpop.f32.mrb[93].mxu0  ;;  %v3914_v53 = vpop.f32.mrb[93].mxu1 }
 0x1b3   : > { %v3851_v24 = vadd.f32 %v3850_v62, %v3849_v32  ;;  %v3915_v27 = vadd.f32 %v3914_v53, %v3913_v46  ;;  %v3852_v20 = vpop.f32.mrb[94].mxu0  ;;  %v3916_v29 = vpop.f32.mrb[94].mxu1 }
 0x1b4   : > { %v3853_v31 = vpop.f32.mrb[95].mxu0  ;;  %v3917_v43 = vpop.f32.mrb[95].mxu1 }
 0x1b5   : > { %v5017_v40 = vadd.f32 %v3851_v24, %v4921_v50  ;;  %v3854_v47 = vadd.f32 %v3853_v31, %v3852_v20  ;;  %v3918_v38 = vadd.f32 %v3917_v43, %v3916_v29  ;;  %v5020_v33 = vadd.f32 %v3915_v27, %v4924_v23 }
 0x1b7   : > { %v5023_v21 = vadd.f32 %v3854_v47, %v4927_v55  ;;  %v5026_v10 = vadd.f32 %v3918_v38, %v4930_v19 }
 0x1b9   : > { %v3855_v14 = vpop.f32.mrb[96].mxu0  ;;  %v3919_v48 = vpop.f32.mrb[96].mxu1 }
 0x1ba   : > { %v3856_v2 = vpop.f32.mrb[97].mxu0  ;;  %v3920_v57 = vpop.f32.mrb[97].mxu1 }
 0x1bb   : > { %v3857_v49 = vadd.f32 %v3856_v2, %v3855_v14  ;;  %v3921_v51 = vadd.f32 %v3920_v57, %v3919_v48  ;;  %v3858_v36 = vpop.f32.mrb[98].mxu0  ;;  %v3922_v50 = vpop.f32.mrb[98].mxu1 }
 0x1bc   : > { %v3859_v59 = vpop.f32.mrb[99].mxu0  ;;  %v3923_v61 = vpop.f32.mrb[99].mxu1 }
 0x1bd   : > { %v5029_v30 = vadd.f32 %v3857_v49, %v4933_v13  ;;  %v3860_v23 = vadd.f32 %v3859_v59, %v3858_v36  ;;  %v3924_v4 = vadd.f32 %v3923_v61, %v3922_v50  ;;  %v5032_v55 = vadd.f32 %v3921_v51, %v4936_v41 }
 0x1bf   : > { %v5035_v19 = vadd.f32 %v3860_v23, %v4939_v17  ;;  %v5038_v22 = vadd.f32 %v3924_v4, %v4942_v42 }
 0x1c1   : > { %v3861_v6 = vpop.f32.mrb[100].mxu0  ;;  %v3925_v3 = vpop.f32.mrb[100].mxu1 }
 0x1c2   : > { %v3862_v8 = vpop.f32.mrb[101].mxu0  ;;  %v3926_v15 = vpop.f32.mrb[101].mxu1 }
 0x1c3   : > { %v3863_v32 = vadd.f32 %v3862_v8, %v3861_v6  ;;  %v3927_v46 = vadd.f32 %v3926_v15, %v3925_v3  ;;  %v3864_v62 = vpop.f32.mrb[102].mxu0  ;;  %v3928_v13 = vpop.f32.mrb[102].mxu1 }
 0x1c4   : > { %v3865_v53 = vpop.f32.mrb[103].mxu0  ;;  %v3929_v24 = vpop.f32.mrb[103].mxu1 }
 0x1c5   : > { %v5041_v27 = vadd.f32 %v3863_v32, %v4945_v35  ;;  %v3866_v41 = vadd.f32 %v3865_v53, %v3864_v62  ;;  %v3930_v20 = vadd.f32 %v3929_v24, %v3928_v13  ;;  %v5044_v17 = vadd.f32 %v3927_v46, %v4948_v1  ;;  %v5093_v53 = vld [vmem:[%s5342_s2] ss:$0 sm:$0xff]  ;;  %v3513_v24 = vld [vmem:[%s5076_s26 + $0x8] sm:$0xff]  }
 0x1c7   : > { %v5047_v42 = vadd.f32 %v3866_v41, %v4951_v39  ;;  %v5050_v29 = vadd.f32 %v3930_v20, %v4954_v7  ;;  %v3370_v41 = vld [vmem:[%s5076_s26] sm:$0xff]  }
 0x1c9   : > { %v3867_v31 = vpop.f32.mrb[104].mxu0  ;;  %v3931_v43 = vpop.f32.mrb[104].mxu1 }
 0x1ca   : > { %v3868_v47 = vpop.f32.mrb[105].mxu0  ;;  %v3932_v38 = vpop.f32.mrb[105].mxu1 }
 0x1cb   : > { %v3869_v14 = vadd.f32 %v3868_v47, %v3867_v31  ;;  %v3933_v48 = vadd.f32 %v3932_v38, %v3931_v43  ;;  %v3870_v2 = vpop.f32.mrb[106].mxu0  ;;  %v3934_v35 = vpop.f32.mrb[106].mxu1  ;;  %v5101_v31 = vld [vmem:[%s5343_s3] ss:$0 sm:$0xff] }
 0x1cc   : > { %v3871_v57 = vpop.f32.mrb[107].mxu0  ;;  %v3935_v49 = vpop.f32.mrb[107].mxu1 }
 0x1cd   : > { %v5053_v1 = vadd.f32 %v3869_v14, %v4957_v0  ;;  %v3872_v51 = vadd.f32 %v3871_v57, %v3870_v2  ;;  %v3936_v39 = vadd.f32 %v3935_v49, %v3934_v35  ;;  %v5056_v36 = vadd.f32 %v3933_v48, %v4960_v5 }
 0x1ce   : > { %v3375_v2 = vunpack.c.l.bf16 %v3513_v24 }
 0x1cf   : > { %v5059_v7 = vadd.f32 %v3872_v51, %v4963_v58  ;;  %v5062_v50 = vadd.f32 %v3936_v39, %v4966_v26 }
 0x1d1   : > { %v3873_v59 = vpop.f32.mrb[108].mxu0  ;;  %v3937_v61 = vpop.f32.mrb[108].mxu1 }
 0x1d2   : > { %v3874_v23 = vpop.f32.mrb[109].mxu0  ;;  %v3938_v4 = vpop.f32.mrb[109].mxu1 }
 0x1d3   : > { %v3875_v6 = vadd.f32 %v3874_v23, %v3873_v59  ;;  %v3939_v0 = vadd.f32 %v3938_v4, %v3937_v61  ;;  %v3876_v3 = vpop.f32.mrb[110].mxu0  ;;  %v3940_v8 = vpop.f32.mrb[110].mxu1  ;;  %v3376_v4 = vunpack.c.h.bf16 %v3513_v24 }
 0x1d4   : > { %v3877_v15 = vpop.f32.mrb[111].mxu0  ;;  %v3941_v5 = vpop.f32.mrb[111].mxu1 }
 0x1d5   : > { %v5066_v32 = vadd.f32 %v3875_v6, %v4969_v37  ;;  %v3878_v58 = vadd.f32 %v3877_v15, %v3876_v3  ;;  %v3942_v46 = vadd.f32 %v3941_v5, %v3940_v8  ;;  %v5069_v26 = vadd.f32 %v3939_v0, %v4972_v56  ;;  %v5117_v6 = vld [vmem:[%s5076_s26 + $0x18] sm:$0xff]  }
 0x1d6   : > { %v3372_v8 = vunpack.c.h.bf16 %v3370_v41 }
 0x1d7   : > { %v5080_v62 = vadd.f32 %v3878_v58, %v4975_v18  ;;  %v5083_v37 = vadd.f32 %v3942_v46, %v4978_v60 }
 0x1d9   : > { %v3943_v13 = vpop.f32.mrb[112].mxu1  ;;  %v4033_v56 = vpop.f32.mrb[112].mxu0 }
 0x1da   : > { %v2454_v18 = vadd.f32 %v4033_v56, %v4996_v63  ;;  %v3944_v60 = vpop.f32.mrb[113].mxu1  ;;  %v2445_v20 = vpop.f32.mrb[113].mxu0  ;;  %v3371_v63 = vunpack.c.l.bf16 %v3370_v41  ;;  %v3383_v56 = vunpack.c.l.bf16 %v5117_v6 }
 0x1db   : > { %v3945_v43 = vadd.f32 %v3944_v60, %v3943_v13  ;;  %v2446_v47 = vadd.f32 %v2445_v20, %v4984_v52  ;;  %v3946_v38 = vpop.f32.mrb[114].mxu1  ;;  %v4034_v14 = vpop.f32.mrb[114].mxu0 }
 0x1dc   : > { %2574 = vst [vmem:[%s5088_s30 + $0x10] sm:$0xff] %v2454_v18  ;;  %v2613_v48 = vmul.f32 %v5093_v53, %v2454_v18  ;;  %v2457_v35 = vadd.f32 %v4034_v14, %v5002_v28  ;;  %v3947_v57 = vpop.f32.mrb[115].mxu1  ;;  %v2448_v49 = vpop.f32.mrb[115].mxu0  ;;  %v5120_v28 = vld [vmem:[%s5076_s26 + $0x10] sm:$0xff]  }
 0x1dd   : > { %2572 = vst [vmem:[%s5088_s30] sm:$0xff] %v2446_v47  ;;  %v2611_v51 = vmul.f32 %v5093_v53, %v2446_v47  ;;  %v3948_v39 = vadd.f32 %v3947_v57, %v3946_v38  ;;  %v2449_v52 = vadd.f32 %v2448_v49, %v4990_v12  ;;  %v5111_v59 = vadd.f32 %v3945_v43, %v4981_v34 }
 0x1de   : > { %v2652_v61 = vadd.f32 %v5101_v31, %v2613_v48  ;;  %2575 = vst [vmem:[%s5088_s30 + $0x18] sm:$0xff] %v2457_v35  ;;  %v2614_v23 = vmul.f32 %v5093_v53, %v2457_v35  ;;  %v3379_v24 = vunpack.c.l.bf16 %v5120_v28  ;;  %v3380_v43 = vunpack.c.h.bf16 %v5120_v28  ;;  %v5153_v28 = vld [vmem:[%s5076_s26 + $0x28] sm:$0xff]  }
 0x1df   : > { %v2650_v0 = vadd.f32 %v5101_v31, %v2611_v51  ;;  %2573 = vst [vmem:[%s5088_s30 + $0x8] sm:$0xff] %v2449_v52  ;;  %v2612_v3 = vmul.f32 %v5093_v53, %v2449_v52  ;;  %v5126_v12 = vadd.f32 %v3948_v39, %v4987_v54  ;;  %v3384_v54 = vunpack.c.h.bf16 %v5117_v6 }
 0x1e0   : > { %v2748_v34 = vadd.f32 %v3375_v2, %v2652_v61  ;;  %v2653_v15 = vadd.f32 %v5101_v31, %v2614_v23 }
 0x1e1   : > { %v2746_v5 = vadd.f32 %v3371_v63, %v2650_v0  ;;  %v2651_v58 = vadd.f32 %v5101_v31, %v2612_v3  ;;  %v3949_v46 = vpop.f32.mrb[116].mxu1  ;;  %v4037_v13 = vpop.f32.mrb[116].mxu0  ;;  %v5156_v0 = vld [vmem:[%s5076_s26 + $0x20] sm:$0xff]  }
 0x1e2   : > { %v2749_v18 = vadd.f32 %v3376_v4, %v2653_v15  ;;  %v2470_v60 = vadd.f32 %v4037_v13, %v5020_v33  ;;  %v3950_v41 = vpop.f32.mrb[117].mxu1  ;;  %v2461_v20 = vpop.f32.mrb[117].mxu0  ;;  %v2780_v47 = vmax.f32 %v2748_v34, 0.0 }
 0x1e3   : > { %v2747_v38 = vadd.f32 %v3372_v8, %v2651_v58  ;;  %v3951_v14 = vadd.f32 %v3950_v41, %v3949_v46  ;;  %v2462_v48 = vadd.f32 %v2461_v20, %v5008_v25  ;;  %v3952_v2 = vpop.f32.mrb[118].mxu1  ;;  %v4038_v63 = vpop.f32.mrb[118].mxu0  ;;  %v2778_v35 = vmax.f32 %v2746_v5, 0.0 }
 0x1e4   : > { %v2781_v57 = vmax.f32 %v2749_v18, 0.0  ;;  %2578 = vst [vmem:[%s5088_s30 + $0x30] sm:$0xff] %v2470_v60  ;;  %v2617_v33 = vmul.f32 %v5093_v53, %v2470_v60  ;;  %v2473_v49 = vadd.f32 %v4038_v63, %v5026_v10  ;;  %v3953_v51 = vpop.f32.mrb[119].mxu1  ;;  %v2464_v39 = vpop.f32.mrb[119].mxu0  ;;  %v3391_v60 = vunpack.c.l.bf16 %v5153_v28 }
 0x1e5   : > { %v2779_v25 = vmax.f32 %v2747_v38, 0.0  ;;  %2576 = vst [vmem:[%s5088_s30 + $0x20] sm:$0xff] %v2462_v48  ;;  %v2615_v52 = vmul.f32 %v5093_v53, %v2462_v48  ;;  %v3954_v61 = vadd.f32 %v3953_v51, %v3952_v2  ;;  %v2465_v23 = vadd.f32 %v2464_v39, %v5014_v44 }
 0x1e6   : > { %v3441_v4 = vpack.c.bf16 %v2781_v57, %v2780_v47  ;;  %v2656_v10 = vadd.f32 %v5101_v31, %v2617_v33  ;;  %2579 = vst [vmem:[%s5088_s30 + $0x38] sm:$0xff] %v2473_v49  ;;  %v2618_v6 = vmul.f32 %v5093_v53, %v2473_v49  ;;  %v5159_v3 = vadd.f32 %v3951_v14, %v4993_v45 }
 0x1e7   : > { %v3436_v8 = vpack.c.bf16 %v2779_v25, %v2778_v35  ;;  %v2654_v34 = vadd.f32 %v5101_v31, %v2615_v52  ;;  %2577 = vst [vmem:[%s5088_s30 + $0x28] sm:$0xff] %v2465_v23  ;;  %v2616_v44 = vmul.f32 %v5093_v53, %v2465_v23  ;;  %v5165_v15 = vadd.f32 %v3954_v61, %v4999_v16 }
 0x1e8   : > { %3528 = vst [vmem:[%s5144_s13 + $0x8] sm:$0xff] %v3441_v4   ;;  %v2752_v5 = vadd.f32 %v3383_v56, %v2656_v10  ;;  %v2657_v58 = vadd.f32 %v5101_v31, %v2618_v6  ;;  %v3387_v41 = vunpack.c.l.bf16 %v5156_v0  ;;  %v3392_v56 = vunpack.c.h.bf16 %v5153_v28  ;;  %v5187_v10 = vld [vmem:[%s5076_s26 + $0x38] sm:$0xff]  }
 0x1e9   : > { %3437 = vst [vmem:[%s5144_s13] sm:$0xff] %v3436_v8   ;;  %v2750_v46 = vadd.f32 %v3379_v24, %v2654_v34  ;;  %v2655_v13 = vadd.f32 %v5101_v31, %v2616_v44  ;;  %v3955_v18 = vpop.f32.mrb[120].mxu1  ;;  %v4041_v45 = vpop.f32.mrb[120].mxu0  ;;  %v3388_v14 = vunpack.c.h.bf16 %v5156_v0 }
 0x1ea   : > { %v2753_v20 = vadd.f32 %v3384_v54, %v2657_v58  ;;  %v2486_v47 = vadd.f32 %v4041_v45, %v5044_v17  ;;  %v3956_v16 = vpop.f32.mrb[121].mxu1  ;;  %v2477_v38 = vpop.f32.mrb[121].mxu0  ;;  %v2784_v24 = vmax.f32 %v2752_v5, 0.0 }
 0x1eb   : > { %v2751_v48 = vadd.f32 %v3380_v43, %v2655_v13  ;;  %v3957_v2 = vadd.f32 %v3956_v16, %v3955_v18  ;;  %v2478_v63 = vadd.f32 %v2477_v38, %v5032_v55  ;;  %v3958_v35 = vpop.f32.mrb[122].mxu1  ;;  %v4042_v57 = vpop.f32.mrb[122].mxu0  ;;  %v2782_v33 = vmax.f32 %v2750_v46, 0.0 }
 0x1ec   : > { %v2785_v54 = vmax.f32 %v2753_v20, 0.0  ;;  %2582 = vst [vmem:[%s5088_s30 + $0x50] sm:$0xff] %v2486_v47  ;;  %v2621_v17 = vmul.f32 %v5093_v53, %v2486_v47  ;;  %v2489_v49 = vadd.f32 %v4042_v57, %v5050_v29  ;;  %v3959_v51 = vpop.f32.mrb[123].mxu1  ;;  %v2480_v39 = vpop.f32.mrb[123].mxu0  ;;  %v5190_v29 = vld [vmem:[%s5076_s26 + $0x30] sm:$0xff]   ;;  %v3399_v13 = vunpack.c.l.bf16 %v5187_v10 }
 0x1ed   : > { %v2783_v25 = vmax.f32 %v2751_v48, 0.0  ;;  %2580 = vst [vmem:[%s5088_s30 + $0x40] sm:$0xff] %v2478_v63  ;;  %v2619_v55 = vmul.f32 %v5093_v53, %v2478_v63  ;;  %v3960_v43 = vadd.f32 %v3959_v51, %v3958_v35  ;;  %v2481_v52 = vadd.f32 %v2480_v39, %v5038_v22 }
 0x1ee   : > { %v3451_v61 = vpack.c.bf16 %v2785_v54, %v2784_v24  ;;  %v2660_v23 = vadd.f32 %v5101_v31, %v2621_v17  ;;  %2583 = vst [vmem:[%s5088_s30 + $0x58] sm:$0xff] %v2489_v49  ;;  %v2622_v4 = vmul.f32 %v5093_v53, %v2489_v49  ;;  %v5193_v6 = vadd.f32 %v3957_v2, %v5005_v9 }
 0x1ef   : > { %v3446_v28 = vpack.c.bf16 %v2783_v25, %v2782_v33  ;;  %v2658_v0 = vadd.f32 %v5101_v31, %v2619_v55  ;;  %2581 = vst [vmem:[%s5088_s30 + $0x48] sm:$0xff] %v2481_v52  ;;  %v2620_v22 = vmul.f32 %v5093_v53, %v2481_v52  ;;  %v5199_v8 = vadd.f32 %v3960_v43, %v5011_v11  ;;  %v5221_v55 = vld [vmem:[%s5076_s26 + $0x48] sm:$0xff]  }
 0x1f0   : > { %3530 = vst [vmem:[%s5144_s13 + $0x18] sm:$0xff] %v3451_v61   ;;  %v2756_v34 = vadd.f32 %v3391_v60, %v2660_v23  ;;  %v2661_v44 = vadd.f32 %v5101_v31, %v2622_v4  ;;  %v3395_v18 = vunpack.c.l.bf16 %v5190_v29  ;;  %v3400_v60 = vunpack.c.h.bf16 %v5187_v10 }
 0x1f1   : > { %3529 = vst [vmem:[%s5144_s13 + $0x10] sm:$0xff] %v3446_v28   ;;  %v2754_v5 = vadd.f32 %v3387_v41, %v2658_v0  ;;  %v2659_v58 = vadd.f32 %v5101_v31, %v2620_v22  ;;  %v3961_v46 = vpop.f32.mrb[124].mxu1  ;;  %v4045_v9 = vpop.f32.mrb[124].mxu0  ;;  %v3396_v16 = vunpack.c.h.bf16 %v5190_v29  ;;  %v3407_v22 = vunpack.c.l.bf16 %v5221_v55 }
 0x1f2   : > { %v2757_v45 = vadd.f32 %v3392_v56, %v2661_v44  ;;  %v2502_v20 = vadd.f32 %v4045_v9, %v5069_v26  ;;  %v3962_v11 = vpop.f32.mrb[125].mxu1  ;;  %v2493_v47 = vpop.f32.mrb[125].mxu0  ;;  %v2788_v41 = vmax.f32 %v2756_v34, 0.0 }
 0x1f3   : > { %v2755_v38 = vadd.f32 %v3388_v14, %v2659_v58  ;;  %v3963_v24 = vadd.f32 %v3962_v11, %v3961_v46  ;;  %v2494_v48 = vadd.f32 %v2493_v47, %v5056_v36  ;;  %v3964_v2 = vpop.f32.mrb[126].mxu1  ;;  %v4046_v63 = vpop.f32.mrb[126].mxu0  ;;  %v2786_v35 = vmax.f32 %v2754_v5, 0.0 }
 0x1f4   : > { %v2789_v56 = vmax.f32 %v2757_v45, 0.0  ;;  %2586 = vst [vmem:[%s5088_s30 + $0x70] sm:$0xff] %v2502_v20  ;;  %v2625_v26 = vmul.f32 %v5093_v53, %v2502_v20  ;;  %v2505_v57 = vadd.f32 %v4046_v63, %v5083_v37  ;;  %v3965_v33 = vpop.f32.mrb[127].mxu1  ;;  %v2496_v54 = vpop.f32.mrb[127].mxu0  ;;  %v5224_v37 = vld [vmem:[%s5076_s26 + $0x40] sm:$0xff]   ;;  %v3408_v46 = vunpack.c.h.bf16 %v5221_v55 }
 0x1f5   : > { %v2787_v17 = vmax.f32 %v2755_v38, 0.0  ;;  %2584 = vst [vmem:[%s5088_s30 + $0x60] sm:$0xff] %v2494_v48  ;;  %v2623_v36 = vmul.f32 %v5093_v53, %v2494_v48  ;;  %v3966_v14 = vadd.f32 %v3965_v33, %v3964_v2  ;;  %v2497_v49 = vadd.f32 %v2496_v54, %v5062_v50 }
 0x1f6   : > { %v3461_v51 = vpack.c.bf16 %v2789_v56, %v2788_v41  ;;  %v2664_v39 = vadd.f32 %v5101_v31, %v2625_v26  ;;  %2587 = vst [vmem:[%s5088_s30 + $0x78] sm:$0xff] %v2505_v57  ;;  %v2626_v25 = vmul.f32 %v5093_v53, %v2505_v57  ;;  %v5227_v43 = vadd.f32 %v3963_v24, %v5017_v40  ;;  %v5255_v57 = vld [vmem:[%s5076_s26 + $0x58] sm:$0xff]  }
 0x1f7   : > { %v3456_v52 = vpack.c.bf16 %v2787_v17, %v2786_v35  ;;  %v2662_v61 = vadd.f32 %v5101_v31, %v2623_v36  ;;  %2585 = vst [vmem:[%s5088_s30 + $0x68] sm:$0xff] %v2497_v49  ;;  %v2624_v50 = vmul.f32 %v5093_v53, %v2497_v49  ;;  %v5233_v23 = vadd.f32 %v3966_v14, %v5023_v21 }
 0x1f8   : > { %3532 = vst [vmem:[%s5144_s13 + $0x28] sm:$0xff] %v3461_v51   ;;  %v2760_v4 = vadd.f32 %v3399_v13, %v2664_v39  ;;  %v2665_v10 = vadd.f32 %v5101_v31, %v2626_v25  ;;  %v3403_v34 = vunpack.c.l.bf16 %v5224_v37  ;;  %v3404_v9 = vunpack.c.h.bf16 %v5224_v37 }
 0x1f9   : > { %3531 = vst [vmem:[%s5144_s13 + $0x20] sm:$0xff] %v3456_v52   ;;  %v2758_v29 = vadd.f32 %v3395_v18, %v2662_v61  ;;  %v2663_v28 = vadd.f32 %v5101_v31, %v2624_v50  ;;  %v3967_v0 = vpop.f32.mrb[128].mxu1  ;;  %v4049_v40 = vpop.f32.mrb[128].mxu0  ;;  %v3415_v55 = vunpack.c.l.bf16 %v5255_v57 }
 0x1fa   : > { %v2761_v44 = vadd.f32 %v3400_v60, %v2665_v10  ;;  %v2518_v5 = vadd.f32 %v4049_v40, %v5159_v3  ;;  %v3968_v21 = vpop.f32.mrb[129].mxu1  ;;  %v2509_v58 = vpop.f32.mrb[129].mxu0  ;;  %v2792_v13 = vmax.f32 %v2760_v4, 0.0  ;;  %v3416_v4 = vunpack.c.h.bf16 %v5255_v57 }
 0x1fb   : > { %v2759_v18 = vadd.f32 %v3396_v16, %v2663_v28  ;;  %v3969_v45 = vadd.f32 %v3968_v21, %v3967_v0  ;;  %v2510_v20 = vadd.f32 %v2509_v58, %v5111_v59  ;;  %v3970_v11 = vpop.f32.mrb[130].mxu1  ;;  %v4050_v47 = vpop.f32.mrb[130].mxu0  ;;  %v2790_v41 = vmax.f32 %v2758_v29, 0.0 }
 0x1fc   : > { %v2793_v60 = vmax.f32 %v2761_v44, 0.0  ;;  %2590 = vst [vmem:[%s5088_s30 + $0x90] sm:$0xff] %v2518_v5  ;;  %v2629_v3 = vmul.f32 %v5093_v53, %v2518_v5  ;;  %v2521_v38 = vadd.f32 %v4050_v47, %v5165_v15  ;;  %v3971_v24 = vpop.f32.mrb[131].mxu1  ;;  %v2512_v48 = vpop.f32.mrb[131].mxu0  ;;  %v5258_v15 = vld [vmem:[%s5076_s26 + $0x50] sm:$0xff]   ;;  %v3525_v47 = vld [vmem:[%s5076_s26 + $0x68] sm:$0xff]  }
 0x1fd   : > { %v2791_v2 = vmax.f32 %v2759_v18, 0.0  ;;  %2588 = vst [vmem:[%s5088_s30 + $0x80] sm:$0xff] %v2510_v20  ;;  %v2627_v59 = vmul.f32 %v5093_v53, %v2510_v20  ;;  %v3972_v16 = vadd.f32 %v3971_v24, %v3970_v11  ;;  %v2513_v63 = vadd.f32 %v2512_v48, %v5126_v12 }
 0x1fe   : > { %v3471_v35 = vpack.c.bf16 %v2793_v60, %v2792_v13  ;;  %v2668_v56 = vadd.f32 %v5101_v31, %v2629_v3  ;;  %2591 = vst [vmem:[%s5088_s30 + $0x98] sm:$0xff] %v2521_v38  ;;  %v2630_v26 = vmul.f32 %v5093_v53, %v2521_v38  ;;  %v5261_v33 = vadd.f32 %v3969_v45, %v5029_v30 }
 0x1ff   : > { %v3466_v54 = vpack.c.bf16 %v2791_v2, %v2790_v41  ;;  %v2666_v17 = vadd.f32 %v5101_v31, %v2627_v59  ;;  %2589 = vst [vmem:[%s5088_s30 + $0x88] sm:$0xff] %v2513_v63  ;;  %v2628_v12 = vmul.f32 %v5093_v53, %v2513_v63  ;;  %v5267_v36 = vadd.f32 %v3972_v16, %v5035_v19  ;;  %v3524_v41 = vld [vmem:[%s5076_s26 + $0x60] sm:$0xff]  }
 0x200   : > { %3534 = vst [vmem:[%s5144_s13 + $0x38] sm:$0xff] %v3471_v35   ;;  %v2764_v14 = vadd.f32 %v3407_v22, %v2668_v56  ;;  %v2669_v49 = vadd.f32 %v5101_v31, %v2630_v26  ;;  %v3411_v37 = vunpack.c.l.bf16 %v5258_v15  ;;  %v3412_v10 = vunpack.c.h.bf16 %v5258_v15 }
 0x201   : > { %3533 = vst [vmem:[%s5144_s13 + $0x30] sm:$0xff] %v3466_v54   ;;  %v2762_v51 = vadd.f32 %v3403_v34, %v2666_v17  ;;  %v2667_v39 = vadd.f32 %v5101_v31, %v2628_v12  ;;  %v3973_v25 = vpop.f32.mrb[132].mxu1  ;;  %v4053_v30 = vpop.f32.mrb[132].mxu0  ;;  %v3423_v63 = vunpack.c.l.bf16 %v3525_v47  ;;  %v3419_v35 = vunpack.c.l.bf16 %v3524_v41 }
 0x202   : > { %v2765_v52 = vadd.f32 %v3408_v46, %v2669_v49  ;;  %v2534_v61 = vadd.f32 %v4053_v30, %v5227_v43  ;;  %v3974_v19 = vpop.f32.mrb[133].mxu1  ;;  %v2525_v50 = vpop.f32.mrb[133].mxu0  ;;  %v2796_v29 = vmax.f32 %v2764_v14, 0.0  ;;  %v3424_v54 = vunpack.c.h.bf16 %v3525_v47 }
 0x203   : > { %v2763_v28 = vadd.f32 %v3404_v9, %v2667_v39  ;;  %v3975_v0 = vadd.f32 %v3974_v19, %v3973_v25  ;;  %v2526_v40 = vadd.f32 %v2525_v50, %v5193_v6  ;;  %v3976_v22 = vpop.f32.mrb[134].mxu1  ;;  %v4054_v34 = vpop.f32.mrb[134].mxu0  ;;  %v2794_v44 = vmax.f32 %v2762_v51, 0.0 }
 0x204   : > { %v2797_v5 = vmax.f32 %v2765_v52, 0.0  ;;  %2594 = vst [vmem:[%s5088_s30 + $0xb0] sm:$0xff] %v2534_v61  ;;  %v2633_v43 = vmul.f32 %v5093_v53, %v2534_v61  ;;  %v2537_v21 = vadd.f32 %v4054_v34, %v5233_v23  ;;  %v3977_v58 = vpop.f32.mrb[135].mxu1  ;;  %v2528_v46 = vpop.f32.mrb[135].mxu0 }
 0x205   : > { %v2795_v13 = vmax.f32 %v2763_v28, 0.0  ;;  %2592 = vst [vmem:[%s5088_s30 + $0xa0] sm:$0xff] %v2526_v40  ;;  %v2631_v6 = vmul.f32 %v5093_v53, %v2526_v40  ;;  %v3978_v9 = vadd.f32 %v3977_v58, %v3976_v22  ;;  %v2529_v18 = vadd.f32 %v2528_v46, %v5199_v8 }
 0x206   : > { %v3481_v45 = vpack.c.bf16 %v2797_v5, %v2796_v29  ;;  %v2672_v20 = vadd.f32 %v5101_v31, %v2633_v43  ;;  %2595 = vst [vmem:[%s5088_s30 + $0xb8] sm:$0xff] %v2537_v21  ;;  %v2634_v11 = vmul.f32 %v5093_v53, %v2537_v21  ;;  %v2389_v23 = vadd.f32 %v3975_v0, %v5041_v27 }
 0x207   : > { %v3476_v60 = vpack.c.bf16 %v2795_v13, %v2794_v44  ;;  %v2670_v3 = vadd.f32 %v5101_v31, %v2631_v6  ;;  %2593 = vst [vmem:[%s5088_s30 + $0xa8] sm:$0xff] %v2529_v18  ;;  %v2632_v38 = vmul.f32 %v5093_v53, %v2529_v18  ;;  %v2392_v24 = vadd.f32 %v3978_v9, %v5047_v42 }
 0x208   : > { %3536 = vst [vmem:[%s5144_s13 + $0x48] sm:$0xff] %v3481_v45   ;;  %v2768_v8 = vadd.f32 %v3415_v55, %v2672_v20  ;;  %v2673_v48 = vadd.f32 %v5101_v31, %v2634_v11  ;;  %v3420_v42 = vunpack.c.h.bf16 %v3524_v41  ;;  %v3526_v20 = vld [vmem:[%s5076_s26 + $0x70] sm:$0xff]  }
 0x209   : > { %3535 = vst [vmem:[%s5144_s13 + $0x40] sm:$0xff] %v3476_v60   ;;  %v2766_v2 = vadd.f32 %v3411_v37, %v2670_v3  ;;  %v2671_v59 = vadd.f32 %v5101_v31, %v2632_v38  ;;  %v3979_v16 = vpop.f32.mrb[136].mxu1  ;;  %v4057_v27 = vpop.f32.mrb[136].mxu0 }
 0x20a   : > { %v2769_v56 = vadd.f32 %v3416_v4, %v2673_v48  ;;  %v2550_v26 = vadd.f32 %v4057_v27, %v2389_v23  ;;  %v3980_v57 = vpop.f32.mrb[137].mxu1  ;;  %v2541_v15 = vpop.f32.mrb[137].mxu0  ;;  %v2800_v17 = vmax.f32 %v2768_v8, 0.0 }
 0x20b   : > { %v2767_v12 = vadd.f32 %v3412_v10, %v2671_v59  ;;  %v3981_v14 = vadd.f32 %v3980_v57, %v3979_v16  ;;  %v2542_v49 = vadd.f32 %v2541_v15, %v5261_v33  ;;  %v3982_v51 = vpop.f32.mrb[138].mxu1  ;;  %v4058_v39 = vpop.f32.mrb[138].mxu0  ;;  %v2798_v25 = vmax.f32 %v2766_v2, 0.0  ;;  %v3527_v59 = vld [vmem:[%s5076_s26 + $0x78] sm:$0xff]  }
 0x20c   : > { %v2801_v30 = vmax.f32 %v2769_v56, 0.0  ;;  %2598 = vst [vmem:[%s5088_s30 + $0xd0] sm:$0xff] %v2550_v26  ;;  %v2637_v55 = vmul.f32 %v5093_v53, %v2550_v26  ;;  %v2553_v37 = vadd.f32 %v4058_v39, %v2392_v24  ;;  %v3983_v52 = vpop.f32.mrb[139].mxu1  ;;  %v2544_v61 = vpop.f32.mrb[139].mxu0  ;;  %v3427_v16 = vunpack.c.l.bf16 %v3526_v20 }
 0x20d   : > { %v2799_v19 = vmax.f32 %v2767_v12, 0.0  ;;  %2596 = vst [vmem:[%s5088_s30 + $0xc0] sm:$0xff] %v2542_v49  ;;  %v2635_v50 = vmul.f32 %v5093_v53, %v2542_v49  ;;  %v3984_v4 = vadd.f32 %v3983_v52, %v3982_v51  ;;  %v2545_v33 = vadd.f32 %v2544_v61, %v5267_v36 }
 0x20e   : > { %v3491_v10 = vpack.c.bf16 %v2801_v30, %v2800_v17  ;;  %v2676_v29 = vadd.f32 %v5101_v31, %v2637_v55  ;;  %2599 = vst [vmem:[%s5088_s30 + $0xd8] sm:$0xff] %v2553_v37  ;;  %v2638_v28 = vmul.f32 %v5093_v53, %v2553_v37  ;;  %v2397_v0 = vadd.f32 %v3981_v14, %v5053_v1 }
 0x20f   : > { %v3486_v40 = vpack.c.bf16 %v2799_v19, %v2798_v25  ;;  %v2674_v22 = vadd.f32 %v5101_v31, %v2635_v50  ;;  %2597 = vst [vmem:[%s5088_s30 + $0xc8] sm:$0xff] %v2545_v33  ;;  %v2636_v34 = vmul.f32 %v5093_v53, %v2545_v33  ;;  %v2400_v44 = vadd.f32 %v3984_v4, %v5059_v7 }
 0x210   : > { %3538 = vst [vmem:[%s5144_s13 + $0x58] sm:$0xff] %v3491_v10   ;;  %v2772_v5 = vadd.f32 %v3423_v63, %v2676_v29  ;;  %v2677_v36 = vadd.f32 %v5101_v31, %v2638_v28  ;;  %v3428_v57 = vunpack.c.h.bf16 %v3526_v20  ;;  %v3432_v49 = vunpack.c.h.bf16 %v3527_v59 }
 0x211   : > { %3537 = vst [vmem:[%s5144_s13 + $0x50] sm:$0xff] %v3486_v40   ;;  %v2770_v43 = vadd.f32 %v3419_v35, %v2674_v22  ;;  %v2675_v21 = vadd.f32 %v5101_v31, %v2636_v34  ;;  %v3985_v58 = vpop.f32.mrb[140].mxu1  ;;  %v4061_v46 = vpop.f32.mrb[140].mxu0 }
 0x212   : > { %v2773_v1 = vadd.f32 %v3424_v54, %v2677_v36  ;;  %v3986_v13 = vpop.f32.mrb[141].mxu1  ;;  %v2557_v6 = vpop.f32.mrb[141].mxu0  ;;  %v2804_v23 = vmax.f32 %v2772_v5, 0.0  ;;  %v3431_v54 = vunpack.c.l.bf16 %v3527_v59 }
 0x213   : > { %v2771_v9 = vadd.f32 %v3420_v42, %v2675_v21  ;;  %v3987_v18 = vadd.f32 %v3986_v13, %v3985_v58  ;;  %v2558_v45 = vadd.f32 %v2557_v6, %v2397_v0  ;;  %v3988_v7 = vpop.f32.mrb[142].mxu1  ;;  %v4062_v11 = vpop.f32.mrb[142].mxu0  ;;  %v2802_v47 = vmax.f32 %v2770_v43, 0.0 }
 0x214   : > { %v2805_v41 = vmax.f32 %v2773_v1, 0.0  ;;  %v3989_v60 = vpop.f32.mrb[143].mxu1  ;;  %v2560_v3 = vpop.f32.mrb[143].mxu0 }
 0x215   : > { %v2803_v38 = vmax.f32 %v2771_v9, 0.0  ;;  %v2405_v24 = vadd.f32 %v3987_v18, %v5066_v32  ;;  %2600 = vst [vmem:[%s5088_s30 + $0xe0] sm:$0xff] %v2558_v45  ;;  %v2639_v8 = vmul.f32 %v5093_v53, %v2558_v45  ;;  %v3990_v48 = vadd.f32 %v3989_v60, %v3988_v7 }
 0x216   : > { %v3501_v2 = vpack.c.bf16 %v2805_v41, %v2804_v23  ;;  %v2561_v27 = vadd.f32 %v2560_v3, %v2400_v44 }
 0x217   : > { %v3496_v63 = vpack.c.bf16 %v2803_v38, %v2802_v47  ;;  %v2566_v35 = vadd.f32 %v4061_v46, %v2405_v24  ;;  %v2678_v56 = vadd.f32 %v5101_v31, %v2639_v8  ;;  %v2408_v26 = vadd.f32 %v3990_v48, %v5080_v62 }
 0x218   : > { %3540 = vst [vmem:[%s5144_s13 + $0x68] sm:$0xff] %v3501_v2   ;;  %2601 = vst [vmem:[%s5088_s30 + $0xe8] sm:$0xff] %v2561_v27  ;;  %v2640_v32 = vmul.f32 %v5093_v53, %v2561_v27 }
 0x219   : > { %3539 = vst [vmem:[%s5144_s13 + $0x60] sm:$0xff] %v3496_v63   ;;  %2602 = vst [vmem:[%s5088_s30 + $0xf0] sm:$0xff] %v2566_v35  ;;  %v2641_v15 = vmul.f32 %v5093_v53, %v2566_v35  ;;  %v2569_v42 = vadd.f32 %v4062_v11, %v2408_v26  ;;  %v2774_v17 = vadd.f32 %v3427_v16, %v2678_v56 }
 0x21a   : > { %v2679_v12 = vadd.f32 %v5101_v31, %v2640_v32 }
 0x21b   : > { %v2680_v14 = vadd.f32 %v5101_v31, %v2641_v15  ;;  %2603 = vst [vmem:[%s5088_s30 + $0xf8] sm:$0xff] %v2569_v42  ;;  %v2642_v62 = vmul.f32 %v5093_v53, %v2569_v42  ;;  %v2806_v30 = vmax.f32 %v2774_v17, 0.0 }
 0x21c   : > { %v2775_v51 = vadd.f32 %v3428_v57, %v2679_v12 }
 0x21d   : > { %v2776_v39 = vadd.f32 %v3431_v54, %v2680_v14  ;;  %v2681_v25 = vadd.f32 %v5101_v31, %v2642_v62 }
 0x21e   : > { %v2807_v55 = vmax.f32 %v2775_v51, 0.0 }
 0x21f   : > { %v2777_v37 = vadd.f32 %v3432_v49, %v2681_v25  ;;  %v2808_v61 = vmax.f32 %v2776_v39, 0.0 }
 0x220   : > { %v3506_v52 = vpack.c.bf16 %v2807_v55, %v2806_v30 }
 0x221   : > { %v2809_v19 = vmax.f32 %v2777_v37, 0.0 }
 0x222   : > { %3541 = vst [vmem:[%s5144_s13 + $0x70] sm:$0xff] %v3506_v52  }
 0x223   : > { %v3511_v50 = vpack.c.bf16 %v2809_v19, %v2808_v61 }
 0x225   : > { %3542 = vst [vmem:[%s5144_s13 + $0x78] sm:$0xff] %v3511_v50  }
 0x226 PF: > { %s17_s21 = sadd.s32 1, %s4374_s21  }
 0x227   : > { %p14_p4 = scmp.ge.s32.totalorder %s17_s21, 4  }
 0x229   :  { %16 = sbr.rel (!%p14_p4) target bundleno = 1 (0x1), region = 85 }

// kernel: teacher_forward.12
= control target key start
LH: loop header
LB: loop body
LE: loop exit
PB: predicated region body
PF: predicated region fallthrough
CT: control target
= control target key end

     0   :  { %s4297_s18 = smov 0   ;;  %s5165_s0 = inlined_call_operand.vmem [shape: bf16[512,1152], index: 0, kind: input, shape index: {}]   ;;  %s5166_s1 = inlined_call_operand.vmem [shape: bf16[1152,128], index: 1, kind: input, shape index: {}]   ;;  %s5167_s2 = inlined_call_operand.vmem [shape: f32[1,128], index: 2, kind: input, shape index: {}]   ;;  %s5168_s3 = inlined_call_operand.vmem [shape: f32[1,128], index: 3, kind: input, shape index: {}]   ;;  %s5169_s4 = inlined_call_operand.vmem [shape: bf16[512,128], index: 4, kind: input, shape index: {}]   ;;  %s5170_s5 = inlined_call_operand.vmem [shape: bf16[512,128], index: 5, kind: output, shape index: {}]  }
   0x1 LB: > { %s2965_s19 = sadd.s32 4294967295, %s4265_s18   ;;  %p2969_p0 = scmp.ge.s32.totalorder %s4265_s18, 1  ;;  %s4265_s18 = sphi %s4297_s18, %s15_s18  }
   0x2   : > { %p200_p1 = scmp.lt.s32.totalorder %s4265_s18, 3 }
   0x4   : > { %p201_p2 = pnand %p2969_p0, %p200_p1 }
   0x5   : > { %v3979_v0 = vld [vmem:[%s5166_s1 + $0x40] sm:$0xff] (!%p201_p2)   ;;  %s2970_s22 = sshll.u32 (!%p201_p2), %s2965_s19, 5  ;;  %v3981_v2 = vld [vmem:[%s5166_s1 + $0x48] sm:$0xff] (!%p201_p2)   ;;  %v3983_v4 = vld [vmem:[%s5166_s1 + $0x50] sm:$0xff] (!%p201_p2)  }
   0x6   : > { %204 = sbr.rel (%p201_p2) target bundleno = 550 (0x226), region = 40  ;;  %v3980_v1 = vld [vmem:[%s5166_s1] sm:$0xff] (!%p201_p2)   ;;  %3434 = vmatprep.subr.bf16.mxu0 (!%p201_p2), %v3979_v0  ;;  %3954 = vmatprep.subr.bf16.mxu1 (!%p201_p2), %v3979_v0  ;;  %p235_p3 = scmp.lt.s32.totalorder (!%p201_p2), %s2970_s22, 63  ;;  %v3982_v3 = vld [vmem:[%s5166_s1 + $0x8] sm:$0xff] (!%p201_p2)   ;;  %v3984_v5 = vld [vmem:[%s5166_s1 + $0x10] sm:$0xff] (!%p201_p2)  }
   0x7   : > { %3435 = vmatpush3.bf16.msra.mxu0 (!%p201_p2), %v3980_v1  ;;  %3962 = vmatpush3.bf16.msra.mxu1 (!%p201_p2), %v3980_v1  ;;  %v3985_v6 = vld [vmem:[%s5166_s1 + $0x58] sm:$0xff] (!%p201_p2)   ;;  %v3987_v8 = vld [vmem:[%s5166_s1 + $0x60] sm:$0xff] (!%p201_p2)   ;;  %v3989_v10 = vld [vmem:[%s5166_s1 + $0x68] sm:$0xff] (!%p201_p2)  }
   0x8   : > { %3436 = vmatprep.subr.bf16.mxu0 (!%p201_p2), %v3981_v2  ;;  %3955 = vmatprep.subr.bf16.mxu1 (!%p201_p2), %v3981_v2  ;;  %v3986_v7 = vld [vmem:[%s5166_s1 + $0x18] sm:$0xff] (!%p201_p2)   ;;  %v3988_v9 = vld [vmem:[%s5166_s1 + $0x20] sm:$0xff] (!%p201_p2)   ;;  %v3990_v13 = vld [vmem:[%s5166_s1 + $0x28] sm:$0xff] (!%p201_p2)  }
   0x9   : > { %v3991_v14 = vld [vmem:[%s5166_s1 + $0x70] sm:$0xff] (!%p201_p2)   ;;  %v3993_v16 = vld [vmem:[%s5166_s1 + $0x78] sm:$0xff] (!%p201_p2)   ;;  %v4001_v18 = vld [vmem:[%s5166_s1 + $0xc0] sm:$0xff] (!%p201_p2)  }
   0xa   : > { %v3992_v15 = vld [vmem:[%s5166_s1 + $0x30] sm:$0xff] (!%p201_p2)   ;;  %v3994_v17 = vld [vmem:[%s5166_s1 + $0x38] sm:$0xff] (!%p201_p2)   ;;  %v4004_v21 = vld [vmem:[%s5166_s1 + $0x140] sm:$0xff] (!%p201_p2)  }
   0xb   : > { %3437 = vmatpush3.bf16.msra.mxu0 (!%p201_p2), %v3982_v3  ;;  %3963 = vmatpush3.bf16.msra.mxu1 (!%p201_p2), %v3982_v3  ;;  %v4002_v22 = vld [vmem:[%s5166_s1 + $0x80] sm:$0xff] (!%p201_p2)   ;;  %v4003_v23 = vld [vmem:[%s5166_s1 + $0xc8] sm:$0xff] (!%p201_p2)   ;;  %v4013_v31 = vld [vmem:[%s5166_s1 + $0xd0] sm:$0xff] (!%p201_p2)  }
   0xc   : > { %3438 = vmatprep.subr.bf16.mxu0 (!%p201_p2), %v3983_v4  ;;  %3956 = vmatprep.subr.bf16.mxu1 (!%p201_p2), %v3983_v4  ;;  %v4006_v24 = vld [vmem:[%s5166_s1 + $0x100] sm:$0xff] (!%p201_p2)   ;;  %v4005_v27 = vld [vmem:[%s5166_s1 + $0x88] sm:$0xff] (!%p201_p2)   ;;  %v4014_v32 = vld [vmem:[%s5166_s1 + $0x90] sm:$0xff] (!%p201_p2)  }
   0xd   : > { %s5172_s22 = smov (!%p235_p3, %s2970_s22), 63  ;;  %v4024_v28 = vld [vmem:[%s5166_s1 + $0x148] sm:$0xff]   ;;  %v4015_v34 = vld [vmem:[%s5166_s1 + $0xd8] sm:$0xff]   ;;  %v4023_v40 = vld [vmem:[%s5166_s1 + $0xe0] sm:$0xff]  }
   0xe   : > { %s3970_s10 = smul.u32 36, %s5172_s22  ;;  %v4026_v33 = vld [vmem:[%s5166_s1 + $0x108] sm:$0xff]   ;;  %v4016_v37 = vld [vmem:[%s5166_s1 + $0x98] sm:$0xff]   ;;  %v4025_v41 = vld [vmem:[%s5166_s1 + $0xa0] sm:$0xff]  }
   0xf   : > { %3439 = vmatpush3.bf16.msra.mxu0 %v3984_v5  ;;  %3964 = vmatpush3.bf16.msra.mxu1 %v3984_v5  ;;  %v4027_v42 = vld [vmem:[%s5166_s1 + $0xe8] sm:$0xff]   ;;  %v4038_v43 = vld [vmem:[%s5166_s1 + $0x150] sm:$0xff]   ;;  %v4037_v52 = vld [vmem:[%s5166_s1 + $0xf8] sm:$0xff]  }
  0x10   : > { %3440 = vmatprep.subr.bf16.mxu0 %v3985_v6  ;;  %3957 = vmatprep.subr.bf16.mxu1 %v3985_v6  ;;  %s4338_s17 = scalar_lea.vmem %s5165_s0, %s3970_s10  ;;  %v4040_v46 = vld [vmem:[%s5166_s1 + $0x110] sm:$0xff]   ;;  %v4028_v47 = vld [vmem:[%s5166_s1 + $0xa8] sm:$0xff]   ;;  %v4055_v55 = vld [vmem:[%s5166_s1 + $0x158] sm:$0xff]  }
  0x11   : > { %v3997_v11 = vld [vmem:[%s4338_s17 + $0x4] ss:$36 sps:$4 sm:$0xff]   ;;  %v4007_v25 = vld [vmem:[%s4338_s17 + $0x4c] ss:$36 sps:$4 sm:$0xff]   ;;  %v4017_v35 = vld [vmem:[%s4338_s17 + $0x94] ss:$36 sps:$4 sm:$0xff]  }
  0x12   : > { %v4000_v12 = vld [vmem:[%s4338_s17 + $0x364] ss:$36 sps:$4 sm:$0xff]   ;;  %1758 = vmatprep.mubr.bf16.mxu0 %v3997_v11  ;;  %v4009_v26 = vld [vmem:[%s4338_s17 + $0x3ac] ss:$36 sps:$4 sm:$0xff]   ;;  %v4019_v36 = vld [vmem:[%s4338_s17 + $0x3f4] ss:$36 sps:$4 sm:$0xff]  }
  0x13   : > { %3441 = vmatpush3.bf16.msra.mxu0 %v3986_v7  ;;  %3965 = vmatpush3.bf16.msra.mxu1 %v3986_v7  ;;  %v3995_v19 = vld [vmem:[%s4338_s17] ss:$36 sps:$4 sm:$0xff]   ;;  %v4011_v29 = vld [vmem:[%s4338_s17 + $0x48] ss:$36 sps:$4 sm:$0xff]   ;;  %v4021_v38 = vld [vmem:[%s4338_s17 + $0x90] ss:$36 sps:$4 sm:$0xff]  }
  0x14   : > { %3442 = vmatprep.subr.bf16.mxu0 %v3987_v8  ;;  %3958 = vmatprep.subr.bf16.mxu1 %v3987_v8  ;;  %v3998_v20 = vld [vmem:[%s4338_s17 + $0x360] ss:$36 sps:$4 sm:$0xff]   ;;  %v4012_v30 = vld [vmem:[%s4338_s17 + $0x3a8] ss:$36 sps:$4 sm:$0xff]   ;;  %v4022_v39 = vld [vmem:[%s4338_s17 + $0x3f0] ss:$36 sps:$4 sm:$0xff]  }
  0x15   : > { %1854 = vmatprep.mubr.bf16.mxu1 %v4000_v12  ;;  %v4029_v44 = vld [vmem:[%s4338_s17 + $0xdc] ss:$36 sps:$4 sm:$0xff]   ;;  %v4035_v48 = vld [vmem:[%s5166_s1 + $0xf0] sm:$0xff]   ;;  %v4041_v53 = vld [vmem:[%s4338_s17 + $0x124] ss:$36 sps:$4 sm:$0xff]  }
  0x16   : > { %v4031_v45 = vld [vmem:[%s4338_s17 + $0x43c] ss:$36 sps:$4 sm:$0xff]   ;;  %v4036_v51 = vld [vmem:[%s5166_s1 + $0xb0] sm:$0xff]   ;;  %v4043_v58 = vld [vmem:[%s4338_s17 + $0x8] ss:$36 sps:$4 sm:$0xff]  }
  0x17   : > { %3443 = vmatpush3.bf16.msra.mxu0 %v3988_v9  ;;  %3966 = vmatpush3.bf16.msra.mxu1 %v3988_v9  ;;  %v4033_v49 = vld [vmem:[%s4338_s17 + $0xd8] ss:$36 sps:$4 sm:$0xff]   ;;  %v4045_v54 = vld [vmem:[%s4338_s17 + $0xc] ss:$36 sps:$4 sm:$0xff]   ;;  %v4046_v59 = vld [vmem:[%s4338_s17 + $0x120] ss:$36 sps:$4 sm:$0xff]  }
  0x18   : > { %3444 = vmatprep.subr.bf16.mxu0 %v3989_v10  ;;  %3959 = vmatprep.subr.bf16.mxu1 %v3989_v10  ;;  %v4034_v50 = vld [vmem:[%s4338_s17 + $0x438] ss:$36 sps:$4 sm:$0xff]   ;;  %v4047_v60 = vld [vmem:[%s5166_s1 + $0x1c0] sm:$0xff]   ;;  %v4049_v62 = vld [vmem:[%s4338_s17 + $0x16c] ss:$36 sps:$4 sm:$0xff]  }
  0x19   : > { %v4056_v56 = vld [vmem:[%s5166_s1 + $0x118] sm:$0xff]   ;;  %v4048_v61 = vld [vmem:[%s5166_s1 + $0x180] sm:$0xff]   ;;  %v4063_v1 = vld [vmem:[%s5166_s1 + $0x1c8] sm:$0xff]  }
  0x1a   : > { %v4039_v57 = vld [vmem:[%s5166_s1 + $0xb8] sm:$0xff]   ;;  %v4065_v0 = vld [vmem:[%s5166_s1 + $0x160] sm:$0xff]   ;;  %v4064_v3 = vld [vmem:[%s5166_s1 + $0x188] sm:$0xff]  }
  0x1b   : > { %3445 = vmatpush3.bf16.msra.mxu0 %v3990_v13  ;;  %3967 = vmatpush3.bf16.msra.mxu1 %v3990_v13  ;;  %v4051_v63 = vld [vmem:[%s4338_s17 + $0x54] ss:$36 sps:$4 sm:$0xff]   ;;  %v4066_v2 = vld [vmem:[%s5166_s1 + $0x120] sm:$0xff]   ;;  %v4053_v4 = vld [vmem:[%s4338_s17 + $0x168] ss:$36 sps:$4 sm:$0xff]  }
  0x1c   : > { %3446 = vmatprep.subr.bf16.mxu0 %v3991_v14  ;;  %3960 = vmatprep.subr.bf16.mxu1 %v3991_v14  ;;  %v4054_v5 = vld [vmem:[%s4338_s17 + $0x50] ss:$36 sps:$4 sm:$0xff]   ;;  %v4059_v7 = vld [vmem:[%s4338_s17 + $0x9c] ss:$36 sps:$4 sm:$0xff]   ;;  %v4079_v8 = vld [vmem:[%s5166_s1 + $0x168] sm:$0xff]  }
  0x1d   : > { %v4057_v6 = vld [vmem:[%s4338_s17 + $0x1b4] ss:$36 sps:$4 sm:$0xff]   ;;  %v4081_v10 = vld [vmem:[%s5166_s1 + $0x128] sm:$0xff]   ;;  %v4067_v14 = vld [vmem:[%s4338_s17 + $0x1fc] ss:$36 sps:$4 sm:$0xff]  }
  0x1e   : > { %v4080_v9 = vld [vmem:[%s5166_s1 + $0x1d0] sm:$0xff]   ;;  %v4062_v13 = vld [vmem:[%s4338_s17 + $0x98] ss:$36 sps:$4 sm:$0xff]  }
  0x1f   : > { %3447 = vmatpush3.bf16.msra.mxu0 %v3992_v15  ;;  %3968 = vmatpush3.bf16.msra.mxu1 %v3992_v15  ;;  %v4082_v11 = vld [vmem:[%s5166_s1 + $0x190] sm:$0xff]  }
  0x20   : > { %3448 = vmatprep.subr.bf16.mxu0 %v3993_v16  ;;  %3961 = vmatprep.subr.bf16.mxu1 %v3993_v16  ;;  %v4061_v12 = vld [vmem:[%s4338_s17 + $0x1b0] ss:$36 sps:$4 sm:$0xff]  }
  0x21   : > { %v4089_v15 = vld [vmem:[%s5166_s1 + $0x170] sm:$0xff]  }
  0x22   : > { %v4090_v16 = vld [vmem:[%s5166_s1 + $0x130] sm:$0xff]  }
  0x23   : > { %3449 = vmatpush3.bf16.msra.mxu0 %v3994_v17  ;;  %3969 = vmatpush3.bf16.msra.mxu1 %v3994_v17  ;;  %v4069_v17 = vld [vmem:[%s4338_s17 + $0xe4] ss:$36 sps:$4 sm:$0xff]  }
  0x24   : > { %3546 = vmatprep.subr.bf16.mxu1 %v4001_v18  ;;  %3658 = vmatprep.subr.bf16.mxu0 %v4004_v21  ;;  %v4097_v18 = vld [vmem:[%s5166_s1 + $0x1d8] sm:$0xff]   ;;  %v4072_v21 = vld [vmem:[%s4338_s17 + $0xe0] ss:$36 sps:$4 sm:$0xff]  }
  0x26   : > { %1759 = vmatmul.mubr.bf16.vlgmr.msra.gmra.mrb[0].mxu0 %v3995_v19  ;;  %1855 = vmatmul.mubr.bf16.vlgmr.msra.gmra.mrb[0].mxu1 %v3998_v20  ;;  %v4098_v19 = vld [vmem:[%s5166_s1 + $0x198] sm:$0xff]  }
  0x27   : > { %3547 = vmatpush3.bf16.msra.mxu1 %v4002_v22  ;;  %3659 = vmatpush3.bf16.msra.mxu0 %v4006_v24  ;;  %v4071_v20 = vld [vmem:[%s4338_s17 + $0x1f8] ss:$36 sps:$4 sm:$0xff]   ;;  %v4073_v22 = vld [vmem:[%s4338_s17 + $0x244] ss:$36 sps:$4 sm:$0xff]  }
  0x28   : > { %3548 = vmatprep.subr.bf16.mxu1 %v4003_v23  ;;  %1766 = vmatprep.mubr.bf16.mxu0 %v4007_v25  ;;  %v4075_v23 = vld [vmem:[%s4338_s17 + $0x12c] ss:$36 sps:$4 sm:$0xff]   ;;  %v4105_v24 = vld [vmem:[%s5166_s1 + $0x178] sm:$0xff]  }
  0x29   : > { %1862 = vmatprep.mubr.bf16.mxu1 %v4009_v26  ;;  %3660 = vmatprep.subr.bf16.mxu0 %v4024_v28  ;;  %v4106_v25 = vld [vmem:[%s5166_s1 + $0x138] sm:$0xff]   ;;  %v4113_v26 = vld [vmem:[%s5166_s1 + $0x1e0] sm:$0xff]  }
  0x2a   : > { %v4114_v28 = vld [vmem:[%s5166_s1 + $0x1a0] sm:$0xff]  }
  0x2b   : > { %3549 = vmatpush3.bf16.msra.mxu1 %v4005_v27  ;;  %3661 = vmatpush3.bf16.msra.mxu0 %v4026_v33  ;;  %v4077_v27 = vld [vmem:[%s4338_s17 + $0x240] ss:$36 sps:$4 sm:$0xff]   ;;  %v4128_v33 = vld [vmem:[%s5166_s1 + $0x1e8] sm:$0xff]  }
  0x2c   : > { %3550 = vmatprep.subr.bf16.mxu1 %v4013_v31  ;;  %3662 = vmatprep.subr.bf16.mxu0 %v4038_v43  ;;  %v4083_v31 = vld [vmem:[%s4338_s17 + $0x28c] ss:$36 sps:$4 sm:$0xff]   ;;  %v4099_v43 = vld [vmem:[%s4338_s17 + $0x31c] ss:$36 sps:$4 sm:$0xff]  }
  0x2e   : > { %1767 = vmatmul.mubr.bf16.gmra.mrb[4].mxu0 %v4011_v29  ;;  %1863 = vmatmul.mubr.bf16.gmra.mrb[4].mxu1 %v4012_v30  ;;  %v4115_v29 = vld [vmem:[%s5166_s1 + $0x200] sm:$0xff]   ;;  %v4078_v30 = vld [vmem:[%s4338_s17 + $0x128] ss:$36 sps:$4 sm:$0xff]  }
  0x2f   : > { %3551 = vmatpush3.bf16.msra.mxu1 %v4014_v32  ;;  %1774 = vmatprep.mubr.bf16.mxu0 %v4017_v35  ;;  %v4085_v32 = vld [vmem:[%s4338_s17 + $0x174] ss:$36 sps:$4 sm:$0xff]   ;;  %v4129_v35 = vld [vmem:[%s5166_s1 + $0x1a8] sm:$0xff]  }
  0x30   : > { %3552 = vmatprep.subr.bf16.mxu1 %v4015_v34  ;;  %1870 = vmatprep.mubr.bf16.mxu1 %v4019_v36  ;;  %v4087_v34 = vld [vmem:[%s4338_s17 + $0x288] ss:$36 sps:$4 sm:$0xff]   ;;  %v4088_v36 = vld [vmem:[%s4338_s17 + $0x170] ss:$36 sps:$4 sm:$0xff]  }
  0x31   : > { %3663 = vmatpush3.bf16.msra.mxu0 %v4040_v46  ;;  %v4104_v46 = vld [vmem:[%s4338_s17 + $0x200] ss:$36 sps:$4 sm:$0xff]  }
  0x32   : > { %3664 = vmatprep.subr.bf16.mxu0 %v4055_v55  ;;  %v4130_v55 = vld [vmem:[%s5166_s1 + $0x208] sm:$0xff]  }
  0x33   : > { %3553 = vmatpush3.bf16.msra.mxu1 %v4016_v37  ;;  %v4091_v37 = vld [vmem:[%s4338_s17 + $0x2d4] ss:$36 sps:$4 sm:$0xff]  }
  0x34   : > { %3554 = vmatprep.subr.bf16.mxu1 %v4023_v40  ;;  %v4096_v40 = vld [vmem:[%s4338_s17 + $0x1b8] ss:$36 sps:$4 sm:$0xff]  }
  0x35   : > { %3665 = vmatpush3.bf16.msra.mxu0 %v4056_v56  ;;  %v4145_v56 = vld [vmem:[%s5166_s1 + $0x210] sm:$0xff]  }
  0x36   : > { %1775 = vmatmul.mubr.bf16.gmra.mrb[8].mxu0 %v4021_v38  ;;  %1871 = vmatmul.mubr.bf16.gmra.mrb[8].mxu1 %v4022_v39  ;;  %v4093_v38 = vld [vmem:[%s4338_s17 + $0x1bc] ss:$36 sps:$4 sm:$0xff]   ;;  %v4095_v39 = vld [vmem:[%s4338_s17 + $0x2d0] ss:$36 sps:$4 sm:$0xff]  }
  0x37   : > { %3555 = vmatpush3.bf16.msra.mxu1 %v4025_v41  ;;  %1782 = vmatprep.mubr.bf16.mxu0 %v4029_v44  ;;  %v4143_v41 = vld [vmem:[%s5166_s1 + $0x1f0] sm:$0xff]   ;;  %v4101_v44 = vld [vmem:[%s4338_s17 + $0x204] ss:$36 sps:$4 sm:$0xff]  }
  0x38   : > { %3556 = vmatprep.subr.bf16.mxu1 %v4027_v42  ;;  %1878 = vmatprep.mubr.bf16.mxu1 %v4031_v45  ;;  %v4144_v42 = vld [vmem:[%s5166_s1 + $0x1b0] sm:$0xff]   ;;  %v4103_v45 = vld [vmem:[%s4338_s17 + $0x318] ss:$36 sps:$4 sm:$0xff]  }
  0x39   : > { %3666 = vmatprep.subr.bf16.mxu0 %v4065_v0  ;;  %v4127_v0 = vld [vmem:[%s4338_s17 + $0xa0] ss:$36 sps:$4 sm:$0xff]  }
  0x3a   : > { %3667 = vmatpush3.bf16.msra.mxu0 %v4066_v2  ;;  %v4133_v2 = vld [vmem:[%s4338_s17 + $0xec] ss:$36 sps:$4 sm:$0xff]  }
  0x3b   : > { %3557 = vmatpush3.bf16.msra.mxu1 %v4028_v47  ;;  %3668 = vmatprep.subr.bf16.mxu0 %v4079_v8  ;;  %v4158_v47 = vld [vmem:[%s5166_s1 + $0x1f8] sm:$0xff]  }
  0x3c   : > { %3558 = vmatprep.subr.bf16.mxu1 %v4035_v48  ;;  %v4159_v48 = vld [vmem:[%s5166_s1 + $0x1b8] sm:$0xff]  }
  0x3d   : > { %v4139_v8 = vld [vmem:[%s4338_s17 + $0x134] ss:$36 sps:$4 sm:$0xff]  }
  0x3e   : > { %1783 = vmatmul.mubr.bf16.gmra.mrb[12].mxu0 %v4033_v49  ;;  %1879 = vmatmul.mubr.bf16.gmra.mrb[12].mxu1 %v4034_v50  ;;  %v4107_v49 = vld [vmem:[%s4338_s17 + $0x24c] ss:$36 sps:$4 sm:$0xff]   ;;  %v4111_v50 = vld [vmem:[%s4338_s17 + $0x14] ss:$36 sps:$4 sm:$0xff]  }
  0x3f   : > { %3559 = vmatpush3.bf16.msra.mxu1 %v4036_v51  ;;  %1790 = vmatprep.mubr.bf16.mxu0 %v4041_v53  ;;  %v4109_v51 = vld [vmem:[%s4338_s17 + $0x10] ss:$36 sps:$4 sm:$0xff]  }
  0x40   : > { %3560 = vmatprep.subr.bf16.mxu1 %v4037_v52  ;;  %1919 = vmatprep.mubr.bf16.mxu1 %v4045_v54  ;;  %v4112_v52 = vld [vmem:[%s4338_s17 + $0x248] ss:$36 sps:$4 sm:$0xff]   ;;  %v4116_v53 = vld [vmem:[%s4338_s17 + $0x294] ss:$36 sps:$4 sm:$0xff]   ;;  %v4118_v54 = vld [vmem:[%s4338_s17 + $0x5c] ss:$36 sps:$4 sm:$0xff]  }
  0x41   : > { %3669 = vmatpush3.bf16.msra.mxu0 %v4081_v10  ;;  %v4141_v10 = vld [vmem:[%s4338_s17 + $0x368] ss:$36 sps:$4 sm:$0xff]  }
  0x42   : > { %3670 = vmatprep.subr.bf16.mxu0 %v4089_v15  ;;  %v4151_v15 = vld [vmem:[%s4338_s17 + $0x178] ss:$36 sps:$4 sm:$0xff]  }
  0x43   : > { %3561 = vmatpush3.bf16.msra.mxu1 %v4039_v57  ;;  %v4120_v57 = vld [vmem:[%s4338_s17 + $0x290] ss:$36 sps:$4 sm:$0xff]  }
  0x44   : > { %3770 = vmatprep.subr.bf16.mxu1 %v4047_v60  ;;  %v4124_v60 = vld [vmem:[%s4338_s17 + $0xa4] ss:$36 sps:$4 sm:$0xff]  }
  0x45   : > { %3671 = vmatpush3.bf16.msra.mxu0 %v4090_v16  ;;  %v4152_v16 = vld [vmem:[%s4338_s17 + $0x3fc] ss:$36 sps:$4 sm:$0xff]  }
  0x46   : > { %1791 = vmatmul.mubr.bf16.gmra.mrb[16].mxu0 %v4046_v59  ;;  %1920 = vmatmul.mubr.bf16.vlgmr.msra.gmra.mrb[16].mxu1 %v4043_v58  ;;  %v4121_v58 = vld [vmem:[%s4338_s17 + $0x58] ss:$36 sps:$4 sm:$0xff]  }
  0x47   : > { %3771 = vmatpush3.bf16.msra.mxu1 %v4048_v61  ;;  %1798 = vmatprep.mubr.bf16.mxu0 %v4049_v62  ;;  %v4122_v59 = vld [vmem:[%s4338_s17 + $0x2dc] ss:$36 sps:$4 sm:$0xff]  }
  0x48   : > { %1927 = vmatprep.mubr.bf16.mxu1 %v4051_v63  ;;  %3772 = vmatprep.subr.bf16.mxu1 %v4063_v1  ;;  %v4160_v61 = vld [vmem:[%s5166_s1 + $0x218] sm:$0xff]   ;;  %v4173_v62 = vld [vmem:[%s5166_s1 + $0x220] sm:$0xff]  }
  0x49   : > { %3672 = vmatprep.subr.bf16.mxu0 %v4105_v24  ;;  %v4126_v63 = vld [vmem:[%s4338_s17 + $0x2d8] ss:$36 sps:$4 sm:$0xff]   ;;  %v4131_v1 = vld [vmem:[%s4338_s17 + $0x324] ss:$36 sps:$4 sm:$0xff]  }
  0x4a   : > { %3673 = vmatpush3.bf16.msra.mxu0 %v4106_v25  ;;  %v4167_v24 = vld [vmem:[%s4338_s17 + $0x254] ss:$36 sps:$4 sm:$0xff]   ;;  %v4171_v25 = vld [vmem:[%s4338_s17 + $0x1c] ss:$36 sps:$4 sm:$0xff]  }
  0x4b   : > { %3773 = vmatpush3.bf16.msra.mxu1 %v4064_v3  ;;  %3906 = vmatprep.subr.bf16.mxu0 %v4115_v29  ;;  %v4186_v3 = vld [vmem:[%s5166_s1 + $0x228] sm:$0xff]  }
  0x4c   : > { %3774 = vmatprep.subr.bf16.mxu1 %v4080_v9  ;;  %v4212_v9 = vld [vmem:[%s5166_s1 + $0x238] sm:$0xff]  }
  0x4e   : > { %1799 = vmatmul.mubr.bf16.gmra.mrb[20].mxu0 %v4053_v4  ;;  %1928 = vmatmul.mubr.bf16.gmra.mrb[20].mxu1 %v4054_v5  ;;  %v4135_v4 = vld [vmem:[%s4338_s17 + $0x320] ss:$36 sps:$4 sm:$0xff]   ;;  %v4136_v5 = vld [vmem:[%s4338_s17 + $0xe8] ss:$36 sps:$4 sm:$0xff]  }
  0x4f   : > { %1806 = vmatprep.mubr.bf16.mxu0 %v4057_v6  ;;  %1935 = vmatprep.mubr.bf16.mxu1 %v4059_v7  ;;  %v4199_v6 = vld [vmem:[%s5166_s1 + $0x230] sm:$0xff]  }
  0x50   : > { %3775 = vmatpush3.bf16.msra.mxu1 %v4082_v11  ;;  %v4137_v7 = vld [vmem:[%s4338_s17 + $0x36c] ss:$36 sps:$4 sm:$0xff]  }
  0x51   : > { %3776 = vmatprep.subr.bf16.mxu1 %v4097_v18  ;;  %v4142_v11 = vld [vmem:[%s4338_s17 + $0x130] ss:$36 sps:$4 sm:$0xff]   ;;  %v4156_v18 = vld [vmem:[%s4338_s17 + $0x3f8] ss:$36 sps:$4 sm:$0xff]  }
  0x54   : > { %3777 = vmatpush3.bf16.msra.mxu1 %v4098_v19  ;;  %v4157_v19 = vld [vmem:[%s4338_s17 + $0x1c0] ss:$36 sps:$4 sm:$0xff]  }
  0x55   : > { %3778 = vmatprep.subr.bf16.mxu1 %v4113_v26  ;;  %v4169_v26 = vld [vmem:[%s4338_s17 + $0x18] ss:$36 sps:$4 sm:$0xff]  }
  0x56   : > { %1807 = vmatmul.mubr.bf16.gmra.mrb[24].mxu0 %v4061_v12  ;;  %1936 = vmatmul.mubr.bf16.gmra.mrb[24].mxu1 %v4062_v13  ;;  %v4146_v12 = vld [vmem:[%s4338_s17 + $0x3b4] ss:$36 sps:$4 sm:$0xff]   ;;  %v4148_v13 = vld [vmem:[%s4338_s17 + $0x17c] ss:$36 sps:$4 sm:$0xff]  }
  0x57   : > { %1814 = vmatprep.mubr.bf16.mxu0 %v4067_v14  ;;  %1943 = vmatprep.mubr.bf16.mxu1 %v4069_v17  ;;  %v4150_v14 = vld [vmem:[%s4338_s17 + $0x3b0] ss:$36 sps:$4 sm:$0xff]   ;;  %v4154_v17 = vld [vmem:[%s4338_s17 + $0x1c4] ss:$36 sps:$4 sm:$0xff]  }
  0x58   : > { %3779 = vmatpush3.bf16.msra.mxu1 %v4114_v28  ;;  %v4174_v28 = vld [vmem:[%s4338_s17 + $0x29c] ss:$36 sps:$4 sm:$0xff]  }
  0x59   : > { %3780 = vmatprep.subr.bf16.mxu1 %v4128_v33  ;;  %v4182_v33 = vld [vmem:[%s4338_s17 + $0xac] ss:$36 sps:$4 sm:$0xff]  }
  0x5c   : > { %3781 = vmatpush3.bf16.msra.mxu1 %v4129_v35  ;;  %v4185_v35 = vld [vmem:[%s4338_s17 + $0xa8] ss:$36 sps:$4 sm:$0xff]  }
  0x5d   : > { %3782 = vmatprep.subr.bf16.mxu1 %v4143_v41  ;;  %v4195_v41 = vld [vmem:[%s4338_s17 + $0x13c] ss:$36 sps:$4 sm:$0xff]  }
  0x5e   : > { %1815 = vmatmul.mubr.bf16.gmra.mrb[28].mxu0 %v4071_v20  ;;  %1944 = vmatmul.mubr.bf16.gmra.mrb[28].mxu1 %v4072_v21  ;;  %v4161_v20 = vld [vmem:[%s4338_s17 + $0x444] ss:$36 sps:$4 sm:$0xff]   ;;  %v4163_v21 = vld [vmem:[%s4338_s17 + $0x20c] ss:$36 sps:$4 sm:$0xff]  }
  0x5f   : > { %1822 = vmatprep.mubr.bf16.mxu0 %v4073_v22  ;;  %1951 = vmatprep.mubr.bf16.mxu1 %v4075_v23  ;;  %v4165_v22 = vld [vmem:[%s4338_s17 + $0x440] ss:$36 sps:$4 sm:$0xff]   ;;  %v4166_v23 = vld [vmem:[%s4338_s17 + $0x208] ss:$36 sps:$4 sm:$0xff]  }
  0x60   : > { %3783 = vmatpush3.bf16.msra.mxu1 %v4144_v42  ;;  %v4197_v42 = vld [vmem:[%s4338_s17 + $0x370] ss:$36 sps:$4 sm:$0xff]  }
  0x61   : > { %3784 = vmatprep.subr.bf16.mxu1 %v4158_v47  ;;  %v4205_v47 = vld [vmem:[%s4338_s17 + $0x180] ss:$36 sps:$4 sm:$0xff]  }
  0x64   : > { %3785 = vmatpush3.bf16.msra.mxu1 %v4159_v48  ;;  %v4206_v48 = vld [vmem:[%s4338_s17 + $0x404] ss:$36 sps:$4 sm:$0xff]  }
  0x66   : > { %1823 = vmatmul.mubr.bf16.gmra.mrb[32].mxu0 %v4077_v27  ;;  %1952 = vmatmul.mubr.bf16.gmra.mrb[32].mxu1 %v4078_v30  ;;  %v4172_v27 = vld [vmem:[%s4338_s17 + $0x250] ss:$36 sps:$4 sm:$0xff]   ;;  %v4178_v30 = vld [vmem:[%s4338_s17 + $0x298] ss:$36 sps:$4 sm:$0xff]  }
  0x67   : > { %1830 = vmatprep.mubr.bf16.mxu0 %v4083_v31  ;;  %1959 = vmatprep.mubr.bf16.mxu1 %v4085_v32  ;;  %v4179_v31 = vld [vmem:[%s4338_s17 + $0x60] ss:$36 sps:$4 sm:$0xff]  }
  0x68   : > { %v4180_v32 = vld [vmem:[%s4338_s17 + $0x2e4] ss:$36 sps:$4 sm:$0xff]  }
  0x6e   : > { %1831 = vmatmul.mubr.bf16.gmra.mrb[36].mxu0 %v4087_v34  ;;  %1960 = vmatmul.mubr.bf16.gmra.mrb[36].mxu1 %v4088_v36  ;;  %v4184_v34 = vld [vmem:[%s4338_s17 + $0x2e0] ss:$36 sps:$4 sm:$0xff]   ;;  %v4187_v36 = vld [vmem:[%s4338_s17 + $0x32c] ss:$36 sps:$4 sm:$0xff]  }
  0x6f   : > { %1838 = vmatprep.mubr.bf16.mxu0 %v4091_v37  ;;  %1967 = vmatprep.mubr.bf16.mxu1 %v4093_v38  ;;  %v4189_v37 = vld [vmem:[%s4338_s17 + $0xf4] ss:$36 sps:$4 sm:$0xff]   ;;  %v4191_v38 = vld [vmem:[%s4338_s17 + $0x328] ss:$36 sps:$4 sm:$0xff]  }
  0x76   : > { %1839 = vmatmul.mubr.bf16.gmra.mrb[40].mxu0 %v4095_v39  ;;  %1968 = vmatmul.mubr.bf16.gmra.mrb[40].mxu1 %v4096_v40  ;;  %v4192_v39 = vld [vmem:[%s4338_s17 + $0xf0] ss:$36 sps:$4 sm:$0xff]  }
  0x77   : > { %1846 = vmatprep.mubr.bf16.mxu0 %v4099_v43  ;;  %1975 = vmatprep.mubr.bf16.mxu1 %v4101_v44  ;;  %v4193_v40 = vld [vmem:[%s4338_s17 + $0x374] ss:$36 sps:$4 sm:$0xff]   ;;  %v4200_v44 = vld [vmem:[%s4338_s17 + $0x3bc] ss:$36 sps:$4 sm:$0xff]  }
  0x78   : > { %v4198_v43 = vld [vmem:[%s4338_s17 + $0x138] ss:$36 sps:$4 sm:$0xff]  }
  0x7e   : > { %1847 = vmatmul.mubr.bf16.gmra.mrb[44].mxu0 %v4103_v45  ;;  %1976 = vmatmul.mubr.bf16.gmra.mrb[44].mxu1 %v4104_v46  ;;  %v4202_v45 = vld [vmem:[%s4338_s17 + $0x184] ss:$36 sps:$4 sm:$0xff]   ;;  %v4204_v46 = vld [vmem:[%s4338_s17 + $0x3b8] ss:$36 sps:$4 sm:$0xff]  }
  0x7f   : > { %1983 = vmatprep.mubr.bf16.mxu1 %v4107_v49  ;;  %2080 = vmatprep.mubr.bf16.mxu0 %v4111_v50  ;;  %v4208_v49 = vld [vmem:[%s4338_s17 + $0x1cc] ss:$36 sps:$4 sm:$0xff]   ;;  %v4210_v50 = vld [vmem:[%s4338_s17 + $0x400] ss:$36 sps:$4 sm:$0xff]  }
  0x86   : > { %1984 = vmatmul.mubr.bf16.gmra.mrb[48].mxu1 %v4112_v52  ;;  %2081 = vmatmul.mubr.bf16.vlgmr.msra.gmra.mrb[48].mxu0 %v4109_v51  ;;  %v4211_v51 = vld [vmem:[%s4338_s17 + $0x1c8] ss:$36 sps:$4 sm:$0xff]  }
  0x87   : > { %3907 = vmatpush3.bf16.msra.mxu0 %v4115_v29  ;;  %1991 = vmatprep.mubr.bf16.mxu1 %v4116_v53  ;;  %v4176_v29 = vld [vmem:[%s4338_s17 + $0x64] ss:$36 sps:$4 sm:$0xff]   ;;  %v4213_v52 = vld [vmem:[%s4338_s17 + $0x44c] ss:$36 sps:$4 sm:$0xff]   ;;  %v4215_v53 = vld [vmem:[%s4338_s17 + $0x214] ss:$36 sps:$4 sm:$0xff]  }
  0x88   : > { %2088 = vmatprep.mubr.bf16.mxu0 %v4118_v54  ;;  %3908 = vmatprep.subr.bf16.mxu0 %v4130_v55 }
  0x8b   : > { %3909 = vmatpush3.bf16.msra.mxu0 %v4130_v55 }
  0x8c   : > { %3910 = vmatprep.subr.bf16.mxu0 %v4145_v56 }
  0x8e   : > { %1992 = vmatmul.mubr.bf16.gmra.mrb[52].mxu1 %v4120_v57  ;;  %2089 = vmatmul.mubr.bf16.gmra.mrb[52].mxu0 %v4121_v58  ;;  %v4217_v58 = vld [vmem:[%s4338_s17 + $0x448] ss:$36 sps:$4 sm:$0xff]  }
  0x8f   : > { %1999 = vmatprep.mubr.bf16.mxu1 %v4122_v59  ;;  %2096 = vmatprep.mubr.bf16.mxu0 %v4124_v60  ;;  %v4218_v59 = vld [vmem:[%s4338_s17 + $0x210] ss:$36 sps:$4 sm:$0xff]  }
  0x90   : > { %3911 = vmatpush3.bf16.msra.mxu0 %v4145_v56 }
  0x91   : > { %3912 = vmatprep.subr.bf16.mxu0 %v4160_v61 }
  0x94   : > { %3913 = vmatpush3.bf16.msra.mxu0 %v4160_v61 }
  0x95   : > { %3914 = vmatprep.subr.bf16.mxu0 %v4173_v62 }
  0x96   : > { %2000 = vmatmul.mubr.bf16.gmra.mrb[56].mxu1 %v4126_v63  ;;  %2097 = vmatmul.mubr.bf16.gmra.mrb[56].mxu0 %v4127_v0  ;;  %v4219_v0 = vld [vmem:[%s4338_s17 + $0x25c] ss:$36 sps:$4 sm:$0xff]  }
  0x97   : > { %2007 = vmatprep.mubr.bf16.mxu1 %v4131_v1  ;;  %2104 = vmatprep.mubr.bf16.mxu0 %v4133_v2  ;;  %v4221_v1 = vld [vmem:[%s4338_s17 + $0x20] ss:$36 sps:$4 sm:$0xff]  }
  0x98   : > { %3915 = vmatpush3.bf16.msra.mxu0 %v4173_v62 }
  0x99   : > { %3916 = vmatprep.subr.bf16.mxu0 %v4186_v3 }
  0x9c   : > { %3917 = vmatpush3.bf16.msra.mxu0 %v4186_v3 }
  0x9d   : > { %3918 = vmatprep.subr.bf16.mxu0 %v4199_v6 }
  0x9e   : > { %2008 = vmatmul.mubr.bf16.gmra.mrb[60].mxu1 %v4135_v4  ;;  %2105 = vmatmul.mubr.bf16.gmra.mrb[60].mxu0 %v4136_v5 }
  0x9f   : > { %2015 = vmatprep.mubr.bf16.mxu1 %v4137_v7  ;;  %2112 = vmatprep.mubr.bf16.mxu0 %v4139_v8 }
  0xa0   : > { %3919 = vmatpush3.bf16.msra.mxu0 %v4199_v6 }
  0xa1   : > { %3920 = vmatprep.subr.bf16.mxu0 %v4212_v9 }
  0xa4   : > { %3921 = vmatpush3.bf16.msra.mxu0 %v4212_v9 }
  0xa6   : > { %2016 = vmatmul.mubr.bf16.gmra.mrb[64].mxu1 %v4141_v10  ;;  %2113 = vmatmul.mubr.bf16.gmra.mrb[64].mxu0 %v4142_v11  ;;  %v4222_v10 = vld [vmem:[%s4338_s17 + $0x258] ss:$36 sps:$4 sm:$0xff]   ;;  %v4223_v11 = vld [vmem:[%s4338_s17 + $0x68] ss:$36 sps:$4 sm:$0xff]  }
  0xa7   : > { %2023 = vmatprep.mubr.bf16.mxu1 %v4146_v12  ;;  %2120 = vmatprep.mubr.bf16.mxu0 %v4148_v13 }
  0xae   : > { %2024 = vmatmul.mubr.bf16.gmra.mrb[68].mxu1 %v4150_v14  ;;  %2121 = vmatmul.mubr.bf16.gmra.mrb[68].mxu0 %v4151_v15 }
  0xaf   : > { %2031 = vmatprep.mubr.bf16.mxu1 %v4152_v16  ;;  %2128 = vmatprep.mubr.bf16.mxu0 %v4154_v17  ;;  %v4224_v16 = vld [vmem:[%s4338_s17 + $0x2a4] ss:$36 sps:$4 sm:$0xff]   ;;  %v4226_v17 = vld [vmem:[%s4338_s17 + $0xb0] ss:$36 sps:$4 sm:$0xff]  }
  0xb6   : > { %2032 = vmatmul.mubr.bf16.gmra.mrb[72].mxu1 %v4156_v18  ;;  %2129 = vmatmul.mubr.bf16.gmra.mrb[72].mxu0 %v4157_v19 }
  0xb7   : > { %2039 = vmatprep.mubr.bf16.mxu1 %v4161_v20  ;;  %2136 = vmatprep.mubr.bf16.mxu0 %v4163_v21 }
  0xbe   : > { %2040 = vmatmul.mubr.bf16.gmra.mrb[76].mxu1 %v4165_v22  ;;  %2137 = vmatmul.mubr.bf16.gmra.mrb[76].mxu0 %v4166_v23 }
  0xbf   : > { %2144 = vmatprep.mubr.bf16.mxu0 %v4167_v24  ;;  %2241 = vmatprep.mubr.bf16.mxu1 %v4171_v25 }
  0xc6   : > { %2145 = vmatmul.mubr.bf16.gmra.mrb[80].mxu0 %v4172_v27  ;;  %2242 = vmatmul.mubr.bf16.vlgmr.msra.gmra.mrb[80].mxu1 %v4169_v26  ;;  %v4227_v26 = vld [vmem:[%s4338_s17 + $0x2a0] ss:$36 sps:$4 sm:$0xff]   ;;  %v4228_v27 = vld [vmem:[%s4338_s17 + $0xf8] ss:$36 sps:$4 sm:$0xff]  }
  0xc7   : > { %2152 = vmatprep.mubr.bf16.mxu0 %v4174_v28  ;;  %2249 = vmatprep.mubr.bf16.mxu1 %v4176_v29 }
  0xce   : > { %2153 = vmatmul.mubr.bf16.gmra.mrb[84].mxu0 %v4178_v30  ;;  %2250 = vmatmul.mubr.bf16.gmra.mrb[84].mxu1 %v4179_v31 }
  0xcf   : > { %2160 = vmatprep.mubr.bf16.mxu0 %v4180_v32  ;;  %2257 = vmatprep.mubr.bf16.mxu1 %v4182_v33  ;;  %v4229_v32 = vld [vmem:[%s4338_s17 + $0x2ec] ss:$36 sps:$4 sm:$0xff]   ;;  %v4231_v33 = vld [vmem:[%s4338_s17 + $0x140] ss:$36 sps:$4 sm:$0xff]  }
  0xd6   : > { %2161 = vmatmul.mubr.bf16.gmra.mrb[88].mxu0 %v4184_v34  ;;  %2258 = vmatmul.mubr.bf16.gmra.mrb[88].mxu1 %v4185_v35 }
  0xd7   : > { %2168 = vmatprep.mubr.bf16.mxu0 %v4187_v36  ;;  %2265 = vmatprep.mubr.bf16.mxu1 %v4189_v37 }
  0xde   : > { %2169 = vmatmul.mubr.bf16.gmra.mrb[92].mxu0 %v4191_v38  ;;  %2266 = vmatmul.mubr.bf16.gmra.mrb[92].mxu1 %v4192_v39 }
  0xdf   : > { %2176 = vmatprep.mubr.bf16.mxu0 %v4193_v40  ;;  %2273 = vmatprep.mubr.bf16.mxu1 %v4195_v41 }
  0xe6   : > { %2177 = vmatmul.mubr.bf16.gmra.mrb[96].mxu0 %v4197_v42  ;;  %2274 = vmatmul.mubr.bf16.gmra.mrb[96].mxu1 %v4198_v43  ;;  %v4232_v42 = vld [vmem:[%s4338_s17 + $0x2e8] ss:$36 sps:$4 sm:$0xff]  }
  0xe7   : > { %2184 = vmatprep.mubr.bf16.mxu0 %v4200_v44  ;;  %2281 = vmatprep.mubr.bf16.mxu1 %v4202_v45  ;;  %v4233_v43 = vld [vmem:[%s4338_s17 + $0x188] ss:$36 sps:$4 sm:$0xff]  }
  0xee   : > { %2185 = vmatmul.mubr.bf16.gmra.mrb[100].mxu0 %v4204_v46  ;;  %2282 = vmatmul.mubr.bf16.gmra.mrb[100].mxu1 %v4205_v47 }
  0xef   : > { %2192 = vmatprep.mubr.bf16.mxu0 %v4206_v48  ;;  %2289 = vmatprep.mubr.bf16.mxu1 %v4208_v49  ;;  %v4234_v48 = vld [vmem:[%s4338_s17 + $0x334] ss:$36 sps:$4 sm:$0xff]  }
  0xf0   : > { %v4236_v49 = vld [vmem:[%s4338_s17 + $0x1d0] ss:$36 sps:$4 sm:$0xff]  }
  0xf6   : > { %2193 = vmatmul.mubr.bf16.gmra.mrb[104].mxu0 %v4210_v50  ;;  %2290 = vmatmul.mubr.bf16.gmra.mrb[104].mxu1 %v4211_v51 }
  0xf7   : > { %2200 = vmatprep.mubr.bf16.mxu0 %v4213_v52  ;;  %2297 = vmatprep.mubr.bf16.mxu1 %v4215_v53 }
  0xf9   : > { %v3522_v54 = vpop.f32.mrb[0].mxu1  ;;  %v3450_v55 = vpop.f32.mrb[0].mxu0 }
  0xfa   : > { %v3523_v56 = vpop.f32.mrb[1].mxu1  ;;  %v3451_v57 = vpop.f32.mrb[1].mxu0 }
  0xfb   : > { %v4641_v60 = vadd.f32 %v3523_v56, %v3522_v54  ;;  %v3525_v61 = vpop.f32.mrb[2].mxu1  ;;  %v4643_v62 = vadd.f32 %v3451_v57, %v3450_v55  ;;  %v3453_v63 = vpop.f32.mrb[2].mxu0 }
  0xfc   : > { %v3526_v2 = vpop.f32.mrb[3].mxu1  ;;  %v3454_v3 = vpop.f32.mrb[3].mxu0 }
  0xfd   : > { %v4647_v4 = vadd.f32 %v3526_v2, %v3525_v61  ;;  %v4649_v5 = vadd.f32 %v3454_v3, %v3453_v63  ;;  %v4239_v2 = vld [vmem:[%s4338_s17 + $0x37c] ss:$36 sps:$4 sm:$0xff]  }
  0xfe   : > { %2201 = vmatmul.mubr.bf16.gmra.mrb[108].mxu0 %v4217_v58  ;;  %2298 = vmatmul.mubr.bf16.gmra.mrb[108].mxu1 %v4218_v59  ;;  %v4237_v58 = vld [vmem:[%s4338_s17 + $0x330] ss:$36 sps:$4 sm:$0xff]   ;;  %v4238_v59 = vld [vmem:[%s4338_s17 + $0x218] ss:$36 sps:$4 sm:$0xff]   ;;  %v4241_v3 = vld [vmem:[%s4338_s17 + $0x260] ss:$36 sps:$4 sm:$0xff]  }
  0xff   : > { %2305 = vmatprep.mubr.bf16.mxu1 %v4219_v0  ;;  %3922 = vmatprep.mubr.bf16.mxu0 %v4221_v1 }
 0x101   : > { %v3528_v6 = vpop.f32.mrb[4].mxu1  ;;  %v3456_v7 = vpop.f32.mrb[4].mxu0 }
 0x102   : > { %v3529_v8 = vpop.f32.mrb[5].mxu1  ;;  %v3457_v9 = vpop.f32.mrb[5].mxu0 }
 0x103   : > { %v4653_v12 = vadd.f32 %v3529_v8, %v3528_v6  ;;  %v3531_v13 = vpop.f32.mrb[6].mxu1  ;;  %v4655_v14 = vadd.f32 %v3457_v9, %v3456_v7  ;;  %v3459_v15 = vpop.f32.mrb[6].mxu0 }
 0x104   : > { %v3532_v18 = vpop.f32.mrb[7].mxu1  ;;  %v3460_v19 = vpop.f32.mrb[7].mxu0 }
 0x105   : > { %v4659_v20 = vadd.f32 %v3532_v18, %v3531_v13  ;;  %v4661_v21 = vadd.f32 %v3460_v19, %v3459_v15  ;;  %v4242_v18 = vld [vmem:[%s4338_s17 + $0x378] ss:$36 sps:$4 sm:$0xff]   ;;  %v4243_v19 = vld [vmem:[%s4338_s17 + $0x2a8] ss:$36 sps:$4 sm:$0xff]  }
 0x106   : > { %2306 = vmatmul.mubr.bf16.gmra.mrb[112].mxu1 %v4222_v10  ;;  %3923 = vmatmul.mubr.bf16.vlgmr.msra.gmra.mrb[112].mxu0 %v4223_v11 }
 0x107   : > { %2313 = vmatprep.mubr.bf16.mxu1 %v4224_v16  ;;  %3926 = vmatprep.mubr.bf16.mxu0 %v4226_v17 }
 0x109   : > { %v3534_v22 = vpop.f32.mrb[8].mxu1  ;;  %v3462_v23 = vpop.f32.mrb[8].mxu0 }
 0x10a   : > { %v3535_v24 = vpop.f32.mrb[9].mxu1  ;;  %v3463_v25 = vpop.f32.mrb[9].mxu0 }
 0x10b   : > { %v4665_v28 = vadd.f32 %v3535_v24, %v3534_v22  ;;  %v3537_v29 = vpop.f32.mrb[10].mxu1  ;;  %v4667_v30 = vadd.f32 %v3463_v25, %v3462_v23  ;;  %v3465_v31 = vpop.f32.mrb[10].mxu0  ;;  %v4244_v25 = vld [vmem:[%s4338_s17 + $0x3c4] ss:$36 sps:$4 sm:$0xff]  }
 0x10c   : > { %v3538_v34 = vpop.f32.mrb[11].mxu1  ;;  %v3466_v35 = vpop.f32.mrb[11].mxu0 }
 0x10d   : > { %v4671_v36 = vadd.f32 %v3538_v34, %v3537_v29  ;;  %v4673_v37 = vadd.f32 %v3466_v35, %v3465_v31 }
 0x10e   : > { %2314 = vmatmul.mubr.bf16.gmra.mrb[116].mxu1 %v4227_v26  ;;  %3927 = vmatmul.mubr.bf16.gmra.mrb[116].mxu0 %v4228_v27  ;;  %v4246_v26 = vld [vmem:[%s4338_s17 + $0x2f0] ss:$36 sps:$4 sm:$0xff]  }
 0x10f   : > { %2321 = vmatprep.mubr.bf16.mxu1 %v4229_v32  ;;  %3930 = vmatprep.mubr.bf16.mxu0 %v4231_v33 }
 0x111   : > { %v3540_v38 = vpop.f32.mrb[12].mxu1  ;;  %v3468_v39 = vpop.f32.mrb[12].mxu0 }
 0x112   : > { %v3541_v40 = vpop.f32.mrb[13].mxu1  ;;  %v3469_v41 = vpop.f32.mrb[13].mxu0 }
 0x113   : > { %v4677_v44 = vadd.f32 %v3541_v40, %v3540_v38  ;;  %v3543_v45 = vpop.f32.mrb[14].mxu1  ;;  %v4679_v46 = vadd.f32 %v3469_v41, %v3468_v39  ;;  %v3471_v47 = vpop.f32.mrb[14].mxu0  ;;  %v4247_v40 = vld [vmem:[%s4338_s17 + $0x3c0] ss:$36 sps:$4 sm:$0xff]   ;;  %v4248_v41 = vld [vmem:[%s4338_s17 + $0x338] ss:$36 sps:$4 sm:$0xff]  }
 0x114   : > { %v3544_v50 = vpop.f32.mrb[15].mxu1  ;;  %v3472_v51 = vpop.f32.mrb[15].mxu0 }
 0x115   : > { %v4683_v52 = vadd.f32 %v3544_v50, %v3543_v45  ;;  %v4685_v53 = vadd.f32 %v3472_v51, %v3471_v47  ;;  %v4249_v47 = vld [vmem:[%s4338_s17 + $0x40c] ss:$36 sps:$4 sm:$0xff]  }
 0x116   : > { %2322 = vmatmul.mubr.bf16.gmra.mrb[120].mxu1 %v4232_v42  ;;  %3931 = vmatmul.mubr.bf16.gmra.mrb[120].mxu0 %v4233_v43 }
 0x117   : > { %2329 = vmatprep.mubr.bf16.mxu1 %v4234_v48  ;;  %3934 = vmatprep.mubr.bf16.mxu0 %v4236_v49  ;;  %v4251_v48 = vld [vmem:[%s4338_s17 + $0x380] ss:$36 sps:$4 sm:$0xff]  }
 0x119   : > { %v3562_v54 = vpop.f32.mrb[16].mxu1  ;;  %v3474_v55 = vpop.f32.mrb[16].mxu0 }
 0x11a   : > { %v3563_v56 = vpop.f32.mrb[17].mxu1  ;;  %v3475_v57 = vpop.f32.mrb[17].mxu0 }
 0x11b   : > { %v3564_v61 = vadd.f32 %v3563_v56, %v3562_v54  ;;  %v3565_v63 = vpop.f32.mrb[18].mxu1  ;;  %v4689_v0 = vadd.f32 %v3475_v57, %v3474_v55  ;;  %v3477_v1 = vpop.f32.mrb[18].mxu0 }
 0x11c   : > { %v3566_v6 = vpop.f32.mrb[19].mxu1  ;;  %v3478_v7 = vpop.f32.mrb[19].mxu0 }
 0x11d   : > { %v4694_v8 = vadd.f32 %v3564_v61, %v4643_v62  ;;  %v3567_v9 = vadd.f32 %v3566_v6, %v3565_v63  ;;  %v4696_v10 = vadd.f32 %v3478_v7, %v3477_v1  ;;  %v4252_v61 = vld [vmem:[%s4338_s17 + $0x408] ss:$36 sps:$4 sm:$0xff]   ;;  %v4254_v6 = vld [vmem:[%s4338_s17 + $0x454] ss:$36 sps:$4 sm:$0xff]  }
 0x11e   : > { %2330 = vmatmul.mubr.bf16.gmra.mrb[124].mxu1 %v4237_v58  ;;  %3935 = vmatmul.mubr.bf16.gmra.mrb[124].mxu0 %v4238_v59  ;;  %v4253_v63 = vld [vmem:[%s4338_s17 + $0x3c8] ss:$36 sps:$4 sm:$0xff]   ;;  %v4256_v7 = vld [vmem:[%s4338_s17 + $0x410] ss:$36 sps:$4 sm:$0xff]  }
 0x11f   : > { %v4699_v11 = vadd.f32 %v3567_v9, %v4649_v5  ;;  %2337 = vmatprep.mubr.bf16.mxu1 %v4239_v2  ;;  %3938 = vmatprep.mubr.bf16.mxu0 %v4241_v3 }
 0x121   : > { %v3568_v13 = vpop.f32.mrb[20].mxu1  ;;  %v3480_v15 = vpop.f32.mrb[20].mxu0 }
 0x122   : > { %v3569_v16 = vpop.f32.mrb[21].mxu1  ;;  %v3481_v17 = vpop.f32.mrb[21].mxu0 }
 0x123   : > { %v3570_v62 = vadd.f32 %v3569_v16, %v3568_v13  ;;  %v3571_v22 = vpop.f32.mrb[22].mxu1  ;;  %v4703_v23 = vadd.f32 %v3481_v17, %v3480_v15  ;;  %v3483_v24 = vpop.f32.mrb[22].mxu0 }
 0x124   : > { %v3572_v27 = vpop.f32.mrb[23].mxu1  ;;  %v3484_v5 = vpop.f32.mrb[23].mxu0 }
 0x125   : > { %v4708_v29 = vadd.f32 %v3570_v62, %v4655_v14  ;;  %v3573_v31 = vadd.f32 %v3572_v27, %v3571_v22  ;;  %v4710_v32 = vadd.f32 %v3484_v5, %v3483_v24  ;;  %v4257_v24 = vld [vmem:[%s4338_s17 + $0x450] ss:$36 sps:$4 sm:$0xff]  }
 0x126   : > { %2338 = vmatmul.mubr.bf16.gmra.mrb[128].mxu1 %v4242_v18  ;;  %3939 = vmatmul.mubr.bf16.gmra.mrb[128].mxu0 %v4243_v19 }
 0x127   : > { %v4713_v33 = vadd.f32 %v3573_v31, %v4661_v21  ;;  %2345 = vmatprep.mubr.bf16.mxu1 %v4244_v25  ;;  %3942 = vmatprep.mubr.bf16.mxu0 %v4246_v26  ;;  %v4258_v25 = vld [vmem:[%s4338_s17 + $0x458] ss:$36 sps:$4 sm:$0xff]   ;;  %s2973_s17 = sshll.u32 %s5172_s22, 2 }
 0x128   : > { %s4962_s13 = scalar_lea.vmem %s5169_s4, %s2973_s17  ;;  %s5015_s23 = scalar_lea.vmem %s5170_s5, %s2973_s17 }
 0x129   : > { %v3574_v34 = vpop.f32.mrb[24].mxu1  ;;  %v3486_v35 = vpop.f32.mrb[24].mxu0 }
 0x12a   : > { %v3575_v38 = vpop.f32.mrb[25].mxu1  ;;  %v3487_v39 = vpop.f32.mrb[25].mxu0 }
 0x12b   : > { %v3576_v14 = vadd.f32 %v3575_v38, %v3574_v34  ;;  %v3577_v42 = vpop.f32.mrb[26].mxu1  ;;  %v4717_v43 = vadd.f32 %v3487_v39, %v3486_v35  ;;  %v3489_v45 = vpop.f32.mrb[26].mxu0 }
 0x12c   : > { %v3578_v49 = vpop.f32.mrb[27].mxu1  ;;  %v3490_v21 = vpop.f32.mrb[27].mxu0 }
 0x12d   : > { %v4722_v50 = vadd.f32 %v3576_v14, %v4667_v30  ;;  %v3579_v51 = vadd.f32 %v3578_v49, %v3577_v42  ;;  %v4724_v54 = vadd.f32 %v3490_v21, %v3489_v45 }
 0x12e   : > { %2346 = vmatmul.mubr.bf16.gmra.mrb[132].mxu1 %v4247_v40  ;;  %3943 = vmatmul.mubr.bf16.gmra.mrb[132].mxu0 %v4248_v41 }
 0x12f   : > { %v4727_v55 = vadd.f32 %v3579_v51, %v4673_v37  ;;  %2353 = vmatprep.mubr.bf16.mxu1 %v4249_v47  ;;  %3946 = vmatprep.mubr.bf16.mxu0 %v4251_v48 }
 0x131   : > { %v3580_v56 = vpop.f32.mrb[28].mxu1  ;;  %v3492_v57 = vpop.f32.mrb[28].mxu0 }
 0x132   : > { %v3581_v58 = vpop.f32.mrb[29].mxu1  ;;  %v3493_v59 = vpop.f32.mrb[29].mxu0 }
 0x133   : > { %v3582_v30 = vadd.f32 %v3581_v58, %v3580_v56  ;;  %v3583_v1 = vpop.f32.mrb[30].mxu1  ;;  %v4731_v2 = vadd.f32 %v3493_v59, %v3492_v57  ;;  %v3495_v3 = vpop.f32.mrb[30].mxu0 }
 0x134   : > { %v3584_v9 = vpop.f32.mrb[31].mxu1  ;;  %v3496_v37 = vpop.f32.mrb[31].mxu0 }
 0x135   : > { %v4736_v13 = vadd.f32 %v3582_v30, %v4679_v46  ;;  %v3585_v15 = vadd.f32 %v3584_v9, %v3583_v1  ;;  %v4738_v16 = vadd.f32 %v3496_v37, %v3495_v3 }
 0x136   : > { %2354 = vmatmul.mubr.bf16.gmra.mrb[136].mxu1 %v4252_v61  ;;  %3947 = vmatmul.mubr.bf16.gmra.mrb[136].mxu0 %v4253_v63 }
 0x137   : > { %v4741_v17 = vadd.f32 %v3585_v15, %v4685_v53  ;;  %2361 = vmatprep.mubr.bf16.mxu1 %v4254_v6  ;;  %3950 = vmatprep.mubr.bf16.mxu0 %v4256_v7 }
 0x139   : > { %v3586_v18 = vpop.f32.mrb[32].mxu1  ;;  %v3498_v19 = vpop.f32.mrb[32].mxu0 }
 0x13a   : > { %v3587_v62 = vpop.f32.mrb[33].mxu1  ;;  %v3499_v22 = vpop.f32.mrb[33].mxu0 }
 0x13b   : > { %v3588_v26 = vadd.f32 %v3587_v62, %v3586_v18  ;;  %v3589_v27 = vpop.f32.mrb[34].mxu1  ;;  %v3500_v46 = vadd.f32 %v3499_v22, %v3498_v19  ;;  %v3501_v5 = vpop.f32.mrb[34].mxu0 }
 0x13c   : > { %v3590_v31 = vpop.f32.mrb[35].mxu1  ;;  %v3502_v34 = vpop.f32.mrb[35].mxu0 }
 0x13d   : > { %v4746_v35 = vadd.f32 %v3588_v26, %v4689_v0  ;;  %v3591_v38 = vadd.f32 %v3590_v31, %v3589_v27  ;;  %v3503_v53 = vadd.f32 %v3502_v34, %v3501_v5 }
 0x13e   : > { %2362 = vmatmul.mubr.bf16.gmra.mrb[140].mxu1 %v4257_v24  ;;  %3951 = vmatmul.mubr.bf16.gmra.mrb[140].mxu0 %v4258_v25 }
 0x13f   : > { %v4749_v39 = vadd.f32 %v3591_v38, %v4696_v10 }
 0x141   : > { %v3592_v40 = vpop.f32.mrb[36].mxu1  ;;  %v3504_v41 = vpop.f32.mrb[36].mxu0 }
 0x142   : > { %v3593_v14 = vpop.f32.mrb[37].mxu1  ;;  %v3505_v42 = vpop.f32.mrb[37].mxu0 }
 0x143   : > { %v3594_v45 = vadd.f32 %v3593_v14, %v3592_v40  ;;  %v3595_v47 = vpop.f32.mrb[38].mxu1  ;;  %v3506_v48 = vadd.f32 %v3505_v42, %v3504_v41  ;;  %v3507_v49 = vpop.f32.mrb[38].mxu0 }
 0x144   : > { %v3596_v21 = vpop.f32.mrb[39].mxu1  ;;  %v3508_v51 = vpop.f32.mrb[39].mxu0 }
 0x145   : > { %v4752_v0 = vadd.f32 %v3594_v45, %v4703_v23  ;;  %v3597_v56 = vadd.f32 %v3596_v21, %v3595_v47  ;;  %v3509_v57 = vadd.f32 %v3508_v51, %v3507_v49 }
 0x147   : > { %v4755_v58 = vadd.f32 %v3597_v56, %v4710_v32 }
 0x149   : > { %v3598_v10 = vpop.f32.mrb[40].mxu1  ;;  %v3510_v59 = vpop.f32.mrb[40].mxu0 }
 0x14a   : > { %v3599_v61 = vpop.f32.mrb[41].mxu1  ;;  %v3511_v63 = vpop.f32.mrb[41].mxu0 }
 0x14b   : > { %v3600_v30 = vadd.f32 %v3599_v61, %v3598_v10  ;;  %v3601_v1 = vpop.f32.mrb[42].mxu1  ;;  %v4757_v3 = vadd.f32 %v3511_v63, %v3510_v59  ;;  %v3513_v6 = vpop.f32.mrb[42].mxu0 }
 0x14c   : > { %v3602_v7 = vpop.f32.mrb[43].mxu1  ;;  %v3514_v9 = vpop.f32.mrb[43].mxu0 }
 0x14d   : > { %v4760_v37 = vadd.f32 %v3600_v30, %v4717_v43  ;;  %v3603_v23 = vadd.f32 %v3602_v7, %v3601_v1  ;;  %v3515_v15 = vadd.f32 %v3514_v9, %v3513_v6 }
 0x14f   : > { %v4763_v18 = vadd.f32 %v3603_v23, %v4724_v54 }
 0x151   : > { %v3604_v32 = vpop.f32.mrb[44].mxu1  ;;  %v3516_v19 = vpop.f32.mrb[44].mxu0 }
 0x152   : > { %v3605_v62 = vpop.f32.mrb[45].mxu1  ;;  %v3517_v22 = vpop.f32.mrb[45].mxu0 }
 0x153   : > { %v3606_v24 = vadd.f32 %v3605_v62, %v3604_v32  ;;  %v3607_v25 = vpop.f32.mrb[46].mxu1  ;;  %v4765_v26 = vadd.f32 %v3517_v22, %v3516_v19  ;;  %v3519_v27 = vpop.f32.mrb[46].mxu0 }
 0x154   : > { %v3608_v5 = vpop.f32.mrb[47].mxu1  ;;  %v3520_v31 = vpop.f32.mrb[47].mxu0 }
 0x155   : > { %v4768_v34 = vadd.f32 %v3606_v24, %v4731_v2  ;;  %v3609_v43 = vadd.f32 %v3608_v5, %v3607_v25  ;;  %v4770_v38 = vadd.f32 %v3520_v31, %v3519_v27 }
 0x157   : > { %v4773_v54 = vadd.f32 %v3609_v43, %v4738_v16 }
 0x159   : > { %v3610_v40 = vpop.f32.mrb[48].mxu1  ;;  %v3674_v41 = vpop.f32.mrb[48].mxu0 }
 0x15a   : > { %v3611_v14 = vpop.f32.mrb[49].mxu1  ;;  %v3675_v42 = vpop.f32.mrb[49].mxu0 }
 0x15b   : > { %v3612_v45 = vadd.f32 %v3611_v14, %v3610_v40  ;;  %v3676_v47 = vadd.f32 %v3675_v42, %v3674_v41  ;;  %v3613_v49 = vpop.f32.mrb[50].mxu1  ;;  %v3677_v21 = vpop.f32.mrb[50].mxu0 }
 0x15c   : > { %v3614_v51 = vpop.f32.mrb[51].mxu1  ;;  %v3678_v56 = vpop.f32.mrb[51].mxu0 }
 0x15d   : > { %v4775_v10 = vadd.f32 %v3612_v45, %v3500_v46  ;;  %v4778_v2 = vadd.f32 %v3676_v47, %v4694_v8  ;;  %v3615_v59 = vadd.f32 %v3614_v51, %v3613_v49  ;;  %v3679_v61 = vadd.f32 %v3678_v56, %v3677_v21 }
 0x15f   : > { %v4780_v63 = vadd.f32 %v3615_v59, %v3503_v53  ;;  %v4783_v16 = vadd.f32 %v3679_v61, %v4699_v11 }
 0x161   : > { %v3616_v30 = vpop.f32.mrb[52].mxu1  ;;  %v3680_v1 = vpop.f32.mrb[52].mxu0 }
 0x162   : > { %v3617_v6 = vpop.f32.mrb[53].mxu1  ;;  %v3681_v7 = vpop.f32.mrb[53].mxu0 }
 0x163   : > { %v3618_v9 = vadd.f32 %v3617_v6, %v3616_v30  ;;  %v3682_v23 = vadd.f32 %v3681_v7, %v3680_v1  ;;  %v3619_v32 = vpop.f32.mrb[54].mxu1  ;;  %v3683_v19 = vpop.f32.mrb[54].mxu0 }
 0x164   : > { %v3620_v46 = vpop.f32.mrb[55].mxu1  ;;  %v3684_v62 = vpop.f32.mrb[55].mxu0 }
 0x165   : > { %v4785_v22 = vadd.f32 %v3618_v9, %v3506_v48  ;;  %v4788_v8 = vadd.f32 %v3682_v23, %v4708_v29  ;;  %v3621_v53 = vadd.f32 %v3620_v46, %v3619_v32  ;;  %v3685_v24 = vadd.f32 %v3684_v62, %v3683_v19 }
 0x167   : > { %v4790_v25 = vadd.f32 %v3621_v53, %v3509_v57  ;;  %v4793_v11 = vadd.f32 %v3685_v24, %v4713_v33 }
 0x169   : > { %v3622_v27 = vpop.f32.mrb[56].mxu1  ;;  %v3686_v5 = vpop.f32.mrb[56].mxu0 }
 0x16a   : > { %v3623_v31 = vpop.f32.mrb[57].mxu1  ;;  %v3687_v43 = vpop.f32.mrb[57].mxu0 }
 0x16b   : > { %v3624_v40 = vadd.f32 %v3623_v31, %v3622_v27  ;;  %v3688_v41 = vadd.f32 %v3687_v43, %v3686_v5  ;;  %v3625_v14 = vpop.f32.mrb[58].mxu1  ;;  %v3689_v42 = vpop.f32.mrb[58].mxu0 }
 0x16c   : > { %v3626_v48 = vpop.f32.mrb[59].mxu1  ;;  %v3690_v45 = vpop.f32.mrb[59].mxu0 }
 0x16d   : > { %v4796_v29 = vadd.f32 %v3624_v40, %v4757_v3  ;;  %v4799_v47 = vadd.f32 %v3688_v41, %v4722_v50  ;;  %v3627_v57 = vadd.f32 %v3626_v48, %v3625_v14  ;;  %v3691_v49 = vadd.f32 %v3690_v45, %v3689_v42 }
 0x16f   : > { %v4801_v33 = vadd.f32 %v3627_v57, %v3515_v15  ;;  %v4804_v21 = vadd.f32 %v3691_v49, %v4727_v55 }
 0x171   : > { %v3628_v51 = vpop.f32.mrb[60].mxu1  ;;  %v3692_v56 = vpop.f32.mrb[60].mxu0 }
 0x172   : > { %v3629_v59 = vpop.f32.mrb[61].mxu1  ;;  %v3693_v61 = vpop.f32.mrb[61].mxu0 }
 0x173   : > { %v3630_v30 = vadd.f32 %v3629_v59, %v3628_v51  ;;  %v3694_v1 = vadd.f32 %v3693_v61, %v3692_v56  ;;  %v3631_v6 = vpop.f32.mrb[62].mxu1  ;;  %v3695_v7 = vpop.f32.mrb[62].mxu0 }
 0x174   : > { %v3632_v3 = vpop.f32.mrb[63].mxu1  ;;  %v3696_v9 = vpop.f32.mrb[63].mxu0 }
 0x175   : > { %v4807_v50 = vadd.f32 %v3630_v30, %v4765_v26  ;;  %v4810_v23 = vadd.f32 %v3694_v1, %v4736_v13  ;;  %v3633_v15 = vadd.f32 %v3632_v3, %v3631_v6  ;;  %v3697_v32 = vadd.f32 %v3696_v9, %v3695_v7 }
 0x177   : > { %v4813_v55 = vadd.f32 %v3633_v15, %v4770_v38  ;;  %v4816_v19 = vadd.f32 %v3697_v32, %v4741_v17 }
 0x179   : > { %v3634_v46 = vpop.f32.mrb[64].mxu1  ;;  %v3698_v62 = vpop.f32.mrb[64].mxu0 }
 0x17a   : > { %v3635_v53 = vpop.f32.mrb[65].mxu1  ;;  %v3699_v24 = vpop.f32.mrb[65].mxu0 }
 0x17b   : > { %v3636_v27 = vadd.f32 %v3635_v53, %v3634_v46  ;;  %v3700_v5 = vadd.f32 %v3699_v24, %v3698_v62  ;;  %v3637_v31 = vpop.f32.mrb[66].mxu1  ;;  %v3701_v26 = vpop.f32.mrb[66].mxu0 }
 0x17c   : > { %v3638_v43 = vpop.f32.mrb[67].mxu1  ;;  %v3702_v40 = vpop.f32.mrb[67].mxu0 }
 0x17d   : > { %v4819_v13 = vadd.f32 %v3636_v27, %v4641_v60  ;;  %v4822_v41 = vadd.f32 %v3700_v5, %v4746_v35  ;;  %v3639_v38 = vadd.f32 %v3638_v43, %v3637_v31  ;;  %v3703_v14 = vadd.f32 %v3702_v40, %v3701_v26 }
 0x17f   : > { %v4825_v17 = vadd.f32 %v3639_v38, %v4647_v4  ;;  %v4828_v42 = vadd.f32 %v3703_v14, %v4749_v39 }
 0x181   : > { %v3640_v48 = vpop.f32.mrb[68].mxu1  ;;  %v3704_v45 = vpop.f32.mrb[68].mxu0 }
 0x182   : > { %v3641_v57 = vpop.f32.mrb[69].mxu1  ;;  %v3705_v49 = vpop.f32.mrb[69].mxu0 }
 0x183   : > { %v3642_v51 = vadd.f32 %v3641_v57, %v3640_v48  ;;  %v3706_v56 = vadd.f32 %v3705_v49, %v3704_v45  ;;  %v3643_v59 = vpop.f32.mrb[70].mxu1  ;;  %v3707_v60 = vpop.f32.mrb[70].mxu0 }
 0x184   : > { %v3644_v61 = vpop.f32.mrb[71].mxu1  ;;  %v3708_v30 = vpop.f32.mrb[71].mxu0 }
 0x185   : > { %v4831_v35 = vadd.f32 %v3642_v51, %v4653_v12  ;;  %v4834_v1 = vadd.f32 %v3706_v56, %v4752_v0  ;;  %v3645_v4 = vadd.f32 %v3644_v61, %v3643_v59  ;;  %v3709_v6 = vadd.f32 %v3708_v30, %v3707_v60 }
 0x187   : > { %v4837_v39 = vadd.f32 %v3645_v4, %v4659_v20  ;;  %v4840_v7 = vadd.f32 %v3709_v6, %v4755_v58 }
 0x189   : > { %v3646_v3 = vpop.f32.mrb[72].mxu1  ;;  %v3710_v9 = vpop.f32.mrb[72].mxu0 }
 0x18a   : > { %v3647_v15 = vpop.f32.mrb[73].mxu1  ;;  %v3711_v32 = vpop.f32.mrb[73].mxu0 }
 0x18b   : > { %v3648_v46 = vadd.f32 %v3647_v15, %v3646_v3  ;;  %v3712_v62 = vadd.f32 %v3711_v32, %v3710_v9  ;;  %v3649_v53 = vpop.f32.mrb[74].mxu1  ;;  %v3713_v12 = vpop.f32.mrb[74].mxu0 }
 0x18c   : > { %v3650_v24 = vpop.f32.mrb[75].mxu1  ;;  %v3714_v27 = vpop.f32.mrb[75].mxu0 }
 0x18d   : > { %v4843_v0 = vadd.f32 %v3648_v46, %v4665_v28  ;;  %v4846_v5 = vadd.f32 %v3712_v62, %v4760_v37  ;;  %v3651_v20 = vadd.f32 %v3650_v24, %v3649_v53  ;;  %v3715_v31 = vadd.f32 %v3714_v27, %v3713_v12 }
 0x18f   : > { %v4849_v58 = vadd.f32 %v3651_v20, %v4671_v36  ;;  %v4852_v26 = vadd.f32 %v3715_v31, %v4763_v18 }
 0x191   : > { %v3652_v43 = vpop.f32.mrb[76].mxu1  ;;  %v3716_v40 = vpop.f32.mrb[76].mxu0 }
 0x192   : > { %v3653_v38 = vpop.f32.mrb[77].mxu1  ;;  %v3717_v14 = vpop.f32.mrb[77].mxu0 }
 0x193   : > { %v3654_v48 = vadd.f32 %v3653_v38, %v3652_v43  ;;  %v3718_v45 = vadd.f32 %v3717_v14, %v3716_v40  ;;  %v3655_v57 = vpop.f32.mrb[78].mxu1  ;;  %v3719_v28 = vpop.f32.mrb[78].mxu0 }
 0x194   : > { %v3656_v49 = vpop.f32.mrb[79].mxu1  ;;  %v3720_v51 = vpop.f32.mrb[79].mxu0 }
 0x195   : > { %v4855_v37 = vadd.f32 %v3654_v48, %v4677_v44  ;;  %v4858_v56 = vadd.f32 %v3718_v45, %v4768_v34  ;;  %v3657_v36 = vadd.f32 %v3656_v49, %v3655_v57  ;;  %v3721_v59 = vadd.f32 %v3720_v51, %v3719_v28 }
 0x197   : > { %v4861_v18 = vadd.f32 %v3657_v36, %v4683_v52  ;;  %v4864_v60 = vadd.f32 %v3721_v59, %v4773_v54 }
 0x199   : > { %v3722_v61 = vpop.f32.mrb[80].mxu0  ;;  %v3786_v30 = vpop.f32.mrb[80].mxu1 }
 0x19a   : > { %v3723_v4 = vpop.f32.mrb[81].mxu0  ;;  %v3787_v6 = vpop.f32.mrb[81].mxu1 }
 0x19b   : > { %v3724_v3 = vadd.f32 %v3723_v4, %v3722_v61  ;;  %v3788_v9 = vadd.f32 %v3787_v6, %v3786_v30  ;;  %v3725_v15 = vpop.f32.mrb[82].mxu0  ;;  %v3789_v44 = vpop.f32.mrb[82].mxu1 }
 0x19c   : > { %v3726_v32 = vpop.f32.mrb[83].mxu0  ;;  %v3790_v46 = vpop.f32.mrb[83].mxu1 }
 0x19d   : > { %v4867_v34 = vadd.f32 %v3724_v3, %v4775_v10  ;;  %v3727_v62 = vadd.f32 %v3726_v32, %v3725_v15  ;;  %v3791_v53 = vadd.f32 %v3790_v46, %v3789_v44  ;;  %v4870_v52 = vadd.f32 %v3788_v9, %v4778_v2 }
 0x19f   : > { %v4873_v54 = vadd.f32 %v3727_v62, %v4780_v63  ;;  %v4876_v12 = vadd.f32 %v3791_v53, %v4783_v16 }
 0x1a1   : > { %v3728_v24 = vpop.f32.mrb[84].mxu0  ;;  %v3792_v27 = vpop.f32.mrb[84].mxu1 }
 0x1a2   : > { %v3729_v20 = vpop.f32.mrb[85].mxu0  ;;  %v3793_v31 = vpop.f32.mrb[85].mxu1 }
 0x1a3   : > { %v3730_v43 = vadd.f32 %v3729_v20, %v3728_v24  ;;  %v3794_v40 = vadd.f32 %v3793_v31, %v3792_v27  ;;  %v3731_v38 = vpop.f32.mrb[86].mxu0  ;;  %v3795_v10 = vpop.f32.mrb[86].mxu1 }
 0x1a4   : > { %v3732_v14 = vpop.f32.mrb[87].mxu0  ;;  %v3796_v48 = vpop.f32.mrb[87].mxu1 }
 0x1a5   : > { %v4879_v45 = vadd.f32 %v3730_v43, %v4785_v22  ;;  %v3733_v2 = vadd.f32 %v3732_v14, %v3731_v38  ;;  %v3797_v57 = vadd.f32 %v3796_v48, %v3795_v10  ;;  %v4882_v63 = vadd.f32 %v3794_v40, %v4788_v8 }
 0x1a7   : > { %v4885_v16 = vadd.f32 %v3733_v2, %v4790_v25  ;;  %v4888_v28 = vadd.f32 %v3797_v57, %v4793_v11 }
 0x1a9   : > { %v3734_v49 = vpop.f32.mrb[88].mxu0  ;;  %v3798_v51 = vpop.f32.mrb[88].mxu1 }
 0x1aa   : > { %v3735_v36 = vpop.f32.mrb[89].mxu0  ;;  %v3799_v59 = vpop.f32.mrb[89].mxu1 }
 0x1ab   : > { %v3736_v61 = vadd.f32 %v3735_v36, %v3734_v49  ;;  %v3800_v30 = vadd.f32 %v3799_v59, %v3798_v51  ;;  %v3737_v4 = vpop.f32.mrb[90].mxu0  ;;  %v3801_v22 = vpop.f32.mrb[90].mxu1 }
 0x1ac   : > { %v3738_v6 = vpop.f32.mrb[91].mxu0  ;;  %v3802_v3 = vpop.f32.mrb[91].mxu1 }
 0x1ad   : > { %v4891_v9 = vadd.f32 %v3736_v61, %v4796_v29  ;;  %v3739_v8 = vadd.f32 %v3738_v6, %v3737_v4  ;;  %v3803_v15 = vadd.f32 %v3802_v3, %v3801_v22  ;;  %v4894_v25 = vadd.f32 %v3800_v30, %v4799_v47 }
 0x1af   : > { %v4897_v11 = vadd.f32 %v3739_v8, %v4801_v33  ;;  %v4900_v44 = vadd.f32 %v3803_v15, %v4804_v21 }
 0x1b1   : > { %v3740_v32 = vpop.f32.mrb[92].mxu0  ;;  %v3804_v46 = vpop.f32.mrb[92].mxu1 }
 0x1b2   : > { %v3741_v62 = vpop.f32.mrb[93].mxu0  ;;  %v3805_v53 = vpop.f32.mrb[93].mxu1 }
 0x1b3   : > { %v3742_v24 = vadd.f32 %v3741_v62, %v3740_v32  ;;  %v3806_v27 = vadd.f32 %v3805_v53, %v3804_v46  ;;  %v3743_v20 = vpop.f32.mrb[94].mxu0  ;;  %v3807_v29 = vpop.f32.mrb[94].mxu1 }
 0x1b4   : > { %v3744_v31 = vpop.f32.mrb[95].mxu0  ;;  %v3808_v43 = vpop.f32.mrb[95].mxu1 }
 0x1b5   : > { %v4903_v40 = vadd.f32 %v3742_v24, %v4807_v50  ;;  %v3745_v47 = vadd.f32 %v3744_v31, %v3743_v20  ;;  %v3809_v38 = vadd.f32 %v3808_v43, %v3807_v29  ;;  %v4906_v33 = vadd.f32 %v3806_v27, %v4810_v23 }
 0x1b7   : > { %v4909_v21 = vadd.f32 %v3745_v47, %v4813_v55  ;;  %v4912_v10 = vadd.f32 %v3809_v38, %v4816_v19 }
 0x1b9   : > { %v3746_v14 = vpop.f32.mrb[96].mxu0  ;;  %v3810_v48 = vpop.f32.mrb[96].mxu1 }
 0x1ba   : > { %v3747_v2 = vpop.f32.mrb[97].mxu0  ;;  %v3811_v57 = vpop.f32.mrb[97].mxu1 }
 0x1bb   : > { %v3748_v49 = vadd.f32 %v3747_v2, %v3746_v14  ;;  %v3812_v51 = vadd.f32 %v3811_v57, %v3810_v48  ;;  %v3749_v36 = vpop.f32.mrb[98].mxu0  ;;  %v3813_v50 = vpop.f32.mrb[98].mxu1 }
 0x1bc   : > { %v3750_v59 = vpop.f32.mrb[99].mxu0  ;;  %v3814_v61 = vpop.f32.mrb[99].mxu1 }
 0x1bd   : > { %v4915_v30 = vadd.f32 %v3748_v49, %v4819_v13  ;;  %v3751_v23 = vadd.f32 %v3750_v59, %v3749_v36  ;;  %v3815_v4 = vadd.f32 %v3814_v61, %v3813_v50  ;;  %v4918_v55 = vadd.f32 %v3812_v51, %v4822_v41 }
 0x1bf   : > { %v4921_v19 = vadd.f32 %v3751_v23, %v4825_v17  ;;  %v4924_v22 = vadd.f32 %v3815_v4, %v4828_v42 }
 0x1c1   : > { %v3752_v6 = vpop.f32.mrb[100].mxu0  ;;  %v3816_v3 = vpop.f32.mrb[100].mxu1 }
 0x1c2   : > { %v3753_v8 = vpop.f32.mrb[101].mxu0  ;;  %v3817_v15 = vpop.f32.mrb[101].mxu1 }
 0x1c3   : > { %v3754_v32 = vadd.f32 %v3753_v8, %v3752_v6  ;;  %v3818_v46 = vadd.f32 %v3817_v15, %v3816_v3  ;;  %v3755_v62 = vpop.f32.mrb[102].mxu0  ;;  %v3819_v13 = vpop.f32.mrb[102].mxu1 }
 0x1c4   : > { %v3756_v53 = vpop.f32.mrb[103].mxu0  ;;  %v3820_v24 = vpop.f32.mrb[103].mxu1 }
 0x1c5   : > { %v4927_v27 = vadd.f32 %v3754_v32, %v4831_v35  ;;  %v3757_v41 = vadd.f32 %v3756_v53, %v3755_v62  ;;  %v3821_v20 = vadd.f32 %v3820_v24, %v3819_v13  ;;  %v4930_v17 = vadd.f32 %v3818_v46, %v4834_v1  ;;  %v3404_v24 = vld [vmem:[%s4962_s13 + $0x8] sm:$0xff]  }
 0x1c7   : > { %v4933_v42 = vadd.f32 %v3757_v41, %v4837_v39  ;;  %v4936_v29 = vadd.f32 %v3821_v20, %v4840_v7  ;;  %v3261_v41 = vld [vmem:[%s4962_s13] sm:$0xff]  }
 0x1c9   : > { %v3758_v31 = vpop.f32.mrb[104].mxu0  ;;  %v3822_v43 = vpop.f32.mrb[104].mxu1 }
 0x1ca   : > { %v3759_v47 = vpop.f32.mrb[105].mxu0  ;;  %v3823_v38 = vpop.f32.mrb[105].mxu1 }
 0x1cb   : > { %v3760_v14 = vadd.f32 %v3759_v47, %v3758_v31  ;;  %v3824_v48 = vadd.f32 %v3823_v38, %v3822_v43  ;;  %v3761_v2 = vpop.f32.mrb[106].mxu0  ;;  %v3825_v35 = vpop.f32.mrb[106].mxu1 }
 0x1cc   : > { %v3762_v57 = vpop.f32.mrb[107].mxu0  ;;  %v3826_v49 = vpop.f32.mrb[107].mxu1 }
 0x1cd   : > { %v4939_v1 = vadd.f32 %v3760_v14, %v4843_v0  ;;  %v3763_v51 = vadd.f32 %v3762_v57, %v3761_v2  ;;  %v3827_v39 = vadd.f32 %v3826_v49, %v3825_v35  ;;  %v4942_v36 = vadd.f32 %v3824_v48, %v4846_v5 }
 0x1ce   : > { %v3266_v2 = vunpack.c.l.bf16 %v3404_v24  ;;  %v3262_v35 = vunpack.c.l.bf16 %v3261_v41 }
 0x1cf   : > { %v4945_v7 = vadd.f32 %v3763_v51, %v4849_v58  ;;  %v4948_v50 = vadd.f32 %v3827_v39, %v4852_v26 }
 0x1d1   : > { %v3764_v59 = vpop.f32.mrb[108].mxu0  ;;  %v3828_v61 = vpop.f32.mrb[108].mxu1 }
 0x1d2   : > { %v3765_v23 = vpop.f32.mrb[109].mxu0  ;;  %v3829_v4 = vpop.f32.mrb[109].mxu1 }
 0x1d3   : > { %v3766_v6 = vadd.f32 %v3765_v23, %v3764_v59  ;;  %v3830_v3 = vadd.f32 %v3829_v4, %v3828_v61  ;;  %v3767_v0 = vpop.f32.mrb[110].mxu0  ;;  %v3831_v8 = vpop.f32.mrb[110].mxu1  ;;  %v3267_v4 = vunpack.c.h.bf16 %v3404_v24 }
 0x1d4   : > { %v3768_v15 = vpop.f32.mrb[111].mxu0  ;;  %v3832_v32 = vpop.f32.mrb[111].mxu1 }
 0x1d5   : > { %v4952_v5 = vadd.f32 %v3766_v6, %v4855_v37  ;;  %v3769_v58 = vadd.f32 %v3768_v15, %v3767_v0  ;;  %v3833_v46 = vadd.f32 %v3832_v32, %v3831_v8  ;;  %v4955_v26 = vadd.f32 %v3830_v3, %v4858_v56  ;;  %v4973_v56 = vld [vmem:[%s5167_s2] ss:$0 sm:$0xff]  ;;  %v3406_v6 = vld [vmem:[%s4962_s13 + $0x18] sm:$0xff]   ;;  %v4995_v3 = vld [vmem:[%s4962_s13 + $0x10] sm:$0xff]  }
 0x1d6   : > { %v3263_v8 = vunpack.c.h.bf16 %v3261_v41  ;;  %v3270_v24 = vunpack.c.l.bf16 %v4995_v3 }
 0x1d7   : > { %v4965_v62 = vadd.f32 %v3769_v58, %v4861_v18  ;;  %v4968_v13 = vadd.f32 %v3833_v46, %v4864_v60  ;;  %v4981_v18 = vld [vmem:[%s5168_s3] ss:$0 sm:$0xff] }
 0x1d9   : > { %v3834_v37 = vpop.f32.mrb[112].mxu1  ;;  %v3924_v53 = vpop.f32.mrb[112].mxu0 }
 0x1da   : > { %v2413_v20 = vadd.f32 %v3924_v53, %v4882_v63  ;;  %v3835_v31 = vpop.f32.mrb[113].mxu1  ;;  %v2404_v43 = vpop.f32.mrb[113].mxu0  ;;  %v3274_v53 = vunpack.c.l.bf16 %v3406_v6 }
 0x1db   : > { %v3836_v60 = vadd.f32 %v3835_v31, %v3834_v37  ;;  %v2405_v47 = vadd.f32 %v2404_v43, %v4870_v52  ;;  %v3837_v38 = vpop.f32.mrb[114].mxu1  ;;  %v3925_v14 = vpop.f32.mrb[114].mxu0 }
 0x1dc   : > { %v2540_v48 = vmul.f32 %v4973_v56, %v2413_v20  ;;  %v2416_v63 = vadd.f32 %v3925_v14, %v4888_v28  ;;  %v3838_v57 = vpop.f32.mrb[115].mxu1  ;;  %v2407_v49 = vpop.f32.mrb[115].mxu0 }
 0x1dd   : > { %v2538_v51 = vmul.f32 %v4973_v56, %v2405_v47  ;;  %v3839_v39 = vadd.f32 %v3838_v57, %v3837_v38  ;;  %v2408_v59 = vadd.f32 %v2407_v49, %v4876_v12  ;;  %v4989_v61 = vadd.f32 %v3836_v60, %v4867_v34 }
 0x1de   : > { %v2579_v52 = vadd.f32 %v4981_v18, %v2540_v48  ;;  %v2541_v23 = vmul.f32 %v4973_v56, %v2416_v63  ;;  %v3275_v60 = vunpack.c.h.bf16 %v3406_v6 }
 0x1df   : > { %v2577_v28 = vadd.f32 %v4981_v18, %v2538_v51  ;;  %v2539_v0 = vmul.f32 %v4973_v56, %v2408_v59  ;;  %v5000_v15 = vadd.f32 %v3839_v39, %v4873_v54  ;;  %v3271_v54 = vunpack.c.h.bf16 %v4995_v3  ;;  %v3408_v3 = vld [vmem:[%s4962_s13 + $0x28] sm:$0xff]  }
 0x1e0   : > { %v2675_v12 = vadd.f32 %v3266_v2, %v2579_v52  ;;  %v2580_v34 = vadd.f32 %v4981_v18, %v2541_v23 }
 0x1e1   : > { %v2673_v32 = vadd.f32 %v3262_v35, %v2577_v28  ;;  %v2578_v58 = vadd.f32 %v4981_v18, %v2539_v0  ;;  %v3840_v46 = vpop.f32.mrb[116].mxu1  ;;  %v3928_v37 = vpop.f32.mrb[116].mxu0  ;;  %v5023_v28 = vld [vmem:[%s4962_s13 + $0x20] sm:$0xff]  }
 0x1e2   : > { %v2676_v20 = vadd.f32 %v3267_v4, %v2580_v34  ;;  %v2429_v31 = vadd.f32 %v3928_v37, %v4906_v33  ;;  %v3841_v43 = vpop.f32.mrb[117].mxu1  ;;  %v2420_v41 = vpop.f32.mrb[117].mxu0  ;;  %v2707_v47 = vmax.f32 %v2675_v12, 0.0 }
 0x1e3   : > { %v2674_v38 = vadd.f32 %v3263_v8, %v2578_v58  ;;  %v3842_v14 = vadd.f32 %v3841_v43, %v3840_v46  ;;  %v2421_v48 = vadd.f32 %v2420_v41, %v4894_v25  ;;  %v3843_v2 = vpop.f32.mrb[118].mxu1  ;;  %v3929_v35 = vpop.f32.mrb[118].mxu0  ;;  %v2705_v63 = vmax.f32 %v2673_v32, 0.0 }
 0x1e4   : > { %v2708_v57 = vmax.f32 %v2676_v20, 0.0  ;;  %v2544_v49 = vmul.f32 %v4973_v56, %v2429_v31  ;;  %v2432_v33 = vadd.f32 %v3929_v35, %v4912_v10  ;;  %v3844_v51 = vpop.f32.mrb[119].mxu1  ;;  %v2423_v39 = vpop.f32.mrb[119].mxu0  ;;  %v3278_v43 = vunpack.c.l.bf16 %v5023_v28 }
 0x1e5   : > { %v2706_v25 = vmax.f32 %v2674_v38, 0.0  ;;  %v2542_v59 = vmul.f32 %v4973_v56, %v2421_v48  ;;  %v3845_v52 = vadd.f32 %v3844_v51, %v3843_v2  ;;  %v2424_v23 = vadd.f32 %v2423_v39, %v4900_v44 }
 0x1e6   : > { %v3332_v4 = vpack.c.bf16 %v2708_v57, %v2707_v47  ;;  %v2583_v6 = vadd.f32 %v4981_v18, %v2544_v49  ;;  %v2545_v10 = vmul.f32 %v4973_v56, %v2432_v33  ;;  %v5026_v0 = vadd.f32 %v3842_v14, %v4879_v45 }
 0x1e7   : > { %v3327_v8 = vpack.c.bf16 %v2706_v25, %v2705_v63  ;;  %v2581_v12 = vadd.f32 %v4981_v18, %v2542_v59  ;;  %v2543_v34 = vmul.f32 %v4973_v56, %v2424_v23  ;;  %v5031_v32 = vadd.f32 %v3845_v52, %v4885_v16 }
 0x1e8   : > { %3419 = vst [vmem:[%s5015_s23 + $0x8] sm:$0xff] %v3332_v4   ;;  %v2679_v44 = vadd.f32 %v3274_v53, %v2583_v6  ;;  %v2584_v58 = vadd.f32 %v4981_v18, %v2545_v10  ;;  %v3282_v45 = vunpack.c.l.bf16 %v3408_v3  ;;  %v3283_v16 = vunpack.c.h.bf16 %v3408_v3  ;;  %v3410_v6 = vld [vmem:[%s4962_s13 + $0x38] sm:$0xff]   ;;  %v5049_v10 = vld [vmem:[%s4962_s13 + $0x30] sm:$0xff]  }
 0x1e9   : > { %3328 = vst [vmem:[%s5015_s23] sm:$0xff] %v3327_v8   ;;  %v2677_v46 = vadd.f32 %v3270_v24, %v2581_v12  ;;  %v2582_v37 = vadd.f32 %v4981_v18, %v2543_v34  ;;  %v3846_v20 = vpop.f32.mrb[120].mxu1  ;;  %v3932_v31 = vpop.f32.mrb[120].mxu0  ;;  %v3279_v48 = vunpack.c.h.bf16 %v5023_v28 }
 0x1ea   : > { %v2680_v41 = vadd.f32 %v3275_v60, %v2584_v58  ;;  %v2445_v47 = vadd.f32 %v3932_v31, %v4930_v17  ;;  %v3847_v38 = vpop.f32.mrb[121].mxu1  ;;  %v2436_v14 = vpop.f32.mrb[121].mxu0  ;;  %v2711_v53 = vmax.f32 %v2679_v44, 0.0 }
 0x1eb   : > { %v2678_v2 = vadd.f32 %v3271_v54, %v2582_v37  ;;  %v3848_v35 = vadd.f32 %v3847_v38, %v3846_v20  ;;  %v2437_v24 = vadd.f32 %v2436_v14, %v4918_v55  ;;  %v3849_v63 = vpop.f32.mrb[122].mxu1  ;;  %v3933_v57 = vpop.f32.mrb[122].mxu0  ;;  %v2709_v49 = vmax.f32 %v2677_v46, 0.0 }
 0x1ec   : > { %v2712_v33 = vmax.f32 %v2680_v41, 0.0  ;;  %v2548_v60 = vmul.f32 %v4973_v56, %v2445_v47  ;;  %v2448_v17 = vadd.f32 %v3933_v57, %v4936_v29  ;;  %v3850_v51 = vpop.f32.mrb[123].mxu1  ;;  %v2439_v39 = vpop.f32.mrb[123].mxu0  ;;  %v3286_v20 = vunpack.c.l.bf16 %v5049_v10 }
 0x1ed   : > { %v2710_v25 = vmax.f32 %v2678_v2, 0.0  ;;  %v2546_v59 = vmul.f32 %v4973_v56, %v2437_v24  ;;  %v3851_v54 = vadd.f32 %v3850_v51, %v3849_v63  ;;  %v2440_v55 = vadd.f32 %v2439_v39, %v4924_v22 }
 0x1ee   : > { %v3342_v52 = vpack.c.bf16 %v2712_v33, %v2711_v53  ;;  %v2587_v23 = vadd.f32 %v4981_v18, %v2548_v60  ;;  %v2549_v4 = vmul.f32 %v4973_v56, %v2448_v17  ;;  %v5052_v29 = vadd.f32 %v3848_v35, %v4891_v9 }
 0x1ef   : > { %v3337_v3 = vpack.c.bf16 %v2710_v25, %v2709_v49  ;;  %v2585_v28 = vadd.f32 %v4981_v18, %v2546_v59  ;;  %v2547_v8 = vmul.f32 %v4973_v56, %v2440_v55  ;;  %v5057_v12 = vadd.f32 %v3851_v54, %v4897_v11  ;;  %v3412_v59 = vld [vmem:[%s4962_s13 + $0x48] sm:$0xff]   ;;  %v5075_v54 = vld [vmem:[%s4962_s13 + $0x40] sm:$0xff]  }
 0x1f0   : > { %3421 = vst [vmem:[%s5015_s23 + $0x18] sm:$0xff] %v3342_v52   ;;  %v2683_v22 = vadd.f32 %v3282_v45, %v2587_v23  ;;  %v2588_v34 = vadd.f32 %v4981_v18, %v2549_v4  ;;  %v3290_v9 = vunpack.c.l.bf16 %v3410_v6  ;;  %v3291_v11 = vunpack.c.h.bf16 %v3410_v6 }
 0x1f1   : > { %3420 = vst [vmem:[%s5015_s23 + $0x10] sm:$0xff] %v3337_v3   ;;  %v2681_v44 = vadd.f32 %v3278_v43, %v2585_v28  ;;  %v2586_v58 = vadd.f32 %v4981_v18, %v2547_v8  ;;  %v3852_v46 = vpop.f32.mrb[124].mxu1  ;;  %v3936_v37 = vpop.f32.mrb[124].mxu0  ;;  %v3287_v14 = vunpack.c.h.bf16 %v5049_v10 }
 0x1f2   : > { %v2684_v31 = vadd.f32 %v3283_v16, %v2588_v34  ;;  %v2461_v41 = vadd.f32 %v3936_v37, %v4955_v26  ;;  %v3853_v47 = vpop.f32.mrb[125].mxu1  ;;  %v2452_v38 = vpop.f32.mrb[125].mxu0  ;;  %v2715_v45 = vmax.f32 %v2683_v22, 0.0  ;;  %v3298_v22 = vunpack.c.l.bf16 %v3412_v59 }
 0x1f3   : > { %v2682_v53 = vadd.f32 %v3279_v48, %v2586_v58  ;;  %v3854_v2 = vadd.f32 %v3853_v47, %v3852_v46  ;;  %v2453_v43 = vadd.f32 %v2452_v38, %v4942_v36  ;;  %v3855_v35 = vpop.f32.mrb[126].mxu1  ;;  %v3937_v24 = vpop.f32.mrb[126].mxu0  ;;  %v2713_v63 = vmax.f32 %v2681_v44, 0.0 }
 0x1f4   : > { %v2716_v57 = vmax.f32 %v2684_v31, 0.0  ;;  %v2552_v16 = vmul.f32 %v4973_v56, %v2461_v41  ;;  %v2464_v26 = vadd.f32 %v3937_v24, %v4968_v13  ;;  %v3856_v49 = vpop.f32.mrb[127].mxu1  ;;  %v2455_v33 = vpop.f32.mrb[127].mxu0  ;;  %v3295_v37 = vunpack.c.h.bf16 %v5075_v54 }
 0x1f5   : > { %v2714_v60 = vmax.f32 %v2682_v53, 0.0  ;;  %v2550_v17 = vmul.f32 %v4973_v56, %v2453_v43  ;;  %v3857_v48 = vadd.f32 %v3856_v49, %v3855_v35  ;;  %v2456_v36 = vadd.f32 %v2455_v33, %v4948_v50  ;;  %v5099_v49 = vld [vmem:[%s4962_s13 + $0x50] sm:$0xff]  }
 0x1f6   : > { %v3352_v51 = vpack.c.bf16 %v2716_v57, %v2715_v45  ;;  %v2591_v39 = vadd.f32 %v4981_v18, %v2552_v16  ;;  %v2553_v25 = vmul.f32 %v4973_v56, %v2464_v26  ;;  %v2332_v13 = vadd.f32 %v3854_v2, %v4903_v40  ;;  %v3414_v26 = vld [vmem:[%s4962_s13 + $0x58] sm:$0xff]  }
 0x1f7   : > { %v3347_v55 = vpack.c.bf16 %v2714_v60, %v2713_v63  ;;  %v2589_v52 = vadd.f32 %v4981_v18, %v2550_v17  ;;  %v2551_v23 = vmul.f32 %v4973_v56, %v2456_v36  ;;  %v5081_v4 = vadd.f32 %v3857_v48, %v4909_v21 }
 0x1f8   : > { %3423 = vst [vmem:[%s5015_s23 + $0x28] sm:$0xff] %v3352_v51   ;;  %v2687_v50 = vadd.f32 %v3290_v9, %v2591_v39  ;;  %v2592_v6 = vadd.f32 %v4981_v18, %v2553_v25  ;;  %v3294_v40 = vunpack.c.l.bf16 %v5075_v54  ;;  %v3299_v21 = vunpack.c.h.bf16 %v3412_v59 }
 0x1f9   : > { %3422 = vst [vmem:[%s5015_s23 + $0x20] sm:$0xff] %v3347_v55   ;;  %v2685_v10 = vadd.f32 %v3286_v20, %v2589_v52  ;;  %v2590_v3 = vadd.f32 %v4981_v18, %v2551_v23  ;;  %v3858_v28 = vpop.f32.mrb[128].mxu1  ;;  %v3940_v8 = vpop.f32.mrb[128].mxu0  ;;  %v3302_v54 = vunpack.c.l.bf16 %v5099_v49 }
 0x1fa   : > { %v2688_v34 = vadd.f32 %v3291_v11, %v2592_v6  ;;  %v2477_v44 = vadd.f32 %v3940_v8, %v5026_v0  ;;  %v3859_v58 = vpop.f32.mrb[129].mxu1  ;;  %v2468_v46 = vpop.f32.mrb[129].mxu0  ;;  %v2719_v9 = vmax.f32 %v2687_v50, 0.0  ;;  %v3307_v6 = vunpack.c.h.bf16 %v3414_v26 }
 0x1fb   : > { %v2686_v31 = vadd.f32 %v3287_v14, %v2590_v3  ;;  %v3860_v41 = vadd.f32 %v3859_v58, %v3858_v28  ;;  %v2469_v20 = vadd.f32 %v2468_v46, %v4989_v61  ;;  %v3861_v47 = vpop.f32.mrb[130].mxu1  ;;  %v3941_v38 = vpop.f32.mrb[130].mxu0  ;;  %v2717_v45 = vmax.f32 %v2685_v10, 0.0 }
 0x1fc   : > { %v2720_v53 = vmax.f32 %v2688_v34, 0.0  ;;  %v2556_v11 = vmul.f32 %v4973_v56, %v2477_v44  ;;  %v2480_v0 = vadd.f32 %v3941_v38, %v5031_v32  ;;  %v3862_v2 = vpop.f32.mrb[131].mxu1  ;;  %v2471_v43 = vpop.f32.mrb[131].mxu0 }
 0x1fd   : > { %v2718_v35 = vmax.f32 %v2686_v31, 0.0  ;;  %v2554_v24 = vmul.f32 %v4973_v56, %v2469_v20  ;;  %v3863_v14 = vadd.f32 %v3862_v2, %v3861_v47  ;;  %v2472_v61 = vadd.f32 %v2471_v43, %v5000_v15 }
 0x1fe   : > { %v3362_v63 = vpack.c.bf16 %v2720_v53, %v2719_v9  ;;  %v2595_v57 = vadd.f32 %v4981_v18, %v2556_v11  ;;  %v2557_v16 = vmul.f32 %v4973_v56, %v2480_v0  ;;  %v5102_v32 = vadd.f32 %v3860_v41, %v4915_v30  ;;  %v3415_v53 = vld [vmem:[%s4962_s13 + $0x60] sm:$0xff]  }
 0x1ff   : > { %v3357_v33 = vpack.c.bf16 %v2718_v35, %v2717_v45  ;;  %v2593_v60 = vadd.f32 %v4981_v18, %v2554_v24  ;;  %v2555_v17 = vmul.f32 %v4973_v56, %v2472_v61  ;;  %v5107_v48 = vadd.f32 %v3863_v14, %v4921_v19  ;;  %v3416_v45 = vld [vmem:[%s4962_s13 + $0x68] sm:$0xff]  }
 0x200   : > { %3425 = vst [vmem:[%s5015_s23 + $0x38] sm:$0xff] %v3362_v63   ;;  %v2691_v15 = vadd.f32 %v3298_v22, %v2595_v57  ;;  %v2596_v36 = vadd.f32 %v4981_v18, %v2557_v16  ;;  %v3306_v30 = vunpack.c.l.bf16 %v3414_v26  ;;  %v3303_v19 = vunpack.c.h.bf16 %v5099_v49 }
 0x201   : > { %3424 = vst [vmem:[%s5015_s23 + $0x30] sm:$0xff] %v3357_v33   ;;  %v2689_v51 = vadd.f32 %v3294_v40, %v2593_v60  ;;  %v2594_v39 = vadd.f32 %v4981_v18, %v2555_v17  ;;  %v3864_v25 = vpop.f32.mrb[132].mxu1  ;;  %v3944_v59 = vpop.f32.mrb[132].mxu0  ;;  %v3310_v63 = vunpack.c.l.bf16 %v3415_v53  ;;  %v3315_v33 = vunpack.c.h.bf16 %v3416_v45 }
 0x202   : > { %v2692_v55 = vadd.f32 %v3299_v21, %v2596_v36  ;;  %v2493_v52 = vadd.f32 %v3944_v59, %v2332_v13  ;;  %v3865_v23 = vpop.f32.mrb[133].mxu1  ;;  %v2484_v50 = vpop.f32.mrb[133].mxu0  ;;  %v2723_v10 = vmax.f32 %v2691_v15, 0.0  ;;  %v3311_v60 = vunpack.c.h.bf16 %v3415_v53 }
 0x203   : > { %v2690_v3 = vadd.f32 %v3295_v37, %v2594_v39  ;;  %v3866_v28 = vadd.f32 %v3865_v23, %v3864_v25  ;;  %v2485_v8 = vadd.f32 %v2484_v50, %v5052_v29  ;;  %v3867_v22 = vpop.f32.mrb[134].mxu1  ;;  %v3945_v40 = vpop.f32.mrb[134].mxu0  ;;  %v2721_v34 = vmax.f32 %v2689_v51, 0.0 }
 0x204   : > { %v2724_v44 = vmax.f32 %v2692_v55, 0.0  ;;  %v2560_v58 = vmul.f32 %v4973_v56, %v2493_v52  ;;  %v2496_v13 = vadd.f32 %v3945_v40, %v5081_v4  ;;  %v3868_v46 = vpop.f32.mrb[135].mxu1  ;;  %v2487_v21 = vpop.f32.mrb[135].mxu0 }
 0x205   : > { %v2722_v9 = vmax.f32 %v2690_v3, 0.0  ;;  %v2558_v31 = vmul.f32 %v4973_v56, %v2485_v8  ;;  %v3869_v37 = vadd.f32 %v3868_v46, %v3867_v22  ;;  %v2488_v29 = vadd.f32 %v2487_v21, %v5057_v12 }
 0x206   : > { %v3372_v41 = vpack.c.bf16 %v2724_v44, %v2723_v10  ;;  %v2599_v20 = vadd.f32 %v4981_v18, %v2560_v58  ;;  %v2561_v47 = vmul.f32 %v4973_v56, %v2496_v13  ;;  %v2348_v38 = vadd.f32 %v3866_v28, %v4927_v27 }
 0x207   : > { %v3367_v4 = vpack.c.bf16 %v2722_v9, %v2721_v34  ;;  %v2597_v11 = vadd.f32 %v4981_v18, %v2558_v31  ;;  %v2559_v0 = vmul.f32 %v4973_v56, %v2488_v29  ;;  %v2351_v2 = vadd.f32 %v3869_v37, %v4933_v42 }
 0x208   : > { %3427 = vst [vmem:[%s5015_s23 + $0x48] sm:$0xff] %v3372_v41   ;;  %v2695_v43 = vadd.f32 %v3306_v30, %v2599_v20  ;;  %v2600_v12 = vadd.f32 %v4981_v18, %v2561_v47  ;;  %v3314_v27 = vunpack.c.l.bf16 %v3416_v45  ;;  %v3417_v20 = vld [vmem:[%s4962_s13 + $0x70] sm:$0xff]  }
 0x209   : > { %3426 = vst [vmem:[%s5015_s23 + $0x40] sm:$0xff] %v3367_v4   ;;  %v2693_v35 = vadd.f32 %v3302_v54, %v2597_v11  ;;  %v2598_v24 = vadd.f32 %v4981_v18, %v2559_v0  ;;  %v3870_v14 = vpop.f32.mrb[136].mxu1  ;;  %v3948_v61 = vpop.f32.mrb[136].mxu0 }
 0x20a   : > { %v2696_v57 = vadd.f32 %v3307_v6, %v2600_v12  ;;  %v2509_v16 = vadd.f32 %v3948_v61, %v2348_v38  ;;  %v3871_v26 = vpop.f32.mrb[137].mxu1  ;;  %v2500_v49 = vpop.f32.mrb[137].mxu0  ;;  %v2727_v17 = vmax.f32 %v2695_v43, 0.0 }
 0x20b   : > { %v2694_v42 = vadd.f32 %v3303_v19, %v2598_v24  ;;  %v3872_v15 = vadd.f32 %v3871_v26, %v3870_v14  ;;  %v2501_v36 = vadd.f32 %v2500_v49, %v5102_v32  ;;  %v3873_v51 = vpop.f32.mrb[138].mxu1  ;;  %v3949_v39 = vpop.f32.mrb[138].mxu0  ;;  %v2725_v25 = vmax.f32 %v2693_v35, 0.0  ;;  %v3418_v24 = vld [vmem:[%s4962_s13 + $0x78] sm:$0xff]  }
 0x20c   : > { %v2728_v59 = vmax.f32 %v2696_v57, 0.0  ;;  %v2564_v30 = vmul.f32 %v4973_v56, %v2509_v16  ;;  %v2512_v54 = vadd.f32 %v3949_v39, %v2351_v2  ;;  %v3874_v55 = vpop.f32.mrb[139].mxu1  ;;  %v2503_v52 = vpop.f32.mrb[139].mxu0  ;;  %v3318_v14 = vunpack.c.l.bf16 %v3417_v20 }
 0x20d   : > { %v2726_v23 = vmax.f32 %v2694_v42, 0.0  ;;  %v2562_v50 = vmul.f32 %v4973_v56, %v2501_v36  ;;  %v3875_v6 = vadd.f32 %v3874_v55, %v3873_v51  ;;  %v2504_v19 = vadd.f32 %v2503_v52, %v5107_v48 }
 0x20e   : > { %v3382_v10 = vpack.c.bf16 %v2728_v59, %v2727_v17  ;;  %v2603_v32 = vadd.f32 %v4981_v18, %v2564_v30  ;;  %v2565_v3 = vmul.f32 %v4973_v56, %v2512_v54  ;;  %v2356_v28 = vadd.f32 %v3872_v15, %v4939_v1 }
 0x20f   : > { %v3377_v8 = vpack.c.bf16 %v2726_v23, %v2725_v25  ;;  %v2601_v22 = vadd.f32 %v4981_v18, %v2562_v50  ;;  %v2563_v40 = vmul.f32 %v4973_v56, %v2504_v19  ;;  %v2359_v34 = vadd.f32 %v3875_v6, %v4945_v7 }
 0x210   : > { %3429 = vst [vmem:[%s5015_s23 + $0x58] sm:$0xff] %v3382_v10   ;;  %v2699_v44 = vadd.f32 %v3314_v27, %v2603_v32  ;;  %v2604_v58 = vadd.f32 %v4981_v18, %v2565_v3  ;;  %v3319_v49 = vunpack.c.h.bf16 %v3417_v20  ;;  %v3323_v51 = vunpack.c.h.bf16 %v3418_v24 }
 0x211   : > { %3428 = vst [vmem:[%s5015_s23 + $0x50] sm:$0xff] %v3377_v8   ;;  %v2697_v48 = vadd.f32 %v3310_v63, %v2601_v22  ;;  %v2602_v13 = vadd.f32 %v4981_v18, %v2563_v40  ;;  %v3876_v46 = vpop.f32.mrb[140].mxu1  ;;  %v3952_v21 = vpop.f32.mrb[140].mxu0 }
 0x212   : > { %v2700_v9 = vadd.f32 %v3315_v33, %v2604_v58  ;;  %v3877_v1 = vpop.f32.mrb[141].mxu1  ;;  %v2516_v31 = vpop.f32.mrb[141].mxu0  ;;  %v2731_v38 = vmax.f32 %v2699_v44, 0.0  ;;  %v3322_v33 = vunpack.c.l.bf16 %v3418_v24 }
 0x213   : > { %v2698_v37 = vadd.f32 %v3311_v60, %v2602_v13  ;;  %v3878_v29 = vadd.f32 %v3877_v1, %v3876_v46  ;;  %v2517_v41 = vadd.f32 %v2516_v31, %v2356_v28  ;;  %v3879_v47 = vpop.f32.mrb[142].mxu1  ;;  %v3953_v7 = vpop.f32.mrb[142].mxu0  ;;  %v2729_v45 = vmax.f32 %v2697_v48, 0.0 }
 0x214   : > { %v2732_v53 = vmax.f32 %v2700_v9, 0.0  ;;  %v3880_v4 = vpop.f32.mrb[143].mxu1  ;;  %v2519_v11 = vpop.f32.mrb[143].mxu0 }
 0x215   : > { %v2730_v0 = vmax.f32 %v2698_v37, 0.0  ;;  %v2364_v2 = vadd.f32 %v3878_v29, %v4952_v5  ;;  %v2566_v43 = vmul.f32 %v4973_v56, %v2517_v41  ;;  %v3881_v12 = vadd.f32 %v3880_v4, %v3879_v47 }
 0x216   : > { %v3392_v35 = vpack.c.bf16 %v2732_v53, %v2731_v38  ;;  %v2520_v61 = vadd.f32 %v2519_v11, %v2359_v34 }
 0x217   : > { %v3387_v27 = vpack.c.bf16 %v2730_v0, %v2729_v45  ;;  %v2525_v63 = vadd.f32 %v3952_v21, %v2364_v2  ;;  %v2605_v57 = vadd.f32 %v4981_v18, %v2566_v43  ;;  %v2367_v16 = vadd.f32 %v3881_v12, %v4965_v62 }
 0x218   : > { %3431 = vst [vmem:[%s5015_s23 + $0x68] sm:$0xff] %v3392_v35   ;;  %v2567_v26 = vmul.f32 %v4973_v56, %v2520_v61 }
 0x219   : > { %3430 = vst [vmem:[%s5015_s23 + $0x60] sm:$0xff] %v3387_v27   ;;  %v2568_v5 = vmul.f32 %v4973_v56, %v2525_v63  ;;  %v2528_v60 = vadd.f32 %v3953_v7, %v2367_v16  ;;  %v2701_v17 = vadd.f32 %v3318_v14, %v2605_v57 }
 0x21a   : > { %v2606_v42 = vadd.f32 %v4981_v18, %v2567_v26 }
 0x21b   : > { %v2607_v15 = vadd.f32 %v4981_v18, %v2568_v5  ;;  %v2569_v36 = vmul.f32 %v4973_v56, %v2528_v60  ;;  %v2733_v59 = vmax.f32 %v2701_v17, 0.0 }
 0x21c   : > { %v2702_v62 = vadd.f32 %v3319_v49, %v2606_v42 }
 0x21d   : > { %v2703_v39 = vadd.f32 %v3322_v33, %v2607_v15  ;;  %v2608_v25 = vadd.f32 %v4981_v18, %v2569_v36 }
 0x21e   : > { %v2734_v30 = vmax.f32 %v2702_v62, 0.0 }
 0x21f   : > { %v2704_v54 = vadd.f32 %v3323_v51, %v2608_v25  ;;  %v2735_v52 = vmax.f32 %v2703_v39, 0.0 }
 0x220   : > { %v3397_v55 = vpack.c.bf16 %v2734_v30, %v2733_v59 }
 0x221   : > { %v2736_v23 = vmax.f32 %v2704_v54, 0.0 }
 0x222   : > { %3432 = vst [vmem:[%s5015_s23 + $0x70] sm:$0xff] %v3397_v55  }
 0x223   : > { %v3402_v50 = vpack.c.bf16 %v2736_v23, %v2735_v52 }
 0x225   : > { %3433 = vst [vmem:[%s5015_s23 + $0x78] sm:$0xff] %v3402_v50  }
 0x226 PF: > { %s15_s18 = sadd.s32 1, %s4265_s18  }
 0x227   : > { %p12_p4 = scmp.ge.s32.totalorder %s15_s18, 4  }
 0x229   :  { %14 = sbr.rel (!%p12_p4) target bundleno = 1 (0x1), region = 73 }

// kernel: teacher_forward.16
= control target key start
LH: loop header
LB: loop body
LE: loop exit
PB: predicated region body
PF: predicated region fallthrough
CT: control target
= control target key end

     0   :  { %s2002_s15 = smov 0   ;;  %s2288_s0 = inlined_call_operand.vmem [shape: bf16[128,1152], index: 0, kind: input, shape index: {}]   ;;  %s2289_s1 = inlined_call_operand.vmem [shape: bf16[1152,128], index: 1, kind: input, shape index: {}]   ;;  %s2290_s2 = inlined_call_operand.vmem [shape: f32[1,128], index: 2, kind: input, shape index: {}]   ;;  %s2291_s3 = inlined_call_operand.vmem [shape: f32[1,128], index: 3, kind: input, shape index: {}]   ;;  %s2292_s4 = inlined_call_operand.vmem [shape: bf16[128,128], index: 4, kind: output, shape index: {}]  }
   0x1 LB: > { %s1464_s16 = sadd.s32 4294967295, %s1975_s15   ;;  %p1468_p0 = scmp.ge.s32.totalorder %s1975_s15, 1  ;;  %s1975_s15 = sphi %s2002_s15, %s14_s15  }
   0x2   : > { %p164_p1 = scmp.lt.s32.totalorder %s1975_s15, 3 }
   0x4   : > { %p165_p2 = pnand %p1468_p0, %p164_p1 }
   0x5   : > { %v1845_v0 = vld [vmem:[%s2289_s1 + $0x40] sm:$0xff] (!%p165_p2)   ;;  %v1849_v4 = vld [vmem:[%s2289_s1 + $0x48] sm:$0xff] (!%p165_p2)   ;;  %v1853_v8 = vld [vmem:[%s2289_s1 + $0x50] sm:$0xff] (!%p165_p2)   ;;  %s1469_s23 = sshll.u32 (!%p165_p2), %s1464_s16, 3 }
   0x6   : > { %168 = sbr.rel (%p165_p2) target bundleno = 331 (0x14b), region = 36  ;;  %v1846_v1 = vld [vmem:[%s2289_s1 + $0xc0] sm:$0xff] (!%p165_p2)   ;;  %1624 = vmatprep.subr.bf16.mxu0 (!%p165_p2), %v1845_v0  ;;  %v1850_v5 = vld [vmem:[%s2289_s1 + $0xc8] sm:$0xff] (!%p165_p2)   ;;  %v1854_v9 = vld [vmem:[%s2289_s1 + $0xd0] sm:$0xff] (!%p165_p2)   ;;  %p192_p3 = scmp.lt.s32.totalorder (!%p165_p2), %s1469_s23, 15 }
   0x7   : > { %v1847_v2 = vld [vmem:[%s2289_s1] sm:$0xff] (!%p165_p2)   ;;  %1664 = vmatprep.subr.bf16.mxu1 (!%p165_p2), %v1846_v1  ;;  %v1851_v6 = vld [vmem:[%s2289_s1 + $0x8] sm:$0xff] (!%p165_p2)   ;;  %v1855_v10 = vld [vmem:[%s2289_s1 + $0x10] sm:$0xff] (!%p165_p2)  }
   0x8   : > { %v1848_v3 = vld [vmem:[%s2289_s1 + $0x80] sm:$0xff] (!%p165_p2)   ;;  %1625 = vmatpush3.bf16.msra.mxu0 (!%p165_p2), %v1847_v2  ;;  %v1852_v7 = vld [vmem:[%s2289_s1 + $0x88] sm:$0xff] (!%p165_p2)   ;;  %v1856_v11 = vld [vmem:[%s2289_s1 + $0x90] sm:$0xff] (!%p165_p2)  }
   0x9   : > { %1665 = vmatpush3.bf16.msra.mxu1 (!%p165_p2), %v1848_v3  ;;  %1626 = vmatprep.subr.bf16.mxu0 (!%p165_p2), %v1849_v4  ;;  %v1857_v12 = vld [vmem:[%s2289_s1 + $0x58] sm:$0xff] (!%p165_p2)   ;;  %v1861_v16 = vld [vmem:[%s2289_s1 + $0x60] sm:$0xff] (!%p165_p2)   ;;  %v1865_v20 = vld [vmem:[%s2289_s1 + $0x68] sm:$0xff] (!%p165_p2)  }
   0xa   : > { %1666 = vmatprep.subr.bf16.mxu1 (!%p165_p2), %v1850_v5  ;;  %v1858_v13 = vld [vmem:[%s2289_s1 + $0xd8] sm:$0xff] (!%p165_p2)   ;;  %v1862_v17 = vld [vmem:[%s2289_s1 + $0xe0] sm:$0xff] (!%p165_p2)   ;;  %v1866_v21 = vld [vmem:[%s2289_s1 + $0xe8] sm:$0xff] (!%p165_p2)  }
   0xb   : > { %v1859_v14 = vld [vmem:[%s2289_s1 + $0x18] sm:$0xff] (!%p165_p2)   ;;  %v1863_v18 = vld [vmem:[%s2289_s1 + $0x20] sm:$0xff] (!%p165_p2)   ;;  %v1867_v22 = vld [vmem:[%s2289_s1 + $0x28] sm:$0xff] (!%p165_p2)  }
   0xc   : > { %1627 = vmatpush3.bf16.msra.mxu0 (!%p165_p2), %v1851_v6  ;;  %v1860_v15 = vld [vmem:[%s2289_s1 + $0x98] sm:$0xff] (!%p165_p2)   ;;  %v1864_v19 = vld [vmem:[%s2289_s1 + $0xa0] sm:$0xff] (!%p165_p2)   ;;  %v1868_v23 = vld [vmem:[%s2289_s1 + $0xa8] sm:$0xff] (!%p165_p2)  }
   0xd   : > { %1667 = vmatpush3.bf16.msra.mxu1 %v1852_v7  ;;  %1628 = vmatprep.subr.bf16.mxu0 %v1853_v8  ;;  %s2294_s23 = smov (!%p192_p3, %s1469_s23), 15  ;;  %v1869_v24 = vld [vmem:[%s2289_s1 + $0x70] sm:$0xff]   ;;  %v1873_v28 = vld [vmem:[%s2289_s1 + $0x78] sm:$0xff]   ;;  %v1883_v36 = vld [vmem:[%s2289_s1 + $0x140] sm:$0xff]  }
   0xe   : > { %1668 = vmatprep.subr.bf16.mxu1 %v1854_v9  ;;  %v1870_v25 = vld [vmem:[%s2289_s1 + $0xf0] sm:$0xff]   ;;  %s1836_s21 = smul.u32 36, %s2294_s23  ;;  %v1874_v29 = vld [vmem:[%s2289_s1 + $0xf8] sm:$0xff]   ;;  %v1884_v37 = vld [vmem:[%s2289_s1 + $0x1c0] sm:$0xff]   ;;  %s1472_s28 = sshll.u32 %s2294_s23, 2 }
   0xf   : > { %v1871_v26 = vld [vmem:[%s2289_s1 + $0x30] sm:$0xff]   ;;  %v1875_v30 = vld [vmem:[%s2289_s1 + $0x38] sm:$0xff]   ;;  %v1885_v38 = vld [vmem:[%s2289_s1 + $0x100] sm:$0xff]   ;;  %s202_s5 = scalar_lea.vmem %s2292_s4, %s1472_s28 }
  0x10   : > { %1629 = vmatpush3.bf16.msra.mxu0 %v1855_v10  ;;  %v1872_v27 = vld [vmem:[%s2289_s1 + $0xb0] sm:$0xff]   ;;  %s2108_s6 = scalar_lea.vmem %s2288_s0, %s1836_s21  ;;  %v1876_v31 = vld [vmem:[%s2289_s1 + $0xb8] sm:$0xff]   ;;  %v1886_v39 = vld [vmem:[%s2289_s1 + $0x180] sm:$0xff]  }
  0x11   : > { %1669 = vmatpush3.bf16.msra.mxu1 %v1856_v11  ;;  %1630 = vmatprep.subr.bf16.mxu0 %v1857_v12  ;;  %v1877_v32 = vld [vmem:[%s2108_s6] ss:$36 sps:$4 sm:$0xff]   ;;  %v1880_v34 = vld [vmem:[%s2108_s6 + $0x8] ss:$36 sps:$4 sm:$0xff]   ;;  %v1893_v45 = vld [vmem:[%s2108_s6 + $0x54] ss:$36 sps:$4 sm:$0xff]  }
  0x12   : > { %1670 = vmatprep.subr.bf16.mxu1 %v1858_v13  ;;  %v1879_v33 = vld [vmem:[%s2108_s6 + $0x4] ss:$36 sps:$4 sm:$0xff]   ;;  %v1882_v35 = vld [vmem:[%s2108_s6 + $0xc] ss:$36 sps:$4 sm:$0xff]   ;;  %v1901_v52 = vld [vmem:[%s2289_s1 + $0x158] sm:$0xff]  }
  0x13   : > { %1037 = vmatprep.mubr.bf16.mxu0 %v1879_v33  ;;  %1102 = vmatprep.mubr.bf16.mxu1 %v1882_v35  ;;  %v1887_v40 = vld [vmem:[%s2289_s1 + $0x148] sm:$0xff]   ;;  %v1896_v47 = vld [vmem:[%s2108_s6 + $0x50] ss:$36 sps:$4 sm:$0xff]   ;;  %v1902_v53 = vld [vmem:[%s2289_s1 + $0x1d8] sm:$0xff]  }
  0x14   : > { %1631 = vmatpush3.bf16.msra.mxu0 %v1859_v14  ;;  %v1888_v41 = vld [vmem:[%s2289_s1 + $0x1c8] sm:$0xff]   ;;  %v1897_v48 = vld [vmem:[%s2289_s1 + $0x150] sm:$0xff]   ;;  %v1903_v54 = vld [vmem:[%s2289_s1 + $0x118] sm:$0xff]  }
  0x15   : > { %1671 = vmatpush3.bf16.msra.mxu1 %v1860_v15  ;;  %1632 = vmatprep.subr.bf16.mxu0 %v1861_v16  ;;  %v1889_v42 = vld [vmem:[%s2289_s1 + $0x108] sm:$0xff]   ;;  %v1898_v49 = vld [vmem:[%s2289_s1 + $0x1d0] sm:$0xff]   ;;  %v1904_v55 = vld [vmem:[%s2289_s1 + $0x198] sm:$0xff]  }
  0x16   : > { %1672 = vmatprep.subr.bf16.mxu1 %v1862_v17  ;;  %v1890_v43 = vld [vmem:[%s2289_s1 + $0x188] sm:$0xff]   ;;  %v1899_v50 = vld [vmem:[%s2289_s1 + $0x110] sm:$0xff]   ;;  %v1907_v57 = vld [vmem:[%s2108_s6 + $0x9c] ss:$36 sps:$4 sm:$0xff]  }
  0x17   : > { %v1891_v44 = vld [vmem:[%s2108_s6 + $0x4c] ss:$36 sps:$4 sm:$0xff]   ;;  %v1905_v56 = vld [vmem:[%s2108_s6 + $0x94] ss:$36 sps:$4 sm:$0xff]   ;;  %v1911_v60 = vld [vmem:[%s2289_s1 + $0x160] sm:$0xff]  }
  0x18   : > { %1633 = vmatpush3.bf16.msra.mxu0 %v1863_v18  ;;  %v1895_v46 = vld [vmem:[%s2108_s6 + $0x48] ss:$36 sps:$4 sm:$0xff]   ;;  %v1900_v51 = vld [vmem:[%s2289_s1 + $0x190] sm:$0xff]   ;;  %v1910_v59 = vld [vmem:[%s2108_s6 + $0x98] ss:$36 sps:$4 sm:$0xff]  }
  0x19   : > { %1673 = vmatpush3.bf16.msra.mxu1 %v1864_v19  ;;  %1634 = vmatprep.subr.bf16.mxu0 %v1865_v20  ;;  %v1909_v58 = vld [vmem:[%s2108_s6 + $0x90] ss:$36 sps:$4 sm:$0xff]   ;;  %v1912_v61 = vld [vmem:[%s2289_s1 + $0x1e0] sm:$0xff]   ;;  %v1915_v0 = vld [vmem:[%s2289_s1 + $0x168] sm:$0xff]  }
  0x1a   : > { %1674 = vmatprep.subr.bf16.mxu1 %v1866_v21  ;;  %v1913_v62 = vld [vmem:[%s2289_s1 + $0x120] sm:$0xff]   ;;  %v1916_v1 = vld [vmem:[%s2289_s1 + $0x1e8] sm:$0xff]   ;;  %v1923_v6 = vld [vmem:[%s2108_s6 + $0xd8] ss:$36 sps:$4 sm:$0xff]  }
  0x1b   : > { %v1914_v63 = vld [vmem:[%s2289_s1 + $0x1a0] sm:$0xff]   ;;  %v1917_v2 = vld [vmem:[%s2289_s1 + $0x128] sm:$0xff]   ;;  %v1925_v8 = vld [vmem:[%s2289_s1 + $0x170] sm:$0xff]  }
  0x1c   : > { %1635 = vmatpush3.bf16.msra.mxu0 %v1867_v22  ;;  %v1918_v3 = vld [vmem:[%s2289_s1 + $0x1a8] sm:$0xff]   ;;  %v1919_v4 = vld [vmem:[%s2108_s6 + $0xdc] ss:$36 sps:$4 sm:$0xff]   ;;  %v1926_v9 = vld [vmem:[%s2289_s1 + $0x1f0] sm:$0xff]  }
  0x1d   : > { %1675 = vmatpush3.bf16.msra.mxu1 %v1868_v23  ;;  %1636 = vmatprep.subr.bf16.mxu0 %v1869_v24  ;;  %v1921_v5 = vld [vmem:[%s2108_s6 + $0xe4] ss:$36 sps:$4 sm:$0xff]   ;;  %v1927_v10 = vld [vmem:[%s2289_s1 + $0x130] sm:$0xff]   ;;  %v1929_v12 = vld [vmem:[%s2289_s1 + $0x178] sm:$0xff]  }
  0x1e   : > { %1676 = vmatprep.subr.bf16.mxu1 %v1870_v25  ;;  %v1924_v7 = vld [vmem:[%s2108_s6 + $0xe0] ss:$36 sps:$4 sm:$0xff]   ;;  %v1928_v11 = vld [vmem:[%s2289_s1 + $0x1b0] sm:$0xff]   ;;  %v1930_v13 = vld [vmem:[%s2289_s1 + $0x1f8] sm:$0xff]  }
  0x1f   : > { %v1931_v14 = vld [vmem:[%s2289_s1 + $0x138] sm:$0xff]   ;;  %v1933_v16 = vld [vmem:[%s2108_s6 + $0x10] ss:$36 sps:$4 sm:$0xff]   ;;  %v1939_v20 = vld [vmem:[%s2289_s1 + $0x200] sm:$0xff]  }
  0x20   : > { %1637 = vmatpush3.bf16.msra.mxu0 %v1871_v26  ;;  %v1932_v15 = vld [vmem:[%s2289_s1 + $0x1b8] sm:$0xff]   ;;  %v1940_v21 = vld [vmem:[%s2289_s1 + $0x208] sm:$0xff]   ;;  %v1946_v25 = vld [vmem:[%s2108_s6 + $0x60] ss:$36 sps:$4 sm:$0xff]  }
  0x21   : > { %1677 = vmatpush3.bf16.msra.mxu1 %v1872_v27  ;;  %1638 = vmatprep.subr.bf16.mxu0 %v1873_v28  ;;  %v1935_v17 = vld [vmem:[%s2108_s6 + $0x14] ss:$36 sps:$4 sm:$0xff]   ;;  %v1938_v19 = vld [vmem:[%s2108_s6 + $0x1c] ss:$36 sps:$4 sm:$0xff]   ;;  %v1943_v23 = vld [vmem:[%s2108_s6 + $0x64] ss:$36 sps:$4 sm:$0xff]  }
  0x22   : > { %1678 = vmatprep.subr.bf16.mxu1 %v1874_v29  ;;  %v1936_v18 = vld [vmem:[%s2108_s6 + $0x18] ss:$36 sps:$4 sm:$0xff]   ;;  %v1947_v26 = vld [vmem:[%s2289_s1 + $0x210] sm:$0xff]   ;;  %v1949_v27 = vld [vmem:[%s2108_s6 + $0xa4] ss:$36 sps:$4 sm:$0xff]  }
  0x23   : > { %v1941_v22 = vld [vmem:[%s2108_s6 + $0x5c] ss:$36 sps:$4 sm:$0xff]   ;;  %v1951_v28 = vld [vmem:[%s2108_s6 + $0xac] ss:$36 sps:$4 sm:$0xff]  }
  0x24   : > { %1639 = vmatpush3.bf16.msra.mxu0 %v1875_v30  ;;  %v1945_v24 = vld [vmem:[%s2108_s6 + $0x58] ss:$36 sps:$4 sm:$0xff]   ;;  %v1953_v30 = vld [vmem:[%s2108_s6 + $0xa0] ss:$36 sps:$4 sm:$0xff]   ;;  %v1957_v33 = vld [vmem:[%s2108_s6 + $0xec] ss:$36 sps:$4 sm:$0xff]  }
  0x25   : > { %1679 = vmatpush3.bf16.msra.mxu1 %v1876_v31  ;;  %1704 = vmatprep.subr.bf16.mxu0 %v1883_v36  ;;  %v1948_v29 = vld [vmem:[%s2289_s1 + $0x218] sm:$0xff]   ;;  %v1954_v31 = vld [vmem:[%s2108_s6 + $0xa8] ss:$36 sps:$4 sm:$0xff]  }
  0x26   : > { %1744 = vmatprep.subr.bf16.mxu1 %v1884_v37  ;;  %v1956_v35 = vld [vmem:[%s2289_s1 + $0x228] sm:$0xff]   ;;  %v1963_v37 = vld [vmem:[%s2289_s1 + $0x230] sm:$0xff]  }
  0x27   : > { %1038 = vmatmul.mubr.bf16.vlgmr.msra.gmra.mrb[0].mxu0 %v1877_v32  ;;  %v1955_v32 = vld [vmem:[%s2289_s1 + $0x220] sm:$0xff]   ;;  %v1961_v36 = vld [vmem:[%s2108_s6 + $0xe8] ss:$36 sps:$4 sm:$0xff]  }
  0x28   : > { %1103 = vmatmul.mubr.bf16.vlgmr.msra.gmra.mrb[0].mxu1 %v1880_v34  ;;  %1705 = vmatpush3.bf16.msra.mxu0 %v1885_v38  ;;  %v1959_v34 = vld [vmem:[%s2108_s6 + $0xf4] ss:$36 sps:$4 sm:$0xff]  }
  0x29   : > { %1745 = vmatpush3.bf16.msra.mxu1 %v1886_v39  ;;  %1706 = vmatprep.subr.bf16.mxu0 %v1887_v40  ;;  %v1962_v38 = vld [vmem:[%s2108_s6 + $0xf0] ss:$36 sps:$4 sm:$0xff]   ;;  %v1965_v39 = vld [vmem:[%s2108_s6 + $0x20] ss:$36 sps:$4 sm:$0xff]  }
  0x2a   : > { %1746 = vmatprep.subr.bf16.mxu1 %v1888_v41  ;;  %1045 = vmatprep.mubr.bf16.mxu0 %v1891_v44  ;;  %v1966_v40 = vld [vmem:[%s2108_s6 + $0xb0] ss:$36 sps:$4 sm:$0xff]   ;;  %v1964_v41 = vld [vmem:[%s2289_s1 + $0x238] sm:$0xff]  }
  0x2b   : > { %1110 = vmatprep.mubr.bf16.mxu1 %v1893_v45 }
  0x2c   : > { %1707 = vmatpush3.bf16.msra.mxu0 %v1889_v42  ;;  %v1967_v42 = vld [vmem:[%s2108_s6 + $0x68] ss:$36 sps:$4 sm:$0xff]  }
  0x2d   : > { %1747 = vmatpush3.bf16.msra.mxu1 %v1890_v43  ;;  %1708 = vmatprep.subr.bf16.mxu0 %v1897_v48  ;;  %v1968_v43 = vld [vmem:[%s2108_s6 + $0xf8] ss:$36 sps:$4 sm:$0xff]  }
  0x2e   : > { %1748 = vmatprep.subr.bf16.mxu1 %v1898_v49 }
  0x2f   : > { %1046 = vmatmul.mubr.bf16.gmra.mrb[4].mxu0 %v1895_v46 }
  0x30   : > { %1111 = vmatmul.mubr.bf16.gmra.mrb[4].mxu1 %v1896_v47  ;;  %1709 = vmatpush3.bf16.msra.mxu0 %v1899_v50 }
  0x31   : > { %1749 = vmatpush3.bf16.msra.mxu1 %v1900_v51  ;;  %1710 = vmatprep.subr.bf16.mxu0 %v1901_v52 }
  0x32   : > { %1750 = vmatprep.subr.bf16.mxu1 %v1902_v53  ;;  %1053 = vmatprep.mubr.bf16.mxu0 %v1905_v56 }
  0x33   : > { %1118 = vmatprep.mubr.bf16.mxu1 %v1907_v57 }
  0x34   : > { %1711 = vmatpush3.bf16.msra.mxu0 %v1903_v54 }
  0x35   : > { %1751 = vmatpush3.bf16.msra.mxu1 %v1904_v55  ;;  %1712 = vmatprep.subr.bf16.mxu0 %v1911_v60 }
  0x36   : > { %1752 = vmatprep.subr.bf16.mxu1 %v1912_v61 }
  0x37   : > { %1054 = vmatmul.mubr.bf16.gmra.mrb[8].mxu0 %v1909_v58 }
  0x38   : > { %1119 = vmatmul.mubr.bf16.gmra.mrb[8].mxu1 %v1910_v59  ;;  %1713 = vmatpush3.bf16.msra.mxu0 %v1913_v62 }
  0x39   : > { %1753 = vmatpush3.bf16.msra.mxu1 %v1914_v63  ;;  %1714 = vmatprep.subr.bf16.mxu0 %v1915_v0 }
  0x3a   : > { %1754 = vmatprep.subr.bf16.mxu1 %v1916_v1  ;;  %1061 = vmatprep.mubr.bf16.mxu0 %v1919_v4 }
  0x3b   : > { %1126 = vmatprep.mubr.bf16.mxu1 %v1921_v5 }
  0x3c   : > { %1715 = vmatpush3.bf16.msra.mxu0 %v1917_v2 }
  0x3d   : > { %1755 = vmatpush3.bf16.msra.mxu1 %v1918_v3  ;;  %1716 = vmatprep.subr.bf16.mxu0 %v1925_v8 }
  0x3e   : > { %1756 = vmatprep.subr.bf16.mxu1 %v1926_v9 }
  0x3f   : > { %1062 = vmatmul.mubr.bf16.gmra.mrb[12].mxu0 %v1923_v6 }
  0x40   : > { %1127 = vmatmul.mubr.bf16.gmra.mrb[12].mxu1 %v1924_v7  ;;  %1717 = vmatpush3.bf16.msra.mxu0 %v1927_v10 }
  0x41   : > { %1757 = vmatpush3.bf16.msra.mxu1 %v1928_v11  ;;  %1718 = vmatprep.subr.bf16.mxu0 %v1929_v12 }
  0x42   : > { %1758 = vmatprep.subr.bf16.mxu1 %v1930_v13  ;;  %1167 = vmatprep.mubr.bf16.mxu0 %v1935_v17 }
  0x43   : > { %1232 = vmatprep.mubr.bf16.mxu1 %v1938_v19 }
  0x44   : > { %1719 = vmatpush3.bf16.msra.mxu0 %v1931_v14 }
  0x45   : > { %1759 = vmatpush3.bf16.msra.mxu1 %v1932_v15  ;;  %1796 = vmatprep.subr.bf16.mxu0 %v1939_v20 }
  0x46   : > { %1820 = vmatprep.subr.bf16.mxu1 %v1939_v20 }
  0x47   : > { %1168 = vmatmul.mubr.bf16.vlgmr.msra.gmra.mrb[16].mxu0 %v1933_v16 }
  0x48   : > { %1233 = vmatmul.mubr.bf16.vlgmr.msra.gmra.mrb[16].mxu1 %v1936_v18  ;;  %1797 = vmatpush3.bf16.msra.mxu0 %v1939_v20 }
  0x49   : > { %1828 = vmatpush3.bf16.msra.mxu1 %v1939_v20  ;;  %1798 = vmatprep.subr.bf16.mxu0 %v1940_v21 }
  0x4a   : > { %1821 = vmatprep.subr.bf16.mxu1 %v1940_v21  ;;  %1175 = vmatprep.mubr.bf16.mxu0 %v1941_v22 }
  0x4b   : > { %1240 = vmatprep.mubr.bf16.mxu1 %v1943_v23 }
  0x4c   : > { %1799 = vmatpush3.bf16.msra.mxu0 %v1940_v21 }
  0x4d   : > { %1829 = vmatpush3.bf16.msra.mxu1 %v1940_v21  ;;  %1800 = vmatprep.subr.bf16.mxu0 %v1947_v26 }
  0x4e   : > { %1822 = vmatprep.subr.bf16.mxu1 %v1947_v26 }
  0x4f   : > { %1176 = vmatmul.mubr.bf16.gmra.mrb[20].mxu0 %v1945_v24 }
  0x50   : > { %1241 = vmatmul.mubr.bf16.gmra.mrb[20].mxu1 %v1946_v25  ;;  %1183 = vmatprep.mubr.bf16.mxu0 %v1949_v27 }
  0x51   : > { %1801 = vmatpush3.bf16.msra.mxu0 %v1947_v26  ;;  %1248 = vmatprep.mubr.bf16.mxu1 %v1951_v28 }
  0x52   : > { %1830 = vmatpush3.bf16.msra.mxu1 %v1947_v26  ;;  %1802 = vmatprep.subr.bf16.mxu0 %v1948_v29 }
  0x53   : > { %1823 = vmatprep.subr.bf16.mxu1 %v1948_v29 }
  0x55   : > { %1803 = vmatpush3.bf16.msra.mxu0 %v1948_v29 }
  0x56   : > { %1831 = vmatpush3.bf16.msra.mxu1 %v1948_v29  ;;  %1804 = vmatprep.subr.bf16.mxu0 %v1955_v32 }
  0x57   : > { %1184 = vmatmul.mubr.bf16.gmra.mrb[24].mxu0 %v1953_v30  ;;  %1824 = vmatprep.subr.bf16.mxu1 %v1955_v32 }
  0x58   : > { %1249 = vmatmul.mubr.bf16.gmra.mrb[24].mxu1 %v1954_v31  ;;  %1191 = vmatprep.mubr.bf16.mxu0 %v1957_v33 }
  0x59   : > { %1805 = vmatpush3.bf16.msra.mxu0 %v1955_v32  ;;  %1256 = vmatprep.mubr.bf16.mxu1 %v1959_v34 }
  0x5a   : > { %1832 = vmatpush3.bf16.msra.mxu1 %v1955_v32  ;;  %1806 = vmatprep.subr.bf16.mxu0 %v1956_v35 }
  0x5b   : > { %1825 = vmatprep.subr.bf16.mxu1 %v1956_v35 }
  0x5d   : > { %1807 = vmatpush3.bf16.msra.mxu0 %v1956_v35 }
  0x5e   : > { %1833 = vmatpush3.bf16.msra.mxu1 %v1956_v35  ;;  %1808 = vmatprep.subr.bf16.mxu0 %v1963_v37 }
  0x5f   : > { %1192 = vmatmul.mubr.bf16.gmra.mrb[28].mxu0 %v1961_v36  ;;  %1826 = vmatprep.subr.bf16.mxu1 %v1963_v37 }
  0x60   : > { %1257 = vmatmul.mubr.bf16.gmra.mrb[28].mxu1 %v1962_v38  ;;  %1812 = vmatprep.mubr.bf16.mxu0 %v1965_v39 }
  0x61   : > { %1809 = vmatpush3.bf16.msra.mxu0 %v1963_v37  ;;  %1816 = vmatprep.mubr.bf16.mxu1 %v1966_v40 }
  0x62   : > { %1834 = vmatpush3.bf16.msra.mxu1 %v1963_v37  ;;  %1810 = vmatprep.subr.bf16.mxu0 %v1964_v41 }
  0x63   : > { %1827 = vmatprep.subr.bf16.mxu1 %v1964_v41 }
  0x65   : > { %1811 = vmatpush3.bf16.msra.mxu0 %v1964_v41 }
  0x66   : > { %1835 = vmatpush3.bf16.msra.mxu1 %v1964_v41 }
  0x68   : > { %1813 = vmatmul.mubr.bf16.vlgmr.msra.gmra.mrb[32].mxu0 %v1967_v42 }
  0x69   : > { %1817 = vmatmul.mubr.bf16.vlgmr.msra.gmra.mrb[32].mxu1 %v1968_v43 }
  0xfa   : > { %v1640_v44 = vpop.f32.mrb[0].mxu0 }
  0xfb   : > { %v1680_v45 = vpop.f32.mrb[0].mxu1  ;;  %v1641_v46 = vpop.f32.mrb[1].mxu0 }
  0xfc   : > { %v1642_v47 = vadd.f32 %v1641_v46, %v1640_v44  ;;  %v1681_v48 = vpop.f32.mrb[1].mxu1  ;;  %v1643_v49 = vpop.f32.mrb[2].mxu0 }
  0xfd   : > { %v1682_v50 = vadd.f32 %v1681_v48, %v1680_v45  ;;  %v1683_v51 = vpop.f32.mrb[2].mxu1  ;;  %v1644_v52 = vpop.f32.mrb[3].mxu0 }
  0xfe   : > { %v1645_v53 = vadd.f32 %v1644_v52, %v1643_v49  ;;  %v1684_v54 = vpop.f32.mrb[3].mxu1 }
  0xff   : > { %v1105_v55 = vadd.f32 %v1682_v50, %v1642_v47  ;;  %v1685_v56 = vadd.f32 %v1684_v54, %v1683_v51 }
 0x101   : > { %v1108_v57 = vadd.f32 %v1685_v56, %v1645_v53 }
 0x102   : > { %v1646_v58 = vpop.f32.mrb[4].mxu0 }
 0x103   : > { %v1686_v59 = vpop.f32.mrb[4].mxu1  ;;  %v1647_v60 = vpop.f32.mrb[5].mxu0 }
 0x104   : > { %v1648_v61 = vadd.f32 %v1647_v60, %v1646_v58  ;;  %v1687_v62 = vpop.f32.mrb[5].mxu1  ;;  %v1649_v63 = vpop.f32.mrb[6].mxu0 }
 0x105   : > { %v1688_v0 = vadd.f32 %v1687_v62, %v1686_v59  ;;  %v1689_v1 = vpop.f32.mrb[6].mxu1  ;;  %v1650_v2 = vpop.f32.mrb[7].mxu0 }
 0x106   : > { %v1651_v3 = vadd.f32 %v1650_v2, %v1649_v63  ;;  %v1690_v4 = vpop.f32.mrb[7].mxu1 }
 0x107   : > { %v1113_v5 = vadd.f32 %v1688_v0, %v1648_v61  ;;  %v1691_v6 = vadd.f32 %v1690_v4, %v1689_v1 }
 0x109   : > { %v1116_v7 = vadd.f32 %v1691_v6, %v1651_v3 }
 0x10a   : > { %v1652_v8 = vpop.f32.mrb[8].mxu0 }
 0x10b   : > { %v1692_v9 = vpop.f32.mrb[8].mxu1  ;;  %v1653_v10 = vpop.f32.mrb[9].mxu0 }
 0x10c   : > { %v1654_v11 = vadd.f32 %v1653_v10, %v1652_v8  ;;  %v1693_v12 = vpop.f32.mrb[9].mxu1  ;;  %v1655_v13 = vpop.f32.mrb[10].mxu0 }
 0x10d   : > { %v1694_v14 = vadd.f32 %v1693_v12, %v1692_v9  ;;  %v1695_v15 = vpop.f32.mrb[10].mxu1  ;;  %v1656_v16 = vpop.f32.mrb[11].mxu0 }
 0x10e   : > { %v1657_v17 = vadd.f32 %v1656_v16, %v1655_v13  ;;  %v1696_v18 = vpop.f32.mrb[11].mxu1 }
 0x10f   : > { %v1121_v19 = vadd.f32 %v1694_v14, %v1654_v11  ;;  %v1697_v20 = vadd.f32 %v1696_v18, %v1695_v15 }
 0x111   : > { %v1124_v21 = vadd.f32 %v1697_v20, %v1657_v17 }
 0x112   : > { %v1658_v22 = vpop.f32.mrb[12].mxu0 }
 0x113   : > { %v1698_v23 = vpop.f32.mrb[12].mxu1  ;;  %v1659_v24 = vpop.f32.mrb[13].mxu0 }
 0x114   : > { %v1699_v25 = vpop.f32.mrb[13].mxu1  ;;  %v1660_v26 = vadd.f32 %v1659_v24, %v1658_v22  ;;  %v1661_v28 = vpop.f32.mrb[14].mxu0 }
 0x115   : > { %v1700_v27 = vadd.f32 %v1699_v25, %v1698_v23  ;;  %v1701_v29 = vpop.f32.mrb[14].mxu1  ;;  %v1662_v30 = vpop.f32.mrb[15].mxu0 }
 0x116   : > { %v1702_v31 = vpop.f32.mrb[15].mxu1  ;;  %v1663_v33 = vadd.f32 %v1662_v30, %v1661_v28 }
 0x117   : > { %v1129_v32 = vadd.f32 %v1700_v27, %v1660_v26  ;;  %v1703_v34 = vadd.f32 %v1702_v31, %v1701_v29 }
 0x119   : > { %v1132_v35 = vadd.f32 %v1703_v34, %v1663_v33 }
 0x11a   : > { %v1720_v36 = vpop.f32.mrb[16].mxu0 }
 0x11b   : > { %v1721_v37 = vpop.f32.mrb[17].mxu0  ;;  %v1760_v38 = vpop.f32.mrb[16].mxu1 }
 0x11c   : > { %v1722_v39 = vadd.f32 %v1721_v37, %v1720_v36  ;;  %v1723_v40 = vpop.f32.mrb[18].mxu0  ;;  %v1761_v41 = vpop.f32.mrb[17].mxu1 }
 0x11d   : > { %v1724_v42 = vpop.f32.mrb[19].mxu0  ;;  %v1762_v44 = vadd.f32 %v1761_v41, %v1760_v38  ;;  %v1763_v45 = vpop.f32.mrb[18].mxu1 }
 0x11e   : > { %v1170_v43 = vadd.f32 %v1722_v39, %v1105_v55  ;;  %v1725_v46 = vadd.f32 %v1724_v42, %v1723_v40  ;;  %v1764_v47 = vpop.f32.mrb[19].mxu1  ;;  %v1581_v39 = vld [vmem:[%s2290_s2] ss:$0 sm:$0xff] }
 0x11f   : > { %v1765_v49 = vadd.f32 %v1764_v47, %v1763_v45 }
 0x120   : > { %v1173_v48 = vadd.f32 %v1725_v46, %v1108_v57  ;;  %v1235_v50 = vadd.f32 %v1762_v44, %v1170_v43 }
 0x122   : > { %v1726_v51 = vpop.f32.mrb[20].mxu0  ;;  %v2272_v52 = vadd.f32 %v1765_v49, %v1173_v48 }
 0x123   : > { %v1727_v53 = vpop.f32.mrb[21].mxu0  ;;  %v1766_v54 = vpop.f32.mrb[20].mxu1 }
 0x124   : > { %v1728_v56 = vadd.f32 %v1727_v53, %v1726_v51  ;;  %v1729_v58 = vpop.f32.mrb[22].mxu0  ;;  %v1767_v59 = vpop.f32.mrb[21].mxu1 }
 0x125   : > { %v1730_v60 = vpop.f32.mrb[23].mxu0  ;;  %v1768_v62 = vadd.f32 %v1767_v59, %v1766_v54  ;;  %v1769_v63 = vpop.f32.mrb[22].mxu1 }
 0x126   : > { %v1178_v61 = vadd.f32 %v1728_v56, %v1113_v5  ;;  %v1731_v55 = vadd.f32 %v1730_v60, %v1729_v58  ;;  %v1770_v0 = vpop.f32.mrb[23].mxu1 }
 0x127   : > { %v1771_v2 = vadd.f32 %v1770_v0, %v1769_v63 }
 0x128   : > { %v1181_v1 = vadd.f32 %v1731_v55, %v1116_v7  ;;  %v1243_v3 = vadd.f32 %v1768_v62, %v1178_v61 }
 0x12a   : > { %v1732_v57 = vpop.f32.mrb[24].mxu0  ;;  %v1246_v4 = vadd.f32 %v1771_v2, %v1181_v1 }
 0x12b   : > { %v1733_v6 = vpop.f32.mrb[25].mxu0  ;;  %v1772_v8 = vpop.f32.mrb[24].mxu1 }
 0x12c   : > { %v1734_v9 = vadd.f32 %v1733_v6, %v1732_v57  ;;  %v1735_v10 = vpop.f32.mrb[26].mxu0  ;;  %v1773_v11 = vpop.f32.mrb[25].mxu1 }
 0x12d   : > { %v1736_v12 = vpop.f32.mrb[27].mxu0  ;;  %v1774_v14 = vadd.f32 %v1773_v11, %v1772_v8  ;;  %v1775_v15 = vpop.f32.mrb[26].mxu1 }
 0x12e   : > { %v1186_v13 = vadd.f32 %v1734_v9, %v1121_v19  ;;  %v1737_v16 = vadd.f32 %v1736_v12, %v1735_v10  ;;  %v1776_v5 = vpop.f32.mrb[27].mxu1 }
 0x12f   : > { %v1777_v18 = vadd.f32 %v1776_v5, %v1775_v15 }
 0x130   : > { %v1189_v17 = vadd.f32 %v1737_v16, %v1124_v21  ;;  %v1251_v20 = vadd.f32 %v1774_v14, %v1186_v13 }
 0x132   : > { %v1738_v22 = vpop.f32.mrb[28].mxu0  ;;  %v1254_v7 = vadd.f32 %v1777_v18, %v1189_v17 }
 0x133   : > { %v1739_v23 = vpop.f32.mrb[29].mxu0  ;;  %v1778_v24 = vpop.f32.mrb[28].mxu1 }
 0x134   : > { %v1740_v25 = vadd.f32 %v1739_v23, %v1738_v22  ;;  %v1741_v26 = vpop.f32.mrb[30].mxu0  ;;  %v1779_v27 = vpop.f32.mrb[29].mxu1 }
 0x135   : > { %v1742_v28 = vpop.f32.mrb[31].mxu0  ;;  %v1780_v30 = vadd.f32 %v1779_v27, %v1778_v24  ;;  %v1781_v31 = vpop.f32.mrb[30].mxu1 }
 0x136   : > { %v1194_v29 = vadd.f32 %v1740_v25, %v1129_v32  ;;  %v1743_v33 = vadd.f32 %v1742_v28, %v1741_v26  ;;  %v1782_v19 = vpop.f32.mrb[31].mxu1  ;;  %v1582_v32 = vld [vmem:[%s2291_s3] ss:$0 sm:$0xff] }
 0x137   : > { %v1783_v36 = vadd.f32 %v1782_v19, %v1781_v31 }
 0x138   : > { %v1197_v34 = vadd.f32 %v1743_v33, %v1132_v35  ;;  %v1259_v37 = vadd.f32 %v1780_v30, %v1194_v29 }
 0x13a   : > { %v1262_v38 = vadd.f32 %v1783_v36, %v1197_v34 }
 0x13b   : > { %v1814_v21 = vpop.f32.mrb[32].mxu0 }
 0x13c   : > { %v1308_v40 = vadd.f32 %v1814_v21, %v1243_v3  ;;  %v1818_v41 = vpop.f32.mrb[32].mxu1  ;;  %v1299_v42 = vpop.f32.mrb[33].mxu0 }
 0x13d   : > { %v1324_v43 = vadd.f32 %v1818_v41, %v1259_v37  ;;  %v1300_v44 = vadd.f32 %v1299_v42, %v1235_v50  ;;  %v1315_v45 = vpop.f32.mrb[33].mxu1  ;;  %v1815_v46 = vpop.f32.mrb[34].mxu0 }
 0x13e   : > { %v1339_v35 = vmul.f32 %v1581_v39, %v1308_v40  ;;  %v1316_v47 = vadd.f32 %v1315_v45, %v1251_v20  ;;  %v1311_v48 = vadd.f32 %v1815_v46, %v1246_v4  ;;  %v1819_v49 = vpop.f32.mrb[34].mxu1  ;;  %v1302_v51 = vpop.f32.mrb[35].mxu0 }
 0x13f   : > { %v1343_v53 = vmul.f32 %v1581_v39, %v1324_v43  ;;  %v1337_v54 = vmul.f32 %v1581_v39, %v1300_v44  ;;  %v1327_v56 = vadd.f32 %v1819_v49, %v1262_v38  ;;  %v1303_v58 = vadd.f32 %v1302_v51, %v2272_v52  ;;  %v1318_v59 = vpop.f32.mrb[35].mxu1 }
 0x140   : > { %v1354_v60 = vadd.f32 %v1582_v32, %v1339_v35  ;;  %v1341_v61 = vmul.f32 %v1581_v39, %v1316_v47  ;;  %v1340_v62 = vmul.f32 %v1581_v39, %v1311_v48  ;;  %v1319_v63 = vadd.f32 %v1318_v59, %v1254_v7 }
 0x141   : > { %v1358_v55 = vadd.f32 %v1582_v32, %v1343_v53  ;;  %v1352_v50 = vadd.f32 %v1582_v32, %v1337_v54  ;;  %v1344_v0 = vmul.f32 %v1581_v39, %v1327_v56  ;;  %v1338_v1 = vmul.f32 %v1581_v39, %v1303_v58 }
 0x142   : > { %v1356_v2 = vadd.f32 %v1582_v32, %v1341_v61  ;;  %v1355_v3 = vadd.f32 %v1582_v32, %v1340_v62  ;;  %v1342_v57 = vmul.f32 %v1581_v39, %v1319_v63  ;;  %v1362_v8 = vmax.f32 %v1354_v60, 0.0 }
 0x143   : > { %v1359_v4 = vadd.f32 %v1582_v32, %v1344_v0  ;;  %v1353_v6 = vadd.f32 %v1582_v32, %v1338_v1  ;;  %v1366_v11 = vmax.f32 %v1358_v55, 0.0  ;;  %v1360_v52 = vmax.f32 %v1352_v50, 0.0 }
 0x144   : > { %v1363_v9 = vmax.f32 %v1355_v3, 0.0  ;;  %v1357_v10 = vadd.f32 %v1582_v32, %v1342_v57  ;;  %v1364_v14 = vmax.f32 %v1356_v2, 0.0 }
 0x145   : > { %v1367_v12 = vmax.f32 %v1359_v4, 0.0  ;;  %v1361_v13 = vmax.f32 %v1353_v6, 0.0 }
 0x146   : > { %v1609_v15 = vpack.c.bf16 %v1363_v9, %v1362_v8  ;;  %v1365_v16 = vmax.f32 %v1357_v10, 0.0 }
 0x147   : > { %v1619_v5 = vpack.c.bf16 %v1367_v12, %v1366_v11  ;;  %v1604_v17 = vpack.c.bf16 %v1361_v13, %v1360_v52 }
 0x148   : > { %1621 = vst [vmem:[%s202_s5 + $0x8] sm:$0xff] %v1609_v15   ;;  %v1614_v18 = vpack.c.bf16 %v1365_v16, %v1364_v14 }
 0x149   : > { %1623 = vst [vmem:[%s202_s5 + $0x18] sm:$0xff] %v1619_v5   ;;  %1605 = vst [vmem:[%s202_s5] sm:$0xff] %v1604_v17  }
 0x14a   : > { %1622 = vst [vmem:[%s202_s5 + $0x10] sm:$0xff] %v1614_v18  }
 0x14b PF: > { %s14_s15 = sadd.s32 1, %s1975_s15  }
 0x14c   : > { %p11_p4 = scmp.ge.s32.totalorder %s14_s15, 4  }
 0x14e   :  { %13 = sbr.rel (!%p11_p4) target bundleno = 1 (0x1), region = 66 }

// kernel: teacher_forward.19
= control target key start
LH: loop header
LB: loop body
LE: loop exit
PB: predicated region body
PF: predicated region fallthrough
CT: control target
= control target key end

     0   :  { %12 = vsyncpa [#allocation3], 0  ;;  %s2846_s0 = inlined_call_operand.vmem [shape: bf16[128,1152], index: 0, kind: input, shape index: {}]   ;;  %s2847_s1 = inlined_call_operand.vmem [shape: bf16[1152,128], index: 1, kind: input, shape index: {}]   ;;  %s2848_s2 = inlined_call_operand.vmem [shape: f32[1,128], index: 2, kind: input, shape index: {}]   ;;  %s2849_s3 = inlined_call_operand.vmem [shape: f32[1,128], index: 3, kind: input, shape index: {}]   ;;  %s2850_s4 = inlined_call_operand.vmem [shape: bf16[128,128], index: 4, kind: input, shape index: {}]   ;;  %s2851_s5 = inlined_call_operand.hbm [shape: f32[128,128], index: 5, kind: output, shape index: {0}]   ;;  %s2852_s6 = inlined_call_operand.hbm [shape: bf16[128,128], index: 6, kind: output, shape index: {1}]  }
   0x1   :  { %14 = vsyncpa [#allocation3 + $0x1], 0 }
   0x2   :  { %15 = vsyncpa [#allocation5], 0 }
   0x3   :  { %17 = vsyncpa [#allocation5 + $0x1], 0  ;;  %s2377_s21 = smov 0   ;;  %s2379_s22 = smov 0  }
   0x4   :  { %s2381_s23 = smov 0   ;;  %s2383_s24 = smov 0  }
   0x5 LB: > { %s2398_s25 = sadd.s32 4294967295, %s2334_s24   ;;  %s1667_s26 = sadd.s32 4294967294, %s2334_s24   ;;  %s2334_s24 = sphi %s2383_s24, %s2858_s24   ;;  %s2330_s23 = sphi %s2381_s23, %s2857_s23   ;;  %s2326_s22 = sphi %s2379_s22, %s2856_s22   ;;  %s2322_s21 = sphi %s2377_s21, %s2855_s21  }
   0x6   : > { %s2402_s27 = sadd.s32 1, %s2334_s24   ;;  %s145_s28 = sadd.s32 1, %s2330_s23 }
   0x7   : > { %s142_s29 = ssub.s32 %s2334_s24, %s2402_s27  ;;  %p155_p0 = scmp.ne.s32.totalorder %s2330_s23, %s2326_s22 }
   0x8   : > { %p143_p1 = scmp.eq.s32.totalorder %s142_s29, 0  ;;  %p156_p2 = scmp.eq.s32.totalorder %s2398_s25, 1 }
   0x9   : > { %p161_p3 = scmp.ne.s32.totalorder %s2326_s22, %s2322_s21  ;;  %p162_p4 = scmp.eq.s32.totalorder %s1667_s26, 1 }
   0xa   : > { %s2413_s30 = scalar_select %p143_p1, %s2330_s23, %s145_s28  }
   0xb   : > { %p2415_p5 = por %p156_p2, %p155_p0  ;;  %p2419_p6 = por %p162_p4, %p161_p3 }
   0xc   : > { %p1670_p7 = scmp.ge.s32.totalorder %s2334_s24, 1  ;;  %p234_p8 = scmp.lt.s32.totalorder %s2334_s24, 3 }
   0xe   : > { %p235_p9 = pnand %p1670_p7, %p234_p8 }
   0xf   : > { %v2116_v0 = vld [vmem:[%s2847_s1 + $0x40] sm:$0xff] (!%p235_p9)   ;;  %v2120_v4 = vld [vmem:[%s2847_s1 + $0x48] sm:$0xff] (!%p235_p9)   ;;  %v2124_v8 = vld [vmem:[%s2847_s1 + $0x50] sm:$0xff] (!%p235_p9)   ;;  %s1673_s9 = sshll.u32 (!%p235_p9), %s2398_s25, 3  ;;  %s2698_s28 = sand.u32 (!%p235_p9), 1, %s2326_s22  }
  0x10   : > { %238 = sbr.rel (%p235_p9) target bundleno = 375 (0x177), region = 40  ;;  %v2117_v1 = vld [vmem:[%s2847_s1 + $0xc0] sm:$0xff] (!%p235_p9)   ;;  %1855 = vmatprep.subr.bf16.mxu0 (!%p235_p9), %v2116_v0  ;;  %v2121_v5 = vld [vmem:[%s2847_s1 + $0xc8] sm:$0xff] (!%p235_p9)   ;;  %v2125_v9 = vld [vmem:[%s2847_s1 + $0xd0] sm:$0xff] (!%p235_p9)   ;;  %p276_p10 = scmp.lt.s32.totalorder (!%p235_p9), %s1673_s9, 15 }
  0x11   : > { %v2118_v2 = vld [vmem:[%s2847_s1] sm:$0xff] (!%p235_p9)   ;;  %1895 = vmatprep.subr.bf16.mxu1 (!%p235_p9), %v2117_v1  ;;  %v2122_v6 = vld [vmem:[%s2847_s1 + $0x8] sm:$0xff] (!%p235_p9)   ;;  %v2126_v10 = vld [vmem:[%s2847_s1 + $0x10] sm:$0xff] (!%p235_p9)   ;;  %s1811_s14 = sshll.u32 (!%p235_p9), %s2398_s25, 10  ;;  %s1527_s10 = scalar_lea.sflag (!%p235_p9), [#allocation3], %s2698_s28 }
  0x12   : > { %v2119_v3 = vld [vmem:[%s2847_s1 + $0x80] sm:$0xff] (!%p235_p9)   ;;  %1856 = vmatpush3.bf16.msra.mxu0 (!%p235_p9), %v2118_v2  ;;  %v2123_v7 = vld [vmem:[%s2847_s1 + $0x88] sm:$0xff] (!%p235_p9)   ;;  %v2127_v11 = vld [vmem:[%s2847_s1 + $0x90] sm:$0xff] (!%p235_p9)   ;;  %s2743_s29 = scalar_lea.hbm (!%p235_p9), %s2851_s5, %s1811_s14 }
  0x13   : > { %1896 = vmatpush3.bf16.msra.mxu1 (!%p235_p9), %v2119_v3  ;;  %1857 = vmatprep.subr.bf16.mxu0 (!%p235_p9), %v2120_v4  ;;  %v2128_v12 = vld [vmem:[%s2847_s1 + $0x58] sm:$0xff] (!%p235_p9)   ;;  %v2132_v16 = vld [vmem:[%s2847_s1 + $0x60] sm:$0xff] (!%p235_p9)   ;;  %v2136_v20 = vld [vmem:[%s2847_s1 + $0x68] sm:$0xff] (!%p235_p9)  }
  0x14   : > { %1897 = vmatprep.subr.bf16.mxu1 (!%p235_p9), %v2121_v5  ;;  %v2129_v13 = vld [vmem:[%s2847_s1 + $0xd8] sm:$0xff] (!%p235_p9)   ;;  %v2133_v17 = vld [vmem:[%s2847_s1 + $0xe0] sm:$0xff] (!%p235_p9)   ;;  %v2137_v21 = vld [vmem:[%s2847_s1 + $0xe8] sm:$0xff] (!%p235_p9)  }
  0x15   : > { %v2130_v14 = vld [vmem:[%s2847_s1 + $0x18] sm:$0xff] (!%p235_p9)   ;;  %v2134_v18 = vld [vmem:[%s2847_s1 + $0x20] sm:$0xff] (!%p235_p9)   ;;  %v2138_v22 = vld [vmem:[%s2847_s1 + $0x28] sm:$0xff] (!%p235_p9)  }
  0x16   : > { %1858 = vmatpush3.bf16.msra.mxu0 (!%p235_p9), %v2122_v6  ;;  %v2131_v15 = vld [vmem:[%s2847_s1 + $0x98] sm:$0xff] (!%p235_p9)   ;;  %v2135_v19 = vld [vmem:[%s2847_s1 + $0xa0] sm:$0xff] (!%p235_p9)   ;;  %v2139_v23 = vld [vmem:[%s2847_s1 + $0xa8] sm:$0xff] (!%p235_p9)  }
  0x17   : > { %1898 = vmatpush3.bf16.msra.mxu1 %v2123_v7  ;;  %1859 = vmatprep.subr.bf16.mxu0 %v2124_v8  ;;  %s2860_s9 = smov (!%p276_p10, %s1673_s9), 15  ;;  %v2140_v24 = vld [vmem:[%s2847_s1 + $0x70] sm:$0xff]   ;;  %v2144_v28 = vld [vmem:[%s2847_s1 + $0x78] sm:$0xff]   ;;  %v2154_v36 = vld [vmem:[%s2847_s1 + $0x140] sm:$0xff]  }
  0x18   : > { %1899 = vmatprep.subr.bf16.mxu1 %v2125_v9  ;;  %v2141_v25 = vld [vmem:[%s2847_s1 + $0xf0] sm:$0xff]   ;;  %s2067_s18 = smul.u32 36, %s2860_s9  ;;  %v2145_v29 = vld [vmem:[%s2847_s1 + $0xf8] sm:$0xff]   ;;  %v2155_v37 = vld [vmem:[%s2847_s1 + $0x1c0] sm:$0xff]  }
  0x19   : > { %v2142_v26 = vld [vmem:[%s2847_s1 + $0x30] sm:$0xff]   ;;  %v2146_v30 = vld [vmem:[%s2847_s1 + $0x38] sm:$0xff]   ;;  %v2156_v38 = vld [vmem:[%s2847_s1 + $0x100] sm:$0xff]  }
  0x1a   : > { %1860 = vmatpush3.bf16.msra.mxu0 %v2126_v10  ;;  %v2143_v27 = vld [vmem:[%s2847_s1 + $0xb0] sm:$0xff]   ;;  %s2522_s15 = scalar_lea.vmem %s2846_s0, %s2067_s18  ;;  %v2147_v31 = vld [vmem:[%s2847_s1 + $0xb8] sm:$0xff]   ;;  %v2157_v39 = vld [vmem:[%s2847_s1 + $0x180] sm:$0xff]   ;;  %s1672_s18 = sshll.u32 %s2698_s28, 5 }
  0x1b   : > { %1900 = vmatpush3.bf16.msra.mxu1 %v2127_v11  ;;  %1861 = vmatprep.subr.bf16.mxu0 %v2128_v12  ;;  %v2148_v32 = vld [vmem:[%s2522_s15] ss:$36 sps:$4 sm:$0xff]   ;;  %v2151_v34 = vld [vmem:[%s2522_s15 + $0x8] ss:$36 sps:$4 sm:$0xff]   ;;  %v2164_v45 = vld [vmem:[%s2522_s15 + $0x54] ss:$36 sps:$4 sm:$0xff]  }
  0x1c   : > { %1901 = vmatprep.subr.bf16.mxu1 %v2129_v13  ;;  %v2150_v33 = vld [vmem:[%s2522_s15 + $0x4] ss:$36 sps:$4 sm:$0xff]   ;;  %v2153_v35 = vld [vmem:[%s2522_s15 + $0xc] ss:$36 sps:$4 sm:$0xff]   ;;  %v2172_v52 = vld [vmem:[%s2847_s1 + $0x158] sm:$0xff]  }
  0x1d   : > { %1123 = vmatprep.mubr.bf16.mxu0 %v2150_v33  ;;  %1188 = vmatprep.mubr.bf16.mxu1 %v2153_v35  ;;  %v2158_v40 = vld [vmem:[%s2847_s1 + $0x148] sm:$0xff]   ;;  %v2167_v47 = vld [vmem:[%s2522_s15 + $0x50] ss:$36 sps:$4 sm:$0xff]   ;;  %v2173_v53 = vld [vmem:[%s2847_s1 + $0x1d8] sm:$0xff]  }
  0x1e   : > { %1862 = vmatpush3.bf16.msra.mxu0 %v2130_v14  ;;  %v2159_v41 = vld [vmem:[%s2847_s1 + $0x1c8] sm:$0xff]   ;;  %v2168_v48 = vld [vmem:[%s2847_s1 + $0x150] sm:$0xff]   ;;  %v2174_v54 = vld [vmem:[%s2847_s1 + $0x118] sm:$0xff]  }
  0x1f   : > { %1902 = vmatpush3.bf16.msra.mxu1 %v2131_v15  ;;  %1863 = vmatprep.subr.bf16.mxu0 %v2132_v16  ;;  %v2160_v42 = vld [vmem:[%s2847_s1 + $0x108] sm:$0xff]   ;;  %v2169_v49 = vld [vmem:[%s2847_s1 + $0x1d0] sm:$0xff]   ;;  %v2175_v55 = vld [vmem:[%s2847_s1 + $0x198] sm:$0xff]  }
  0x20   : > { %1903 = vmatprep.subr.bf16.mxu1 %v2133_v17  ;;  %v2161_v43 = vld [vmem:[%s2847_s1 + $0x188] sm:$0xff]   ;;  %v2170_v50 = vld [vmem:[%s2847_s1 + $0x110] sm:$0xff]   ;;  %v2178_v57 = vld [vmem:[%s2522_s15 + $0x9c] ss:$36 sps:$4 sm:$0xff]  }
  0x21   : > { %v2162_v44 = vld [vmem:[%s2522_s15 + $0x4c] ss:$36 sps:$4 sm:$0xff]   ;;  %v2176_v56 = vld [vmem:[%s2522_s15 + $0x94] ss:$36 sps:$4 sm:$0xff]   ;;  %v2182_v60 = vld [vmem:[%s2847_s1 + $0x160] sm:$0xff]  }
  0x22   : > { %1864 = vmatpush3.bf16.msra.mxu0 %v2134_v18  ;;  %v2166_v46 = vld [vmem:[%s2522_s15 + $0x48] ss:$36 sps:$4 sm:$0xff]   ;;  %v2171_v51 = vld [vmem:[%s2847_s1 + $0x190] sm:$0xff]   ;;  %v2181_v59 = vld [vmem:[%s2522_s15 + $0x98] ss:$36 sps:$4 sm:$0xff]  }
  0x23   : > { %1904 = vmatpush3.bf16.msra.mxu1 %v2135_v19  ;;  %1865 = vmatprep.subr.bf16.mxu0 %v2136_v20  ;;  %v2180_v58 = vld [vmem:[%s2522_s15 + $0x90] ss:$36 sps:$4 sm:$0xff]   ;;  %v2183_v61 = vld [vmem:[%s2847_s1 + $0x1e0] sm:$0xff]   ;;  %v2186_v0 = vld [vmem:[%s2847_s1 + $0x168] sm:$0xff]  }
  0x24   : > { %1905 = vmatprep.subr.bf16.mxu1 %v2137_v21  ;;  %v2184_v62 = vld [vmem:[%s2847_s1 + $0x120] sm:$0xff]   ;;  %v2187_v1 = vld [vmem:[%s2847_s1 + $0x1e8] sm:$0xff]   ;;  %v2194_v6 = vld [vmem:[%s2522_s15 + $0xd8] ss:$36 sps:$4 sm:$0xff]  }
  0x25   : > { %v2185_v63 = vld [vmem:[%s2847_s1 + $0x1a0] sm:$0xff]   ;;  %v2188_v2 = vld [vmem:[%s2847_s1 + $0x128] sm:$0xff]   ;;  %v2196_v8 = vld [vmem:[%s2847_s1 + $0x170] sm:$0xff]  }
  0x26   : > { %1866 = vmatpush3.bf16.msra.mxu0 %v2138_v22  ;;  %v2189_v3 = vld [vmem:[%s2847_s1 + $0x1a8] sm:$0xff]   ;;  %v2190_v4 = vld [vmem:[%s2522_s15 + $0xdc] ss:$36 sps:$4 sm:$0xff]   ;;  %v2197_v9 = vld [vmem:[%s2847_s1 + $0x1f0] sm:$0xff]  }
  0x27   : > { %1906 = vmatpush3.bf16.msra.mxu1 %v2139_v23  ;;  %1867 = vmatprep.subr.bf16.mxu0 %v2140_v24  ;;  %v2192_v5 = vld [vmem:[%s2522_s15 + $0xe4] ss:$36 sps:$4 sm:$0xff]   ;;  %v2198_v10 = vld [vmem:[%s2847_s1 + $0x130] sm:$0xff]   ;;  %v2200_v12 = vld [vmem:[%s2847_s1 + $0x178] sm:$0xff]  }
  0x28   : > { %1907 = vmatprep.subr.bf16.mxu1 %v2141_v25  ;;  %v2195_v7 = vld [vmem:[%s2522_s15 + $0xe0] ss:$36 sps:$4 sm:$0xff]   ;;  %v2199_v11 = vld [vmem:[%s2847_s1 + $0x1b0] sm:$0xff]   ;;  %v2201_v13 = vld [vmem:[%s2847_s1 + $0x1f8] sm:$0xff]  }
  0x29   : > { %v2202_v14 = vld [vmem:[%s2847_s1 + $0x138] sm:$0xff]   ;;  %v2204_v16 = vld [vmem:[%s2522_s15 + $0x10] ss:$36 sps:$4 sm:$0xff]   ;;  %v2210_v20 = vld [vmem:[%s2847_s1 + $0x200] sm:$0xff]  }
  0x2a   : > { %1868 = vmatpush3.bf16.msra.mxu0 %v2142_v26  ;;  %v2203_v15 = vld [vmem:[%s2847_s1 + $0x1b8] sm:$0xff]   ;;  %v2211_v21 = vld [vmem:[%s2847_s1 + $0x208] sm:$0xff]   ;;  %v2217_v25 = vld [vmem:[%s2522_s15 + $0x60] ss:$36 sps:$4 sm:$0xff]  }
  0x2b   : > { %1908 = vmatpush3.bf16.msra.mxu1 %v2143_v27  ;;  %1869 = vmatprep.subr.bf16.mxu0 %v2144_v28  ;;  %v2206_v17 = vld [vmem:[%s2522_s15 + $0x14] ss:$36 sps:$4 sm:$0xff]   ;;  %v2209_v19 = vld [vmem:[%s2522_s15 + $0x1c] ss:$36 sps:$4 sm:$0xff]   ;;  %v2214_v23 = vld [vmem:[%s2522_s15 + $0x64] ss:$36 sps:$4 sm:$0xff]  }
  0x2c   : > { %1909 = vmatprep.subr.bf16.mxu1 %v2145_v29  ;;  %v2207_v18 = vld [vmem:[%s2522_s15 + $0x18] ss:$36 sps:$4 sm:$0xff]   ;;  %v2218_v26 = vld [vmem:[%s2847_s1 + $0x210] sm:$0xff]   ;;  %v2220_v27 = vld [vmem:[%s2522_s15 + $0xa4] ss:$36 sps:$4 sm:$0xff]  }
  0x2d   : > { %v2212_v22 = vld [vmem:[%s2522_s15 + $0x5c] ss:$36 sps:$4 sm:$0xff]   ;;  %v2222_v28 = vld [vmem:[%s2522_s15 + $0xac] ss:$36 sps:$4 sm:$0xff]  }
  0x2e   : > { %1870 = vmatpush3.bf16.msra.mxu0 %v2146_v30  ;;  %v2216_v24 = vld [vmem:[%s2522_s15 + $0x58] ss:$36 sps:$4 sm:$0xff]   ;;  %v2224_v30 = vld [vmem:[%s2522_s15 + $0xa0] ss:$36 sps:$4 sm:$0xff]   ;;  %v2228_v33 = vld [vmem:[%s2522_s15 + $0xec] ss:$36 sps:$4 sm:$0xff]  }
  0x2f   : > { %1910 = vmatpush3.bf16.msra.mxu1 %v2147_v31  ;;  %1935 = vmatprep.subr.bf16.mxu0 %v2154_v36  ;;  %v2219_v29 = vld [vmem:[%s2847_s1 + $0x218] sm:$0xff]   ;;  %v2225_v31 = vld [vmem:[%s2522_s15 + $0xa8] ss:$36 sps:$4 sm:$0xff]  }
  0x30   : > { %1975 = vmatprep.subr.bf16.mxu1 %v2155_v37  ;;  %v2227_v35 = vld [vmem:[%s2847_s1 + $0x228] sm:$0xff]   ;;  %v2234_v37 = vld [vmem:[%s2847_s1 + $0x230] sm:$0xff]  }
  0x31   : > { %1124 = vmatmul.mubr.bf16.vlgmr.msra.gmra.mrb[0].mxu0 %v2148_v32  ;;  %v2226_v32 = vld [vmem:[%s2847_s1 + $0x220] sm:$0xff]   ;;  %v2232_v36 = vld [vmem:[%s2522_s15 + $0xe8] ss:$36 sps:$4 sm:$0xff]  }
  0x32   : > { %1189 = vmatmul.mubr.bf16.vlgmr.msra.gmra.mrb[0].mxu1 %v2151_v34  ;;  %1936 = vmatpush3.bf16.msra.mxu0 %v2156_v38  ;;  %v2230_v34 = vld [vmem:[%s2522_s15 + $0xf4] ss:$36 sps:$4 sm:$0xff]  }
  0x33   : > { %1976 = vmatpush3.bf16.msra.mxu1 %v2157_v39  ;;  %1937 = vmatprep.subr.bf16.mxu0 %v2158_v40  ;;  %v2233_v38 = vld [vmem:[%s2522_s15 + $0xf0] ss:$36 sps:$4 sm:$0xff]   ;;  %v2236_v39 = vld [vmem:[%s2522_s15 + $0x20] ss:$36 sps:$4 sm:$0xff]  }
  0x34   : > { %1977 = vmatprep.subr.bf16.mxu1 %v2159_v41  ;;  %1131 = vmatprep.mubr.bf16.mxu0 %v2162_v44  ;;  %v2237_v40 = vld [vmem:[%s2522_s15 + $0xb0] ss:$36 sps:$4 sm:$0xff]   ;;  %v2235_v41 = vld [vmem:[%s2847_s1 + $0x238] sm:$0xff]  }
  0x35   : > { %1196 = vmatprep.mubr.bf16.mxu1 %v2164_v45 }
  0x36   : > { %1938 = vmatpush3.bf16.msra.mxu0 %v2160_v42  ;;  %v2238_v42 = vld [vmem:[%s2522_s15 + $0x68] ss:$36 sps:$4 sm:$0xff]  }
  0x37   : > { %1978 = vmatpush3.bf16.msra.mxu1 %v2161_v43  ;;  %1939 = vmatprep.subr.bf16.mxu0 %v2168_v48  ;;  %v2239_v43 = vld [vmem:[%s2522_s15 + $0xf8] ss:$36 sps:$4 sm:$0xff]   ;;  %s1676_s15 = sshll.u32 %s2860_s9, 2  ;;  %s1671_s9 = sshll.u32 %s2698_s28, 6 }
  0x38   : > { %1979 = vmatprep.subr.bf16.mxu1 %v2169_v49  ;;  %s286_s11 = scalar_lea.vmem %s2850_s4, %s1676_s15  ;;  %s2722_s16 = scalar_lea.vmem [#allocation2], %s1671_s9 }
  0x39   : > { %1132 = vmatmul.mubr.bf16.gmra.mrb[4].mxu0 %v2166_v46  ;;  %s1545_s17 = sshll.u32 %s2722_s16, 4  ;;  %s2336_s9 = smov [#allocation2]   ;;  %s2745_s17 = int_to_ptr.vmem [resolvable:$true] %s1545_s17 }
  0x3a   : > { %1197 = vmatmul.mubr.bf16.gmra.mrb[4].mxu1 %v2167_v47  ;;  %1940 = vmatpush3.bf16.msra.mxu0 %v2170_v50  ;;  %s2244_s12 = sshll.u32 %s2336_s9, 4  ;;  %s2245_s12 = int_to_ptr.vmem [resolvable:$false] %s2244_s12 }
  0x3b   : > { %1980 = vmatpush3.bf16.msra.mxu1 %v2171_v51  ;;  %1941 = vmatprep.subr.bf16.mxu0 %v2172_v52  ;;  %s2246_s13 = scalar_lea.vmem %s2245_s12, 2048  ;;  %p2247_p0 = scmp.lt.s32.totalorder %s2745_s17, %s2245_s12 }
  0x3c   : > { %1981 = vmatprep.subr.bf16.mxu1 %v2173_v53  ;;  %1139 = vmatprep.mubr.bf16.mxu0 %v2176_v56 }
  0x3d   : > { %1204 = vmatprep.mubr.bf16.mxu1 %v2178_v57 }
  0x3e   : > { %1942 = vmatpush3.bf16.msra.mxu0 %v2174_v54 }
  0x3f   : > { %1982 = vmatpush3.bf16.msra.mxu1 %v2175_v55  ;;  %1943 = vmatprep.subr.bf16.mxu0 %v2182_v60 }
  0x40   : > { %1983 = vmatprep.subr.bf16.mxu1 %v2183_v61 }
  0x41   : > { %1140 = vmatmul.mubr.bf16.gmra.mrb[8].mxu0 %v2180_v58 }
  0x42   : > { %1205 = vmatmul.mubr.bf16.gmra.mrb[8].mxu1 %v2181_v59  ;;  %1944 = vmatpush3.bf16.msra.mxu0 %v2184_v62 }
  0x43   : > { %1984 = vmatpush3.bf16.msra.mxu1 %v2185_v63  ;;  %1945 = vmatprep.subr.bf16.mxu0 %v2186_v0 }
  0x44   : > { %1985 = vmatprep.subr.bf16.mxu1 %v2187_v1  ;;  %1147 = vmatprep.mubr.bf16.mxu0 %v2190_v4 }
  0x45   : > { %1212 = vmatprep.mubr.bf16.mxu1 %v2192_v5 }
  0x46   : > { %1946 = vmatpush3.bf16.msra.mxu0 %v2188_v2 }
  0x47   : > { %1986 = vmatpush3.bf16.msra.mxu1 %v2189_v3  ;;  %1947 = vmatprep.subr.bf16.mxu0 %v2196_v8 }
  0x48   : > { %1987 = vmatprep.subr.bf16.mxu1 %v2197_v9 }
  0x49   : > { %1148 = vmatmul.mubr.bf16.gmra.mrb[12].mxu0 %v2194_v6 }
  0x4a   : > { %1213 = vmatmul.mubr.bf16.gmra.mrb[12].mxu1 %v2195_v7  ;;  %1948 = vmatpush3.bf16.msra.mxu0 %v2198_v10 }
  0x4b   : > { %1988 = vmatpush3.bf16.msra.mxu1 %v2199_v11  ;;  %1949 = vmatprep.subr.bf16.mxu0 %v2200_v12 }
  0x4c   : > { %1989 = vmatprep.subr.bf16.mxu1 %v2201_v13  ;;  %1253 = vmatprep.mubr.bf16.mxu0 %v2206_v17 }
  0x4d   : > { %1318 = vmatprep.mubr.bf16.mxu1 %v2209_v19 }
  0x4e   : > { %1950 = vmatpush3.bf16.msra.mxu0 %v2202_v14 }
  0x4f   : > { %1990 = vmatpush3.bf16.msra.mxu1 %v2203_v15  ;;  %2027 = vmatprep.subr.bf16.mxu0 %v2210_v20 }
  0x50   : > { %2051 = vmatprep.subr.bf16.mxu1 %v2210_v20 }
  0x51   : > { %1254 = vmatmul.mubr.bf16.vlgmr.msra.gmra.mrb[16].mxu0 %v2204_v16 }
  0x52   : > { %1319 = vmatmul.mubr.bf16.vlgmr.msra.gmra.mrb[16].mxu1 %v2207_v18  ;;  %2028 = vmatpush3.bf16.msra.mxu0 %v2210_v20 }
  0x53   : > { %2059 = vmatpush3.bf16.msra.mxu1 %v2210_v20  ;;  %2029 = vmatprep.subr.bf16.mxu0 %v2211_v21 }
  0x54   : > { %2052 = vmatprep.subr.bf16.mxu1 %v2211_v21  ;;  %1261 = vmatprep.mubr.bf16.mxu0 %v2212_v22 }
  0x55   : > { %1326 = vmatprep.mubr.bf16.mxu1 %v2214_v23 }
  0x56   : > { %2030 = vmatpush3.bf16.msra.mxu0 %v2211_v21 }
  0x57   : > { %2060 = vmatpush3.bf16.msra.mxu1 %v2211_v21  ;;  %2031 = vmatprep.subr.bf16.mxu0 %v2218_v26 }
  0x58   : > { %2053 = vmatprep.subr.bf16.mxu1 %v2218_v26 }
  0x59   : > { %1262 = vmatmul.mubr.bf16.gmra.mrb[20].mxu0 %v2216_v24 }
  0x5a   : > { %1327 = vmatmul.mubr.bf16.gmra.mrb[20].mxu1 %v2217_v25  ;;  %1269 = vmatprep.mubr.bf16.mxu0 %v2220_v27 }
  0x5b   : > { %2032 = vmatpush3.bf16.msra.mxu0 %v2218_v26  ;;  %1334 = vmatprep.mubr.bf16.mxu1 %v2222_v28 }
  0x5c   : > { %2061 = vmatpush3.bf16.msra.mxu1 %v2218_v26  ;;  %2033 = vmatprep.subr.bf16.mxu0 %v2219_v29 }
  0x5d   : > { %2054 = vmatprep.subr.bf16.mxu1 %v2219_v29 }
  0x5f   : > { %2034 = vmatpush3.bf16.msra.mxu0 %v2219_v29 }
  0x60   : > { %2062 = vmatpush3.bf16.msra.mxu1 %v2219_v29  ;;  %2035 = vmatprep.subr.bf16.mxu0 %v2226_v32 }
  0x61   : > { %1270 = vmatmul.mubr.bf16.gmra.mrb[24].mxu0 %v2224_v30  ;;  %2055 = vmatprep.subr.bf16.mxu1 %v2226_v32 }
  0x62   : > { %1335 = vmatmul.mubr.bf16.gmra.mrb[24].mxu1 %v2225_v31  ;;  %1277 = vmatprep.mubr.bf16.mxu0 %v2228_v33 }
  0x63   : > { %2036 = vmatpush3.bf16.msra.mxu0 %v2226_v32  ;;  %1342 = vmatprep.mubr.bf16.mxu1 %v2230_v34 }
  0x64   : > { %2063 = vmatpush3.bf16.msra.mxu1 %v2226_v32  ;;  %2037 = vmatprep.subr.bf16.mxu0 %v2227_v35 }
  0x65   : > { %2056 = vmatprep.subr.bf16.mxu1 %v2227_v35 }
  0x67   : > { %2038 = vmatpush3.bf16.msra.mxu0 %v2227_v35 }
  0x68   : > { %2064 = vmatpush3.bf16.msra.mxu1 %v2227_v35  ;;  %2039 = vmatprep.subr.bf16.mxu0 %v2234_v37 }
  0x69   : > { %1278 = vmatmul.mubr.bf16.gmra.mrb[28].mxu0 %v2232_v36  ;;  %2057 = vmatprep.subr.bf16.mxu1 %v2234_v37 }
  0x6a   : > { %1343 = vmatmul.mubr.bf16.gmra.mrb[28].mxu1 %v2233_v38  ;;  %2043 = vmatprep.mubr.bf16.mxu0 %v2236_v39 }
  0x6b   : > { %2040 = vmatpush3.bf16.msra.mxu0 %v2234_v37  ;;  %2047 = vmatprep.mubr.bf16.mxu1 %v2237_v40 }
  0x6c   : > { %2065 = vmatpush3.bf16.msra.mxu1 %v2234_v37  ;;  %2041 = vmatprep.subr.bf16.mxu0 %v2235_v41 }
  0x6d   : > { %2058 = vmatprep.subr.bf16.mxu1 %v2235_v41 }
  0x6f   : > { %2042 = vmatpush3.bf16.msra.mxu0 %v2235_v41 }
  0x70   : > { %2066 = vmatpush3.bf16.msra.mxu1 %v2235_v41 }
  0x72   : > { %2044 = vmatmul.mubr.bf16.vlgmr.msra.gmra.mrb[32].mxu0 %v2238_v42 }
  0x73   : > { %2048 = vmatmul.mubr.bf16.vlgmr.msra.gmra.mrb[32].mxu1 %v2239_v43 }
 0x104   : > { %v1871_v44 = vpop.f32.mrb[0].mxu0 }
 0x105   : > { %v1911_v45 = vpop.f32.mrb[0].mxu1  ;;  %v1872_v46 = vpop.f32.mrb[1].mxu0 }
 0x106   : > { %v1873_v47 = vadd.f32 %v1872_v46, %v1871_v44  ;;  %v1912_v48 = vpop.f32.mrb[1].mxu1  ;;  %v1874_v49 = vpop.f32.mrb[2].mxu0 }
 0x107   : > { %v1913_v50 = vadd.f32 %v1912_v48, %v1911_v45  ;;  %v1914_v51 = vpop.f32.mrb[2].mxu1  ;;  %v1875_v52 = vpop.f32.mrb[3].mxu0 }
 0x108   : > { %v1876_v53 = vadd.f32 %v1875_v52, %v1874_v49  ;;  %v1915_v54 = vpop.f32.mrb[3].mxu1 }
 0x109   : > { %v1191_v55 = vadd.f32 %v1913_v50, %v1873_v47  ;;  %v1916_v56 = vadd.f32 %v1915_v54, %v1914_v51 }
 0x10b   : > { %v1194_v57 = vadd.f32 %v1916_v56, %v1876_v53 }
 0x10c   : > { %v1877_v58 = vpop.f32.mrb[4].mxu0 }
 0x10d   : > { %v1917_v59 = vpop.f32.mrb[4].mxu1  ;;  %v1878_v60 = vpop.f32.mrb[5].mxu0 }
 0x10e   : > { %v1879_v61 = vadd.f32 %v1878_v60, %v1877_v58  ;;  %v1918_v62 = vpop.f32.mrb[5].mxu1  ;;  %v1880_v63 = vpop.f32.mrb[6].mxu0 }
 0x10f   : > { %v1919_v0 = vadd.f32 %v1918_v62, %v1917_v59  ;;  %v1920_v1 = vpop.f32.mrb[6].mxu1  ;;  %v1881_v2 = vpop.f32.mrb[7].mxu0 }
 0x110   : > { %v1882_v3 = vadd.f32 %v1881_v2, %v1880_v63  ;;  %v1921_v4 = vpop.f32.mrb[7].mxu1 }
 0x111   : > { %v1199_v5 = vadd.f32 %v1919_v0, %v1879_v61  ;;  %v1922_v6 = vadd.f32 %v1921_v4, %v1920_v1 }
 0x113   : > { %v1202_v7 = vadd.f32 %v1922_v6, %v1882_v3 }
 0x114   : > { %v1883_v8 = vpop.f32.mrb[8].mxu0 }
 0x115   : > { %v1923_v9 = vpop.f32.mrb[8].mxu1  ;;  %v1884_v10 = vpop.f32.mrb[9].mxu0 }
 0x116   : > { %v1885_v11 = vadd.f32 %v1884_v10, %v1883_v8  ;;  %v1924_v12 = vpop.f32.mrb[9].mxu1  ;;  %v1886_v13 = vpop.f32.mrb[10].mxu0 }
 0x117   : > { %v1925_v14 = vadd.f32 %v1924_v12, %v1923_v9  ;;  %v1926_v15 = vpop.f32.mrb[10].mxu1  ;;  %v1887_v16 = vpop.f32.mrb[11].mxu0 }
 0x118   : > { %v1888_v17 = vadd.f32 %v1887_v16, %v1886_v13  ;;  %v1927_v18 = vpop.f32.mrb[11].mxu1 }
 0x119   : > { %v1207_v19 = vadd.f32 %v1925_v14, %v1885_v11  ;;  %v1928_v20 = vadd.f32 %v1927_v18, %v1926_v15 }
 0x11b   : > { %v1210_v21 = vadd.f32 %v1928_v20, %v1888_v17 }
 0x11c   : > { %v1889_v22 = vpop.f32.mrb[12].mxu0 }
 0x11d   : > { %v1929_v23 = vpop.f32.mrb[12].mxu1  ;;  %v1890_v24 = vpop.f32.mrb[13].mxu0 }
 0x11e   : > { %v1930_v25 = vpop.f32.mrb[13].mxu1  ;;  %v1891_v26 = vadd.f32 %v1890_v24, %v1889_v22  ;;  %v1892_v28 = vpop.f32.mrb[14].mxu0 }
 0x11f   : > { %v1931_v27 = vadd.f32 %v1930_v25, %v1929_v23  ;;  %v1932_v29 = vpop.f32.mrb[14].mxu1  ;;  %v1893_v30 = vpop.f32.mrb[15].mxu0 }
 0x120   : > { %v1933_v31 = vpop.f32.mrb[15].mxu1  ;;  %v1894_v33 = vadd.f32 %v1893_v30, %v1892_v28 }
 0x121   : > { %v1215_v32 = vadd.f32 %v1931_v27, %v1891_v26  ;;  %v1934_v34 = vadd.f32 %v1933_v31, %v1932_v29 }
 0x123   : > { %v2686_v35 = vadd.f32 %v1934_v34, %v1894_v33 }
 0x124   : > { %v1951_v36 = vpop.f32.mrb[16].mxu0 }
 0x125   : > { %v1952_v37 = vpop.f32.mrb[17].mxu0  ;;  %v1991_v38 = vpop.f32.mrb[16].mxu1 }
 0x126   : > { %v1953_v39 = vadd.f32 %v1952_v37, %v1951_v36  ;;  %v1954_v40 = vpop.f32.mrb[18].mxu0  ;;  %v1992_v41 = vpop.f32.mrb[17].mxu1  ;;  %v2705_v37 = vld [vmem:[%s286_s11 + $0x8] sm:$0xff]  }
 0x127   : > { %v1955_v42 = vpop.f32.mrb[19].mxu0  ;;  %v1993_v44 = vadd.f32 %v1992_v41, %v1991_v38  ;;  %v1994_v45 = vpop.f32.mrb[18].mxu1  ;;  %v2709_v38 = vld [vmem:[%s286_s11] sm:$0xff]  }
 0x128   : > { %v1256_v43 = vadd.f32 %v1953_v39, %v1191_v55  ;;  %v1956_v46 = vadd.f32 %v1955_v42, %v1954_v40  ;;  %v1995_v47 = vpop.f32.mrb[19].mxu1  ;;  %v2711_v39 = vld [vmem:[%s286_s11 + $0x10] sm:$0xff]   ;;  %v1785_v42 = vld [vmem:[%s2848_s2] ss:$0 sm:$0xff] }
 0x129   : > { %v1996_v49 = vadd.f32 %v1995_v47, %v1994_v45  ;;  %v1815_v47 = vunpack.c.l.bf16 %v2709_v38 }
 0x12a   : > { %v1259_v48 = vadd.f32 %v1956_v46, %v1194_v57  ;;  %v2688_v50 = vadd.f32 %v1993_v44, %v1256_v43 }
 0x12c   : > { %v1957_v51 = vpop.f32.mrb[20].mxu0  ;;  %v2690_v52 = vadd.f32 %v1996_v49, %v1259_v48  ;;  %v1823_v48 = vunpack.c.l.bf16 %v2711_v39  ;;  %v1820_v49 = vunpack.c.h.bf16 %v2705_v37 }
 0x12d   : > { %v1958_v53 = vpop.f32.mrb[21].mxu0  ;;  %v1997_v54 = vpop.f32.mrb[20].mxu1 }
 0x12e   : > { %v1959_v56 = vadd.f32 %v1958_v53, %v1957_v51  ;;  %v1960_v58 = vpop.f32.mrb[22].mxu0  ;;  %v1998_v59 = vpop.f32.mrb[21].mxu1  ;;  %v2728_v51 = vld [vmem:[%s2849_s3] ss:$0 sm:$0xff] }
 0x12f   : > { %v1961_v60 = vpop.f32.mrb[23].mxu0  ;;  %v1999_v62 = vadd.f32 %v1998_v59, %v1997_v54  ;;  %v2000_v55 = vpop.f32.mrb[22].mxu1 }
 0x130   : > { %v1264_v61 = vadd.f32 %v1959_v56, %v1199_v5  ;;  %v1962_v63 = vadd.f32 %v1961_v60, %v1960_v58  ;;  %v2001_v0 = vpop.f32.mrb[23].mxu1  ;;  %v1816_v60 = vunpack.c.h.bf16 %v2709_v38 }
 0x131   : > { %v2002_v2 = vadd.f32 %v2001_v0, %v2000_v55 }
 0x132   : > { %v1267_v1 = vadd.f32 %v1962_v63, %v1202_v7  ;;  %v1329_v57 = vadd.f32 %v1999_v62, %v1264_v61 }
 0x134   : > { %v1963_v3 = vpop.f32.mrb[24].mxu0  ;;  %v2692_v4 = vadd.f32 %v2002_v2, %v1267_v1  ;;  %v1824_v1 = vunpack.c.h.bf16 %v2711_v39 }
 0x135   : > { %v1964_v6 = vpop.f32.mrb[25].mxu0  ;;  %v2003_v8 = vpop.f32.mrb[24].mxu1 }
 0x136   : > { %v1965_v9 = vadd.f32 %v1964_v6, %v1963_v3  ;;  %v1966_v10 = vpop.f32.mrb[26].mxu0  ;;  %v2004_v11 = vpop.f32.mrb[25].mxu1 }
 0x137   : > { %v1967_v12 = vpop.f32.mrb[27].mxu0  ;;  %v2005_v14 = vadd.f32 %v2004_v11, %v2003_v8  ;;  %v2006_v5 = vpop.f32.mrb[26].mxu1 }
 0x138   : > { %v1272_v13 = vadd.f32 %v1965_v9, %v1207_v19  ;;  %v1968_v15 = vadd.f32 %v1967_v12, %v1966_v10  ;;  %v2007_v16 = vpop.f32.mrb[27].mxu1 }
 0x139   : > { %v2008_v7 = vadd.f32 %v2007_v16, %v2006_v5 }
 0x13a   : > { %v1275_v17 = vadd.f32 %v1968_v15, %v1210_v21  ;;  %v1337_v18 = vadd.f32 %v2005_v14, %v1272_v13 }
 0x13c   : > { %v1969_v20 = vpop.f32.mrb[28].mxu0  ;;  %v2694_v22 = vadd.f32 %v2008_v7, %v1275_v17 }
 0x13d   : > { %v1970_v23 = vpop.f32.mrb[29].mxu0  ;;  %v2009_v24 = vpop.f32.mrb[28].mxu1 }
 0x13e   : > { %v1971_v25 = vadd.f32 %v1970_v23, %v1969_v20  ;;  %v1972_v26 = vpop.f32.mrb[30].mxu0  ;;  %v2010_v27 = vpop.f32.mrb[29].mxu1 }
 0x13f   : > { %v1973_v28 = vpop.f32.mrb[31].mxu0  ;;  %v2011_v19 = vadd.f32 %v2010_v27, %v2009_v24  ;;  %v2012_v30 = vpop.f32.mrb[30].mxu1 }
 0x140   : > { %v1280_v29 = vadd.f32 %v1971_v25, %v1215_v32  ;;  %v1974_v31 = vadd.f32 %v1973_v28, %v1972_v26  ;;  %v2013_v21 = vpop.f32.mrb[31].mxu1  ;;  %v2707_v32 = vld [vmem:[%s286_s11 + $0x18] sm:$0xff]   ;;  %s2240_s11 = scalar_lea.vmem %s2745_s17, 1024 }
 0x141   : > { %v2014_v34 = vadd.f32 %v2013_v21, %v2012_v30  ;;  %v1827_v43 = vunpack.c.l.bf16 %v2707_v32  ;;  %v1828_v59 = vunpack.c.h.bf16 %v2707_v32  ;;  %p2241_p11 = scmp.ne.s32.totalorder %s2745_s17, %s2240_s11  ;;  %p2248_p1 = scmp.lt.s32.totalorder %s2246_s13, %s2240_s11 }
 0x142   : > { %v1283_v33 = vadd.f32 %v1974_v31, %v2686_v35  ;;  %v1345_v36 = vadd.f32 %v2011_v19, %v1280_v29  ;;  %v1819_v35 = vunpack.c.l.bf16 %v2705_v37 }
 0x143   : > { %p2242_p12 = pnand %p2241_p11, %p2415_p5  ;;  %p2249_p2 = por %p2248_p1, %p2247_p0 }
 0x144   : > { %v1348_v40 = vadd.f32 %v2014_v34, %v1283_v33 }
 0x145   : > { %v2045_v41 = vpop.f32.mrb[32].mxu0  ;;  %p2243_p13 = pneg %p2242_p12 }
 0x146   : > { %v1394_v44 = vadd.f32 %v2045_v41, %v1329_v57  ;;  %v2049_v45 = vpop.f32.mrb[32].mxu1  ;;  %v1385_v46 = vpop.f32.mrb[33].mxu0 }
 0x147   : > { %v1410_v53 = vadd.f32 %v2049_v45, %v1345_v36  ;;  %v1386_v54 = vadd.f32 %v1385_v46, %v2688_v50  ;;  %v1401_v56 = vpop.f32.mrb[33].mxu1  ;;  %v2046_v58 = vpop.f32.mrb[34].mxu0  ;;  %p2250_p3 = pnand %p2249_p2, %p2243_p13 }
 0x148   : > { %1418 = vst [vmem:[%s2722_s16 + $0x10] sm:$0xff] %v1394_v44  ;;  %v1433_v61 = vmul.f32 %v1785_v42, %v1394_v44  ;;  %v1402_v62 = vadd.f32 %v1401_v56, %v1337_v18  ;;  %v1397_v55 = vadd.f32 %v2046_v58, %v2692_v4  ;;  %v2050_v63 = vpop.f32.mrb[34].mxu1  ;;  %v1388_v0 = vpop.f32.mrb[35].mxu0 }
 0x149   : > { %1422 = vst [vmem:[%s2722_s16 + $0x30] sm:$0xff] %v1410_v53  ;;  %v1437_v50 = vmul.f32 %v1785_v42, %v1410_v53  ;;  %1416 = vst [vmem:[%s2722_s16] sm:$0xff] %v1386_v54  ;;  %v1431_v2 = vmul.f32 %v1785_v42, %v1386_v54  ;;  %v1413_v57 = vadd.f32 %v2050_v63, %v1348_v40  ;;  %v1404_v6 = vpop.f32.mrb[35].mxu1 }
 0x14a   : > { %v1389_v3 = vadd.f32 %v1388_v0, %v2690_v52  ;;  %v1448_v4 = vadd.f32 %v2728_v51, %v1433_v61  ;;  %1420 = vst [vmem:[%s2722_s16 + $0x20] sm:$0xff] %v1402_v62  ;;  %v1435_v8 = vmul.f32 %v1785_v42, %v1402_v62  ;;  %1419 = vst [vmem:[%s2722_s16 + $0x18] sm:$0xff] %v1397_v55 }
 0x14b   : > { %v1434_v9 = vmul.f32 %v1785_v42, %v1397_v55  ;;  %v1405_v10 = vadd.f32 %v1404_v6, %v2694_v22  ;;  %v1452_v52 = vadd.f32 %v2728_v51, %v1437_v50  ;;  %v1446_v11 = vadd.f32 %v2728_v51, %v1431_v2  ;;  %1423 = vst [vmem:[%s2722_s16 + $0x38] sm:$0xff] %v1413_v57 }
 0x14c   : > { %v1438_v12 = vmul.f32 %v1785_v42, %v1413_v57  ;;  %1417 = vst [vmem:[%s2722_s16 + $0x8] sm:$0xff] %v1389_v3  ;;  %v1432_v13 = vmul.f32 %v1785_v42, %v1389_v3  ;;  %v1472_v14 = vadd.f32 %v1819_v35, %v1448_v4  ;;  %v1450_v5 = vadd.f32 %v2728_v51, %v1435_v8 }
 0x14d   : > { %v1449_v15 = vadd.f32 %v2728_v51, %v1434_v9  ;;  %1421 = vst [vmem:[%s2722_s16 + $0x28] sm:$0xff] %v1405_v10  ;;  %v1436_v16 = vmul.f32 %v1785_v42, %v1405_v10  ;;  %v1476_v17 = vadd.f32 %v1827_v43, %v1452_v52  ;;  %v1470_v7 = vadd.f32 %v1815_v47, %v1446_v11 }
 0x14e   : > { %v1453_v18 = vadd.f32 %v2728_v51, %v1438_v12  ;;  %v1447_v20 = vadd.f32 %v2728_v51, %v1432_v13 }
 0x14f   : > { %2253 = shalt.err (!%p2250_p3)
}
 0x150   : > { %s2254_s14 = scalar_lea.hbm %s2743_s29, 1024  ;;  %s2258_s20 = scalar_lea.hbm %s2851_s5, 2048 }
 0x151   : > { %p2255_p4 = scmp.ne.s32.totalorder %s2743_s29, %s2254_s14  ;;  %p2259_p9 = scmp.lt.u32.totalorder %s2743_s29, %s2851_s5 }
 0x152   : > { %p2260_p10 = scmp.lt.u32.totalorder %s2258_s20, %s2254_s14  ;;  %p2262_p12 = scmp.lt.u32.totalorder %s2254_s14, %s2743_s29 }
 0x153   : > { %p2256_p7 = pnand %p2255_p4, %p2415_p5 }
 0x154   : > { %p2261_p11 = por %p2260_p10, %p2259_p9 }
 0x155   : > { %p2257_p8 = pneg %p2256_p7 }
 0x156   : > { %p2263_p13 = por %p2262_p12, %p2261_p11 }
 0x158   : > { %p2264_p0 = pnand %p2263_p13, %p2257_p8 }
 0x15a   : > { %2267 = shalt.err (!%p2264_p0)
}
 0x15b   : > { %s2337_s11 = smov 128   ;;  %s2338_s9 = smov 8   ;;  %v1474_v22 = vadd.f32 %v1823_v48, %v1450_v5  ;;  %v1473_v23 = vadd.f32 %v1820_v49, %v1449_v15  ;;  %v1451_v24 = vadd.f32 %v2728_v51, %v1436_v16  ;;  %v1477_v25 = vadd.f32 %v1828_v59, %v1453_v18 }
 0x15c   : > { %2068 = dma.vmem_to_hbm [thread:$0]  (%p2415_p5), %s2745_s17, 1024, %s2743_s29, %s1527_s10, %s2337_s11, %s2337_s11, %s2338_s9   ;;  %v1471_v26 = vadd.f32 %v1816_v60, %v1447_v20  ;;  %v1480_v27 = vmax.f32 %v1472_v14, 0.0  ;;  %v1484_v19 = vmax.f32 %v1476_v17, 0.0  ;;  %v1478_v30 = vmax.f32 %v1470_v7, 0.0 }
 0x15d   : > { %v1481_v28 = vmax.f32 %v1473_v23, 0.0  ;;  %v1475_v29 = vadd.f32 %v1824_v1, %v1451_v24  ;;  %s1812_s17 = sshll.u32 %s2398_s25, 9  ;;  %s274_s29 = scalar_lea.vmem [#allocation4], %s1672_s18  ;;  %v1485_v31 = vmax.f32 %v1477_v25, 0.0  ;;  %v1482_v33 = vmax.f32 %v1474_v22, 0.0 }
 0x15e   : > { %s1561_s10 = sshll.u32 %s274_s29, 4  ;;  %v1479_v21 = vmax.f32 %v1471_v26, 0.0  ;;  %s2801_s14 = scalar_lea.hbm %s2852_s6, %s1812_s17  ;;  %s2803_s10 = int_to_ptr.vmem [resolvable:$true] %s1561_s10 }
 0x15f   : > { %v1837_v34 = vpack.c.bf16 %v1481_v28, %v1480_v27  ;;  %v1483_v36 = vmax.f32 %v1475_v29, 0.0  ;;  %v1847_v37 = vpack.c.bf16 %v1485_v31, %v1484_v19  ;;  %s1532_s25 = scalar_lea.sflag [#allocation5], %s2698_s28  ;;  %s2268_s18 = scalar_lea.vmem %s2803_s10, 512 }
 0x160   : > { %v1832_v32 = vpack.c.bf16 %v1479_v21, %v1478_v30  ;;  %p2269_p1 = scmp.ne.s32.totalorder %s2803_s10, %s2268_s18  ;;  %s2339_s16 = smov [#allocation4]  }
 0x161   : > { %1852 = vst [vmem:[%s274_s29 + $0x8] sm:$0xff] %v1837_v34   ;;  %v1842_v38 = vpack.c.bf16 %v1483_v36, %v1482_v33  ;;  %1854 = vst [vmem:[%s274_s29 + $0x18] sm:$0xff] %v1847_v37   ;;  %s2272_s19 = sshll.u32 %s2339_s16, 4  ;;  %s2273_s19 = int_to_ptr.vmem [resolvable:$false] %s2272_s19 }
 0x162   : > { %1833 = vst [vmem:[%s274_s29] sm:$0xff] %v1832_v32   ;;  %p2270_p2 = pnand %p2269_p1, %p2415_p5  ;;  %s2274_s20 = scalar_lea.vmem %s2273_s19, 1024 }
 0x163   : > { %1853 = vst [vmem:[%s274_s29 + $0x10] sm:$0xff] %v1842_v38   ;;  %p2275_p4 = scmp.lt.s32.totalorder %s2803_s10, %s2273_s19  ;;  %p2276_p7 = scmp.lt.s32.totalorder %s2274_s20, %s2268_s18 }
 0x164   : > { %p2271_p3 = pneg %p2270_p2 }
 0x165   : > { %p2277_p8 = por %p2276_p7, %p2275_p4 }
 0x167   : > { %p2278_p9 = pnand %p2277_p8, %p2271_p3 }
 0x169   : > { %2281 = shalt.err (!%p2278_p9)
}
 0x16a   : > { %s2282_s26 = scalar_lea.hbm %s2801_s14, 512  ;;  %s2286_s9 = scalar_lea.hbm %s2852_s6, 1024 }
 0x16b   : > { %p2283_p10 = scmp.ne.s32.totalorder %s2801_s14, %s2282_s26  ;;  %p2287_p13 = scmp.lt.u32.totalorder %s2801_s14, %s2852_s6 }
 0x16c   : > { %p2288_p0 = scmp.lt.u32.totalorder %s2286_s9, %s2282_s26  ;;  %p2290_p2 = scmp.lt.u32.totalorder %s2282_s26, %s2801_s14 }
 0x16d   : > { %p2284_p11 = pnand %p2283_p10, %p2415_p5 }
 0x16e   : > { %p2289_p1 = por %p2288_p0, %p2287_p13 }
 0x16f   : > { %p2285_p12 = pneg %p2284_p11 }
 0x170   : > { %p2291_p3 = por %p2290_p2, %p2289_p1 }
 0x172   : > { %p2292_p4 = pnand %p2291_p3, %p2285_p12 }
 0x174   : > { %2295 = shalt.err (!%p2292_p4)
}
 0x175   : > { %s2340_s12 = smov 64   ;;  %s2341_s13 = smov 4  }
 0x176   : > { %2069 = dma.vmem_to_hbm [thread:$0]  (%p2415_p5), %s2803_s10, 512, %s2801_s14, %s1532_s25, %s2340_s12, %s2340_s12, %s2341_s13  }
 0x177 PF: > { %p2079_p7 = scmp.ge.s32.totalorder %s2334_s24, 2  ;;  %s1576_s18 = sand.u32 1, %s2322_s21  }
 0x178   : > { %s1577_s16 = scalar_lea.sflag [#allocation3], %s1576_s18 }
 0x179   : > { %p2073_p8 = pnand %p2079_p7, %p2419_p6 }
 0x17b   : > { %2313 = dma.done.wait (!%p2073_p8), %s1577_s16, 1024  }
 0x17c   : > { %2315 = vsyncadd (!%p2073_p8), %s1577_s16, 4294966272  ;;  %s1586_s19 = scalar_lea.sflag [#allocation5], %s1576_s18 }
 0x17d   : > { %2317 = dma.done.wait (!%p2073_p8), %s1586_s19, 512  }
 0x17e   : > { %2319 = vsyncadd (!%p2073_p8), %s1586_s19, 4294966784  ;;  %p20_p5 = scmp.ge.s32.totalorder %s2402_s27, 4   ;;  %s2855_s21 = smov %s2326_s22 }
 0x17f   : > { %s2856_s22 = smov %s2330_s23  ;;  %s2857_s23 = smov %s2413_s30 }
 0x180   : > { %s2858_s24 = smov %s2402_s27  ;;  %22 = sbr.rel (!%p20_p5) target bundleno = 5 (0x5), region = 95 }
 0x187   :  { %1591 = vsyncpa [#allocation3], 1 }
 0x188   :  { %1593 = vsyncpa [#allocation3 + $0x1], 1 }
 0x189   :  { %1594 = vsyncpa [#allocation5], 1 }
 0x18a   :  { %1596 = vsyncpa [#allocation5 + $0x1], 1 }

// kernel: teacher_forward.17
= control target key start
LH: loop header
LB: loop body
LE: loop exit
PB: predicated region body
PF: predicated region fallthrough
CT: control target
= control target key end

     0   :  { %s2113_s18 = smov 0   ;;  %s2412_s0 = inlined_call_operand.vmem [shape: bf16[128,1152], index: 0, kind: input, shape index: {}]   ;;  %s2413_s1 = inlined_call_operand.vmem [shape: bf16[1152,128], index: 1, kind: input, shape index: {}]   ;;  %s2414_s2 = inlined_call_operand.vmem [shape: f32[1,128], index: 2, kind: input, shape index: {}]   ;;  %s2415_s3 = inlined_call_operand.vmem [shape: f32[1,128], index: 3, kind: input, shape index: {}]   ;;  %s2416_s4 = inlined_call_operand.vmem [shape: bf16[128,128], index: 4, kind: input, shape index: {}]   ;;  %s2417_s5 = inlined_call_operand.vmem [shape: bf16[128,128], index: 5, kind: output, shape index: {}]  }
   0x1 LB: > { %s1549_s19 = sadd.s32 4294967295, %s2081_s18   ;;  %p1553_p0 = scmp.ge.s32.totalorder %s2081_s18, 1  ;;  %s2081_s18 = sphi %s2113_s18, %s15_s18  }
   0x2   : > { %p200_p1 = scmp.lt.s32.totalorder %s2081_s18, 3 }
   0x4   : > { %p201_p2 = pnand %p1553_p0, %p200_p1 }
   0x5   : > { %v1951_v0 = vld [vmem:[%s2413_s1 + $0x40] sm:$0xff] (!%p201_p2)   ;;  %v1955_v4 = vld [vmem:[%s2413_s1 + $0x48] sm:$0xff] (!%p201_p2)   ;;  %v1959_v8 = vld [vmem:[%s2413_s1 + $0x50] sm:$0xff] (!%p201_p2)   ;;  %s1554_s27 = sshll.u32 (!%p201_p2), %s1549_s19, 3 }
   0x6   : > { %204 = sbr.rel (%p201_p2) target bundleno = 333 (0x14d), region = 40  ;;  %v1952_v1 = vld [vmem:[%s2413_s1 + $0xc0] sm:$0xff] (!%p201_p2)   ;;  %1730 = vmatprep.subr.bf16.mxu0 (!%p201_p2), %v1951_v0  ;;  %v1956_v5 = vld [vmem:[%s2413_s1 + $0xc8] sm:$0xff] (!%p201_p2)   ;;  %v1960_v9 = vld [vmem:[%s2413_s1 + $0xd0] sm:$0xff] (!%p201_p2)   ;;  %p235_p3 = scmp.lt.s32.totalorder (!%p201_p2), %s1554_s27, 15 }
   0x7   : > { %v1953_v2 = vld [vmem:[%s2413_s1] sm:$0xff] (!%p201_p2)   ;;  %1770 = vmatprep.subr.bf16.mxu1 (!%p201_p2), %v1952_v1  ;;  %v1957_v6 = vld [vmem:[%s2413_s1 + $0x8] sm:$0xff] (!%p201_p2)   ;;  %v1961_v10 = vld [vmem:[%s2413_s1 + $0x10] sm:$0xff] (!%p201_p2)  }
   0x8   : > { %v1954_v3 = vld [vmem:[%s2413_s1 + $0x80] sm:$0xff] (!%p201_p2)   ;;  %1731 = vmatpush3.bf16.msra.mxu0 (!%p201_p2), %v1953_v2  ;;  %v1958_v7 = vld [vmem:[%s2413_s1 + $0x88] sm:$0xff] (!%p201_p2)   ;;  %v1962_v11 = vld [vmem:[%s2413_s1 + $0x90] sm:$0xff] (!%p201_p2)  }
   0x9   : > { %1771 = vmatpush3.bf16.msra.mxu1 (!%p201_p2), %v1954_v3  ;;  %1732 = vmatprep.subr.bf16.mxu0 (!%p201_p2), %v1955_v4  ;;  %v1963_v12 = vld [vmem:[%s2413_s1 + $0x58] sm:$0xff] (!%p201_p2)   ;;  %v1967_v16 = vld [vmem:[%s2413_s1 + $0x60] sm:$0xff] (!%p201_p2)   ;;  %v1971_v20 = vld [vmem:[%s2413_s1 + $0x68] sm:$0xff] (!%p201_p2)  }
   0xa   : > { %1772 = vmatprep.subr.bf16.mxu1 (!%p201_p2), %v1956_v5  ;;  %v1964_v13 = vld [vmem:[%s2413_s1 + $0xd8] sm:$0xff] (!%p201_p2)   ;;  %v1968_v17 = vld [vmem:[%s2413_s1 + $0xe0] sm:$0xff] (!%p201_p2)   ;;  %v1972_v21 = vld [vmem:[%s2413_s1 + $0xe8] sm:$0xff] (!%p201_p2)  }
   0xb   : > { %v1965_v14 = vld [vmem:[%s2413_s1 + $0x18] sm:$0xff] (!%p201_p2)   ;;  %v1969_v18 = vld [vmem:[%s2413_s1 + $0x20] sm:$0xff] (!%p201_p2)   ;;  %v1973_v22 = vld [vmem:[%s2413_s1 + $0x28] sm:$0xff] (!%p201_p2)  }
   0xc   : > { %1733 = vmatpush3.bf16.msra.mxu0 (!%p201_p2), %v1957_v6  ;;  %v1966_v15 = vld [vmem:[%s2413_s1 + $0x98] sm:$0xff] (!%p201_p2)   ;;  %v1970_v19 = vld [vmem:[%s2413_s1 + $0xa0] sm:$0xff] (!%p201_p2)   ;;  %v1974_v23 = vld [vmem:[%s2413_s1 + $0xa8] sm:$0xff] (!%p201_p2)  }
   0xd   : > { %1773 = vmatpush3.bf16.msra.mxu1 %v1958_v7  ;;  %1734 = vmatprep.subr.bf16.mxu0 %v1959_v8  ;;  %s2419_s27 = smov (!%p235_p3, %s1554_s27), 15  ;;  %v1975_v24 = vld [vmem:[%s2413_s1 + $0x70] sm:$0xff]   ;;  %v1979_v28 = vld [vmem:[%s2413_s1 + $0x78] sm:$0xff]   ;;  %v1989_v36 = vld [vmem:[%s2413_s1 + $0x140] sm:$0xff]  }
   0xe   : > { %1774 = vmatprep.subr.bf16.mxu1 %v1960_v9  ;;  %v1976_v25 = vld [vmem:[%s2413_s1 + $0xf0] sm:$0xff]   ;;  %s1942_s26 = smul.u32 36, %s2419_s27  ;;  %v1980_v29 = vld [vmem:[%s2413_s1 + $0xf8] sm:$0xff]   ;;  %v1990_v37 = vld [vmem:[%s2413_s1 + $0x1c0] sm:$0xff]  }
   0xf   : > { %v1977_v26 = vld [vmem:[%s2413_s1 + $0x30] sm:$0xff]   ;;  %v1981_v30 = vld [vmem:[%s2413_s1 + $0x38] sm:$0xff]   ;;  %v1991_v38 = vld [vmem:[%s2413_s1 + $0x100] sm:$0xff]  }
  0x10   : > { %1735 = vmatpush3.bf16.msra.mxu0 %v1961_v10  ;;  %v1978_v27 = vld [vmem:[%s2413_s1 + $0xb0] sm:$0xff]   ;;  %s2219_s12 = scalar_lea.vmem %s2412_s0, %s1942_s26  ;;  %v1982_v31 = vld [vmem:[%s2413_s1 + $0xb8] sm:$0xff]   ;;  %v1992_v39 = vld [vmem:[%s2413_s1 + $0x180] sm:$0xff]  }
  0x11   : > { %1775 = vmatpush3.bf16.msra.mxu1 %v1962_v11  ;;  %1736 = vmatprep.subr.bf16.mxu0 %v1963_v12  ;;  %v1983_v32 = vld [vmem:[%s2219_s12] ss:$36 sps:$4 sm:$0xff]   ;;  %v1986_v34 = vld [vmem:[%s2219_s12 + $0x8] ss:$36 sps:$4 sm:$0xff]   ;;  %v1999_v45 = vld [vmem:[%s2219_s12 + $0x54] ss:$36 sps:$4 sm:$0xff]  }
  0x12   : > { %1776 = vmatprep.subr.bf16.mxu1 %v1964_v13  ;;  %v1985_v33 = vld [vmem:[%s2219_s12 + $0x4] ss:$36 sps:$4 sm:$0xff]   ;;  %v1988_v35 = vld [vmem:[%s2219_s12 + $0xc] ss:$36 sps:$4 sm:$0xff]   ;;  %v2007_v52 = vld [vmem:[%s2413_s1 + $0x158] sm:$0xff]  }
  0x13   : > { %1086 = vmatprep.mubr.bf16.mxu0 %v1985_v33  ;;  %1151 = vmatprep.mubr.bf16.mxu1 %v1988_v35  ;;  %v1993_v40 = vld [vmem:[%s2413_s1 + $0x148] sm:$0xff]   ;;  %v2002_v47 = vld [vmem:[%s2219_s12 + $0x50] ss:$36 sps:$4 sm:$0xff]   ;;  %v2008_v53 = vld [vmem:[%s2413_s1 + $0x1d8] sm:$0xff]  }
  0x14   : > { %1737 = vmatpush3.bf16.msra.mxu0 %v1965_v14  ;;  %v1994_v41 = vld [vmem:[%s2413_s1 + $0x1c8] sm:$0xff]   ;;  %v2003_v48 = vld [vmem:[%s2413_s1 + $0x150] sm:$0xff]   ;;  %v2009_v54 = vld [vmem:[%s2413_s1 + $0x118] sm:$0xff]  }
  0x15   : > { %1777 = vmatpush3.bf16.msra.mxu1 %v1966_v15  ;;  %1738 = vmatprep.subr.bf16.mxu0 %v1967_v16  ;;  %v1995_v42 = vld [vmem:[%s2413_s1 + $0x108] sm:$0xff]   ;;  %v2004_v49 = vld [vmem:[%s2413_s1 + $0x1d0] sm:$0xff]   ;;  %v2010_v55 = vld [vmem:[%s2413_s1 + $0x198] sm:$0xff]  }
  0x16   : > { %1778 = vmatprep.subr.bf16.mxu1 %v1968_v17  ;;  %v1996_v43 = vld [vmem:[%s2413_s1 + $0x188] sm:$0xff]   ;;  %v2005_v50 = vld [vmem:[%s2413_s1 + $0x110] sm:$0xff]   ;;  %v2013_v57 = vld [vmem:[%s2219_s12 + $0x9c] ss:$36 sps:$4 sm:$0xff]  }
  0x17   : > { %v1997_v44 = vld [vmem:[%s2219_s12 + $0x4c] ss:$36 sps:$4 sm:$0xff]   ;;  %v2011_v56 = vld [vmem:[%s2219_s12 + $0x94] ss:$36 sps:$4 sm:$0xff]   ;;  %v2017_v60 = vld [vmem:[%s2413_s1 + $0x160] sm:$0xff]  }
  0x18   : > { %1739 = vmatpush3.bf16.msra.mxu0 %v1969_v18  ;;  %v2001_v46 = vld [vmem:[%s2219_s12 + $0x48] ss:$36 sps:$4 sm:$0xff]   ;;  %v2006_v51 = vld [vmem:[%s2413_s1 + $0x190] sm:$0xff]   ;;  %v2016_v59 = vld [vmem:[%s2219_s12 + $0x98] ss:$36 sps:$4 sm:$0xff]  }
  0x19   : > { %1779 = vmatpush3.bf16.msra.mxu1 %v1970_v19  ;;  %1740 = vmatprep.subr.bf16.mxu0 %v1971_v20  ;;  %v2015_v58 = vld [vmem:[%s2219_s12 + $0x90] ss:$36 sps:$4 sm:$0xff]   ;;  %v2018_v61 = vld [vmem:[%s2413_s1 + $0x1e0] sm:$0xff]   ;;  %v2021_v0 = vld [vmem:[%s2413_s1 + $0x168] sm:$0xff]  }
  0x1a   : > { %1780 = vmatprep.subr.bf16.mxu1 %v1972_v21  ;;  %v2019_v62 = vld [vmem:[%s2413_s1 + $0x120] sm:$0xff]   ;;  %v2022_v1 = vld [vmem:[%s2413_s1 + $0x1e8] sm:$0xff]   ;;  %v2029_v6 = vld [vmem:[%s2219_s12 + $0xd8] ss:$36 sps:$4 sm:$0xff]  }
  0x1b   : > { %v2020_v63 = vld [vmem:[%s2413_s1 + $0x1a0] sm:$0xff]   ;;  %v2023_v2 = vld [vmem:[%s2413_s1 + $0x128] sm:$0xff]   ;;  %v2031_v8 = vld [vmem:[%s2413_s1 + $0x170] sm:$0xff]  }
  0x1c   : > { %1741 = vmatpush3.bf16.msra.mxu0 %v1973_v22  ;;  %v2024_v3 = vld [vmem:[%s2413_s1 + $0x1a8] sm:$0xff]   ;;  %v2025_v4 = vld [vmem:[%s2219_s12 + $0xdc] ss:$36 sps:$4 sm:$0xff]   ;;  %v2032_v9 = vld [vmem:[%s2413_s1 + $0x1f0] sm:$0xff]  }
  0x1d   : > { %1781 = vmatpush3.bf16.msra.mxu1 %v1974_v23  ;;  %1742 = vmatprep.subr.bf16.mxu0 %v1975_v24  ;;  %v2027_v5 = vld [vmem:[%s2219_s12 + $0xe4] ss:$36 sps:$4 sm:$0xff]   ;;  %v2033_v10 = vld [vmem:[%s2413_s1 + $0x130] sm:$0xff]   ;;  %v2035_v12 = vld [vmem:[%s2413_s1 + $0x178] sm:$0xff]  }
  0x1e   : > { %1782 = vmatprep.subr.bf16.mxu1 %v1976_v25  ;;  %v2030_v7 = vld [vmem:[%s2219_s12 + $0xe0] ss:$36 sps:$4 sm:$0xff]   ;;  %v2034_v11 = vld [vmem:[%s2413_s1 + $0x1b0] sm:$0xff]   ;;  %v2036_v13 = vld [vmem:[%s2413_s1 + $0x1f8] sm:$0xff]  }
  0x1f   : > { %v2037_v14 = vld [vmem:[%s2413_s1 + $0x138] sm:$0xff]   ;;  %v2039_v16 = vld [vmem:[%s2219_s12 + $0x10] ss:$36 sps:$4 sm:$0xff]   ;;  %v2045_v20 = vld [vmem:[%s2413_s1 + $0x200] sm:$0xff]  }
  0x20   : > { %1743 = vmatpush3.bf16.msra.mxu0 %v1977_v26  ;;  %v2038_v15 = vld [vmem:[%s2413_s1 + $0x1b8] sm:$0xff]   ;;  %v2046_v21 = vld [vmem:[%s2413_s1 + $0x208] sm:$0xff]   ;;  %v2052_v25 = vld [vmem:[%s2219_s12 + $0x60] ss:$36 sps:$4 sm:$0xff]  }
  0x21   : > { %1783 = vmatpush3.bf16.msra.mxu1 %v1978_v27  ;;  %1744 = vmatprep.subr.bf16.mxu0 %v1979_v28  ;;  %v2041_v17 = vld [vmem:[%s2219_s12 + $0x14] ss:$36 sps:$4 sm:$0xff]   ;;  %v2044_v19 = vld [vmem:[%s2219_s12 + $0x1c] ss:$36 sps:$4 sm:$0xff]   ;;  %v2049_v23 = vld [vmem:[%s2219_s12 + $0x64] ss:$36 sps:$4 sm:$0xff]  }
  0x22   : > { %1784 = vmatprep.subr.bf16.mxu1 %v1980_v29  ;;  %v2042_v18 = vld [vmem:[%s2219_s12 + $0x18] ss:$36 sps:$4 sm:$0xff]   ;;  %v2053_v26 = vld [vmem:[%s2413_s1 + $0x210] sm:$0xff]   ;;  %v2055_v27 = vld [vmem:[%s2219_s12 + $0xa4] ss:$36 sps:$4 sm:$0xff]  }
  0x23   : > { %v2047_v22 = vld [vmem:[%s2219_s12 + $0x5c] ss:$36 sps:$4 sm:$0xff]   ;;  %v2057_v28 = vld [vmem:[%s2219_s12 + $0xac] ss:$36 sps:$4 sm:$0xff]  }
  0x24   : > { %1745 = vmatpush3.bf16.msra.mxu0 %v1981_v30  ;;  %v2051_v24 = vld [vmem:[%s2219_s12 + $0x58] ss:$36 sps:$4 sm:$0xff]   ;;  %v2059_v30 = vld [vmem:[%s2219_s12 + $0xa0] ss:$36 sps:$4 sm:$0xff]   ;;  %v2063_v33 = vld [vmem:[%s2219_s12 + $0xec] ss:$36 sps:$4 sm:$0xff]  }
  0x25   : > { %1785 = vmatpush3.bf16.msra.mxu1 %v1982_v31  ;;  %1810 = vmatprep.subr.bf16.mxu0 %v1989_v36  ;;  %v2054_v29 = vld [vmem:[%s2413_s1 + $0x218] sm:$0xff]   ;;  %v2060_v31 = vld [vmem:[%s2219_s12 + $0xa8] ss:$36 sps:$4 sm:$0xff]  }
  0x26   : > { %1850 = vmatprep.subr.bf16.mxu1 %v1990_v37  ;;  %v2062_v35 = vld [vmem:[%s2413_s1 + $0x228] sm:$0xff]   ;;  %v2069_v37 = vld [vmem:[%s2413_s1 + $0x230] sm:$0xff]  }
  0x27   : > { %1087 = vmatmul.mubr.bf16.vlgmr.msra.gmra.mrb[0].mxu0 %v1983_v32  ;;  %v2061_v32 = vld [vmem:[%s2413_s1 + $0x220] sm:$0xff]   ;;  %v2067_v36 = vld [vmem:[%s2219_s12 + $0xe8] ss:$36 sps:$4 sm:$0xff]  }
  0x28   : > { %1152 = vmatmul.mubr.bf16.vlgmr.msra.gmra.mrb[0].mxu1 %v1986_v34  ;;  %1811 = vmatpush3.bf16.msra.mxu0 %v1991_v38  ;;  %v2065_v34 = vld [vmem:[%s2219_s12 + $0xf4] ss:$36 sps:$4 sm:$0xff]  }
  0x29   : > { %1851 = vmatpush3.bf16.msra.mxu1 %v1992_v39  ;;  %1812 = vmatprep.subr.bf16.mxu0 %v1993_v40  ;;  %v2068_v38 = vld [vmem:[%s2219_s12 + $0xf0] ss:$36 sps:$4 sm:$0xff]   ;;  %v2071_v39 = vld [vmem:[%s2219_s12 + $0x20] ss:$36 sps:$4 sm:$0xff]  }
  0x2a   : > { %1852 = vmatprep.subr.bf16.mxu1 %v1994_v41  ;;  %1094 = vmatprep.mubr.bf16.mxu0 %v1997_v44  ;;  %v2072_v40 = vld [vmem:[%s2219_s12 + $0xb0] ss:$36 sps:$4 sm:$0xff]   ;;  %v2070_v41 = vld [vmem:[%s2413_s1 + $0x238] sm:$0xff]  }
  0x2b   : > { %1159 = vmatprep.mubr.bf16.mxu1 %v1999_v45 }
  0x2c   : > { %1813 = vmatpush3.bf16.msra.mxu0 %v1995_v42  ;;  %v2073_v42 = vld [vmem:[%s2219_s12 + $0x68] ss:$36 sps:$4 sm:$0xff]  }
  0x2d   : > { %1853 = vmatpush3.bf16.msra.mxu1 %v1996_v43  ;;  %1814 = vmatprep.subr.bf16.mxu0 %v2003_v48  ;;  %v2074_v43 = vld [vmem:[%s2219_s12 + $0xf8] ss:$36 sps:$4 sm:$0xff]   ;;  %s1557_s12 = sshll.u32 %s2419_s27, 2 }
  0x2e   : > { %1854 = vmatprep.subr.bf16.mxu1 %v2004_v49  ;;  %s245_s19 = scalar_lea.vmem %s2416_s4, %s1557_s12  ;;  %s251_s20 = scalar_lea.vmem %s2417_s5, %s1557_s12 }
  0x2f   : > { %1095 = vmatmul.mubr.bf16.gmra.mrb[4].mxu0 %v2001_v46 }
  0x30   : > { %1160 = vmatmul.mubr.bf16.gmra.mrb[4].mxu1 %v2002_v47  ;;  %1815 = vmatpush3.bf16.msra.mxu0 %v2005_v50 }
  0x31   : > { %1855 = vmatpush3.bf16.msra.mxu1 %v2006_v51  ;;  %1816 = vmatprep.subr.bf16.mxu0 %v2007_v52 }
  0x32   : > { %1856 = vmatprep.subr.bf16.mxu1 %v2008_v53  ;;  %1102 = vmatprep.mubr.bf16.mxu0 %v2011_v56 }
  0x33   : > { %1167 = vmatprep.mubr.bf16.mxu1 %v2013_v57 }
  0x34   : > { %1817 = vmatpush3.bf16.msra.mxu0 %v2009_v54 }
  0x35   : > { %1857 = vmatpush3.bf16.msra.mxu1 %v2010_v55  ;;  %1818 = vmatprep.subr.bf16.mxu0 %v2017_v60 }
  0x36   : > { %1858 = vmatprep.subr.bf16.mxu1 %v2018_v61 }
  0x37   : > { %1103 = vmatmul.mubr.bf16.gmra.mrb[8].mxu0 %v2015_v58 }
  0x38   : > { %1168 = vmatmul.mubr.bf16.gmra.mrb[8].mxu1 %v2016_v59  ;;  %1819 = vmatpush3.bf16.msra.mxu0 %v2019_v62 }
  0x39   : > { %1859 = vmatpush3.bf16.msra.mxu1 %v2020_v63  ;;  %1820 = vmatprep.subr.bf16.mxu0 %v2021_v0 }
  0x3a   : > { %1860 = vmatprep.subr.bf16.mxu1 %v2022_v1  ;;  %1110 = vmatprep.mubr.bf16.mxu0 %v2025_v4 }
  0x3b   : > { %1175 = vmatprep.mubr.bf16.mxu1 %v2027_v5 }
  0x3c   : > { %1821 = vmatpush3.bf16.msra.mxu0 %v2023_v2 }
  0x3d   : > { %1861 = vmatpush3.bf16.msra.mxu1 %v2024_v3  ;;  %1822 = vmatprep.subr.bf16.mxu0 %v2031_v8 }
  0x3e   : > { %1862 = vmatprep.subr.bf16.mxu1 %v2032_v9 }
  0x3f   : > { %1111 = vmatmul.mubr.bf16.gmra.mrb[12].mxu0 %v2029_v6 }
  0x40   : > { %1176 = vmatmul.mubr.bf16.gmra.mrb[12].mxu1 %v2030_v7  ;;  %1823 = vmatpush3.bf16.msra.mxu0 %v2033_v10 }
  0x41   : > { %1863 = vmatpush3.bf16.msra.mxu1 %v2034_v11  ;;  %1824 = vmatprep.subr.bf16.mxu0 %v2035_v12 }
  0x42   : > { %1864 = vmatprep.subr.bf16.mxu1 %v2036_v13  ;;  %1216 = vmatprep.mubr.bf16.mxu0 %v2041_v17 }
  0x43   : > { %1281 = vmatprep.mubr.bf16.mxu1 %v2044_v19 }
  0x44   : > { %1825 = vmatpush3.bf16.msra.mxu0 %v2037_v14 }
  0x45   : > { %1865 = vmatpush3.bf16.msra.mxu1 %v2038_v15  ;;  %1902 = vmatprep.subr.bf16.mxu0 %v2045_v20 }
  0x46   : > { %1926 = vmatprep.subr.bf16.mxu1 %v2045_v20 }
  0x47   : > { %1217 = vmatmul.mubr.bf16.vlgmr.msra.gmra.mrb[16].mxu0 %v2039_v16 }
  0x48   : > { %1282 = vmatmul.mubr.bf16.vlgmr.msra.gmra.mrb[16].mxu1 %v2042_v18  ;;  %1903 = vmatpush3.bf16.msra.mxu0 %v2045_v20 }
  0x49   : > { %1934 = vmatpush3.bf16.msra.mxu1 %v2045_v20  ;;  %1904 = vmatprep.subr.bf16.mxu0 %v2046_v21 }
  0x4a   : > { %1927 = vmatprep.subr.bf16.mxu1 %v2046_v21  ;;  %1224 = vmatprep.mubr.bf16.mxu0 %v2047_v22 }
  0x4b   : > { %1289 = vmatprep.mubr.bf16.mxu1 %v2049_v23 }
  0x4c   : > { %1905 = vmatpush3.bf16.msra.mxu0 %v2046_v21 }
  0x4d   : > { %1935 = vmatpush3.bf16.msra.mxu1 %v2046_v21  ;;  %1906 = vmatprep.subr.bf16.mxu0 %v2053_v26 }
  0x4e   : > { %1928 = vmatprep.subr.bf16.mxu1 %v2053_v26 }
  0x4f   : > { %1225 = vmatmul.mubr.bf16.gmra.mrb[20].mxu0 %v2051_v24 }
  0x50   : > { %1290 = vmatmul.mubr.bf16.gmra.mrb[20].mxu1 %v2052_v25  ;;  %1232 = vmatprep.mubr.bf16.mxu0 %v2055_v27 }
  0x51   : > { %1907 = vmatpush3.bf16.msra.mxu0 %v2053_v26  ;;  %1297 = vmatprep.mubr.bf16.mxu1 %v2057_v28 }
  0x52   : > { %1936 = vmatpush3.bf16.msra.mxu1 %v2053_v26  ;;  %1908 = vmatprep.subr.bf16.mxu0 %v2054_v29 }
  0x53   : > { %1929 = vmatprep.subr.bf16.mxu1 %v2054_v29 }
  0x55   : > { %1909 = vmatpush3.bf16.msra.mxu0 %v2054_v29 }
  0x56   : > { %1937 = vmatpush3.bf16.msra.mxu1 %v2054_v29  ;;  %1910 = vmatprep.subr.bf16.mxu0 %v2061_v32 }
  0x57   : > { %1233 = vmatmul.mubr.bf16.gmra.mrb[24].mxu0 %v2059_v30  ;;  %1930 = vmatprep.subr.bf16.mxu1 %v2061_v32 }
  0x58   : > { %1298 = vmatmul.mubr.bf16.gmra.mrb[24].mxu1 %v2060_v31  ;;  %1240 = vmatprep.mubr.bf16.mxu0 %v2063_v33 }
  0x59   : > { %1911 = vmatpush3.bf16.msra.mxu0 %v2061_v32  ;;  %1305 = vmatprep.mubr.bf16.mxu1 %v2065_v34 }
  0x5a   : > { %1938 = vmatpush3.bf16.msra.mxu1 %v2061_v32  ;;  %1912 = vmatprep.subr.bf16.mxu0 %v2062_v35 }
  0x5b   : > { %1931 = vmatprep.subr.bf16.mxu1 %v2062_v35 }
  0x5d   : > { %1913 = vmatpush3.bf16.msra.mxu0 %v2062_v35 }
  0x5e   : > { %1939 = vmatpush3.bf16.msra.mxu1 %v2062_v35  ;;  %1914 = vmatprep.subr.bf16.mxu0 %v2069_v37 }
  0x5f   : > { %1241 = vmatmul.mubr.bf16.gmra.mrb[28].mxu0 %v2067_v36  ;;  %1932 = vmatprep.subr.bf16.mxu1 %v2069_v37 }
  0x60   : > { %1306 = vmatmul.mubr.bf16.gmra.mrb[28].mxu1 %v2068_v38  ;;  %1918 = vmatprep.mubr.bf16.mxu0 %v2071_v39 }
  0x61   : > { %1915 = vmatpush3.bf16.msra.mxu0 %v2069_v37  ;;  %1922 = vmatprep.mubr.bf16.mxu1 %v2072_v40 }
  0x62   : > { %1940 = vmatpush3.bf16.msra.mxu1 %v2069_v37  ;;  %1916 = vmatprep.subr.bf16.mxu0 %v2070_v41 }
  0x63   : > { %1933 = vmatprep.subr.bf16.mxu1 %v2070_v41 }
  0x65   : > { %1917 = vmatpush3.bf16.msra.mxu0 %v2070_v41 }
  0x66   : > { %1941 = vmatpush3.bf16.msra.mxu1 %v2070_v41 }
  0x68   : > { %1919 = vmatmul.mubr.bf16.vlgmr.msra.gmra.mrb[32].mxu0 %v2073_v42 }
  0x69   : > { %1923 = vmatmul.mubr.bf16.vlgmr.msra.gmra.mrb[32].mxu1 %v2074_v43 }
  0xfa   : > { %v1746_v44 = vpop.f32.mrb[0].mxu0 }
  0xfb   : > { %v1786_v45 = vpop.f32.mrb[0].mxu1  ;;  %v1747_v46 = vpop.f32.mrb[1].mxu0 }
  0xfc   : > { %v1748_v47 = vadd.f32 %v1747_v46, %v1746_v44  ;;  %v1787_v48 = vpop.f32.mrb[1].mxu1  ;;  %v1749_v49 = vpop.f32.mrb[2].mxu0 }
  0xfd   : > { %v1788_v50 = vadd.f32 %v1787_v48, %v1786_v45  ;;  %v1789_v51 = vpop.f32.mrb[2].mxu1  ;;  %v1750_v52 = vpop.f32.mrb[3].mxu0 }
  0xfe   : > { %v1751_v53 = vadd.f32 %v1750_v52, %v1749_v49  ;;  %v1790_v54 = vpop.f32.mrb[3].mxu1 }
  0xff   : > { %v1154_v55 = vadd.f32 %v1788_v50, %v1748_v47  ;;  %v1791_v56 = vadd.f32 %v1790_v54, %v1789_v51 }
 0x101   : > { %v1157_v57 = vadd.f32 %v1791_v56, %v1751_v53 }
 0x102   : > { %v1752_v58 = vpop.f32.mrb[4].mxu0 }
 0x103   : > { %v1792_v59 = vpop.f32.mrb[4].mxu1  ;;  %v1753_v60 = vpop.f32.mrb[5].mxu0 }
 0x104   : > { %v1754_v61 = vadd.f32 %v1753_v60, %v1752_v58  ;;  %v1793_v62 = vpop.f32.mrb[5].mxu1  ;;  %v1755_v63 = vpop.f32.mrb[6].mxu0 }
 0x105   : > { %v1794_v0 = vadd.f32 %v1793_v62, %v1792_v59  ;;  %v1795_v1 = vpop.f32.mrb[6].mxu1  ;;  %v1756_v2 = vpop.f32.mrb[7].mxu0 }
 0x106   : > { %v1757_v3 = vadd.f32 %v1756_v2, %v1755_v63  ;;  %v1796_v4 = vpop.f32.mrb[7].mxu1 }
 0x107   : > { %v1162_v5 = vadd.f32 %v1794_v0, %v1754_v61  ;;  %v1797_v6 = vadd.f32 %v1796_v4, %v1795_v1 }
 0x109   : > { %v1165_v7 = vadd.f32 %v1797_v6, %v1757_v3 }
 0x10a   : > { %v1758_v8 = vpop.f32.mrb[8].mxu0 }
 0x10b   : > { %v1798_v9 = vpop.f32.mrb[8].mxu1  ;;  %v1759_v10 = vpop.f32.mrb[9].mxu0 }
 0x10c   : > { %v1760_v11 = vadd.f32 %v1759_v10, %v1758_v8  ;;  %v1799_v12 = vpop.f32.mrb[9].mxu1  ;;  %v1761_v13 = vpop.f32.mrb[10].mxu0 }
 0x10d   : > { %v1800_v14 = vadd.f32 %v1799_v12, %v1798_v9  ;;  %v1801_v15 = vpop.f32.mrb[10].mxu1  ;;  %v1762_v16 = vpop.f32.mrb[11].mxu0 }
 0x10e   : > { %v1763_v17 = vadd.f32 %v1762_v16, %v1761_v13  ;;  %v1802_v18 = vpop.f32.mrb[11].mxu1 }
 0x10f   : > { %v1170_v19 = vadd.f32 %v1800_v14, %v1760_v11  ;;  %v1803_v20 = vadd.f32 %v1802_v18, %v1801_v15 }
 0x111   : > { %v1173_v21 = vadd.f32 %v1803_v20, %v1763_v17 }
 0x112   : > { %v1764_v22 = vpop.f32.mrb[12].mxu0 }
 0x113   : > { %v1804_v23 = vpop.f32.mrb[12].mxu1  ;;  %v1765_v24 = vpop.f32.mrb[13].mxu0 }
 0x114   : > { %v1805_v25 = vpop.f32.mrb[13].mxu1  ;;  %v1766_v26 = vadd.f32 %v1765_v24, %v1764_v22  ;;  %v1767_v28 = vpop.f32.mrb[14].mxu0 }
 0x115   : > { %v1806_v27 = vadd.f32 %v1805_v25, %v1804_v23  ;;  %v1807_v29 = vpop.f32.mrb[14].mxu1  ;;  %v1768_v30 = vpop.f32.mrb[15].mxu0 }
 0x116   : > { %v1808_v31 = vpop.f32.mrb[15].mxu1  ;;  %v1769_v33 = vadd.f32 %v1768_v30, %v1767_v28 }
 0x117   : > { %v1178_v32 = vadd.f32 %v1806_v27, %v1766_v26  ;;  %v1809_v34 = vadd.f32 %v1808_v31, %v1807_v29 }
 0x119   : > { %v2383_v35 = vadd.f32 %v1809_v34, %v1769_v33 }
 0x11a   : > { %v1826_v36 = vpop.f32.mrb[16].mxu0 }
 0x11b   : > { %v1827_v37 = vpop.f32.mrb[17].mxu0  ;;  %v1866_v38 = vpop.f32.mrb[16].mxu1 }
 0x11c   : > { %v1828_v39 = vadd.f32 %v1827_v37, %v1826_v36  ;;  %v1829_v40 = vpop.f32.mrb[18].mxu0  ;;  %v1867_v41 = vpop.f32.mrb[17].mxu1  ;;  %v1724_v37 = vld [vmem:[%s245_s19 + $0x8] sm:$0xff]  }
 0x11d   : > { %v1830_v42 = vpop.f32.mrb[19].mxu0  ;;  %v1868_v44 = vadd.f32 %v1867_v41, %v1866_v38  ;;  %v1869_v45 = vpop.f32.mrb[18].mxu1  ;;  %v1726_v38 = vld [vmem:[%s245_s19 + $0x18] sm:$0xff]  }
 0x11e   : > { %v1219_v43 = vadd.f32 %v1828_v39, %v1154_v55  ;;  %v1831_v46 = vadd.f32 %v1830_v42, %v1829_v40  ;;  %v1870_v47 = vpop.f32.mrb[19].mxu1  ;;  %v1689_v39 = vld [vmem:[%s245_s19] sm:$0xff]   ;;  %v1725_v40 = vld [vmem:[%s245_s19 + $0x10] sm:$0xff]  }
 0x11f   : > { %v1871_v49 = vadd.f32 %v1870_v47, %v1869_v45 }
 0x120   : > { %v1222_v48 = vadd.f32 %v1831_v46, %v1157_v57  ;;  %v2385_v50 = vadd.f32 %v1868_v44, %v1219_v43  ;;  %v1694_v43 = vunpack.c.l.bf16 %v1724_v37  ;;  %v1702_v44 = vunpack.c.l.bf16 %v1726_v38 }
 0x122   : > { %v1832_v51 = vpop.f32.mrb[20].mxu0  ;;  %v2387_v52 = vadd.f32 %v1871_v49, %v1222_v48  ;;  %v1690_v48 = vunpack.c.l.bf16 %v1689_v39  ;;  %v1698_v49 = vunpack.c.l.bf16 %v1725_v40 }
 0x123   : > { %v1833_v53 = vpop.f32.mrb[21].mxu0  ;;  %v1872_v54 = vpop.f32.mrb[20].mxu1 }
 0x124   : > { %v1834_v56 = vadd.f32 %v1833_v53, %v1832_v51  ;;  %v1835_v58 = vpop.f32.mrb[22].mxu0  ;;  %v1873_v59 = vpop.f32.mrb[21].mxu1  ;;  %v1669_v51 = vld [vmem:[%s2415_s3] ss:$0 sm:$0xff] }
 0x125   : > { %v1836_v60 = vpop.f32.mrb[23].mxu0  ;;  %v1874_v62 = vadd.f32 %v1873_v59, %v1872_v54  ;;  %v1875_v55 = vpop.f32.mrb[22].mxu1  ;;  %v1703_v59 = vunpack.c.h.bf16 %v1726_v38 }
 0x126   : > { %v1227_v61 = vadd.f32 %v1834_v56, %v1162_v5  ;;  %v1837_v63 = vadd.f32 %v1836_v60, %v1835_v58  ;;  %v1876_v0 = vpop.f32.mrb[23].mxu1  ;;  %v1691_v60 = vunpack.c.h.bf16 %v1689_v39 }
 0x127   : > { %v1877_v2 = vadd.f32 %v1876_v0, %v1875_v55 }
 0x128   : > { %v1230_v1 = vadd.f32 %v1837_v63, %v1165_v7  ;;  %v1292_v57 = vadd.f32 %v1874_v62, %v1227_v61 }
 0x12a   : > { %v1838_v3 = vpop.f32.mrb[24].mxu0  ;;  %v1295_v4 = vadd.f32 %v1877_v2, %v1230_v1  ;;  %v1699_v1 = vunpack.c.h.bf16 %v1725_v40 }
 0x12b   : > { %v1839_v6 = vpop.f32.mrb[25].mxu0  ;;  %v1878_v8 = vpop.f32.mrb[24].mxu1 }
 0x12c   : > { %v1840_v9 = vadd.f32 %v1839_v6, %v1838_v3  ;;  %v1841_v10 = vpop.f32.mrb[26].mxu0  ;;  %v1879_v11 = vpop.f32.mrb[25].mxu1 }
 0x12d   : > { %v1842_v12 = vpop.f32.mrb[27].mxu0  ;;  %v1880_v14 = vadd.f32 %v1879_v11, %v1878_v8  ;;  %v1881_v15 = vpop.f32.mrb[26].mxu1 }
 0x12e   : > { %v1235_v13 = vadd.f32 %v1840_v9, %v1170_v19  ;;  %v1843_v5 = vadd.f32 %v1842_v12, %v1841_v10  ;;  %v1882_v16 = vpop.f32.mrb[27].mxu1 }
 0x12f   : > { %v1883_v18 = vadd.f32 %v1882_v16, %v1881_v15 }
 0x130   : > { %v1238_v17 = vadd.f32 %v1843_v5, %v1173_v21  ;;  %v1300_v7 = vadd.f32 %v1880_v14, %v1235_v13 }
 0x132   : > { %v1844_v20 = vpop.f32.mrb[28].mxu0  ;;  %v1303_v22 = vadd.f32 %v1883_v18, %v1238_v17 }
 0x133   : > { %v1845_v23 = vpop.f32.mrb[29].mxu0  ;;  %v1884_v24 = vpop.f32.mrb[28].mxu1 }
 0x134   : > { %v1846_v25 = vadd.f32 %v1845_v23, %v1844_v20  ;;  %v1847_v26 = vpop.f32.mrb[30].mxu0  ;;  %v1885_v27 = vpop.f32.mrb[29].mxu1 }
 0x135   : > { %v1848_v28 = vpop.f32.mrb[31].mxu0  ;;  %v1886_v30 = vadd.f32 %v1885_v27, %v1884_v24  ;;  %v1887_v19 = vpop.f32.mrb[30].mxu1 }
 0x136   : > { %v1243_v29 = vadd.f32 %v1846_v25, %v1178_v32  ;;  %v1849_v31 = vadd.f32 %v1848_v28, %v1847_v26  ;;  %v1888_v21 = vpop.f32.mrb[31].mxu1  ;;  %v1668_v32 = vld [vmem:[%s2414_s2] ss:$0 sm:$0xff] }
 0x137   : > { %v1889_v34 = vadd.f32 %v1888_v21, %v1887_v19 }
 0x138   : > { %v1246_v33 = vadd.f32 %v1849_v31, %v2383_v35  ;;  %v1308_v36 = vadd.f32 %v1886_v30, %v1243_v29  ;;  %v1695_v35 = vunpack.c.h.bf16 %v1724_v37 }
 0x13a   : > { %v1311_v41 = vadd.f32 %v1889_v34, %v1246_v33 }
 0x13b   : > { %v1920_v42 = vpop.f32.mrb[32].mxu0 }
 0x13c   : > { %v1357_v45 = vadd.f32 %v1920_v42, %v1292_v57  ;;  %v1924_v46 = vpop.f32.mrb[32].mxu1  ;;  %v1348_v47 = vpop.f32.mrb[33].mxu0 }
 0x13d   : > { %v1373_v53 = vadd.f32 %v1924_v46, %v1308_v36  ;;  %v1349_v54 = vadd.f32 %v1348_v47, %v2385_v50  ;;  %v1364_v56 = vpop.f32.mrb[33].mxu1  ;;  %v1921_v58 = vpop.f32.mrb[34].mxu0 }
 0x13e   : > { %v1388_v61 = vmul.f32 %v1668_v32, %v1357_v45  ;;  %v1365_v62 = vadd.f32 %v1364_v56, %v1300_v7  ;;  %v1360_v55 = vadd.f32 %v1921_v58, %v1295_v4  ;;  %v1925_v63 = vpop.f32.mrb[34].mxu1  ;;  %v1351_v0 = vpop.f32.mrb[35].mxu0 }
 0x13f   : > { %v1392_v2 = vmul.f32 %v1668_v32, %v1373_v53  ;;  %v1386_v57 = vmul.f32 %v1668_v32, %v1349_v54  ;;  %v1376_v3 = vadd.f32 %v1925_v63, %v1311_v41  ;;  %v1352_v6 = vadd.f32 %v1351_v0, %v2387_v52  ;;  %v1367_v8 = vpop.f32.mrb[35].mxu1 }
 0x140   : > { %v1403_v9 = vadd.f32 %v1669_v51, %v1388_v61  ;;  %v1390_v10 = vmul.f32 %v1668_v32, %v1365_v62  ;;  %v1389_v11 = vmul.f32 %v1668_v32, %v1360_v55  ;;  %v1368_v50 = vadd.f32 %v1367_v8, %v1303_v22 }
 0x141   : > { %v1407_v12 = vadd.f32 %v1669_v51, %v1392_v2  ;;  %v1401_v13 = vadd.f32 %v1669_v51, %v1386_v57  ;;  %v1393_v14 = vmul.f32 %v1668_v32, %v1376_v3  ;;  %v1387_v15 = vmul.f32 %v1668_v32, %v1352_v6 }
 0x142   : > { %v1427_v5 = vadd.f32 %v1694_v43, %v1403_v9  ;;  %v1405_v16 = vadd.f32 %v1669_v51, %v1390_v10  ;;  %v1404_v4 = vadd.f32 %v1669_v51, %v1389_v11  ;;  %v1391_v17 = vmul.f32 %v1668_v32, %v1368_v50 }
 0x143   : > { %v1431_v18 = vadd.f32 %v1702_v44, %v1407_v12  ;;  %v1425_v7 = vadd.f32 %v1690_v48, %v1401_v13  ;;  %v1408_v20 = vadd.f32 %v1669_v51, %v1393_v14  ;;  %v1402_v23 = vadd.f32 %v1669_v51, %v1387_v15 }
 0x144   : > { %v1429_v24 = vadd.f32 %v1698_v49, %v1405_v16  ;;  %v1428_v52 = vadd.f32 %v1695_v35, %v1404_v4  ;;  %v1406_v25 = vadd.f32 %v1669_v51, %v1391_v17  ;;  %v1435_v28 = vmax.f32 %v1427_v5, 0.0 }
 0x145   : > { %v1432_v26 = vadd.f32 %v1703_v59, %v1408_v20  ;;  %v1426_v27 = vadd.f32 %v1691_v60, %v1402_v23  ;;  %v1439_v30 = vmax.f32 %v1431_v18, 0.0  ;;  %v1433_v19 = vmax.f32 %v1425_v7, 0.0 }
 0x146   : > { %v1436_v22 = vmax.f32 %v1428_v52, 0.0  ;;  %v1430_v29 = vadd.f32 %v1699_v1, %v1406_v25  ;;  %v1437_v33 = vmax.f32 %v1429_v24, 0.0 }
 0x147   : > { %v1440_v31 = vmax.f32 %v1432_v26, 0.0  ;;  %v1434_v21 = vmax.f32 %v1426_v27, 0.0 }
 0x148   : > { %v1712_v34 = vpack.c.bf16 %v1436_v22, %v1435_v28  ;;  %v1438_v36 = vmax.f32 %v1430_v29, 0.0 }
 0x149   : > { %v1722_v37 = vpack.c.bf16 %v1440_v31, %v1439_v30  ;;  %v1707_v38 = vpack.c.bf16 %v1434_v21, %v1433_v19 }
 0x14a   : > { %1727 = vst [vmem:[%s251_s20 + $0x8] sm:$0xff] %v1712_v34   ;;  %v1717_v39 = vpack.c.bf16 %v1438_v36, %v1437_v33 }
 0x14b   : > { %1729 = vst [vmem:[%s251_s20 + $0x18] sm:$0xff] %v1722_v37   ;;  %1708 = vst [vmem:[%s251_s20] sm:$0xff] %v1707_v38  }
 0x14c   : > { %1728 = vst [vmem:[%s251_s20 + $0x10] sm:$0xff] %v1717_v39  }
 0x14d PF: > { %s15_s18 = sadd.s32 1, %s2081_s18  }
 0x14e   : > { %p12_p4 = scmp.ge.s32.totalorder %s15_s18, 4  }
 0x150   :  { %14 = sbr.rel (!%p12_p4) target bundleno = 1 (0x1), region = 73 }

</bundles_post_ra>
